<compile_context>
chip_gen: v7x
topology: tpu7x:2x2x1
jax: 0.10.0
libtpu: 0.0.40
codegen_flags: <defaults>
</compile_context>

<pallas_src>
import functools

import jax
import jax.numpy as jnp
from jax.experimental import pallas as pl
from jax.experimental.pallas import tpu as pltpu


# ------------------------------- fused kernel ------------------------------- #

def _fused_dense_attention_kernel(*refs, num_layers, num_heads, channels,
                                  tokens, batch_block):
    # refs = [x_ref,
    #         (w_q, b_q, w_k, b_k, w_v, b_v, w_proj, b_proj) * num_layers,
    #         ff_w, ff_b,
    #         o_ref]
    x_ref = refs[0]
    o_ref = refs[-1]
    ff_w_ref = refs[-3]          # (C*(L+1), C) bf16
    ff_b_ref = refs[-2]          # (1, C)       f32
    layer_refs = refs[1:-3]

    C = channels
    H = num_heads
    Dh = C // H
    N = tokens
    BB = batch_block             # batches folded into this block's rows

    x_f32 = x_ref[...]                               # (BB*N, C) f32 (residual)
    feats_bf = x_f32.astype(jnp.bfloat16)            # dense concat, grows by C per layer

    for i in range(num_layers):
        (wq_ref, bq_ref, wk_ref, bk_ref,
         wv_ref, bv_ref, wp_ref, bp_ref) = layer_refs[8 * i:8 * i + 8]

        # q/k/v from three lane-offset-0 matmuls on the materialized concat.
        # Softmax scale is already folded into w_q / b_q (prepare_params).
        q = jnp.dot(feats_bf, wq_ref[...], preferred_element_type=jnp.float32) + bq_ref[...]
        k = jnp.dot(feats_bf, wk_ref[...], preferred_element_type=jnp.float32) + bk_ref[...]
        v = jnp.dot(feats_bf, wv_ref[...], preferred_element_type=jnp.float32) + bv_ref[...]
        q_bf = q.astype(jnp.bfloat16)
        k_bf = k.astype(jnp.bfloat16)
        v_bf = v.astype(jnp.bfloat16)

        # Attention is per-batch (scores only mix tokens within a batch), so loop
        # over the folded batches for the (N,N) block only.
        batch_blocks = []
        for b in range(BB):
            r0 = b * N
            head_outs = []
            for h in range(H):
                lo = h * Dh
                qh = q_bf[r0:r0 + N, lo:lo + Dh]     # (N, Dh) bf16
                kh = k_bf[r0:r0 + N, lo:lo + Dh]
                vh = v_bf[r0:r0 + N, lo:lo + Dh]

                # scores: contract last dims of q and k (no explicit k.T at JAX level)
                s = jax.lax.dot_general(qh, kh, (((1,), (1,)), ((), ())),
                                        preferred_element_type=jnp.float32)  # (N, N)
                m = jnp.max(s, axis=-1, keepdims=True)
                e = jnp.exp(s - m)
                r = pl.reciprocal(jnp.sum(e, axis=-1, keepdims=True), approx=True)
                p = (e * r).astype(jnp.bfloat16)

                oh = jnp.dot(p, vh, preferred_element_type=jnp.float32)      # (N, Dh)
                head_outs.append(oh.astype(jnp.bfloat16))
            batch_blocks.append(jnp.concatenate(head_outs, axis=-1))         # (N, C)

        attn_bf = (batch_blocks[0] if BB == 1
                   else jnp.concatenate(batch_blocks, axis=0))               # (BB*N, C)

        # Single output-projection matmul per layer (heads concatenated above).
        y = jnp.dot(attn_bf, wp_ref[...], preferred_element_type=jnp.float32) + bp_ref[...]
        feats_bf = jnp.concatenate([feats_bf, y.astype(jnp.bfloat16)], axis=-1)

    # feed_forward(concat(feats)) + x : one wide matmul.
    out = jnp.dot(feats_bf, ff_w_ref[...], preferred_element_type=jnp.float32)
    out = out + ff_b_ref[...] + x_f32
    o_ref[...] = out.astype(o_ref.dtype)


# ------------------------- one-time parameter prep -------------------------- #

def prepare_params(params, channels, num_heads):
    """Split qkv, fold softmax scale into q, pre-cast all weights to bf16.

    Done once, outside the forward call, so no per-forward XLA cast/slice ops.
    """
    C = channels
    Dh = C // num_heads
    scale = float(Dh) ** -0.5
    prepared = {"layers": []}
    for lp in params["layers"]:
        w = lp["w_qkv"]                                   # (C*(i+1), 3C) f32
        b = lp["b_qkv"]                                   # (3C,)        f32
        prepared["layers"].append({
            "w_q": (w[:, 0 * C:1 * C] * scale).astype(jnp.bfloat16),
            "b_q": (b[0 * C:1 * C] * scale).reshape(1, C).astype(jnp.float32),
            "w_k": w[:, 1 * C:2 * C].astype(jnp.bfloat16),
            "b_k": b[1 * C:2 * C].reshape(1, C).astype(jnp.float32),
            "w_v": w[:, 2 * C:3 * C].astype(jnp.bfloat16),
            "b_v": b[2 * C:3 * C].reshape(1, C).astype(jnp.float32),
            "w_proj": lp["w_proj"].astype(jnp.bfloat16),  # (C, C) bf16
            "b_proj": lp["b_proj"].reshape(1, C).astype(jnp.float32),
        })
    prepared["ff_w"] = params["ff_w"].astype(jnp.bfloat16)       # (C*(L+1), C)
    prepared["ff_b"] = params["ff_b"].reshape(1, C).astype(jnp.float32)
    return jax.tree_util.tree_map(jnp.asarray, prepared)


def _default_batch_block(batch):
    """Fold all batches into one grid step on single-TC chips (v5e/v6e);
    keep a per-batch grid on v7x so the 2 TensorCores each take a batch."""
    try:
        kind = jax.devices()[0].device_kind.lower()
    except Exception:  # pragma: no cover - be robust on unusual backends
        kind = ""
    if "v7" in kind:
        return 1
    return batch


# --------------------------------- wrapper ---------------------------------- #

def dense_scaled_attention(x, prepared, num_heads, batch_block=None):
    """Forward pass of DenseScaledAttention. x: (B, N, C) float32."""
    B, N, C = x.shape
    num_layers = len(prepared["layers"])
    assert C % num_heads == 0
    if batch_block is None:
        batch_block = _default_batch_block(B)
    assert B % batch_block == 0
    rows = batch_block * N                       # rows per grid step

    # Batch folded into the token (sublane) axis at the boundary: free reshape,
    # per-token matmuls then run with M = batch_block * N rows.
    x2 = x.reshape(B * N, C)

    inputs = [x2]
    in_specs = [pl.BlockSpec((rows, C), lambda g: (g, 0))]

    def add_full(arr):
        inputs.append(arr)
        in_specs.append(pl.BlockSpec(arr.shape, lambda g: (0, 0)))

    for lp in prepared["layers"]:
        for name in ("w_q", "b_q", "w_k", "b_k", "w_v", "b_v", "w_proj", "b_proj"):
            add_full(lp[name])
    add_full(prepared["ff_w"])
    add_full(prepared["ff_b"])

    kernel = functools.partial(
        _fused_dense_attention_kernel,
        num_layers=num_layers, num_heads=num_heads, channels=C,
        tokens=N, batch_block=batch_block)

    out = pl.pallas_call(
        kernel,
        out_shape=jax.ShapeDtypeStruct((B * N, C), x.dtype),
        grid_spec=pltpu.PrefetchScalarGridSpec(
            num_scalar_prefetch=0,
            grid=(B // batch_block,),
            in_specs=in_specs,
            out_specs=pl.BlockSpec((rows, C), lambda g: (g, 0)),
        ),
        compiler_params=pltpu.CompilerParams(
            dimension_semantics=("parallel",)),
    )(*inputs)
    return out.reshape(B, N, C)


# --------------------------- deterministic params --------------------------- #

def init_params(key, channels, scale_ratio, qkv_bias=False):
    params = {"layers": []}
    for i, sr in enumerate(scale_ratio):
        in_dim = channels + channels * i
        out_dim = channels * sr
        key, k1, k2, k3 = jax.random.split(key, 4)
        layer = {
            "w_qkv": 0.05 * jax.random.normal(k1, (in_dim, 3 * out_dim), jnp.float32),
            "b_qkv": (0.05 * jax.random.normal(k3, (3 * out_dim,), jnp.float32)
                      if qkv_bias else jnp.zeros((3 * out_dim,), jnp.float32)),
            "w_proj": 0.05 * jax.random.normal(k2, (out_dim, out_dim), jnp.float32),
            "b_proj": jnp.zeros((out_dim,), jnp.float32),
        }
        params["layers"].append(layer)
    num_layers = len(scale_ratio)
    key, kf, kb = jax.random.split(key, 3)
    params["ff_w"] = 0.05 * jax.random.normal(
        kf, (channels * (num_layers + 1), channels), jnp.float32)
    params["ff_b"] = 0.01 * jax.random.normal(kb, (channels,), jnp.float32)
    return params


# ------------------------------- pure-JAX ref ------------------------------- #

def _ref_self_attention(x, p, num_heads):
    B, N, _ = x.shape
    Cout = p["w_proj"].shape[0]
    Dh = Cout // num_heads
    qkv = (x @ p["w_qkv"] + p["b_qkv"]).reshape(B, N, 3, num_heads, Dh)
    qkv = jnp.transpose(qkv, (2, 0, 3, 1, 4))
    q, k, v = qkv[0], qkv[1], qkv[2]
    s = jnp.einsum("bhnd,bhmd->bhnm", q, k) * (float(Dh) ** -0.5)
    a = jax.nn.softmax(s, axis=-1)
    o = jnp.einsum("bhnm,bhmd->bhnd", a, v)
    o = jnp.transpose(o, (0, 2, 1, 3)).reshape(B, N, Cout)
    return o @ p["w_proj"] + p["b_proj"]


def _ref_forward(x, params, num_heads):
    out = [x]
    for layer_p in params["layers"]:
        out.append(_ref_self_attention(jnp.concatenate(out, -1), layer_p, num_heads))
    cat = jnp.concatenate(out, -1)
    return cat @ params["ff_w"] + params["ff_b"] + x


# ----------------------------------- main ----------------------------------- #

if __name__ == "__main__":
    B, N, C = 2, 64, 32           # batch, tokens, channels
    num_heads = 4
    scale_ratio = (1, 1)          # 2 dense attention layers (consistent with __init__ dims)

    key = jax.random.PRNGKey(0)
    key, kx, kp = jax.random.split(key, 3)
    x = jax.random.normal(kx, (B, N, C), jnp.float32)
    params = init_params(kp, C, scale_ratio, qkv_bias=False)
    prepared = prepare_params(params, C, num_heads)   # one-time: split/scale/cast

    out = dense_scaled_attention(x, prepared, num_heads)
    out = jax.block_until_ready(out)

    ref = _ref_forward(x, params, num_heads)
    assert out.shape == (B, N, C)
    # bf16 MXU operands with f32 accumulation (+ approx reciprocal in softmax)
    # -> slightly looser tolerance than pure f32.
    assert jnp.allclose(out, ref, rtol=2e-2, atol=2e-2), "mismatch vs JAX reference"

    print("KERNEL_OK")
</pallas_src>

<mosaic_0001>
module attributes {stable_mosaic.version = 11 : i64} {
  func.func @_fused_dense_attention_kernel(%arg0: i32, %arg1: memref<128x32xf32, #tpu.memory_space<vmem>>, %arg2: memref<32x32xbf16, #tpu.memory_space<vmem>>, %arg3: memref<1x32xf32, #tpu.memory_space<vmem>>, %arg4: memref<32x32xbf16, #tpu.memory_space<vmem>>, %arg5: memref<1x32xf32, #tpu.memory_space<vmem>>, %arg6: memref<32x32xbf16, #tpu.memory_space<vmem>>, %arg7: memref<1x32xf32, #tpu.memory_space<vmem>>, %arg8: memref<32x32xbf16, #tpu.memory_space<vmem>>, %arg9: memref<1x32xf32, #tpu.memory_space<vmem>>, %arg10: memref<64x32xbf16, #tpu.memory_space<vmem>>, %arg11: memref<1x32xf32, #tpu.memory_space<vmem>>, %arg12: memref<64x32xbf16, #tpu.memory_space<vmem>>, %arg13: memref<1x32xf32, #tpu.memory_space<vmem>>, %arg14: memref<64x32xbf16, #tpu.memory_space<vmem>>, %arg15: memref<1x32xf32, #tpu.memory_space<vmem>>, %arg16: memref<32x32xbf16, #tpu.memory_space<vmem>>, %arg17: memref<1x32xf32, #tpu.memory_space<vmem>>, %arg18: memref<96x32xbf16, #tpu.memory_space<vmem>>, %arg19: memref<1x32xf32, #tpu.memory_space<vmem>>, %arg20: memref<128x32xf32, #tpu.memory_space<vmem>>) attributes {dimension_semantics = [#tpu.dimension_semantics<parallel>], iteration_bounds = array<i64: 1>, scalar_prefetch = 0 : i64, scratch_operands = 0 : i64, tpu.core_type = #tpu.core_type<tc>, window_params = [{transform_indices = @transform_0, window_bounds = array<i64: 128, 32>}, {pipeline_mode = #tpu.pipeline_mode<synchronous>, transform_indices = @transform_1, window_bounds = array<i64: 32, 32>}, {pipeline_mode = #tpu.pipeline_mode<synchronous>, transform_indices = @transform_2, window_bounds = array<i64: 1, 32>}, {pipeline_mode = #tpu.pipeline_mode<synchronous>, transform_indices = @transform_3, window_bounds = array<i64: 32, 32>}, {pipeline_mode = #tpu.pipeline_mode<synchronous>, transform_indices = @transform_4, window_bounds = array<i64: 1, 32>}, {pipeline_mode = #tpu.pipeline_mode<synchronous>, transform_indices = @transform_5, window_bounds = array<i64: 32, 32>}, {pipeline_mode = #tpu.pipeline_mode<synchronous>, transform_indices = @transform_6, window_bounds = array<i64: 1, 32>}, {pipeline_mode = #tpu.pipeline_mode<synchronous>, transform_indices = @transform_7, window_bounds = array<i64: 32, 32>}, {pipeline_mode = #tpu.pipeline_mode<synchronous>, transform_indices = @transform_8, window_bounds = array<i64: 1, 32>}, {pipeline_mode = #tpu.pipeline_mode<synchronous>, transform_indices = @transform_9, window_bounds = array<i64: 64, 32>}, {pipeline_mode = #tpu.pipeline_mode<synchronous>, transform_indices = @transform_10, window_bounds = array<i64: 1, 32>}, {pipeline_mode = #tpu.pipeline_mode<synchronous>, transform_indices = @transform_11, window_bounds = array<i64: 64, 32>}, {pipeline_mode = #tpu.pipeline_mode<synchronous>, transform_indices = @transform_12, window_bounds = array<i64: 1, 32>}, {pipeline_mode = #tpu.pipeline_mode<synchronous>, transform_indices = @transform_13, window_bounds = array<i64: 64, 32>}, {pipeline_mode = #tpu.pipeline_mode<synchronous>, transform_indices = @transform_14, window_bounds = array<i64: 1, 32>}, {pipeline_mode = #tpu.pipeline_mode<synchronous>, transform_indices = @transform_15, window_bounds = array<i64: 32, 32>}, {pipeline_mode = #tpu.pipeline_mode<synchronous>, transform_indices = @transform_16, window_bounds = array<i64: 1, 32>}, {pipeline_mode = #tpu.pipeline_mode<synchronous>, transform_indices = @transform_17, window_bounds = array<i64: 96, 32>}, {pipeline_mode = #tpu.pipeline_mode<synchronous>, transform_indices = @transform_18, window_bounds = array<i64: 1, 32>}, {transform_indices = @transform_19, window_bounds = array<i64: 128, 32>}]} {
    %c0 = arith.constant 0 : index
    %c0_0 = arith.constant 0 : index
    %0 = vector.load %arg1[%c0, %c0_0] : memref<128x32xf32, #tpu.memory_space<vmem>>, vector<128x32xf32>
    %1 = arith.truncf %0 : vector<128x32xf32> to vector<128x32xbf16>
    %c0_1 = arith.constant 0 : index
    %c0_2 = arith.constant 0 : index
    %2 = vector.load %arg2[%c0_1, %c0_2] : memref<32x32xbf16, #tpu.memory_space<vmem>>, vector<32x32xbf16>
    %cst = arith.constant dense<0.000000e+00> : vector<128x32xf32>
    %3 = tpu.matmul %1, %2, %cst {dimension_numbers = #tpu.dot_dimension_numbers<[1], [0], [0], [1], [0, 0, 1, 1], [], []>} : vector<128x32xbf16>, vector<32x32xbf16>, vector<128x32xf32> -> vector<128x32xf32>
    %c0_3 = arith.constant 0 : index
    %c0_4 = arith.constant 0 : index
    %4 = vector.load %arg3[%c0_3, %c0_4] : memref<1x32xf32, #tpu.memory_space<vmem>>, vector<1x32xf32>
    %5 = vector.broadcast %4 : vector<1x32xf32> to vector<128x32xf32>
    %6 = arith.addf %3, %5 : vector<128x32xf32>
    %c0_5 = arith.constant 0 : index
    %c0_6 = arith.constant 0 : index
    %7 = vector.load %arg4[%c0_5, %c0_6] : memref<32x32xbf16, #tpu.memory_space<vmem>>, vector<32x32xbf16>
    %cst_7 = arith.constant dense<0.000000e+00> : vector<128x32xf32>
    %8 = tpu.matmul %1, %7, %cst_7 {dimension_numbers = #tpu.dot_dimension_numbers<[1], [0], [0], [1], [0, 0, 1, 1], [], []>} : vector<128x32xbf16>, vector<32x32xbf16>, vector<128x32xf32> -> vector<128x32xf32>
    %c0_8 = arith.constant 0 : index
    %c0_9 = arith.constant 0 : index
    %9 = vector.load %arg5[%c0_8, %c0_9] : memref<1x32xf32, #tpu.memory_space<vmem>>, vector<1x32xf32>
    %10 = vector.broadcast %9 : vector<1x32xf32> to vector<128x32xf32>
    %11 = arith.addf %8, %10 : vector<128x32xf32>
    %c0_10 = arith.constant 0 : index
    %c0_11 = arith.constant 0 : index
    %12 = vector.load %arg6[%c0_10, %c0_11] : memref<32x32xbf16, #tpu.memory_space<vmem>>, vector<32x32xbf16>
    %cst_12 = arith.constant dense<0.000000e+00> : vector<128x32xf32>
    %13 = tpu.matmul %1, %12, %cst_12 {dimension_numbers = #tpu.dot_dimension_numbers<[1], [0], [0], [1], [0, 0, 1, 1], [], []>} : vector<128x32xbf16>, vector<32x32xbf16>, vector<128x32xf32> -> vector<128x32xf32>
    %c0_13 = arith.constant 0 : index
    %c0_14 = arith.constant 0 : index
    %14 = vector.load %arg7[%c0_13, %c0_14] : memref<1x32xf32, #tpu.memory_space<vmem>>, vector<1x32xf32>
    %15 = vector.broadcast %14 : vector<1x32xf32> to vector<128x32xf32>
    %16 = arith.addf %13, %15 : vector<128x32xf32>
    %17 = arith.truncf %6 : vector<128x32xf32> to vector<128x32xbf16>
    %18 = arith.truncf %11 : vector<128x32xf32> to vector<128x32xbf16>
    %19 = arith.truncf %16 : vector<128x32xf32> to vector<128x32xbf16>
    %20 = vector.extract_strided_slice %17 {offsets = [0, 0], sizes = [64, 8], strides = [1, 1]} : vector<128x32xbf16> to vector<64x8xbf16>
    %21 = vector.extract_strided_slice %18 {offsets = [0, 0], sizes = [64, 8], strides = [1, 1]} : vector<128x32xbf16> to vector<64x8xbf16>
    %22 = vector.extract_strided_slice %19 {offsets = [0, 0], sizes = [64, 8], strides = [1, 1]} : vector<128x32xbf16> to vector<64x8xbf16>
    %cst_15 = arith.constant dense<0.000000e+00> : vector<64x64xf32>
    %23 = tpu.matmul %20, %21, %cst_15 {dimension_numbers = #tpu.dot_dimension_numbers<[1], [1], [0], [0], [0, 0, 1, 0], [], []>} : vector<64x8xbf16>, vector<64x8xbf16>, vector<64x64xf32> -> vector<64x64xf32>
    %cst_16 = arith.constant dense<0xFF800000> : vector<64xf32>
    %24 = vector.multi_reduction <maximumf>, %23, %cst_16 [1] : vector<64x64xf32> to vector<64xf32>
    %25 = vector.shape_cast %24 : vector<64xf32> to vector<64x1xf32>
    %26 = vector.broadcast %25 : vector<64x1xf32> to vector<64x64xf32>
    %27 = arith.subf %23, %26 : vector<64x64xf32>
    %28 = math.exp %27 : vector<64x64xf32>
    %cst_17 = arith.constant dense<0.000000e+00> : vector<64xf32>
    %29 = vector.multi_reduction <add>, %28, %cst_17 [1] : vector<64x64xf32> to vector<64xf32>
    %30 = vector.shape_cast %29 : vector<64xf32> to vector<64x1xf32>
    %31 = tpu.reciprocal %30 {approx = true} : vector<64x1xf32> -> vector<64x1xf32>
    %32 = vector.broadcast %31 : vector<64x1xf32> to vector<64x64xf32>
    %33 = arith.mulf %28, %32 : vector<64x64xf32>
    %34 = arith.truncf %33 : vector<64x64xf32> to vector<64x64xbf16>
    %cst_18 = arith.constant dense<0.000000e+00> : vector<64x8xf32>
    %35 = tpu.matmul %34, %22, %cst_18 {dimension_numbers = #tpu.dot_dimension_numbers<[1], [0], [0], [1], [0, 0, 1, 1], [], []>} : vector<64x64xbf16>, vector<64x8xbf16>, vector<64x8xf32> -> vector<64x8xf32>
    %36 = arith.truncf %35 : vector<64x8xf32> to vector<64x8xbf16>
    %37 = vector.extract_strided_slice %17 {offsets = [0, 8], sizes = [64, 8], strides = [1, 1]} : vector<128x32xbf16> to vector<64x8xbf16>
    %38 = vector.extract_strided_slice %18 {offsets = [0, 8], sizes = [64, 8], strides = [1, 1]} : vector<128x32xbf16> to vector<64x8xbf16>
    %39 = vector.extract_strided_slice %19 {offsets = [0, 8], sizes = [64, 8], strides = [1, 1]} : vector<128x32xbf16> to vector<64x8xbf16>
    %cst_19 = arith.constant dense<0.000000e+00> : vector<64x64xf32>
    %40 = tpu.matmul %37, %38, %cst_19 {dimension_numbers = #tpu.dot_dimension_numbers<[1], [1], [0], [0], [0, 0, 1, 0], [], []>} : vector<64x8xbf16>, vector<64x8xbf16>, vector<64x64xf32> -> vector<64x64xf32>
    %cst_20 = arith.constant dense<0xFF800000> : vector<64xf32>
    %41 = vector.multi_reduction <maximumf>, %40, %cst_20 [1] : vector<64x64xf32> to vector<64xf32>
    %42 = vector.shape_cast %41 : vector<64xf32> to vector<64x1xf32>
    %43 = vector.broadcast %42 : vector<64x1xf32> to vector<64x64xf32>
    %44 = arith.subf %40, %43 : vector<64x64xf32>
    %45 = math.exp %44 : vector<64x64xf32>
    %cst_21 = arith.constant dense<0.000000e+00> : vector<64xf32>
    %46 = vector.multi_reduction <add>, %45, %cst_21 [1] : vector<64x64xf32> to vector<64xf32>
    %47 = vector.shape_cast %46 : vector<64xf32> to vector<64x1xf32>
    %48 = tpu.reciprocal %47 {approx = true} : vector<64x1xf32> -> vector<64x1xf32>
    %49 = vector.broadcast %48 : vector<64x1xf32> to vector<64x64xf32>
    %50 = arith.mulf %45, %49 : vector<64x64xf32>
    %51 = arith.truncf %50 : vector<64x64xf32> to vector<64x64xbf16>
    %cst_22 = arith.constant dense<0.000000e+00> : vector<64x8xf32>
    %52 = tpu.matmul %51, %39, %cst_22 {dimension_numbers = #tpu.dot_dimension_numbers<[1], [0], [0], [1], [0, 0, 1, 1], [], []>} : vector<64x64xbf16>, vector<64x8xbf16>, vector<64x8xf32> -> vector<64x8xf32>
    %53 = arith.truncf %52 : vector<64x8xf32> to vector<64x8xbf16>
    %54 = vector.extract_strided_slice %17 {offsets = [0, 16], sizes = [64, 8], strides = [1, 1]} : vector<128x32xbf16> to vector<64x8xbf16>
    %55 = vector.extract_strided_slice %18 {offsets = [0, 16], sizes = [64, 8], strides = [1, 1]} : vector<128x32xbf16> to vector<64x8xbf16>
    %56 = vector.extract_strided_slice %19 {offsets = [0, 16], sizes = [64, 8], strides = [1, 1]} : vector<128x32xbf16> to vector<64x8xbf16>
    %cst_23 = arith.constant dense<0.000000e+00> : vector<64x64xf32>
    %57 = tpu.matmul %54, %55, %cst_23 {dimension_numbers = #tpu.dot_dimension_numbers<[1], [1], [0], [0], [0, 0, 1, 0], [], []>} : vector<64x8xbf16>, vector<64x8xbf16>, vector<64x64xf32> -> vector<64x64xf32>
    %cst_24 = arith.constant dense<0xFF800000> : vector<64xf32>
    %58 = vector.multi_reduction <maximumf>, %57, %cst_24 [1] : vector<64x64xf32> to vector<64xf32>
    %59 = vector.shape_cast %58 : vector<64xf32> to vector<64x1xf32>
    %60 = vector.broadcast %59 : vector<64x1xf32> to vector<64x64xf32>
    %61 = arith.subf %57, %60 : vector<64x64xf32>
    %62 = math.exp %61 : vector<64x64xf32>
    %cst_25 = arith.constant dense<0.000000e+00> : vector<64xf32>
    %63 = vector.multi_reduction <add>, %62, %cst_25 [1] : vector<64x64xf32> to vector<64xf32>
    %64 = vector.shape_cast %63 : vector<64xf32> to vector<64x1xf32>
    %65 = tpu.reciprocal %64 {approx = true} : vector<64x1xf32> -> vector<64x1xf32>
    %66 = vector.broadcast %65 : vector<64x1xf32> to vector<64x64xf32>
    %67 = arith.mulf %62, %66 : vector<64x64xf32>
    %68 = arith.truncf %67 : vector<64x64xf32> to vector<64x64xbf16>
    %cst_26 = arith.constant dense<0.000000e+00> : vector<64x8xf32>
    %69 = tpu.matmul %68, %56, %cst_26 {dimension_numbers = #tpu.dot_dimension_numbers<[1], [0], [0], [1], [0, 0, 1, 1], [], []>} : vector<64x64xbf16>, vector<64x8xbf16>, vector<64x8xf32> -> vector<64x8xf32>
    %70 = arith.truncf %69 : vector<64x8xf32> to vector<64x8xbf16>
    %71 = vector.extract_strided_slice %17 {offsets = [0, 24], sizes = [64, 8], strides = [1, 1]} : vector<128x32xbf16> to vector<64x8xbf16>
    %72 = vector.extract_strided_slice %18 {offsets = [0, 24], sizes = [64, 8], strides = [1, 1]} : vector<128x32xbf16> to vector<64x8xbf16>
    %73 = vector.extract_strided_slice %19 {offsets = [0, 24], sizes = [64, 8], strides = [1, 1]} : vector<128x32xbf16> to vector<64x8xbf16>
    %cst_27 = arith.constant dense<0.000000e+00> : vector<64x64xf32>
    %74 = tpu.matmul %71, %72, %cst_27 {dimension_numbers = #tpu.dot_dimension_numbers<[1], [1], [0], [0], [0, 0, 1, 0], [], []>} : vector<64x8xbf16>, vector<64x8xbf16>, vector<64x64xf32> -> vector<64x64xf32>
    %cst_28 = arith.constant dense<0xFF800000> : vector<64xf32>
    %75 = vector.multi_reduction <maximumf>, %74, %cst_28 [1] : vector<64x64xf32> to vector<64xf32>
    %76 = vector.shape_cast %75 : vector<64xf32> to vector<64x1xf32>
    %77 = vector.broadcast %76 : vector<64x1xf32> to vector<64x64xf32>
    %78 = arith.subf %74, %77 : vector<64x64xf32>
    %79 = math.exp %78 : vector<64x64xf32>
    %cst_29 = arith.constant dense<0.000000e+00> : vector<64xf32>
    %80 = vector.multi_reduction <add>, %79, %cst_29 [1] : vector<64x64xf32> to vector<64xf32>
    %81 = vector.shape_cast %80 : vector<64xf32> to vector<64x1xf32>
    %82 = tpu.reciprocal %81 {approx = true} : vector<64x1xf32> -> vector<64x1xf32>
    %83 = vector.broadcast %82 : vector<64x1xf32> to vector<64x64xf32>
    %84 = arith.mulf %79, %83 : vector<64x64xf32>
    %85 = arith.truncf %84 : vector<64x64xf32> to vector<64x64xbf16>
    %cst_30 = arith.constant dense<0.000000e+00> : vector<64x8xf32>
    %86 = tpu.matmul %85, %73, %cst_30 {dimension_numbers = #tpu.dot_dimension_numbers<[1], [0], [0], [1], [0, 0, 1, 1], [], []>} : vector<64x64xbf16>, vector<64x8xbf16>, vector<64x8xf32> -> vector<64x8xf32>
    %87 = arith.truncf %86 : vector<64x8xf32> to vector<64x8xbf16>
    %88 = tpu.concatenate %36, %53, %70, %87 in 1 : vector<64x8xbf16>, vector<64x8xbf16>, vector<64x8xbf16>, vector<64x8xbf16> -> vector<64x32xbf16>
    %89 = vector.extract_strided_slice %17 {offsets = [64, 0], sizes = [64, 8], strides = [1, 1]} : vector<128x32xbf16> to vector<64x8xbf16>
    %90 = vector.extract_strided_slice %18 {offsets = [64, 0], sizes = [64, 8], strides = [1, 1]} : vector<128x32xbf16> to vector<64x8xbf16>
    %91 = vector.extract_strided_slice %19 {offsets = [64, 0], sizes = [64, 8], strides = [1, 1]} : vector<128x32xbf16> to vector<64x8xbf16>
    %cst_31 = arith.constant dense<0.000000e+00> : vector<64x64xf32>
    %92 = tpu.matmul %89, %90, %cst_31 {dimension_numbers = #tpu.dot_dimension_numbers<[1], [1], [0], [0], [0, 0, 1, 0], [], []>} : vector<64x8xbf16>, vector<64x8xbf16>, vector<64x64xf32> -> vector<64x64xf32>
    %cst_32 = arith.constant dense<0xFF800000> : vector<64xf32>
    %93 = vector.multi_reduction <maximumf>, %92, %cst_32 [1] : vector<64x64xf32> to vector<64xf32>
    %94 = vector.shape_cast %93 : vector<64xf32> to vector<64x1xf32>
    %95 = vector.broadcast %94 : vector<64x1xf32> to vector<64x64xf32>
    %96 = arith.subf %92, %95 : vector<64x64xf32>
    %97 = math.exp %96 : vector<64x64xf32>
    %cst_33 = arith.constant dense<0.000000e+00> : vector<64xf32>
    %98 = vector.multi_reduction <add>, %97, %cst_33 [1] : vector<64x64xf32> to vector<64xf32>
    %99 = vector.shape_cast %98 : vector<64xf32> to vector<64x1xf32>
    %100 = tpu.reciprocal %99 {approx = true} : vector<64x1xf32> -> vector<64x1xf32>
    %101 = vector.broadcast %100 : vector<64x1xf32> to vector<64x64xf32>
    %102 = arith.mulf %97, %101 : vector<64x64xf32>
    %103 = arith.truncf %102 : vector<64x64xf32> to vector<64x64xbf16>
    %cst_34 = arith.constant dense<0.000000e+00> : vector<64x8xf32>
    %104 = tpu.matmul %103, %91, %cst_34 {dimension_numbers = #tpu.dot_dimension_numbers<[1], [0], [0], [1], [0, 0, 1, 1], [], []>} : vector<64x64xbf16>, vector<64x8xbf16>, vector<64x8xf32> -> vector<64x8xf32>
    %105 = arith.truncf %104 : vector<64x8xf32> to vector<64x8xbf16>
    %106 = vector.extract_strided_slice %17 {offsets = [64, 8], sizes = [64, 8], strides = [1, 1]} : vector<128x32xbf16> to vector<64x8xbf16>
    %107 = vector.extract_strided_slice %18 {offsets = [64, 8], sizes = [64, 8], strides = [1, 1]} : vector<128x32xbf16> to vector<64x8xbf16>
    %108 = vector.extract_strided_slice %19 {offsets = [64, 8], sizes = [64, 8], strides = [1, 1]} : vector<128x32xbf16> to vector<64x8xbf16>
    %cst_35 = arith.constant dense<0.000000e+00> : vector<64x64xf32>
    %109 = tpu.matmul %106, %107, %cst_35 {dimension_numbers = #tpu.dot_dimension_numbers<[1], [1], [0], [0], [0, 0, 1, 0], [], []>} : vector<64x8xbf16>, vector<64x8xbf16>, vector<64x64xf32> -> vector<64x64xf32>
    %cst_36 = arith.constant dense<0xFF800000> : vector<64xf32>
    %110 = vector.multi_reduction <maximumf>, %109, %cst_36 [1] : vector<64x64xf32> to vector<64xf32>
    %111 = vector.shape_cast %110 : vector<64xf32> to vector<64x1xf32>
    %112 = vector.broadcast %111 : vector<64x1xf32> to vector<64x64xf32>
    %113 = arith.subf %109, %112 : vector<64x64xf32>
    %114 = math.exp %113 : vector<64x64xf32>
    %cst_37 = arith.constant dense<0.000000e+00> : vector<64xf32>
    %115 = vector.multi_reduction <add>, %114, %cst_37 [1] : vector<64x64xf32> to vector<64xf32>
    %116 = vector.shape_cast %115 : vector<64xf32> to vector<64x1xf32>
    %117 = tpu.reciprocal %116 {approx = true} : vector<64x1xf32> -> vector<64x1xf32>
    %118 = vector.broadcast %117 : vector<64x1xf32> to vector<64x64xf32>
    %119 = arith.mulf %114, %118 : vector<64x64xf32>
    %120 = arith.truncf %119 : vector<64x64xf32> to vector<64x64xbf16>
    %cst_38 = arith.constant dense<0.000000e+00> : vector<64x8xf32>
    %121 = tpu.matmul %120, %108, %cst_38 {dimension_numbers = #tpu.dot_dimension_numbers<[1], [0], [0], [1], [0, 0, 1, 1], [], []>} : vector<64x64xbf16>, vector<64x8xbf16>, vector<64x8xf32> -> vector<64x8xf32>
    %122 = arith.truncf %121 : vector<64x8xf32> to vector<64x8xbf16>
    %123 = vector.extract_strided_slice %17 {offsets = [64, 16], sizes = [64, 8], strides = [1, 1]} : vector<128x32xbf16> to vector<64x8xbf16>
    %124 = vector.extract_strided_slice %18 {offsets = [64, 16], sizes = [64, 8], strides = [1, 1]} : vector<128x32xbf16> to vector<64x8xbf16>
    %125 = vector.extract_strided_slice %19 {offsets = [64, 16], sizes = [64, 8], strides = [1, 1]} : vector<128x32xbf16> to vector<64x8xbf16>
    %cst_39 = arith.constant dense<0.000000e+00> : vector<64x64xf32>
    %126 = tpu.matmul %123, %124, %cst_39 {dimension_numbers = #tpu.dot_dimension_numbers<[1], [1], [0], [0], [0, 0, 1, 0], [], []>} : vector<64x8xbf16>, vector<64x8xbf16>, vector<64x64xf32> -> vector<64x64xf32>
    %cst_40 = arith.constant dense<0xFF800000> : vector<64xf32>
    %127 = vector.multi_reduction <maximumf>, %126, %cst_40 [1] : vector<64x64xf32> to vector<64xf32>
    %128 = vector.shape_cast %127 : vector<64xf32> to vector<64x1xf32>
    %129 = vector.broadcast %128 : vector<64x1xf32> to vector<64x64xf32>
    %130 = arith.subf %126, %129 : vector<64x64xf32>
    %131 = math.exp %130 : vector<64x64xf32>
    %cst_41 = arith.constant dense<0.000000e+00> : vector<64xf32>
    %132 = vector.multi_reduction <add>, %131, %cst_41 [1] : vector<64x64xf32> to vector<64xf32>
    %133 = vector.shape_cast %132 : vector<64xf32> to vector<64x1xf32>
    %134 = tpu.reciprocal %133 {approx = true} : vector<64x1xf32> -> vector<64x1xf32>
    %135 = vector.broadcast %134 : vector<64x1xf32> to vector<64x64xf32>
    %136 = arith.mulf %131, %135 : vector<64x64xf32>
    %137 = arith.truncf %136 : vector<64x64xf32> to vector<64x64xbf16>
    %cst_42 = arith.constant dense<0.000000e+00> : vector<64x8xf32>
    %138 = tpu.matmul %137, %125, %cst_42 {dimension_numbers = #tpu.dot_dimension_numbers<[1], [0], [0], [1], [0, 0, 1, 1], [], []>} : vector<64x64xbf16>, vector<64x8xbf16>, vector<64x8xf32> -> vector<64x8xf32>
    %139 = arith.truncf %138 : vector<64x8xf32> to vector<64x8xbf16>
    %140 = vector.extract_strided_slice %17 {offsets = [64, 24], sizes = [64, 8], strides = [1, 1]} : vector<128x32xbf16> to vector<64x8xbf16>
    %141 = vector.extract_strided_slice %18 {offsets = [64, 24], sizes = [64, 8], strides = [1, 1]} : vector<128x32xbf16> to vector<64x8xbf16>
    %142 = vector.extract_strided_slice %19 {offsets = [64, 24], sizes = [64, 8], strides = [1, 1]} : vector<128x32xbf16> to vector<64x8xbf16>
    %cst_43 = arith.constant dense<0.000000e+00> : vector<64x64xf32>
    %143 = tpu.matmul %140, %141, %cst_43 {dimension_numbers = #tpu.dot_dimension_numbers<[1], [1], [0], [0], [0, 0, 1, 0], [], []>} : vector<64x8xbf16>, vector<64x8xbf16>, vector<64x64xf32> -> vector<64x64xf32>
    %cst_44 = arith.constant dense<0xFF800000> : vector<64xf32>
    %144 = vector.multi_reduction <maximumf>, %143, %cst_44 [1] : vector<64x64xf32> to vector<64xf32>
    %145 = vector.shape_cast %144 : vector<64xf32> to vector<64x1xf32>
    %146 = vector.broadcast %145 : vector<64x1xf32> to vector<64x64xf32>
    %147 = arith.subf %143, %146 : vector<64x64xf32>
    %148 = math.exp %147 : vector<64x64xf32>
    %cst_45 = arith.constant dense<0.000000e+00> : vector<64xf32>
    %149 = vector.multi_reduction <add>, %148, %cst_45 [1] : vector<64x64xf32> to vector<64xf32>
    %150 = vector.shape_cast %149 : vector<64xf32> to vector<64x1xf32>
    %151 = tpu.reciprocal %150 {approx = true} : vector<64x1xf32> -> vector<64x1xf32>
    %152 = vector.broadcast %151 : vector<64x1xf32> to vector<64x64xf32>
    %153 = arith.mulf %148, %152 : vector<64x64xf32>
    %154 = arith.truncf %153 : vector<64x64xf32> to vector<64x64xbf16>
    %cst_46 = arith.constant dense<0.000000e+00> : vector<64x8xf32>
    %155 = tpu.matmul %154, %142, %cst_46 {dimension_numbers = #tpu.dot_dimension_numbers<[1], [0], [0], [1], [0, 0, 1, 1], [], []>} : vector<64x64xbf16>, vector<64x8xbf16>, vector<64x8xf32> -> vector<64x8xf32>
    %156 = arith.truncf %155 : vector<64x8xf32> to vector<64x8xbf16>
    %157 = tpu.concatenate %105, %122, %139, %156 in 1 : vector<64x8xbf16>, vector<64x8xbf16>, vector<64x8xbf16>, vector<64x8xbf16> -> vector<64x32xbf16>
    %158 = tpu.concatenate %88, %157 in 0 : vector<64x32xbf16>, vector<64x32xbf16> -> vector<128x32xbf16>
    %c0_47 = arith.constant 0 : index
    %c0_48 = arith.constant 0 : index
    %159 = vector.load %arg8[%c0_47, %c0_48] : memref<32x32xbf16, #tpu.memory_space<vmem>>, vector<32x32xbf16>
    %cst_49 = arith.constant dense<0.000000e+00> : vector<128x32xf32>
    %160 = tpu.matmul %158, %159, %cst_49 {dimension_numbers = #tpu.dot_dimension_numbers<[1], [0], [0], [1], [0, 0, 1, 1], [], []>} : vector<128x32xbf16>, vector<32x32xbf16>, vector<128x32xf32> -> vector<128x32xf32>
    %c0_50 = arith.constant 0 : index
    %c0_51 = arith.constant 0 : index
    %161 = vector.load %arg9[%c0_50, %c0_51] : memref<1x32xf32, #tpu.memory_space<vmem>>, vector<1x32xf32>
    %162 = vector.broadcast %161 : vector<1x32xf32> to vector<128x32xf32>
    %163 = arith.addf %160, %162 : vector<128x32xf32>
    %164 = arith.truncf %163 : vector<128x32xf32> to vector<128x32xbf16>
    %165 = tpu.concatenate %1, %164 in 1 : vector<128x32xbf16>, vector<128x32xbf16> -> vector<128x64xbf16>
    %c0_52 = arith.constant 0 : index
    %c0_53 = arith.constant 0 : index
    %166 = vector.load %arg10[%c0_52, %c0_53] : memref<64x32xbf16, #tpu.memory_space<vmem>>, vector<64x32xbf16>
    %cst_54 = arith.constant dense<0.000000e+00> : vector<128x32xf32>
    %167 = tpu.matmul %165, %166, %cst_54 {dimension_numbers = #tpu.dot_dimension_numbers<[1], [0], [0], [1], [0, 0, 1, 1], [], []>} : vector<128x64xbf16>, vector<64x32xbf16>, vector<128x32xf32> -> vector<128x32xf32>
    %c0_55 = arith.constant 0 : index
    %c0_56 = arith.constant 0 : index
    %168 = vector.load %arg11[%c0_55, %c0_56] : memref<1x32xf32, #tpu.memory_space<vmem>>, vector<1x32xf32>
    %169 = vector.broadcast %168 : vector<1x32xf32> to vector<128x32xf32>
    %170 = arith.addf %167, %169 : vector<128x32xf32>
    %c0_57 = arith.constant 0 : index
    %c0_58 = arith.constant 0 : index
    %171 = vector.load %arg12[%c0_57, %c0_58] : memref<64x32xbf16, #tpu.memory_space<vmem>>, vector<64x32xbf16>
    %cst_59 = arith.constant dense<0.000000e+00> : vector<128x32xf32>
    %172 = tpu.matmul %165, %171, %cst_59 {dimension_numbers = #tpu.dot_dimension_numbers<[1], [0], [0], [1], [0, 0, 1, 1], [], []>} : vector<128x64xbf16>, vector<64x32xbf16>, vector<128x32xf32> -> vector<128x32xf32>
    %c0_60 = arith.constant 0 : index
    %c0_61 = arith.constant 0 : index
    %173 = vector.load %arg13[%c0_60, %c0_61] : memref<1x32xf32, #tpu.memory_space<vmem>>, vector<1x32xf32>
    %174 = vector.broadcast %173 : vector<1x32xf32> to vector<128x32xf32>
    %175 = arith.addf %172, %174 : vector<128x32xf32>
    %c0_62 = arith.constant 0 : index
    %c0_63 = arith.constant 0 : index
    %176 = vector.load %arg14[%c0_62, %c0_63] : memref<64x32xbf16, #tpu.memory_space<vmem>>, vector<64x32xbf16>
    %cst_64 = arith.constant dense<0.000000e+00> : vector<128x32xf32>
    %177 = tpu.matmul %165, %176, %cst_64 {dimension_numbers = #tpu.dot_dimension_numbers<[1], [0], [0], [1], [0, 0, 1, 1], [], []>} : vector<128x64xbf16>, vector<64x32xbf16>, vector<128x32xf32> -> vector<128x32xf32>
    %c0_65 = arith.constant 0 : index
    %c0_66 = arith.constant 0 : index
    %178 = vector.load %arg15[%c0_65, %c0_66] : memref<1x32xf32, #tpu.memory_space<vmem>>, vector<1x32xf32>
    %179 = vector.broadcast %178 : vector<1x32xf32> to vector<128x32xf32>
    %180 = arith.addf %177, %179 : vector<128x32xf32>
    %181 = arith.truncf %170 : vector<128x32xf32> to vector<128x32xbf16>
    %182 = arith.truncf %175 : vector<128x32xf32> to vector<128x32xbf16>
    %183 = arith.truncf %180 : vector<128x32xf32> to vector<128x32xbf16>
    %184 = vector.extract_strided_slice %181 {offsets = [0, 0], sizes = [64, 8], strides = [1, 1]} : vector<128x32xbf16> to vector<64x8xbf16>
    %185 = vector.extract_strided_slice %182 {offsets = [0, 0], sizes = [64, 8], strides = [1, 1]} : vector<128x32xbf16> to vector<64x8xbf16>
    %186 = vector.extract_strided_slice %183 {offsets = [0, 0], sizes = [64, 8], strides = [1, 1]} : vector<128x32xbf16> to vector<64x8xbf16>
    %cst_67 = arith.constant dense<0.000000e+00> : vector<64x64xf32>
    %187 = tpu.matmul %184, %185, %cst_67 {dimension_numbers = #tpu.dot_dimension_numbers<[1], [1], [0], [0], [0, 0, 1, 0], [], []>} : vector<64x8xbf16>, vector<64x8xbf16>, vector<64x64xf32> -> vector<64x64xf32>
    %cst_68 = arith.constant dense<0xFF800000> : vector<64xf32>
    %188 = vector.multi_reduction <maximumf>, %187, %cst_68 [1] : vector<64x64xf32> to vector<64xf32>
    %189 = vector.shape_cast %188 : vector<64xf32> to vector<64x1xf32>
    %190 = vector.broadcast %189 : vector<64x1xf32> to vector<64x64xf32>
    %191 = arith.subf %187, %190 : vector<64x64xf32>
    %192 = math.exp %191 : vector<64x64xf32>
    %cst_69 = arith.constant dense<0.000000e+00> : vector<64xf32>
    %193 = vector.multi_reduction <add>, %192, %cst_69 [1] : vector<64x64xf32> to vector<64xf32>
    %194 = vector.shape_cast %193 : vector<64xf32> to vector<64x1xf32>
    %195 = tpu.reciprocal %194 {approx = true} : vector<64x1xf32> -> vector<64x1xf32>
    %196 = vector.broadcast %195 : vector<64x1xf32> to vector<64x64xf32>
    %197 = arith.mulf %192, %196 : vector<64x64xf32>
    %198 = arith.truncf %197 : vector<64x64xf32> to vector<64x64xbf16>
    %cst_70 = arith.constant dense<0.000000e+00> : vector<64x8xf32>
    %199 = tpu.matmul %198, %186, %cst_70 {dimension_numbers = #tpu.dot_dimension_numbers<[1], [0], [0], [1], [0, 0, 1, 1], [], []>} : vector<64x64xbf16>, vector<64x8xbf16>, vector<64x8xf32> -> vector<64x8xf32>
    %200 = arith.truncf %199 : vector<64x8xf32> to vector<64x8xbf16>
    %201 = vector.extract_strided_slice %181 {offsets = [0, 8], sizes = [64, 8], strides = [1, 1]} : vector<128x32xbf16> to vector<64x8xbf16>
    %202 = vector.extract_strided_slice %182 {offsets = [0, 8], sizes = [64, 8], strides = [1, 1]} : vector<128x32xbf16> to vector<64x8xbf16>
    %203 = vector.extract_strided_slice %183 {offsets = [0, 8], sizes = [64, 8], strides = [1, 1]} : vector<128x32xbf16> to vector<64x8xbf16>
    %cst_71 = arith.constant dense<0.000000e+00> : vector<64x64xf32>
    %204 = tpu.matmul %201, %202, %cst_71 {dimension_numbers = #tpu.dot_dimension_numbers<[1], [1], [0], [0], [0, 0, 1, 0], [], []>} : vector<64x8xbf16>, vector<64x8xbf16>, vector<64x64xf32> -> vector<64x64xf32>
    %cst_72 = arith.constant dense<0xFF800000> : vector<64xf32>
    %205 = vector.multi_reduction <maximumf>, %204, %cst_72 [1] : vector<64x64xf32> to vector<64xf32>
    %206 = vector.shape_cast %205 : vector<64xf32> to vector<64x1xf32>
    %207 = vector.broadcast %206 : vector<64x1xf32> to vector<64x64xf32>
    %208 = arith.subf %204, %207 : vector<64x64xf32>
    %209 = math.exp %208 : vector<64x64xf32>
    %cst_73 = arith.constant dense<0.000000e+00> : vector<64xf32>
    %210 = vector.multi_reduction <add>, %209, %cst_73 [1] : vector<64x64xf32> to vector<64xf32>
    %211 = vector.shape_cast %210 : vector<64xf32> to vector<64x1xf32>
    %212 = tpu.reciprocal %211 {approx = true} : vector<64x1xf32> -> vector<64x1xf32>
    %213 = vector.broadcast %212 : vector<64x1xf32> to vector<64x64xf32>
    %214 = arith.mulf %209, %213 : vector<64x64xf32>
    %215 = arith.truncf %214 : vector<64x64xf32> to vector<64x64xbf16>
    %cst_74 = arith.constant dense<0.000000e+00> : vector<64x8xf32>
    %216 = tpu.matmul %215, %203, %cst_74 {dimension_numbers = #tpu.dot_dimension_numbers<[1], [0], [0], [1], [0, 0, 1, 1], [], []>} : vector<64x64xbf16>, vector<64x8xbf16>, vector<64x8xf32> -> vector<64x8xf32>
    %217 = arith.truncf %216 : vector<64x8xf32> to vector<64x8xbf16>
    %218 = vector.extract_strided_slice %181 {offsets = [0, 16], sizes = [64, 8], strides = [1, 1]} : vector<128x32xbf16> to vector<64x8xbf16>
    %219 = vector.extract_strided_slice %182 {offsets = [0, 16], sizes = [64, 8], strides = [1, 1]} : vector<128x32xbf16> to vector<64x8xbf16>
    %220 = vector.extract_strided_slice %183 {offsets = [0, 16], sizes = [64, 8], strides = [1, 1]} : vector<128x32xbf16> to vector<64x8xbf16>
    %cst_75 = arith.constant dense<0.000000e+00> : vector<64x64xf32>
    %221 = tpu.matmul %218, %219, %cst_75 {dimension_numbers = #tpu.dot_dimension_numbers<[1], [1], [0], [0], [0, 0, 1, 0], [], []>} : vector<64x8xbf16>, vector<64x8xbf16>, vector<64x64xf32> -> vector<64x64xf32>
    %cst_76 = arith.constant dense<0xFF800000> : vector<64xf32>
    %222 = vector.multi_reduction <maximumf>, %221, %cst_76 [1] : vector<64x64xf32> to vector<64xf32>
    %223 = vector.shape_cast %222 : vector<64xf32> to vector<64x1xf32>
    %224 = vector.broadcast %223 : vector<64x1xf32> to vector<64x64xf32>
    %225 = arith.subf %221, %224 : vector<64x64xf32>
    %226 = math.exp %225 : vector<64x64xf32>
    %cst_77 = arith.constant dense<0.000000e+00> : vector<64xf32>
    %227 = vector.multi_reduction <add>, %226, %cst_77 [1] : vector<64x64xf32> to vector<64xf32>
    %228 = vector.shape_cast %227 : vector<64xf32> to vector<64x1xf32>
    %229 = tpu.reciprocal %228 {approx = true} : vector<64x1xf32> -> vector<64x1xf32>
    %230 = vector.broadcast %229 : vector<64x1xf32> to vector<64x64xf32>
    %231 = arith.mulf %226, %230 : vector<64x64xf32>
    %232 = arith.truncf %231 : vector<64x64xf32> to vector<64x64xbf16>
    %cst_78 = arith.constant dense<0.000000e+00> : vector<64x8xf32>
    %233 = tpu.matmul %232, %220, %cst_78 {dimension_numbers = #tpu.dot_dimension_numbers<[1], [0], [0], [1], [0, 0, 1, 1], [], []>} : vector<64x64xbf16>, vector<64x8xbf16>, vector<64x8xf32> -> vector<64x8xf32>
    %234 = arith.truncf %233 : vector<64x8xf32> to vector<64x8xbf16>
    %235 = vector.extract_strided_slice %181 {offsets = [0, 24], sizes = [64, 8], strides = [1, 1]} : vector<128x32xbf16> to vector<64x8xbf16>
    %236 = vector.extract_strided_slice %182 {offsets = [0, 24], sizes = [64, 8], strides = [1, 1]} : vector<128x32xbf16> to vector<64x8xbf16>
    %237 = vector.extract_strided_slice %183 {offsets = [0, 24], sizes = [64, 8], strides = [1, 1]} : vector<128x32xbf16> to vector<64x8xbf16>
    %cst_79 = arith.constant dense<0.000000e+00> : vector<64x64xf32>
    %238 = tpu.matmul %235, %236, %cst_79 {dimension_numbers = #tpu.dot_dimension_numbers<[1], [1], [0], [0], [0, 0, 1, 0], [], []>} : vector<64x8xbf16>, vector<64x8xbf16>, vector<64x64xf32> -> vector<64x64xf32>
    %cst_80 = arith.constant dense<0xFF800000> : vector<64xf32>
    %239 = vector.multi_reduction <maximumf>, %238, %cst_80 [1] : vector<64x64xf32> to vector<64xf32>
    %240 = vector.shape_cast %239 : vector<64xf32> to vector<64x1xf32>
    %241 = vector.broadcast %240 : vector<64x1xf32> to vector<64x64xf32>
    %242 = arith.subf %238, %241 : vector<64x64xf32>
    %243 = math.exp %242 : vector<64x64xf32>
    %cst_81 = arith.constant dense<0.000000e+00> : vector<64xf32>
    %244 = vector.multi_reduction <add>, %243, %cst_81 [1] : vector<64x64xf32> to vector<64xf32>
    %245 = vector.shape_cast %244 : vector<64xf32> to vector<64x1xf32>
    %246 = tpu.reciprocal %245 {approx = true} : vector<64x1xf32> -> vector<64x1xf32>
    %247 = vector.broadcast %246 : vector<64x1xf32> to vector<64x64xf32>
    %248 = arith.mulf %243, %247 : vector<64x64xf32>
    %249 = arith.truncf %248 : vector<64x64xf32> to vector<64x64xbf16>
    %cst_82 = arith.constant dense<0.000000e+00> : vector<64x8xf32>
    %250 = tpu.matmul %249, %237, %cst_82 {dimension_numbers = #tpu.dot_dimension_numbers<[1], [0], [0], [1], [0, 0, 1, 1], [], []>} : vector<64x64xbf16>, vector<64x8xbf16>, vector<64x8xf32> -> vector<64x8xf32>
    %251 = arith.truncf %250 : vector<64x8xf32> to vector<64x8xbf16>
    %252 = tpu.concatenate %200, %217, %234, %251 in 1 : vector<64x8xbf16>, vector<64x8xbf16>, vector<64x8xbf16>, vector<64x8xbf16> -> vector<64x32xbf16>
    %253 = vector.extract_strided_slice %181 {offsets = [64, 0], sizes = [64, 8], strides = [1, 1]} : vector<128x32xbf16> to vector<64x8xbf16>
    %254 = vector.extract_strided_slice %182 {offsets = [64, 0], sizes = [64, 8], strides = [1, 1]} : vector<128x32xbf16> to vector<64x8xbf16>
    %255 = vector.extract_strided_slice %183 {offsets = [64, 0], sizes = [64, 8], strides = [1, 1]} : vector<128x32xbf16> to vector<64x8xbf16>
    %cst_83 = arith.constant dense<0.000000e+00> : vector<64x64xf32>
    %256 = tpu.matmul %253, %254, %cst_83 {dimension_numbers = #tpu.dot_dimension_numbers<[1], [1], [0], [0], [0, 0, 1, 0], [], []>} : vector<64x8xbf16>, vector<64x8xbf16>, vector<64x64xf32> -> vector<64x64xf32>
    %cst_84 = arith.constant dense<0xFF800000> : vector<64xf32>
    %257 = vector.multi_reduction <maximumf>, %256, %cst_84 [1] : vector<64x64xf32> to vector<64xf32>
    %258 = vector.shape_cast %257 : vector<64xf32> to vector<64x1xf32>
    %259 = vector.broadcast %258 : vector<64x1xf32> to vector<64x64xf32>
    %260 = arith.subf %256, %259 : vector<64x64xf32>
    %261 = math.exp %260 : vector<64x64xf32>
    %cst_85 = arith.constant dense<0.000000e+00> : vector<64xf32>
    %262 = vector.multi_reduction <add>, %261, %cst_85 [1] : vector<64x64xf32> to vector<64xf32>
    %263 = vector.shape_cast %262 : vector<64xf32> to vector<64x1xf32>
    %264 = tpu.reciprocal %263 {approx = true} : vector<64x1xf32> -> vector<64x1xf32>
    %265 = vector.broadcast %264 : vector<64x1xf32> to vector<64x64xf32>
    %266 = arith.mulf %261, %265 : vector<64x64xf32>
    %267 = arith.truncf %266 : vector<64x64xf32> to vector<64x64xbf16>
    %cst_86 = arith.constant dense<0.000000e+00> : vector<64x8xf32>
    %268 = tpu.matmul %267, %255, %cst_86 {dimension_numbers = #tpu.dot_dimension_numbers<[1], [0], [0], [1], [0, 0, 1, 1], [], []>} : vector<64x64xbf16>, vector<64x8xbf16>, vector<64x8xf32> -> vector<64x8xf32>
    %269 = arith.truncf %268 : vector<64x8xf32> to vector<64x8xbf16>
    %270 = vector.extract_strided_slice %181 {offsets = [64, 8], sizes = [64, 8], strides = [1, 1]} : vector<128x32xbf16> to vector<64x8xbf16>
    %271 = vector.extract_strided_slice %182 {offsets = [64, 8], sizes = [64, 8], strides = [1, 1]} : vector<128x32xbf16> to vector<64x8xbf16>
    %272 = vector.extract_strided_slice %183 {offsets = [64, 8], sizes = [64, 8], strides = [1, 1]} : vector<128x32xbf16> to vector<64x8xbf16>
    %cst_87 = arith.constant dense<0.000000e+00> : vector<64x64xf32>
    %273 = tpu.matmul %270, %271, %cst_87 {dimension_numbers = #tpu.dot_dimension_numbers<[1], [1], [0], [0], [0, 0, 1, 0], [], []>} : vector<64x8xbf16>, vector<64x8xbf16>, vector<64x64xf32> -> vector<64x64xf32>
    %cst_88 = arith.constant dense<0xFF800000> : vector<64xf32>
    %274 = vector.multi_reduction <maximumf>, %273, %cst_88 [1] : vector<64x64xf32> to vector<64xf32>
    %275 = vector.shape_cast %274 : vector<64xf32> to vector<64x1xf32>
    %276 = vector.broadcast %275 : vector<64x1xf32> to vector<64x64xf32>
    %277 = arith.subf %273, %276 : vector<64x64xf32>
    %278 = math.exp %277 : vector<64x64xf32>
    %cst_89 = arith.constant dense<0.000000e+00> : vector<64xf32>
    %279 = vector.multi_reduction <add>, %278, %cst_89 [1] : vector<64x64xf32> to vector<64xf32>
    %280 = vector.shape_cast %279 : vector<64xf32> to vector<64x1xf32>
    %281 = tpu.reciprocal %280 {approx = true} : vector<64x1xf32> -> vector<64x1xf32>
    %282 = vector.broadcast %281 : vector<64x1xf32> to vector<64x64xf32>
    %283 = arith.mulf %278, %282 : vector<64x64xf32>
    %284 = arith.truncf %283 : vector<64x64xf32> to vector<64x64xbf16>
    %cst_90 = arith.constant dense<0.000000e+00> : vector<64x8xf32>
    %285 = tpu.matmul %284, %272, %cst_90 {dimension_numbers = #tpu.dot_dimension_numbers<[1], [0], [0], [1], [0, 0, 1, 1], [], []>} : vector<64x64xbf16>, vector<64x8xbf16>, vector<64x8xf32> -> vector<64x8xf32>
    %286 = arith.truncf %285 : vector<64x8xf32> to vector<64x8xbf16>
    %287 = vector.extract_strided_slice %181 {offsets = [64, 16], sizes = [64, 8], strides = [1, 1]} : vector<128x32xbf16> to vector<64x8xbf16>
    %288 = vector.extract_strided_slice %182 {offsets = [64, 16], sizes = [64, 8], strides = [1, 1]} : vector<128x32xbf16> to vector<64x8xbf16>
    %289 = vector.extract_strided_slice %183 {offsets = [64, 16], sizes = [64, 8], strides = [1, 1]} : vector<128x32xbf16> to vector<64x8xbf16>
    %cst_91 = arith.constant dense<0.000000e+00> : vector<64x64xf32>
    %290 = tpu.matmul %287, %288, %cst_91 {dimension_numbers = #tpu.dot_dimension_numbers<[1], [1], [0], [0], [0, 0, 1, 0], [], []>} : vector<64x8xbf16>, vector<64x8xbf16>, vector<64x64xf32> -> vector<64x64xf32>
    %cst_92 = arith.constant dense<0xFF800000> : vector<64xf32>
    %291 = vector.multi_reduction <maximumf>, %290, %cst_92 [1] : vector<64x64xf32> to vector<64xf32>
    %292 = vector.shape_cast %291 : vector<64xf32> to vector<64x1xf32>
    %293 = vector.broadcast %292 : vector<64x1xf32> to vector<64x64xf32>
    %294 = arith.subf %290, %293 : vector<64x64xf32>
    %295 = math.exp %294 : vector<64x64xf32>
    %cst_93 = arith.constant dense<0.000000e+00> : vector<64xf32>
    %296 = vector.multi_reduction <add>, %295, %cst_93 [1] : vector<64x64xf32> to vector<64xf32>
    %297 = vector.shape_cast %296 : vector<64xf32> to vector<64x1xf32>
    %298 = tpu.reciprocal %297 {approx = true} : vector<64x1xf32> -> vector<64x1xf32>
    %299 = vector.broadcast %298 : vector<64x1xf32> to vector<64x64xf32>
    %300 = arith.mulf %295, %299 : vector<64x64xf32>
    %301 = arith.truncf %300 : vector<64x64xf32> to vector<64x64xbf16>
    %cst_94 = arith.constant dense<0.000000e+00> : vector<64x8xf32>
    %302 = tpu.matmul %301, %289, %cst_94 {dimension_numbers = #tpu.dot_dimension_numbers<[1], [0], [0], [1], [0, 0, 1, 1], [], []>} : vector<64x64xbf16>, vector<64x8xbf16>, vector<64x8xf32> -> vector<64x8xf32>
    %303 = arith.truncf %302 : vector<64x8xf32> to vector<64x8xbf16>
    %304 = vector.extract_strided_slice %181 {offsets = [64, 24], sizes = [64, 8], strides = [1, 1]} : vector<128x32xbf16> to vector<64x8xbf16>
    %305 = vector.extract_strided_slice %182 {offsets = [64, 24], sizes = [64, 8], strides = [1, 1]} : vector<128x32xbf16> to vector<64x8xbf16>
    %306 = vector.extract_strided_slice %183 {offsets = [64, 24], sizes = [64, 8], strides = [1, 1]} : vector<128x32xbf16> to vector<64x8xbf16>
    %cst_95 = arith.constant dense<0.000000e+00> : vector<64x64xf32>
    %307 = tpu.matmul %304, %305, %cst_95 {dimension_numbers = #tpu.dot_dimension_numbers<[1], [1], [0], [0], [0, 0, 1, 0], [], []>} : vector<64x8xbf16>, vector<64x8xbf16>, vector<64x64xf32> -> vector<64x64xf32>
    %cst_96 = arith.constant dense<0xFF800000> : vector<64xf32>
    %308 = vector.multi_reduction <maximumf>, %307, %cst_96 [1] : vector<64x64xf32> to vector<64xf32>
    %309 = vector.shape_cast %308 : vector<64xf32> to vector<64x1xf32>
    %310 = vector.broadcast %309 : vector<64x1xf32> to vector<64x64xf32>
    %311 = arith.subf %307, %310 : vector<64x64xf32>
    %312 = math.exp %311 : vector<64x64xf32>
    %cst_97 = arith.constant dense<0.000000e+00> : vector<64xf32>
    %313 = vector.multi_reduction <add>, %312, %cst_97 [1] : vector<64x64xf32> to vector<64xf32>
    %314 = vector.shape_cast %313 : vector<64xf32> to vector<64x1xf32>
    %315 = tpu.reciprocal %314 {approx = true} : vector<64x1xf32> -> vector<64x1xf32>
    %316 = vector.broadcast %315 : vector<64x1xf32> to vector<64x64xf32>
    %317 = arith.mulf %312, %316 : vector<64x64xf32>
    %318 = arith.truncf %317 : vector<64x64xf32> to vector<64x64xbf16>
    %cst_98 = arith.constant dense<0.000000e+00> : vector<64x8xf32>
    %319 = tpu.matmul %318, %306, %cst_98 {dimension_numbers = #tpu.dot_dimension_numbers<[1], [0], [0], [1], [0, 0, 1, 1], [], []>} : vector<64x64xbf16>, vector<64x8xbf16>, vector<64x8xf32> -> vector<64x8xf32>
    %320 = arith.truncf %319 : vector<64x8xf32> to vector<64x8xbf16>
    %321 = tpu.concatenate %269, %286, %303, %320 in 1 : vector<64x8xbf16>, vector<64x8xbf16>, vector<64x8xbf16>, vector<64x8xbf16> -> vector<64x32xbf16>
    %322 = tpu.concatenate %252, %321 in 0 : vector<64x32xbf16>, vector<64x32xbf16> -> vector<128x32xbf16>
    %c0_99 = arith.constant 0 : index
    %c0_100 = arith.constant 0 : index
    %323 = vector.load %arg16[%c0_99, %c0_100] : memref<32x32xbf16, #tpu.memory_space<vmem>>, vector<32x32xbf16>
    %cst_101 = arith.constant dense<0.000000e+00> : vector<128x32xf32>
    %324 = tpu.matmul %322, %323, %cst_101 {dimension_numbers = #tpu.dot_dimension_numbers<[1], [0], [0], [1], [0, 0, 1, 1], [], []>} : vector<128x32xbf16>, vector<32x32xbf16>, vector<128x32xf32> -> vector<128x32xf32>
    %c0_102 = arith.constant 0 : index
    %c0_103 = arith.constant 0 : index
    %325 = vector.load %arg17[%c0_102, %c0_103] : memref<1x32xf32, #tpu.memory_space<vmem>>, vector<1x32xf32>
    %326 = vector.broadcast %325 : vector<1x32xf32> to vector<128x32xf32>
    %327 = arith.addf %324, %326 : vector<128x32xf32>
    %328 = arith.truncf %327 : vector<128x32xf32> to vector<128x32xbf16>
    %329 = tpu.concatenate %165, %328 in 1 : vector<128x64xbf16>, vector<128x32xbf16> -> vector<128x96xbf16>
    %c0_104 = arith.constant 0 : index
    %c0_105 = arith.constant 0 : index
    %330 = vector.load %arg18[%c0_104, %c0_105] : memref<96x32xbf16, #tpu.memory_space<vmem>>, vector<96x32xbf16>
    %cst_106 = arith.constant dense<0.000000e+00> : vector<128x32xf32>
    %331 = tpu.matmul %329, %330, %cst_106 {dimension_numbers = #tpu.dot_dimension_numbers<[1], [0], [0], [1], [0, 0, 1, 1], [], []>} : vector<128x96xbf16>, vector<96x32xbf16>, vector<128x32xf32> -> vector<128x32xf32>
    %c0_107 = arith.constant 0 : index
    %c0_108 = arith.constant 0 : index
    %332 = vector.load %arg19[%c0_107, %c0_108] : memref<1x32xf32, #tpu.memory_space<vmem>>, vector<1x32xf32>
    %333 = vector.broadcast %332 : vector<1x32xf32> to vector<128x32xf32>
    %334 = arith.addf %331, %333 : vector<128x32xf32>
    %335 = arith.addf %334, %0 : vector<128x32xf32>
    %c0_109 = arith.constant 0 : index
    %c0_110 = arith.constant 0 : index
    %336 = vector.load %arg20[%c0_109, %c0_110] : memref<128x32xf32, #tpu.memory_space<vmem>>, vector<128x32xf32>
    tpu.vector_store %arg20[%c0_109, %c0_110], %335 {strides = array<i32>} : memref<128x32xf32, #tpu.memory_space<vmem>>, vector<128x32xf32>,
    return
  }
  func.func @transform_0(%arg0: i32) -> (i32, i32) {
    %c0_i32 = arith.constant 0 : i32
    %c0_i32_0 = arith.constant 0 : i32
    return %arg0, %c0_i32 : i32, i32
  }
  func.func @transform_1(%arg0: i32) -> (i32, i32) {
    %c0_i32 = arith.constant 0 : i32
    %c0_i32_0 = arith.constant 0 : i32
    %c0_i32_1 = arith.constant 0 : i32
    return %c0_i32, %c0_i32_0 : i32, i32
  }
  func.func @transform_2(%arg0: i32) -> (i32, i32) {
    %c0_i32 = arith.constant 0 : i32
    %c0_i32_0 = arith.constant 0 : i32
    %c0_i32_1 = arith.constant 0 : i32
    return %c0_i32, %c0_i32_0 : i32, i32
  }
  func.func @transform_3(%arg0: i32) -> (i32, i32) {
    %c0_i32 = arith.constant 0 : i32
    %c0_i32_0 = arith.constant 0 : i32
    %c0_i32_1 = arith.constant 0 : i32
    return %c0_i32, %c0_i32_0 : i32, i32
  }
  func.func @transform_4(%arg0: i32) -> (i32, i32) {
    %c0_i32 = arith.constant 0 : i32
    %c0_i32_0 = arith.constant 0 : i32
    %c0_i32_1 = arith.constant 0 : i32
    return %c0_i32, %c0_i32_0 : i32, i32
  }
  func.func @transform_5(%arg0: i32) -> (i32, i32) {
    %c0_i32 = arith.constant 0 : i32
    %c0_i32_0 = arith.constant 0 : i32
    %c0_i32_1 = arith.constant 0 : i32
    return %c0_i32, %c0_i32_0 : i32, i32
  }
  func.func @transform_6(%arg0: i32) -> (i32, i32) {
    %c0_i32 = arith.constant 0 : i32
    %c0_i32_0 = arith.constant 0 : i32
    %c0_i32_1 = arith.constant 0 : i32
    return %c0_i32, %c0_i32_0 : i32, i32
  }
  func.func @transform_7(%arg0: i32) -> (i32, i32) {
    %c0_i32 = arith.constant 0 : i32
    %c0_i32_0 = arith.constant 0 : i32
    %c0_i32_1 = arith.constant 0 : i32
    return %c0_i32, %c0_i32_0 : i32, i32
  }
  func.func @transform_8(%arg0: i32) -> (i32, i32) {
    %c0_i32 = arith.constant 0 : i32
    %c0_i32_0 = arith.constant 0 : i32
    %c0_i32_1 = arith.constant 0 : i32
    return %c0_i32, %c0_i32_0 : i32, i32
  }
  func.func @transform_9(%arg0: i32) -> (i32, i32) {
    %c0_i32 = arith.constant 0 : i32
    %c0_i32_0 = arith.constant 0 : i32
    %c0_i32_1 = arith.constant 0 : i32
    return %c0_i32, %c0_i32_0 : i32, i32
  }
  func.func @transform_10(%arg0: i32) -> (i32, i32) {
    %c0_i32 = arith.constant 0 : i32
    %c0_i32_0 = arith.constant 0 : i32
    %c0_i32_1 = arith.constant 0 : i32
    return %c0_i32, %c0_i32_0 : i32, i32
  }
  func.func @transform_11(%arg0: i32) -> (i32, i32) {
    %c0_i32 = arith.constant 0 : i32
    %c0_i32_0 = arith.constant 0 : i32
    %c0_i32_1 = arith.constant 0 : i32
    return %c0_i32, %c0_i32_0 : i32, i32
  }
  func.func @transform_12(%arg0: i32) -> (i32, i32) {
    %c0_i32 = arith.constant 0 : i32
    %c0_i32_0 = arith.constant 0 : i32
    %c0_i32_1 = arith.constant 0 : i32
    return %c0_i32, %c0_i32_0 : i32, i32
  }
  func.func @transform_13(%arg0: i32) -> (i32, i32) {
    %c0_i32 = arith.constant 0 : i32
    %c0_i32_0 = arith.constant 0 : i32
    %c0_i32_1 = arith.constant 0 : i32
    return %c0_i32, %c0_i32_0 : i32, i32
  }
  func.func @transform_14(%arg0: i32) -> (i32, i32) {
    %c0_i32 = arith.constant 0 : i32
    %c0_i32_0 = arith.constant 0 : i32
    %c0_i32_1 = arith.constant 0 : i32
    return %c0_i32, %c0_i32_0 : i32, i32
  }
  func.func @transform_15(%arg0: i32) -> (i32, i32) {
    %c0_i32 = arith.constant 0 : i32
    %c0_i32_0 = arith.constant 0 : i32
    %c0_i32_1 = arith.constant 0 : i32
    return %c0_i32, %c0_i32_0 : i32, i32
  }
  func.func @transform_16(%arg0: i32) -> (i32, i32) {
    %c0_i32 = arith.constant 0 : i32
    %c0_i32_0 = arith.constant 0 : i32
    %c0_i32_1 = arith.constant 0 : i32
    return %c0_i32, %c0_i32_0 : i32, i32
  }
  func.func @transform_17(%arg0: i32) -> (i32, i32) {
    %c0_i32 = arith.constant 0 : i32
    %c0_i32_0 = arith.constant 0 : i32
    %c0_i32_1 = arith.constant 0 : i32
    return %c0_i32, %c0_i32_0 : i32, i32
  }
  func.func @transform_18(%arg0: i32) -> (i32, i32) {
    %c0_i32 = arith.constant 0 : i32
    %c0_i32_0 = arith.constant 0 : i32
    %c0_i32_1 = arith.constant 0 : i32
    return %c0_i32, %c0_i32_0 : i32, i32
  }
  func.func @transform_19(%arg0: i32) -> (i32, i32) {
    %c0_i32 = arith.constant 0 : i32
    %c0_i32_0 = arith.constant 0 : i32
    return %arg0, %c0_i32 : i32, i32
  }
}

</mosaic_0001>

<bundles_post_ra>
// kernel: tpu_custom_call.1
= control target key start
LH: loop header
LB: loop body
LE: loop exit
PB: predicated region body
PF: predicated region fallthrough
CT: control target
= control target key end

     0   :  { %vm110_vm0 = vcmask 261120   ;;  %vm496_vm1 = vcmask 64512   ;;  %s8291_s25 = smov 112   ;;  %vm586_vm2 = vcmask 523264   ;;  %s8293_s27 = smov 8   ;;  %vm1690_vm3 = vcmask 130048   ;;  %s11191_s1 = inlined_call_operand.vmem [shape: bf16[32,32], index: 1, kind: input, shape index: {}]   ;;  %s11192_s0 = inlined_call_operand.vmem [shape: f32[128,32], index: 0, kind: input, shape index: {}]   ;;  %s11193_s3 = inlined_call_operand.vmem [shape: bf16[32,32], index: 3, kind: input, shape index: {}]   ;;  %s11194_s5 = inlined_call_operand.vmem [shape: bf16[32,32], index: 5, kind: input, shape index: {}]   ;;  %s11195_s2 = inlined_call_operand.vmem [shape: f32[1,32], index: 2, kind: input, shape index: {}]   ;;  %s11196_s4 = inlined_call_operand.vmem [shape: f32[1,32], index: 4, kind: input, shape index: {}]   ;;  %s11197_s6 = inlined_call_operand.vmem [shape: f32[1,32], index: 6, kind: input, shape index: {}]   ;;  %s11198_s7 = inlined_call_operand.vmem [shape: bf16[32,32], index: 7, kind: input, shape index: {}]   ;;  %s11199_s11 = inlined_call_operand.vmem [shape: bf16[64,32], index: 11, kind: input, shape index: {}]   ;;  %s11200_s9 = inlined_call_operand.vmem [shape: bf16[64,32], index: 9, kind: input, shape index: {}]   ;;  %s11201_s8 = inlined_call_operand.vmem [shape: f32[1,32], index: 8, kind: input, shape index: {}]   ;;  %s11202_s13 = inlined_call_operand.vmem [shape: bf16[64,32], index: 13, kind: input, shape index: {}]   ;;  %s11203_s10 = inlined_call_operand.vmem [shape: f32[1,32], index: 10, kind: input, shape index: {}]   ;;  %s11204_s12 = inlined_call_operand.vmem [shape: f32[1,32], index: 12, kind: input, shape index: {}]   ;;  %s11205_s14 = inlined_call_operand.vmem [shape: f32[1,32], index: 14, kind: input, shape index: {}]   ;;  %s11206_s15 = inlined_call_operand.vmem [shape: bf16[32,32], index: 15, kind: input, shape index: {}]   ;;  %s11207_s17 = inlined_call_operand.vmem [shape: bf16[96,32], index: 17, kind: input, shape index: {}]   ;;  %s11208_s16 = inlined_call_operand.vmem [shape: f32[1,32], index: 16, kind: input, shape index: {}]   ;;  %s11209_s18 = inlined_call_operand.vmem [shape: f32[1,32], index: 18, kind: input, shape index: {}]   ;;  %s11210_s19 = inlined_call_operand.vmem [shape: f32[128,32], index: 19, kind: output, shape index: {}]  }
   0x1   :  { %11278 = sst [smem:[#allocation31_spill]] %s11191_s1  ;;  %v8531_v30 = vld [vmem:[%s11195_s2] ss:$0 sm:$0xff]  ;;  %s8294_s28 = smov 16   ;;  %vm1699_vm4 = vcmask 195584   ;;  %vm6203_vm5 = vcmask 785408  }
   0x2   :  { %11279 = sst [smem:[#allocation32_spill]] %s11192_s0  ;;  %s11282_s20 = sld [smem:[#allocation31_spill]]  ;;  %v8552_v52 = vld [vmem:[%s11196_s4] ss:$0 sm:$0xff] }
   0x3   :  { %11280 = sst [smem:[#allocation33_spill]] %s11193_s3  ;;  %s11283_s23 = sld [smem:[#allocation32_spill]] }
   0x4   :  { %11281 = sst [smem:[#allocation34_spill]] %s11194_s5  ;;  %s11285_s30 = sld [smem:[#allocation33_spill]] }
   0x5   :  { %s11290_s22 = sld [smem:[#allocation34_spill]]  ;;  %s8290_s4 = smov 120  }
   0x6   :  { %s8295_s29 = smov 24   ;;  %s8296_s2 = smov 32  }
   0x8   :  { %v7734_v0 = vld [vmem:[%s11282_s20] sm:$0xff]   ;;  %v7735_v1 = vld [vmem:[%s11282_s20 + $0x8] sm:$0xff]  }
   0x9   :  { %7658 = vmatprep.subr.bf16.mxu1 %v7734_v0  ;;  %v75_v2 = vld [vmem:[%s11283_s23 + $0x60] sm:$0xff]  ;;  %v76_v3 = vld [vmem:[%s11283_s23 + $0x68] sm:$0xff]  ;;  %v77_v4 = vld [vmem:[%s11283_s23 + $0x70] sm:$0xff]  ;;  %6946 = vmatprep.subr.bf16.mxu0 %v7734_v0 }
   0xa   :  { %7660 = vmatpush3.bf16.msra.mxu1 %v7734_v0  ;;  %v8413_v5 = vpack.c.bf16 %v76_v3, %v75_v2  ;;  %v78_v6 = vld [vmem:[%s11283_s23 + $0x78] sm:$0xff]  ;;  %6947 = vmatpush3.bf16.msra.mxu0 %v7734_v0  ;;  %v7736_v7 = vld [vmem:[%s11285_s30] sm:$0xff]   ;;  %v64_v9 = vld [vmem:[%s11283_s23 + $0x8] sm:$0xff] }
   0xb   :  { %7659 = vmatprep.subr.bf16.mxu1 %v7735_v1  ;;  %6948 = vmatprep.subr.bf16.mxu0 %v7735_v1  ;;  %v63_v8 = vld [vmem:[%s11283_s23] sm:$0xff]  ;;  %v8429_v10 = vpack.c.bf16 %v78_v6, %v77_v4  ;;  %v65_v12 = vld [vmem:[%s11283_s23 + $0x10] sm:$0xff]  ;;  %v66_v13 = vld [vmem:[%s11283_s23 + $0x18] sm:$0xff] }
   0xc   :  { %11284 = vst [vmem:[#allocation2_spill] sm:$0xff] %v8413_v5  ;;  %6962 = vmatprep.mubr.msk.bf16.mxu1 %vm110_vm0, %v8413_v5  ;;  %v8431_v11 = vpack.c.bf16 %v64_v9, %v63_v8  ;;  %v67_v14 = vld [vmem:[%s11283_s23 + $0x20] sm:$0xff]  ;;  %v68_v15 = vld [vmem:[%s11283_s23 + $0x28] sm:$0xff]  ;;  %v8448_v17 = vpack.c.bf16 %v66_v13, %v65_v12  ;;  %v69_v23 = vld [vmem:[%s11283_s23 + $0x30] sm:$0xff] }
   0xd   :  { %11286 = vst [vmem:[#allocation3_spill] sm:$0xff] %v8429_v10  ;;  %v7737_v16 = vld [vmem:[%s11285_s30 + $0x8] sm:$0xff]   ;;  %v8454_v18 = vpack.c.bf16 %v68_v15, %v67_v14  ;;  %v7738_v19 = vld [vmem:[%s11290_s22] sm:$0xff]   ;;  %v70_v24 = vld [vmem:[%s11283_s23 + $0x38] sm:$0xff] }
   0xe   :  { %11287 = vst [vmem:[#allocation4_spill] sm:$0xff] %v8431_v11  ;;  %7661 = vmatpush3.bf16.msra.mxu1 %v7735_v1  ;;  %6949 = vmatpush3.bf16.msra.mxu0 %v7735_v1  ;;  %11288 = vst [vmem:[#allocation5_spill] sm:$0xff] %v8448_v17  ;;  %v7739_v20 = vld [vmem:[%s11290_s22 + $0x8] sm:$0xff]   ;;  %v71_v21 = vld [vmem:[%s11283_s23 + $0x40] sm:$0xff]  ;;  %v8482_v26 = vpack.c.bf16 %v70_v24, %v69_v23 }
   0xf   :  { %6966 = vmatprep.subr.bf16.mxu1 %v7736_v7  ;;  %6950 = vmatprep.mubr.msk.bf16.mxu0 %vm110_vm0, %v8431_v11  ;;  %11289 = vst [vmem:[#allocation6_spill] sm:$0xff] %v8454_v18  ;;  %v72_v22 = vld [vmem:[%s11283_s23 + $0x48] sm:$0xff]  ;;  %v73_v27 = vld [vmem:[%s11283_s23 + $0x50] sm:$0xff]  ;;  %v74_v28 = vld [vmem:[%s11283_s23 + $0x58] sm:$0xff] }
  0x10   :  { %6986 = vmatprep.subr.bf16.mxu0 %v7738_v19  ;;  %v8480_v25 = vpack.c.bf16 %v72_v22, %v71_v21  ;;  %11292 = vst [vmem:[#allocation8_spill] sm:$0xff] %v8482_v26  ;;  %v8498_v29 = vpack.c.bf16 %v74_v28, %v73_v27 }
  0x11   :  { %6963 = vmatmul.mubr.msk.bf16.vlgmr.msra.gmra.mrb[0].mxu1 %vm110_vm0, %v8429_v10  ;;  %6951 = vmatmul.mubr.msk.bf16.vlgmr.msra.gmra.mrb[0].mxu0 %vm110_vm0, %v8448_v17 }
  0x12   :  { %6967 = vmatpush3.bf16.msra.mxu1 %v7736_v7  ;;  %6970 = vmatprep.mubr.msk.bf16.mxu1 %vm110_vm0, %v8431_v11  ;;  %11291 = vst [vmem:[#allocation7_spill] sm:$0xff] %v8480_v25  ;;  %11293 = vst [vmem:[#allocation9_spill] sm:$0xff] %v8498_v29 }
  0x13   :  { %6968 = vmatprep.subr.bf16.mxu1 %v7737_v16  ;;  %6954 = vmatprep.mubr.msk.bf16.mxu0 %vm110_vm0, %v8454_v18 }
  0x14   :  { %6987 = vmatpush3.bf16.msra.mxu0 %v7738_v19 }
  0x15   :  { %6988 = vmatprep.subr.bf16.mxu0 %v7739_v20 }
  0x16   :  { %6969 = vmatpush3.bf16.msra.mxu1 %v7737_v16 }
  0x18   :  { %6989 = vmatpush3.bf16.msra.mxu0 %v7739_v20 }
  0x19   :  { %6971 = vmatmul.mubr.msk.bf16.vlgmr.msra.gmra.mrb[4].mxu1 %vm110_vm0, %v8448_v17  ;;  %6955 = vmatmul.mubr.msk.bf16.gmra.mrb[4].mxu0 %vm110_vm0, %v8482_v26 }
  0x1a   :  { %6974 = vmatprep.mubr.msk.bf16.mxu1 %vm110_vm0, %v8454_v18  ;;  %6958 = vmatprep.mubr.msk.bf16.mxu0 %vm110_vm0, %v8480_v25 }
  0x21   :  { %6975 = vmatmul.mubr.msk.bf16.gmra.mrb[8].mxu1 %vm110_vm0, %v8482_v26  ;;  %6959 = vmatmul.mubr.msk.bf16.gmra.mrb[8].mxu0 %vm110_vm0, %v8498_v29 }
  0x22   :  { %6990 = vmatprep.mubr.msk.bf16.mxu0 %vm110_vm0, %v8431_v11  ;;  %6978 = vmatprep.mubr.msk.bf16.mxu1 %vm110_vm0, %v8480_v25 }
  0x29   :  { %6991 = vmatmul.mubr.msk.bf16.vlgmr.msra.gmra.mrb[12].mxu0 %vm110_vm0, %v8448_v17  ;;  %6979 = vmatmul.mubr.msk.bf16.gmra.mrb[12].mxu1 %vm110_vm0, %v8498_v29 }
  0x2a   :  { %6994 = vmatprep.mubr.msk.bf16.mxu0 %vm110_vm0, %v8454_v18  ;;  %6982 = vmatprep.mubr.msk.bf16.mxu1 %vm110_vm0, %v8413_v5 }
  0x31   :  { %6995 = vmatmul.mubr.msk.bf16.gmra.mrb[16].mxu0 %vm110_vm0, %v8482_v26  ;;  %6983 = vmatmul.mubr.msk.bf16.gmra.mrb[16].mxu1 %vm110_vm0, %v8429_v10 }
  0x32   :  { %6998 = vmatprep.mubr.msk.bf16.mxu0 %vm110_vm0, %v8480_v25 }
  0x39   :  { %6999 = vmatmul.mubr.msk.bf16.gmra.mrb[20].mxu0 %vm110_vm0, %v8498_v29 }
  0x3a   :  { %7002 = vmatprep.mubr.msk.bf16.mxu0 %vm110_vm0, %v8413_v5 }
  0x41   :  { %7003 = vmatmul.mubr.msk.bf16.gmra.mrb[24].mxu0 %vm110_vm0, %v8429_v10 }
  0xe4   :  { %v6964_v31 = vpop.f32.mrb[0].mxu1  ;;  %v6952_v32 = vpop.f32.mrb[0].mxu0 }
  0xe5   :  { %v217_v33 = vpop.f32.mrb[1].mxu1  ;;  %v178_v34 = vadd.f32 %v6952_v32, %v8531_v30  ;;  %v169_v35 = vpop.f32.mrb[1].mxu0  ;;  %v226_v39 = vadd.f32 %v6964_v31, %v8531_v30 }
  0xe6   :  { %v6965_v36 = vpop.f32.mrb[2].mxu1  ;;  %v170_v37 = vadd.f32 %v8531_v30, %v169_v35  ;;  %v6953_v38 = vpop.f32.mrb[2].mxu0  ;;  %v218_v44 = vadd.f32 %v8531_v30, %v217_v33 }
  0xe7   :  { %v229_v40 = vadd.f32 %v6965_v36, %v8531_v30  ;;  %v220_v41 = vpop.f32.mrb[3].mxu1  ;;  %v181_v42 = vadd.f32 %v6953_v38, %v8531_v30  ;;  %v172_v43 = vpop.f32.mrb[3].mxu0 }
  0xe8   :  { %v221_v45 = vadd.f32 %v8531_v30, %v220_v41  ;;  %v173_v46 = vadd.f32 %v8531_v30, %v172_v43 }
  0xe9   :  { %v8541_v47 = vpack.c.bf16 %v229_v40, %v226_v39  ;;  %v8543_v48 = vpack.c.bf16 %v181_v42, %v178_v34  ;;  %v8640_v39 = vld [vmem:[%s11197_s6] ss:$0 sm:$0xff]  ;;  %s8292_s6 = smov 104  }
  0xea   :  { %v8545_v49 = vpack.c.bf16 %v221_v45, %v218_v44  ;;  %v8547_v50 = vpack.c.bf16 %v173_v46, %v170_v37 }
  0xeb   :  { %11294 = vst [vmem:[#allocation10_spill] sm:$0xff] %v8541_v47 }
  0xec   :  { %11295 = vst [vmem:[#allocation11_spill] sm:$0xff] %v8545_v49  ;;  %v6972_v51 = vpop.f32.mrb[4].mxu1  ;;  %v6956_v53 = vpop.f32.mrb[4].mxu0  ;;  %7014 = vmatprep.mubr.msk.bf16.mxu1 %vm496_vm1, %v8547_v50 }
  0xed   :  { %v289_v54 = vpop.f32.mrb[5].mxu1  ;;  %v194_v55 = vadd.f32 %v6956_v53, %v8531_v30  ;;  %v185_v56 = vpop.f32.mrb[5].mxu0  ;;  %v298_v60 = vadd.f32 %v6972_v51, %v8552_v52 }
  0xee   :  { %v6973_v57 = vpop.f32.mrb[6].mxu1  ;;  %v186_v58 = vadd.f32 %v8531_v30, %v185_v56  ;;  %v6957_v59 = vpop.f32.mrb[6].mxu0  ;;  %v290_v1 = vadd.f32 %v8552_v52, %v289_v54 }
  0xef   :  { %v301_v61 = vadd.f32 %v6973_v57, %v8552_v52  ;;  %v292_v62 = vpop.f32.mrb[7].mxu1  ;;  %v197_v63 = vadd.f32 %v6957_v59, %v8531_v30  ;;  %v188_v0 = vpop.f32.mrb[7].mxu0 }
  0xf0   :  { %v293_v2 = vadd.f32 %v8552_v52, %v292_v62  ;;  %v189_v3 = vadd.f32 %v8531_v30, %v188_v0 }
  0xf1   :  { %v8564_v4 = vpack.c.bf16 %v301_v61, %v298_v60  ;;  %v8566_v6 = vpack.c.bf16 %v197_v63, %v194_v55 }
  0xf2   :  { %v8568_v7 = vpack.c.bf16 %v293_v2, %v290_v1  ;;  %v8570_v8 = vpack.c.bf16 %v189_v3, %v186_v58 }
  0xf3   :  { %v513_v24 = vsel %vm496_vm1, %v8564_v4, 0 }
  0xf4   :  { %v6976_v9 = vpop.f32.mrb[8].mxu1  ;;  %776 = vrot.lane.b32.xlu0 %v8568_v7, %s8290_s4  ;;  %7662 = vmatprep.subr.msk.bf16.mxu1 %vm496_vm1, %v8568_v7  ;;  %v510_v12 = vsel %vm496_vm1, %v8568_v7, 0  ;;  %v6960_v31 = vpop.f32.mrb[8].mxu0 }
  0xf5   :  { %v314_v13 = vadd.f32 %v6976_v9, %v8552_v52  ;;  %v305_v14 = vpop.f32.mrb[9].mxu1  ;;  %7007 = vmatpush3.bf16.xpose.msra.mxu1 %v510_v12  ;;  %v210_v33 = vadd.f32 %v6960_v31, %v8531_v30  ;;  %v201_v34 = vpop.f32.mrb[9].mxu0 }
  0xf6   :  { %v306_v15 = vadd.f32 %v8552_v52, %v305_v14  ;;  %v6977_v16 = vpop.f32.mrb[10].mxu1  ;;  %7663 = vmatprep.subr.msk.bf16.mxu1 %vm496_vm1, %v8564_v4  ;;  %v202_v37 = vadd.f32 %v8531_v30, %v201_v34  ;;  %v6961_v38 = vpop.f32.mrb[10].mxu0 }
  0xf7   :  { %v317_v19 = vadd.f32 %v6977_v16, %v8552_v52  ;;  %v308_v20 = vpop.f32.mrb[11].mxu1  ;;  %v213_v42 = vadd.f32 %v6961_v38, %v8531_v30  ;;  %v204_v43 = vpop.f32.mrb[11].mxu0 }
  0xf8   :  { %v309_v21 = vadd.f32 %v8552_v52, %v308_v20  ;;  %778 = vrot.lane.b32.xlu0 %v8564_v4, %s8290_s4  ;;  %v205_v46 = vadd.f32 %v8531_v30, %v204_v43 }
  0xf9   :  { %v8586_v22 = vpack.c.bf16 %v317_v19, %v314_v13  ;;  %v8647_v55 = vpack.c.bf16 %v213_v42, %v210_v33 }
  0xfa   :  { %v8588_v23 = vpack.c.bf16 %v309_v21, %v306_v15  ;;  %v8653_v61 = vpack.c.bf16 %v205_v46, %v202_v37 }
  0xfb   :  { %v519_v28 = vsel %vm496_vm1, %v8586_v22, 0  ;;  %11296 = vst [vmem:[#allocation12_spill] sm:$0xff] %v8647_v55 }
  0xfc   :  { %780 = vrot.lane.b32.xlu1 %v8588_v23, %s8290_s4  ;;  %764 = vrot.lane.b32.xlu0 %v8547_v50, %s8290_s4  ;;  %v516_v27 = vsel %vm496_vm1, %v8588_v23, 0  ;;  %v6980_v32 = vpop.f32.mrb[12].mxu1  ;;  %v6992_v51 = vpop.f32.mrb[12].mxu0  ;;  %11297 = vst [vmem:[#allocation13_spill] sm:$0xff] %v8653_v61 }
  0xfd   :  { %7009 = vmatpush3.bf16.xpose.msra.mxu1 %v513_v24  ;;  %v330_v35 = vadd.f32 %v6980_v32, %v8552_v52  ;;  %v321_v36 = vpop.f32.mrb[13].mxu1  ;;  %v418_v56 = vadd.f32 %v6992_v51, %v8640_v39  ;;  %v409_v57 = vpop.f32.mrb[13].mxu0 }
  0xfe   :  { %7664 = vmatprep.subr.msk.bf16.mxu1 %vm496_vm1, %v8588_v23  ;;  %v322_v40 = vadd.f32 %v8552_v52, %v321_v36  ;;  %v6981_v41 = vpop.f32.mrb[14].mxu1  ;;  %v410_v62 = vadd.f32 %v8640_v39, %v409_v57  ;;  %v6993_v63 = vpop.f32.mrb[14].mxu0 }
  0xff   :  { %v333_v44 = vadd.f32 %v6981_v41, %v8552_v52  ;;  %v324_v45 = vpop.f32.mrb[15].mxu1  ;;  %v421_v2 = vadd.f32 %v6993_v63, %v8640_v39  ;;  %v412_v3 = vpop.f32.mrb[15].mxu0 }
 0x100   :  { %782 = vrot.lane.b32.xlu1 %v8586_v22, %s8290_s4  ;;  %766 = vrot.lane.b32.xlu0 %v8543_v48, %s8290_s4  ;;  %v325_v53 = vadd.f32 %v8552_v52, %v324_v45  ;;  %v413_v13 = vadd.f32 %v8640_v39, %v412_v3 }
 0x101   :  { %v8650_v58 = vpack.c.bf16 %v333_v44, %v330_v35  ;;  %v8663_v16 = vpack.c.bf16 %v421_v2, %v418_v56 }
 0x102   :  { %v8656_v30 = vpack.c.bf16 %v325_v53, %v322_v40  ;;  %v8668_v24 = vpack.c.bf16 %v413_v13, %v410_v62 }
 0x104   :  { %1070 = vrot.lane.b32.xlu1 %v8568_v7, %s8291_s25  ;;  %1074 = vrot.lane.b32.xlu0 %v8588_v23, %s8291_s25  ;;  %v6984_v54 = vpop.f32.mrb[16].mxu1  ;;  %v6996_v14 = vpop.f32.mrb[16].mxu0 }
 0x105   :  { %7011 = vmatpush3.bf16.xpose.msra.mxu1 %v516_v27  ;;  %v346_v59 = vadd.f32 %v6984_v54, %v8552_v52  ;;  %v337_v60 = vpop.f32.mrb[17].mxu1  ;;  %v434_v19 = vadd.f32 %v6996_v14, %v8640_v39  ;;  %v425_v20 = vpop.f32.mrb[17].mxu0 }
 0x106   :  { %7665 = vmatprep.subr.msk.bf16.mxu1 %vm496_vm1, %v8586_v22  ;;  %v338_v0 = vadd.f32 %v8552_v52, %v337_v60  ;;  %v6985_v1 = vpop.f32.mrb[18].mxu1  ;;  %v426_v27 = vadd.f32 %v8640_v39, %v425_v20 }
 0x107   :  { %v349_v9 = vadd.f32 %v6985_v1, %v8552_v52  ;;  %v340_v12 = vpop.f32.mrb[19].mxu1 }
 0x108   :  { %1072 = vrot.lane.b32.xlu1 %v8564_v4, %s8291_s25  ;;  %770 = vrot.lane.b32.xlu0 %v8566_v6, %s8290_s4  ;;  %v341_v15 = vadd.f32 %v8552_v52, %v340_v12 }
 0x109   :  { %v8666_v21 = vpack.c.bf16 %v349_v9, %v346_v59 }
 0x10a   :  { %v8671_v31 = vpack.c.bf16 %v341_v15, %v338_v0 }
 0x10b   :  { %11298 = vst [vmem:[#allocation14_spill] sm:$0xff] %v8666_v21 }
 0x10c   :  { %768 = vrot.lane.b32.xlu1 %v8570_v8, %s8290_s4  ;;  %1062 = vrot.lane.b32.xlu0 %v8547_v50, %s8291_s25  ;;  %11299 = vst [vmem:[#allocation15_spill] sm:$0xff] %v8671_v31 }
 0x10d   :  { %7013 = vmatpush3.bf16.xpose.msra.mxu1 %v519_v28  ;;  %v6997_v28 = vpop.f32.mrb[18].mxu0 }
 0x10e   :  { %v437_v32 = vadd.f32 %v6997_v28, %v8640_v39  ;;  %v428_v52 = vpop.f32.mrb[19].mxu0  ;;  %7022 = vmatprep.subr.bf16.mxu1 %v8668_v24 }
 0x10f   :  { %v429_v33 = vadd.f32 %v8640_v39, %v428_v52  ;;  %v7000_v45 = vpop.f32.mrb[20].mxu0 }
 0x110   :  { %1076 = vrot.lane.b32.xlu1 %v8586_v22, %s8291_s25  ;;  %1066 = vrot.lane.b32.xlu0 %v8570_v8, %s8291_s25  ;;  %v8680_v34 = vpack.c.bf16 %v437_v32, %v434_v19  ;;  %v450_v51 = vadd.f32 %v7000_v45, %v8640_v39  ;;  %v441_v53 = vpop.f32.mrb[21].mxu0 }
 0x111   :  { %v8683_v35 = vpack.c.bf16 %v429_v33, %v426_v27  ;;  %v442_v54 = vadd.f32 %v8640_v39, %v441_v53  ;;  %v7001_v56 = vpop.f32.mrb[22].mxu0 }
 0x112   :  { %v453_v57 = vadd.f32 %v7001_v56, %v8640_v39  ;;  %v444_v59 = vpop.f32.mrb[23].mxu0 }
 0x113   :  { %v445_v60 = vadd.f32 %v8640_v39, %v444_v59 }
 0x114   :  { %1064 = vrot.lane.b32.xlu1 %v8543_v48, %s8291_s25  ;;  %7015 = vmatmul.mubr.msk.bf16.vlgmr.msra.gmra.mrb[20].mxu1 %vm496_vm1, %v8543_v48  ;;  %v8712_v0 = vpack.c.bf16 %v453_v57, %v450_v51  ;;  %v7004_v1 = vpop.f32.mrb[24].mxu0 }
 0x115   :  { %7018 = vmatprep.mubr.msk.bf16.mxu1 %vm496_vm1, %v8570_v8  ;;  %971 = vrot.lane.b32.xlu0 %v8663_v16, %s8290_s4  ;;  %v8714_v2 = vpack.c.bf16 %v445_v60, %v442_v54  ;;  %v466_v3 = vadd.f32 %v7004_v1, %v8640_v39  ;;  %v457_v9 = vpop.f32.mrb[25].mxu0 }
 0x116   :  { %7023 = vmatpush3.bf16.msra.mxu1 %v8668_v24  ;;  %v7005_v13 = vpop.f32.mrb[26].mxu0  ;;  %v458_v14 = vadd.f32 %v8640_v39, %v457_v9 }
 0x117   :  { %7024 = vmatprep.subr.bf16.mxu1 %v8663_v16  ;;  %v469_v15 = vadd.f32 %v7005_v13, %v8640_v39  ;;  %v460_v19 = vpop.f32.mrb[27].mxu0 }
 0x118   :  { %1068 = vrot.lane.b32.xlu1 %v8566_v6, %s8291_s25  ;;  %v461_v27 = vadd.f32 %v8640_v39, %v460_v19 }
 0x119   :  { %975 = vrot.lane.b32.xlu0 %v8680_v34, %s8290_s4  ;;  %v8720_v20 = vpack.c.bf16 %v469_v15, %v466_v3 }
 0x11a   :  { %7025 = vmatpush3.bf16.msra.mxu1 %v8663_v16  ;;  %v8723_v32 = vpack.c.bf16 %v461_v27, %v458_v14 }
 0x11b   :  { %7026 = vmatprep.subr.bf16.mxu1 %v8683_v35 }
 0x11c   :  { %7019 = vmatmul.mubr.msk.bf16.gmra.mrb[24].mxu1 %vm496_vm1, %v8566_v6  ;;  %1261 = vrot.lane.b32.xlu1 %v8663_v16, %s8291_s25 }
 0x11e   :  { %7027 = vmatpush3.bf16.msra.mxu1 %v8683_v35 }
 0x11f   :  { %7028 = vmatprep.subr.bf16.mxu1 %v8680_v34 }
 0x120   :  { %969 = vrot.lane.b32.xlu1 %v8668_v24, %s8290_s4 }
 0x122   :  { %7029 = vmatpush3.bf16.msra.mxu1 %v8680_v34 }
 0x124   :  { %1259 = vrot.lane.b32.xlu1 %v8668_v24, %s8291_s25 }
 0x128   :  { %973 = vrot.lane.b32.xlu1 %v8683_v35, %s8290_s4 }
 0x166   :  { %v777_v36 = vpop.permute.xlu0 %776 }
 0x167   :  { %7666 = vmatprep.subr.msk.bf16.mxu0 %vm496_vm1, %v777_v36  ;;  %v797_v37 = vsel %vm496_vm1, %v777_v36, 0 }
 0x168   :  { %7039 = vmatpush3.bf16.xpose.msra.mxu0 %v797_v37 }
 0x16a   :  { %v779_v38 = vpop.permute.xlu0 %778 }
 0x16b   :  { %7667 = vmatprep.subr.msk.bf16.mxu0 %vm496_vm1, %v779_v38  ;;  %v800_v42 = vsel %vm496_vm1, %v779_v38, 0 }
 0x16e   :  { %v765_v40 = vpop.permute.xlu0 %764  ;;  %v781_v41 = vpop.permute.xlu1 %780 }
 0x16f   :  { %7046 = vmatprep.mubr.msk.bf16.mxu0 %vm496_vm1, %v765_v40  ;;  %v803_v44 = vsel %vm496_vm1, %v781_v41, 0 }
 0x170   :  { %7041 = vmatpush3.bf16.xpose.msra.mxu0 %v800_v42 }
 0x171   :  { %7668 = vmatprep.subr.msk.bf16.mxu0 %vm496_vm1, %v781_v41 }
 0x172   :  { %v783_v43 = vpop.permute.xlu1 %782  ;;  %v767_v62 = vpop.permute.xlu0 %766 }
 0x173   :  { %v806_v63 = vsel %vm496_vm1, %v783_v43, 0 }
 0x176   :  { %v1071_v46 = vpop.permute.xlu1 %1070  ;;  %v1075_v28 = vpop.permute.xlu0 %1074 }
 0x177   :  { %v1091_v33 = vsel %vm496_vm1, %v1071_v46, 0  ;;  %v1097_v39 = vsel %vm496_vm1, %v1075_v28, 0 }
 0x178   :  { %7043 = vmatpush3.bf16.xpose.msra.mxu0 %v803_v44 }
 0x179   :  { %7669 = vmatprep.subr.msk.bf16.mxu0 %vm496_vm1, %v783_v43 }
 0x17a   :  { %v1073_v12 = vpop.permute.xlu1 %1072  ;;  %v771_v36 = vpop.permute.xlu0 %770 }
 0x17b   :  { %v1094_v38 = vsel %vm496_vm1, %v1073_v12, 0 }
 0x17e   :  { %v769_v52 = vpop.permute.xlu1 %768  ;;  %v1063_v37 = vpop.permute.xlu0 %1062 }
 0x180   :  { %7045 = vmatpush3.bf16.xpose.msra.mxu0 %v806_v63 }
 0x181   :  { %7670 = vmatprep.subr.msk.bf16.mxu0 %vm496_vm1, %v1071_v46 }
 0x182   :  { %v1077_v40 = vpop.permute.xlu1 %1076  ;;  %v1067_v43 = vpop.permute.xlu0 %1066 }
 0x183   :  { %v1100_v41 = vsel %vm496_vm1, %v1077_v40, 0 }
 0x186   :  { %v1065_v42 = vpop.permute.xlu1 %1064 }
 0x187   :  { %7047 = vmatmul.mubr.msk.bf16.vlgmr.msra.gmra.mrb[28].mxu0 %vm496_vm1, %v767_v62 }
 0x188   :  { %7071 = vmatpush3.bf16.xpose.msra.mxu0 %v1091_v33  ;;  %7050 = vmatprep.mubr.msk.bf16.mxu0 %vm496_vm1, %v769_v52 }
 0x189   :  { %7671 = vmatprep.subr.msk.bf16.mxu0 %vm496_vm1, %v1073_v12 }
 0x18a   :  { %v1069_v44 = vpop.permute.xlu1 %1068 }
 0x18e   :  { %v8745_v53 = vpop.permute.xlu1 %1261 }
 0x18f   :  { %7051 = vmatmul.mubr.msk.bf16.gmra.mrb[32].mxu0 %vm496_vm1, %v771_v36 }
 0x190   :  { %7073 = vmatpush3.bf16.xpose.msra.mxu0 %v1094_v38  ;;  %7078 = vmatprep.mubr.msk.bf16.mxu0 %vm496_vm1, %v1063_v37 }
 0x191   :  { %7672 = vmatprep.subr.msk.bf16.mxu0 %vm496_vm1, %v1075_v28 }
 0x192   :  { %v8755_v60 = vpop.permute.xlu1 %969 }
 0x193   :  { %7054 = vmatprep.subr.bf16.mxu1 %v8755_v60 }
 0x196   :  { %v8846_v10 = vpop.permute.xlu1 %1259 }
 0x198   :  { %7075 = vmatpush3.bf16.xpose.msra.mxu0 %v1097_v39 }
 0x199   :  { %7673 = vmatprep.subr.msk.bf16.mxu0 %vm496_vm1, %v1077_v40 }
 0x1a0   :  { %7077 = vmatpush3.bf16.xpose.msra.mxu0 %v1100_v41 }
 0x1a7   :  { %7079 = vmatmul.mubr.msk.bf16.vlgmr.msra.gmra.mrb[36].mxu0 %vm496_vm1, %v1065_v42 }
 0x1a8   :  { %7082 = vmatprep.mubr.msk.bf16.mxu0 %vm496_vm1, %v1067_v43 }
 0x1af   :  { %7083 = vmatmul.mubr.msk.bf16.gmra.mrb[40].mxu0 %vm496_vm1, %v1069_v44 }
 0x1e7   :  { %v8739_v45 = vpop.f32.mrb[20].mxu1 }
 0x1e8   :  { %v8741_v46 = vpop.f32.mrb[21].mxu1  ;;  %v593_v51 = vsel %vm586_vm2, %v8739_v45, -inf }
 0x1e9   :  { %594 = vmax.xlane.f32.xlu0 %v593_v51  ;;  %v8747_v54 = vpop.f32.mrb[22].mxu1  ;;  %v587_v59 = vsel %vm586_vm2, %v8741_v46, -inf }
 0x1ea   :  { %v8749_v56 = vpop.f32.mrb[23].mxu1  ;;  %v596_v63 = vsel %vm586_vm2, %v8747_v54, -inf }
 0x1eb   :  { %v590_v57 = vsel %vm586_vm2, %v8749_v56, -inf }
 0x1ec   :  { %591 = vmax.xlane.f32.xlu1 %v590_v57 }
 0x1ed   :  { %588 = vmax.xlane.f32.xlu0 %v587_v59 }
 0x1ef   :  { %v8758_v62 = vpop.f32.mrb[24].mxu1 }
 0x1f0   :  { %v605_v1 = vsel %vm586_vm2, %v8758_v62, -inf  ;;  %v8764_v3 = vpop.f32.mrb[25].mxu1 }
 0x1f1   :  { %597 = vmax.xlane.f32.xlu0 %v596_v63  ;;  %606 = vmax.xlane.f32.xlu1 %v605_v1  ;;  %v8766_v9 = vpop.f32.mrb[26].mxu1  ;;  %v599_v12 = vsel %vm586_vm2, %v8764_v3, -inf }
 0x1f2   :  { %v608_v13 = vsel %vm586_vm2, %v8766_v9, -inf  ;;  %v8772_v14 = vpop.f32.mrb[27].mxu1 }
 0x1f3   :  { %v602_v15 = vsel %vm586_vm2, %v8772_v14, -inf }
 0x1f5   :  { %600 = vmax.xlane.f32.xlu1 %v599_v12  ;;  %609 = vmax.xlane.f32.xlu0 %v608_v13 }
 0x1f9   :  { %603 = vmax.xlane.f32.xlu0 %v602_v15 }
 0x25a   :  { %v8776_v19 = vpop.f32.mrb[28].mxu0 }
 0x25b   :  { %v8778_v27 = vpop.f32.mrb[29].mxu0  ;;  %v879_v28 = vsel %vm586_vm2, %v8776_v19, -inf }
 0x25c   :  { %v8782_v52 = vpop.f32.mrb[30].mxu0  ;;  %880 = vmax.xlane.f32.xlu1 %v879_v28  ;;  %v873_v37 = vsel %vm586_vm2, %v8778_v27, -inf }
 0x25d   :  { %v8784_v33 = vpop.f32.mrb[31].mxu0  ;;  %v882_v36 = vsel %vm586_vm2, %v8782_v52, -inf }
 0x25e   :  { %883 = vmax.xlane.f32.xlu0 %v882_v36  ;;  %v876_v38 = vsel %vm586_vm2, %v8784_v33, -inf }
 0x260   :  { %874 = vmax.xlane.f32.xlu1 %v873_v37 }
 0x262   :  { %v8792_v39 = vpop.f32.mrb[32].mxu0  ;;  %877 = vmax.xlane.f32.xlu0 %v876_v38 }
 0x263   :  { %v8794_v40 = vpop.f32.mrb[33].mxu0  ;;  %v891_v41 = vsel %vm586_vm2, %v8792_v39, -inf }
 0x264   :  { %v8798_v42 = vpop.f32.mrb[34].mxu0  ;;  %892 = vmax.xlane.f32.xlu1 %v891_v41  ;;  %v885_v51 = vsel %vm586_vm2, %v8794_v40, -inf }
 0x265   :  { %v894_v43 = vsel %vm586_vm2, %v8798_v42, -inf  ;;  %v8802_v44 = vpop.f32.mrb[35].mxu0 }
 0x266   :  { %895 = vmax.xlane.f32.xlu0 %v894_v43  ;;  %v888_v57 = vsel %vm586_vm2, %v8802_v44, -inf }
 0x268   :  { %886 = vmax.xlane.f32.xlu1 %v885_v51 }
 0x26a   :  { %889 = vmax.xlane.f32.xlu0 %v888_v57 }
 0x27a   :  { %v8808_v59 = vpop.f32.mrb[36].mxu0 }
 0x27b   :  { %v8810_v63 = vpop.f32.mrb[37].mxu0  ;;  %v1173_v1 = vsel %vm586_vm2, %v8808_v59, -inf }
 0x27c   :  { %v8814_v12 = vpop.f32.mrb[38].mxu0  ;;  %1174 = vmax.xlane.f32.xlu1 %v1173_v1  ;;  %v1167_v28 = vsel %vm586_vm2, %v8810_v63, -inf }
 0x27d   :  { %v8816_v13 = vpop.f32.mrb[39].mxu0  ;;  %v1176_v15 = vsel %vm586_vm2, %v8814_v12, -inf }
 0x27e   :  { %1177 = vmax.xlane.f32.xlu0 %v1176_v15  ;;  %v1170_v36 = vsel %vm586_vm2, %v8816_v13, -inf }
 0x280   :  { %1168 = vmax.xlane.f32.xlu1 %v1167_v28  ;;  %v8840_v28 = vpop.permute.xlu0 %971 }
 0x282   :  { %v8824_v37 = vpop.f32.mrb[40].mxu0  ;;  %1171 = vmax.xlane.f32.xlu0 %v1170_v36 }
 0x283   :  { %v8826_v38 = vpop.f32.mrb[41].mxu0  ;;  %v1185_v41 = vsel %vm586_vm2, %v8824_v37, -inf }
 0x284   :  { %v8830_v43 = vpop.f32.mrb[42].mxu0  ;;  %1186 = vmax.xlane.f32.xlu1 %v1185_v41  ;;  %v1179_v1 = vsel %vm586_vm2, %v8826_v38, -inf  ;;  %v8842_v36 = vpop.permute.xlu0 %975 }
 0x285   :  { %v8832_v51 = vpop.f32.mrb[43].mxu0  ;;  %v1188_v57 = vsel %vm586_vm2, %v8830_v43, -inf }
 0x286   :  { %1189 = vmax.xlane.f32.xlu0 %v1188_v57  ;;  %v1182_v15 = vsel %vm586_vm2, %v8832_v51, -inf }
 0x288   :  { %1180 = vmax.xlane.f32.xlu1 %v1179_v1  ;;  %v595_v41 = vpop.xlane.xlu0 %594  ;;  %v8852_v1 = vpop.permute.xlu1 %973 }
 0x289   :  { %v613_v25 = vsub.f32 %v8739_v45, %v595_v41 }
 0x28a   :  { %1183 = vmax.xlane.f32.xlu0 %v1182_v15 }
 0x28b   :  { %v623_v47 = vmul.f32 1.442695, %v613_v25 }
 0x28c   :  { %v589_v57 = vpop.xlane.xlu0 %588  ;;  %v592_v5 = vpop.xlane.xlu1 %591 }
 0x28d   :  { %v612_v18 = vsub.f32 %v8749_v56, %v592_v5 }
 0x28f   :  { %v621_v49 = vmul.f32 1.442695, %v612_v18 }
 0x290   :  { %v598_v15 = vpop.xlane.xlu0 %597  ;;  %v607_v11 = vpop.xlane.xlu1 %606 }
 0x291   :  { %v614_v29 = vsub.f32 %v8747_v54, %v598_v15  ;;  %v617_v31 = vsub.f32 %v8758_v62, %v607_v11 }
 0x293   :  { %v625_v17 = vmul.f32 1.442695, %v614_v29  ;;  %v631_v5 = vmul.f32 1.442695, %v617_v31 }
 0x294   :  { %v610_v26 = vpop.xlane.xlu0 %609  ;;  %v601_v54 = vpop.xlane.xlu1 %600 }
 0x295   :  { %7762 = vpow2.f32 %v625_v17  ;;  %v618_v55 = vsub.f32 %v8766_v9, %v610_v26  ;;  %v615_v25 = vsub.f32 %v8764_v3, %v601_v54 }
 0x296   :  { %7764 = vpow2.f32 %v623_v47 }
 0x297   :  { %7766 = vpow2.f32 %v621_v49  ;;  %v633_v45 = vmul.f32 1.442695, %v618_v55  ;;  %v627_v17 = vmul.f32 1.442695, %v615_v25 }
 0x298   :  { %v604_v61 = vpop.xlane.xlu0 %603 }
 0x299   :  { %1265 = vrot.lane.b32.xlu1 %v8680_v34, %s8291_s25  ;;  %v616_v41 = vsub.f32 %v8772_v14, %v604_v61 }
 0x29b   :  { %v629_v29 = vmul.f32 1.442695, %v616_v41 }
 0x29d   :  { %1360 = vrot.lane.b32.xlu1 %v8568_v7, %s8292_s6  ;;  %v611_v7 = vsub.f32 %v8741_v46, %v589_v57 }
 0x29f   :  { %v619_v21 = vmul.f32 1.442695, %v611_v7  ;;  %v8862_v18 = vpop.eup %7762 }
 0x2a0   :  { %1263 = vrot.lane.b32.xlu0 %v8683_v35, %s8291_s25  ;;  %v8864_v26 = vpop.eup %7764  ;;  %v644_v11 = vsel %vm586_vm2, %v8862_v18, 0.0 }
 0x2a1   :  { %7768 = vpow2.f32 %v619_v21  ;;  %v8868_v47 = vpop.eup %7766  ;;  %v641_v49 = vsel %vm586_vm2, %v8864_v26, 0.0 }
 0x2a2   :  { %7770 = vpow2.f32 %v633_v45  ;;  %v638_v61 = vsel %vm586_vm2, %v8868_v47, 0.0 }
 0x2a3   :  { %7772 = vpow2.f32 %v631_v5 }
 0x2a4   :  { %7774 = vpow2.f32 %v629_v29 }
 0x2a5   :  { %7776 = vpow2.f32 %v627_v17 }
 0x2ab   :  { %v8872_v55 = vpop.eup %7768 }
 0x2ac   :  { %v8876_v21 = vpop.eup %7770  ;;  %v635_v31 = vsel %vm586_vm2, %v8872_v55, 0.0 }
 0x2ad   :  { %v8880_v46 = vpop.eup %7772  ;;  %v656_v56 = vsel %vm586_vm2, %v8876_v21, 0.0 }
 0x2ae   :  { %v8884_v62 = vpop.eup %7774  ;;  %v653_v3 = vsel %vm586_vm2, %v8880_v46, 0.0 }
 0x2af   :  { %v8888_v9 = vpop.eup %7776  ;;  %v650_v14 = vsel %vm586_vm2, %v8884_v62, 0.0 }
 0x2b0   :  { %v647_v57 = vsel %vm586_vm2, %v8888_v9, 0.0 }
 0x2bf   :  { %645 = vadd.xlane.f32.xlu0 %v644_v11 }
 0x2c1   :  { %642 = vadd.xlane.f32.xlu1 %v641_v49 }
 0x2c3   :  { %639 = vadd.xlane.f32.xlu0 %v638_v61 }
 0x2c5   :  { %636 = vadd.xlane.f32.xlu1 %v635_v31 }
 0x2c7   :  { %657 = vadd.xlane.f32.xlu0 %v656_v56 }
 0x2c9   :  { %654 = vadd.xlane.f32.xlu1 %v653_v3 }
 0x2cb   :  { %651 = vadd.xlane.f32.xlu0 %v650_v14 }
 0x2cd   :  { %648 = vadd.xlane.f32.xlu1 %v647_v57 }
 0x2e9   :  { %v881_v15 = vpop.xlane.xlu1 %880 }
 0x2ea   :  { %v899_v7 = vsub.f32 %v8776_v19, %v881_v15 }
 0x2eb   :  { %v884_v54 = vpop.xlane.xlu0 %883 }
 0x2ec   :  { %v909_v45 = vmul.f32 1.442695, %v899_v7  ;;  %v900_v41 = vsub.f32 %v8782_v52, %v884_v54 }
 0x2ed   :  { %v875_v5 = vpop.xlane.xlu1 %874 }
 0x2ee   :  { %7778 = vpow2.f32 %v909_v45  ;;  %v911_v25 = vmul.f32 1.442695, %v900_v41  ;;  %v897_v29 = vsub.f32 %v8778_v27, %v875_v5 }
 0x2ef   :  { %v878_v17 = vpop.xlane.xlu0 %877 }
 0x2f0   :  { %7780 = vpow2.f32 %v911_v25  ;;  %v905_v11 = vmul.f32 1.442695, %v897_v29  ;;  %v898_v49 = vsub.f32 %v8784_v33, %v878_v17 }
 0x2f1   :  { %v893_v61 = vpop.xlane.xlu1 %892 }
 0x2f2   :  { %7782 = vpow2.f32 %v905_v11  ;;  %v907_v31 = vmul.f32 1.442695, %v898_v49  ;;  %v903_v56 = vsub.f32 %v8792_v39, %v893_v61 }
 0x2f3   :  { %v896_v19 = vpop.xlane.xlu0 %895 }
 0x2f4   :  { %7784 = vpow2.f32 %v907_v31  ;;  %v917_v3 = vmul.f32 1.442695, %v903_v56  ;;  %v904_v52 = vsub.f32 %v8798_v42, %v896_v19 }
 0x2f5   :  { %v887_v14 = vpop.xlane.xlu1 %886 }
 0x2f6   :  { %7786 = vpow2.f32 %v917_v3  ;;  %v919_v57 = vmul.f32 1.442695, %v904_v52  ;;  %v901_v27 = vsub.f32 %v8794_v40, %v887_v14 }
 0x2f7   :  { %v890_v15 = vpop.xlane.xlu0 %889 }
 0x2f8   :  { %v8901_v7 = vpop.eup %7778  ;;  %v913_v54 = vmul.f32 1.442695, %v901_v27  ;;  %v902_v33 = vsub.f32 %v8802_v44, %v890_v15  ;;  %7788 = vpow2.f32 %v919_v57 }
 0x2f9   :  { %v927_v39 = vsel %vm586_vm2, %v8901_v7, 0.0 }
 0x2fa   :  { %v8906_v45 = vpop.eup %7780  ;;  %7790 = vpow2.f32 %v913_v54  ;;  %v915_v41 = vmul.f32 1.442695, %v902_v33  ;;  %928 = vadd.xlane.f32.xlu1 %v927_v39 }
 0x2fb   :  { %v930_v42 = vsel %vm586_vm2, %v8906_v45, 0.0 }
 0x2fc   :  { %v8910_v5 = vpop.eup %7782  ;;  %931 = vadd.xlane.f32.xlu0 %v930_v42  ;;  %7792 = vpow2.f32 %v915_v41 }
 0x2fd   :  { %v921_v40 = vsel %vm586_vm2, %v8910_v5, 0.0 }
 0x2fe   :  { %v8914_v25 = vpop.eup %7784  ;;  %922 = vadd.xlane.f32.xlu1 %v921_v40 }
 0x2ff   :  { %v924_v44 = vsel %vm586_vm2, %v8914_v25, 0.0 }
 0x300   :  { %v8918_v29 = vpop.eup %7786  ;;  %925 = vadd.xlane.f32.xlu0 %v924_v44 }
 0x301   :  { %v939_v11 = vsel %vm586_vm2, %v8918_v29, 0.0 }
 0x302   :  { %v8920_v17 = vpop.eup %7788 }
 0x303   :  { %v942_v31 = vsel %vm586_vm2, %v8920_v17, 0.0 }
 0x304   :  { %v8924_v49 = vpop.eup %7790  ;;  %940 = vadd.xlane.f32.xlu0 %v939_v11 }
 0x305   :  { %v933_v61 = vsel %vm586_vm2, %v8924_v49, 0.0 }
 0x306   :  { %934 = vadd.xlane.f32.xlu1 %v933_v61  ;;  %v8930_v56 = vpop.eup %7792 }
 0x307   :  { %v936_v14 = vsel %vm586_vm2, %v8930_v56, 0.0 }
 0x308   :  { %943 = vadd.xlane.f32.xlu0 %v942_v31 }
 0x309   :  { %v1175_v19 = vpop.xlane.xlu1 %1174 }
 0x30a   :  { %v1193_v3 = vsub.f32 %v8808_v59, %v1175_v19 }
 0x30b   :  { %v1178_v52 = vpop.xlane.xlu0 %1177 }
 0x30c   :  { %v1203_v57 = vmul.f32 1.442695, %v1193_v3  ;;  %v1194_v27 = vsub.f32 %v8814_v12, %v1178_v52  ;;  %937 = vadd.xlane.f32.xlu0 %v936_v14 }
 0x30d   :  { %v1169_v15 = vpop.xlane.xlu1 %1168 }
 0x30e   :  { %7794 = vpow2.f32 %v1203_v57  ;;  %v1191_v54 = vsub.f32 %v8810_v63, %v1169_v15  ;;  %v1205_v33 = vmul.f32 1.442695, %v1194_v27 }
 0x30f   :  { %v1172_v39 = vpop.xlane.xlu0 %1171 }
 0x310   :  { %v1199_v41 = vmul.f32 1.442695, %v1191_v54  ;;  %v1192_v42 = vsub.f32 %v8816_v13, %v1172_v39 }
 0x311   :  { %v1187_v40 = vpop.xlane.xlu1 %1186 }
 0x312   :  { %7796 = vpow2.f32 %v1199_v41  ;;  %v1201_v59 = vmul.f32 1.442695, %v1192_v42  ;;  %v1197_v44 = vsub.f32 %v8824_v37, %v1187_v40 }
 0x313   :  { %7798 = vpow2.f32 %v1205_v33  ;;  %v1190_v11 = vpop.xlane.xlu0 %1189 }
 0x314   :  { %7800 = vpow2.f32 %v1201_v59  ;;  %v1211_v61 = vmul.f32 1.442695, %v1197_v44  ;;  %v1198_v31 = vsub.f32 %v8830_v43, %v1190_v11 }
 0x315   :  { %v1181_v12 = vpop.xlane.xlu1 %1180 }
 0x316   :  { %7802 = vpow2.f32 %v1211_v61  ;;  %v1195_v63 = vsub.f32 %v8826_v38, %v1181_v12  ;;  %v1213_v52 = vmul.f32 1.442695, %v1198_v31 }
 0x317   :  { %v1184_v40 = vpop.xlane.xlu0 %1183 }
 0x318   :  { %v8941_v19 = vpop.eup %7794  ;;  %v1207_v3 = vmul.f32 1.442695, %v1195_v63  ;;  %v1196_v59 = vsub.f32 %v8832_v51, %v1184_v40 }
 0x319   :  { %v1221_v13 = vsel %vm586_vm2, %v8941_v19, 0.0  ;;  %v8974_v44 = vpop.permute.xlu1 %1265 }
 0x31a   :  { %7804 = vpow2.f32 %v1207_v3  ;;  %1222 = vadd.xlane.f32.xlu1 %v1221_v13  ;;  %v1209_v11 = vmul.f32 1.442695, %v1196_v59 }
 0x31b   :  { %7806 = vpow2.f32 %v1213_v52  ;;  %v8978_v61 = vpop.permute.xlu0 %1263 }
 0x31c   :  { %v8945_v37 = vpop.eup %7796  ;;  %7808 = vpow2.f32 %v1209_v11 }
 0x31d   :  { %v8947_v14 = vpop.eup %7798  ;;  %v1215_v57 = vsel %vm586_vm2, %v8945_v37, 0.0  ;;  %v8980_v12 = vpop.permute.xlu1 %1360 }
 0x31e   :  { %v8951_v27 = vpop.eup %7800  ;;  %1216 = vadd.xlane.f32.xlu1 %v1215_v57  ;;  %v1224_v15 = vsel %vm586_vm2, %v8947_v14, 0.0 }
 0x31f   :  { %v1218_v38 = vsel %vm586_vm2, %v8951_v27, 0.0 }
 0x320   :  { %v8955_v43 = vpop.eup %7802  ;;  %1219 = vadd.xlane.f32.xlu0 %v1218_v38 }
 0x321   :  { %v1233_v54 = vsel %vm586_vm2, %v8955_v43, 0.0 }
 0x322   :  { %1225 = vadd.xlane.f32.xlu1 %v1224_v15 }
 0x324   :  { %v8961_v33 = vpop.eup %7804  ;;  %1234 = vadd.xlane.f32.xlu0 %v1233_v54 }
 0x325   :  { %v1227_v39 = vsel %vm586_vm2, %v8961_v33, 0.0  ;;  %v8965_v41 = vpop.eup %7806 }
 0x326   :  { %v1236_v42 = vsel %vm586_vm2, %v8965_v41, 0.0  ;;  %v8984_v63 = vpop.eup %7808 }
 0x327   :  { %v1230_v13 = vsel %vm586_vm2, %v8984_v63, 0.0 }
 0x328   :  { %1228 = vadd.xlane.f32.xlu0 %v1227_v39 }
 0x32c   :  { %1237 = vadd.xlane.f32.xlu0 %v1236_v42 }
 0x333   :  { %1364 = vrot.lane.b32.xlu1 %v8588_v23, %s8292_s6 }
 0x342   :  { %1362 = vrot.lane.b32.xlu0 %v8564_v4, %s8292_s6 }
 0x346   :  { %1352 = vrot.lane.b32.xlu0 %v8547_v50, %s8292_s6 }
 0x34a   :  { %1356 = vrot.lane.b32.xlu0 %v8570_v8, %s8292_s6 }
 0x34c   :  { %v646_v23 = vpop.xlane.xlu0 %645 }
 0x34e   :  { %v643_v31 = vpop.xlane.xlu1 %642 }
 0x34f   :  { %7810 = vrcp.f32 %v643_v31 }
 0x350   :  { %v640_v51 = vpop.xlane.xlu0 %639 }
 0x351   :  { %7812 = vrcp.f32 %v640_v51 }
 0x352   :  { %7814 = vrcp.f32 %v646_v23  ;;  %v637_v4 = vpop.xlane.xlu1 %636 }
 0x353   :  { %7816 = vrcp.f32 %v637_v4 }
 0x354   :  { %v658_v3 = vpop.xlane.xlu0 %657 }
 0x356   :  { %v655_v50 = vpop.xlane.xlu1 %654 }
 0x357   :  { %1231 = vadd.xlane.f32.xlu1 %v1230_v13  ;;  %7818 = vrcp.f32 %v655_v50 }
 0x358   :  { %v652_v52 = vpop.xlane.xlu0 %651 }
 0x359   :  { %7820 = vrcp.f32 %v652_v52  ;;  %v7811_v8 = vpop.eup %7810 }
 0x35a   :  { %7822 = vrcp.f32 %v658_v3  ;;  %v649_v57 = vpop.xlane.xlu1 %648  ;;  %v669_v39 = vmul.f32 %v7811_v8, %v8864_v26 }
 0x35b   :  { %v7813_v38 = vpop.eup %7812  ;;  %7824 = vrcp.f32 %v649_v57 }
 0x35c   :  { %v7815_v15 = vpop.eup %7814  ;;  %v668_v40 = vmul.f32 %v7813_v38, %v8868_v47 }
 0x35d   :  { %v7817_v54 = vpop.eup %7816  ;;  %v670_v59 = vmul.f32 %v7815_v15, %v8862_v18 }
 0x35e   :  { %v667_v42 = vmul.f32 %v7817_v54, %v8872_v55 }
 0x35f   :  { %v676_v23 = vpack.c.bf16 %v670_v59, %v669_v39 }
 0x360   :  { %v675_v11 = vpack.c.bf16 %v668_v40, %v667_v42 }
 0x361   :  { %v7819_v31 = vpop.eup %7818 }
 0x362   :  { %7030 = vmatprep.mubr.msk.bf16.mxu1 %vm586_vm2, %v675_v11  ;;  %v673_v26 = vmul.f32 %v7819_v31, %v8880_v46 }
 0x363   :  { %v7821_v51 = vpop.eup %7820  ;;  %7031 = vmatmul.mubr.msk.bf16.vlgmr.msra.gmra.mrb[28].mxu1 %vm586_vm2, %v676_v23 }
 0x364   :  { %v7823_v4 = vpop.eup %7822  ;;  %7055 = vmatpush3.bf16.msra.mxu1 %v8755_v60  ;;  %v672_v18 = vmul.f32 %v7821_v51, %v8884_v62 }
 0x365   :  { %v7825_v3 = vpop.eup %7824  ;;  %7056 = vmatprep.subr.bf16.mxu1 %v8840_v28  ;;  %v674_v55 = vmul.f32 %v7823_v4, %v8876_v21 }
 0x366   :  { %v671_v47 = vmul.f32 %v7825_v3, %v8888_v9 }
 0x367   :  { %v678_v60 = vpack.c.bf16 %v674_v55, %v673_v26 }
 0x368   :  { %7057 = vmatpush3.bf16.msra.mxu1 %v8840_v28  ;;  %1366 = vrot.lane.b32.xlu1 %v8586_v22, %s8292_s6  ;;  %v677_v50 = vpack.c.bf16 %v672_v18, %v671_v47 }
 0x369   :  { %7058 = vmatprep.subr.bf16.mxu1 %v8852_v1 }
 0x36a   :  { %7034 = vmatprep.mubr.msk.bf16.mxu1 %vm586_vm2, %v677_v50 }
 0x36b   :  { %7035 = vmatmul.mubr.msk.bf16.gmra.mrb[32].mxu1 %vm586_vm2, %v678_v60 }
 0x36c   :  { %7059 = vmatpush3.bf16.msra.mxu1 %v8852_v1  ;;  %1354 = vrot.lane.b32.xlu1 %v8543_v48, %s8292_s6 }
 0x36d   :  { %7060 = vmatprep.subr.bf16.mxu1 %v8842_v36 }
 0x370   :  { %7061 = vmatpush3.bf16.msra.mxu1 %v8842_v36  ;;  %1358 = vrot.lane.b32.xlu1 %v8566_v6, %s8292_s6 }
 0x371   :  { %7086 = vmatprep.subr.bf16.mxu1 %v8846_v10 }
 0x387   :  { %v929_v22 = vpop.xlane.xlu1 %928 }
 0x389   :  { %v932_v28 = vpop.xlane.xlu0 %931 }
 0x38a   :  { %7826 = vrcp.f32 %v932_v28 }
 0x38b   :  { %v923_v21 = vpop.xlane.xlu1 %922 }
 0x38c   :  { %7828 = vrcp.f32 %v923_v21 }
 0x38d   :  { %7830 = vrcp.f32 %v929_v22  ;;  %v926_v46 = vpop.xlane.xlu0 %925  ;;  %v1381_v22 = vsel %vm496_vm1, %v8980_v12, 0 }
 0x38e   :  { %7832 = vrcp.f32 %v926_v46 }
 0x391   :  { %v941_v1 = vpop.xlane.xlu0 %940 }
 0x393   :  { %v935_v48 = vpop.xlane.xlu1 %934 }
 0x394   :  { %v7827_v62 = vpop.eup %7826 }
 0x395   :  { %v944_v9 = vpop.xlane.xlu0 %943  ;;  %v956_v6 = vmul.f32 %v7827_v62, %v8906_v45 }
 0x396   :  { %v7829_v13 = vpop.eup %7828  ;;  %7834 = vrcp.f32 %v944_v9 }
 0x397   :  { %v7831_v52 = vpop.eup %7830  ;;  %7836 = vrcp.f32 %v935_v48  ;;  %v953_v57 = vmul.f32 %v7829_v13, %v8910_v5 }
 0x398   :  { %v7833_v36 = vpop.eup %7832  ;;  %7838 = vrcp.f32 %v941_v1  ;;  %v955_v15 = vmul.f32 %v7831_v52, %v8901_v7 }
 0x399   :  { %v938_v8 = vpop.xlane.xlu0 %937  ;;  %v954_v38 = vmul.f32 %v7833_v36, %v8914_v25 }
 0x39a   :  { %7840 = vrcp.f32 %v938_v8  ;;  %v962_v39 = vpack.c.bf16 %v956_v6, %v955_v15 }
 0x39b   :  { %v961_v54 = vpack.c.bf16 %v954_v38, %v953_v57 }
 0x39d   :  { %7062 = vmatprep.mubr.msk.bf16.mxu1 %vm586_vm2, %v961_v54 }
 0x39e   :  { %7063 = vmatmul.mubr.msk.bf16.vlgmr.msra.gmra.mrb[36].mxu1 %vm586_vm2, %v962_v39 }
 0x39f   :  { %7087 = vmatpush3.bf16.msra.mxu1 %v8846_v10 }
 0x3a0   :  { %7088 = vmatprep.subr.bf16.mxu1 %v8745_v53  ;;  %v7835_v45 = vpop.eup %7834 }
 0x3a1   :  { %v7837_v42 = vpop.eup %7836  ;;  %v960_v7 = vmul.f32 %v7835_v45, %v8920_v17 }
 0x3a2   :  { %v7839_v40 = vpop.eup %7838  ;;  %v957_v25 = vmul.f32 %v7837_v42, %v8924_v49 }
 0x3a3   :  { %7089 = vmatpush3.bf16.msra.mxu1 %v8745_v53  ;;  %v959_v11 = vmul.f32 %v7839_v40, %v8918_v29 }
 0x3a4   :  { %v7841_v5 = vpop.eup %7840  ;;  %7090 = vmatprep.subr.bf16.mxu1 %v8978_v61 }
 0x3a5   :  { %v958_v59 = vmul.f32 %v7841_v5, %v8930_v56  ;;  %v964_v31 = vpack.c.bf16 %v960_v7, %v959_v11 }
 0x3a7   :  { %7091 = vmatpush3.bf16.msra.mxu1 %v8978_v61  ;;  %v1223_v10 = vpop.xlane.xlu1 %1222  ;;  %v963_v23 = vpack.c.bf16 %v958_v59, %v957_v25 }
 0x3a8   :  { %7092 = vmatprep.subr.bf16.mxu1 %v8974_v44 }
 0x3a9   :  { %7066 = vmatprep.mubr.msk.bf16.mxu1 %vm586_vm2, %v963_v23 }
 0x3aa   :  { %7067 = vmatmul.mubr.msk.bf16.gmra.mrb[40].mxu1 %vm586_vm2, %v964_v31 }
 0x3ab   :  { %7093 = vmatpush3.bf16.msra.mxu1 %v8974_v44  ;;  %v1217_v53 = vpop.xlane.xlu1 %1216 }
 0x3ac   :  { %7842 = vrcp.f32 %v1217_v53  ;;  %7674 = vmatprep.subr.msk.bf16.mxu1 %vm496_vm1, %v8980_v12 }
 0x3ad   :  { %7844 = vrcp.f32 %v1223_v10  ;;  %v1220_v29 = vpop.xlane.xlu0 %1219 }
 0x3ae   :  { %7846 = vrcp.f32 %v1220_v29 }
 0x3af   :  { %v1226_v17 = vpop.xlane.xlu1 %1225 }
 0x3b0   :  { %7848 = vrcp.f32 %v1226_v17 }
 0x3b1   :  { %v1235_v49 = vpop.xlane.xlu0 %1234 }
 0x3b5   :  { %v1229_v56 = vpop.xlane.xlu0 %1228 }
 0x3b6   :  { %v7843_v61 = vpop.eup %7842 }
 0x3b7   :  { %v7845_v51 = vpop.eup %7844  ;;  %v1247_v3 = vmul.f32 %v7843_v61, %v8945_v37 }
 0x3b8   :  { %v7847_v4 = vpop.eup %7846  ;;  %v1249_v18 = vmul.f32 %v7845_v51, %v8941_v19 }
 0x3b9   :  { %v1248_v26 = vmul.f32 %v7847_v4, %v8951_v27  ;;  %v1238_v47 = vpop.xlane.xlu0 %1237  ;;  %v1365_v27 = vpop.permute.xlu1 %1364 }
 0x3ba   :  { %v7849_v44 = vpop.eup %7848  ;;  %v1387_v19 = vsel %vm496_vm1, %v1365_v27, 0  ;;  %7850 = vrcp.f32 %v1238_v47 }
 0x3bb   :  { %v1250_v55 = vmul.f32 %v7849_v44, %v8947_v14  ;;  %v1255_v50 = vpack.c.bf16 %v1248_v26, %v1247_v3  ;;  %7852 = vrcp.f32 %v1229_v56 }
 0x3bc   :  { %7854 = vrcp.f32 %v1235_v49 }
 0x3bd   :  { %v1256_v60 = vpack.c.bf16 %v1250_v55, %v1249_v18  ;;  %7094 = vmatprep.mubr.msk.bf16.mxu1 %vm586_vm2, %v1255_v50  ;;  %v1363_v28 = vpop.permute.xlu0 %1362 }
 0x3be   :  { %v1384_v37 = vsel %vm496_vm1, %v1363_v28, 0 }
 0x3bf   :  { %7095 = vmatmul.mubr.msk.bf16.vlgmr.msra.gmra.mrb[44].mxu1 %vm586_vm2, %v1256_v60 }
 0x3c0   :  { %7103 = vmatpush3.bf16.xpose.msra.mxu1 %v1381_v22 }
 0x3c1   :  { %7675 = vmatprep.subr.msk.bf16.mxu1 %vm496_vm1, %v1363_v28  ;;  %v1353_v57 = vpop.permute.xlu0 %1352 }
 0x3c4   :  { %v7851_v46 = vpop.eup %7850 }
 0x3c5   :  { %v7853_v1 = vpop.eup %7852  ;;  %v1254_v9 = vmul.f32 %v7851_v46, %v8965_v41  ;;  %v1357_v15 = vpop.permute.xlu0 %1356 }
 0x3c6   :  { %v7855_v62 = vpop.eup %7854  ;;  %v1251_v13 = vmul.f32 %v7853_v1, %v8961_v33 }
 0x3c7   :  { %v1253_v36 = vmul.f32 %v7855_v62, %v8955_v43 }
 0x3c8   :  { %7105 = vmatpush3.bf16.xpose.msra.mxu1 %v1384_v37 }
 0x3c9   :  { %7676 = vmatprep.subr.msk.bf16.mxu1 %vm496_vm1, %v1365_v27  ;;  %v1258_v8 = vpack.c.bf16 %v1254_v9, %v1253_v36 }
 0x3d0   :  { %7107 = vmatpush3.bf16.xpose.msra.mxu1 %v1387_v19 }
 0x3e4   :  { %v1232_v14 = vpop.xlane.xlu1 %1231 }
 0x3e5   :  { %7856 = vrcp.f32 %v1232_v14 }
 0x3e8   :  { %v1367_v21 = vpop.permute.xlu1 %1366 }
 0x3e9   :  { %7677 = vmatprep.subr.msk.bf16.mxu1 %vm496_vm1, %v1367_v21  ;;  %v1390_v12 = vsel %vm496_vm1, %v1367_v21, 0 }
 0x3ea   :  { %7109 = vmatpush3.bf16.xpose.msra.mxu1 %v1390_v12 }
 0x3eb   :  { %7150 = vmatprep.subr.bf16.mxu1 %v8714_v2 }
 0x3ec   :  { %v1355_v38 = vpop.permute.xlu1 %1354 }
 0x3ef   :  { %v7857_v48 = vpop.eup %7856 }
 0x3f0   :  { %v1252_v52 = vmul.f32 %v7857_v48, %v8984_v63  ;;  %v1359_v43 = vpop.permute.xlu1 %1358 }
 0x3f2   :  { %v1257_v6 = vpack.c.bf16 %v1252_v52, %v1251_v13 }
 0x3f4   :  { %7098 = vmatprep.mubr.msk.bf16.mxu1 %vm586_vm2, %v1257_v6 }
 0x3f5   :  { %7099 = vmatmul.mubr.msk.bf16.gmra.mrb[48].mxu1 %vm586_vm2, %v1258_v8 }
 0x3f6   :  { %7110 = vmatprep.mubr.msk.bf16.mxu1 %vm496_vm1, %v1353_v57 }
 0x3fd   :  { %7111 = vmatmul.mubr.msk.bf16.vlgmr.msra.gmra.mrb[52].mxu1 %vm496_vm1, %v1355_v38 }
 0x3fe   :  { %7151 = vmatpush3.bf16.msra.mxu1 %v8714_v2  ;;  %7114 = vmatprep.mubr.msk.bf16.mxu1 %vm496_vm1, %v1357_v15 }
 0x3ff   :  { %7152 = vmatprep.subr.bf16.mxu1 %v8712_v0 }
 0x402   :  { %7153 = vmatpush3.bf16.msra.mxu1 %v8712_v0 }
 0x403   :  { %7154 = vmatprep.subr.bf16.mxu1 %v8723_v32 }
 0x405   :  { %7115 = vmatmul.mubr.msk.bf16.gmra.mrb[56].mxu1 %vm496_vm1, %v1359_v43 }
 0x406   :  { %7155 = vmatpush3.bf16.msra.mxu1 %v8723_v32 }
 0x407   :  { %7156 = vmatprep.subr.bf16.mxu1 %v8720_v20 }
 0x40a   :  { %7157 = vmatpush3.bf16.msra.mxu1 %v8720_v20 }
 0x436   :  { %v9067_v33 = vpop.f32.mrb[28].mxu1 }
 0x437   :  { %11300 = vst [vmem:[#allocation16_spill] sm:$0xff] %v9067_v33  ;;  %v9069_v41 = vpop.f32.mrb[29].mxu1 }
 0x438   :  { %11301 = vst [vmem:[#allocation17_spill] sm:$0xff] %v9069_v41  ;;  %v9071_v63 = vpop.f32.mrb[30].mxu1 }
 0x439   :  { %11302 = vst [vmem:[#allocation18_spill] sm:$0xff] %v9071_v63  ;;  %v9075_v39 = vpop.f32.mrb[31].mxu1 }
 0x43a   :  { %11303 = vst [vmem:[#allocation19_spill] sm:$0xff] %v9075_v39 }
 0x43e   :  { %v9079_v42 = vpop.f32.mrb[32].mxu1 }
 0x43f   :  { %11304 = vst [vmem:[#allocation20_spill] sm:$0xff] %v9079_v42  ;;  %v9081_v40 = vpop.f32.mrb[33].mxu1 }
 0x440   :  { %11305 = vst [vmem:[#allocation21_spill] sm:$0xff] %v9081_v40  ;;  %v9083_v5 = vpop.f32.mrb[34].mxu1 }
 0x441   :  { %11306 = vst [vmem:[#allocation22_spill] sm:$0xff] %v9083_v5  ;;  %v9087_v25 = vpop.f32.mrb[35].mxu1 }
 0x442   :  { %11307 = vst [vmem:[#allocation23_spill] sm:$0xff] %v9087_v25 }
 0x471   :  { %v9091_v11 = vpop.f32.mrb[36].mxu1 }
 0x472   :  { %v9093_v10 = vpop.f32.mrb[37].mxu1 }
 0x473   :  { %v9095_v23 = vpop.f32.mrb[38].mxu1 }
 0x474   :  { %v9099_v53 = vpop.f32.mrb[39].mxu1 }
 0x47d   :  { %v9103_v17 = vpop.f32.mrb[40].mxu1 }
 0x47e   :  { %v9105_v49 = vpop.f32.mrb[41].mxu1 }
 0x47f   :  { %v9107_v56 = vpop.f32.mrb[42].mxu1 }
 0x480   :  { %v9111_v51 = vpop.f32.mrb[43].mxu1 }
 0x492   :  { %v9115_v3 = vpop.f32.mrb[44].mxu1 }
 0x493   :  { %v9117_v26 = vpop.f32.mrb[45].mxu1 }
 0x494   :  { %v9119_v44 = vpop.f32.mrb[46].mxu1 }
 0x495   :  { %v9123_v18 = vpop.f32.mrb[47].mxu1 }
 0x4c8   :  { %v9127_v50 = vpop.f32.mrb[48].mxu1 }
 0x4c9   :  { %v9129_v60 = vpop.f32.mrb[49].mxu1 }
 0x4ca   :  { %v9131_v22 = vpop.f32.mrb[50].mxu1 }
 0x4cb   :  { %v9135_v37 = vpop.f32.mrb[51].mxu1 }
 0x4d0   :  { %v7112_v19 = vpop.f32.mrb[52].mxu1 }
 0x4d1   :  { %v1426_v14 = vpop.f32.mrb[53].mxu1  ;;  %v1463_v21 = vsel %vm586_vm2, %v7112_v19, -inf }
 0x4d2   :  { %1464 = vmax.xlane.f32.xlu0 %v1463_v21  ;;  %v7113_v12 = vpop.f32.mrb[54].mxu1  ;;  %v1457_v62 = vsel %vm586_vm2, %v1426_v14, -inf }
 0x4d3   :  { %v1429_v46 = vpop.f32.mrb[55].mxu1  ;;  %v1466_v13 = vsel %vm586_vm2, %v7113_v12, -inf }
 0x4d4   :  { %v1460_v1 = vsel %vm586_vm2, %v1429_v46, -inf }
 0x4d5   :  { %1461 = vmax.xlane.f32.xlu1 %v1460_v1 }
 0x4d6   :  { %1458 = vmax.xlane.f32.xlu0 %v1457_v62 }
 0x4d8   :  { %v7116_v48 = vpop.f32.mrb[56].mxu1 }
 0x4d9   :  { %v1442_v9 = vpop.f32.mrb[57].mxu1  ;;  %v1475_v52 = vsel %vm586_vm2, %v7116_v48, -inf }
 0x4da   :  { %1467 = vmax.xlane.f32.xlu0 %v1466_v13  ;;  %1476 = vmax.xlane.f32.xlu1 %v1475_v52  ;;  %v7117_v36 = vpop.f32.mrb[58].mxu1  ;;  %v1469_v57 = vsel %vm586_vm2, %v1442_v9, -inf }
 0x4db   :  { %v1445_v6 = vpop.f32.mrb[59].mxu1  ;;  %v1478_v38 = vsel %vm586_vm2, %v7117_v36, -inf }
 0x4dc   :  { %v1472_v8 = vsel %vm586_vm2, %v1445_v6, -inf }
 0x4de   :  { %1470 = vmax.xlane.f32.xlu1 %v1469_v57  ;;  %1473 = vmax.xlane.f32.xlu0 %v1472_v8 }
 0x4e2   :  { %1479 = vmax.xlane.f32.xlu0 %v1478_v38 }
 0x4ef   :  { %1549 = vrot.lane.b32.xlu1 %v8668_v24, %s8292_s6 }
 0x55f   :  { %v1465_v15 = vpop.xlane.xlu0 %1464 }
 0x560   :  { %v1483_v43 = vsub.f32 %v7112_v19, %v1465_v15 }
 0x562   :  { %v1493_v21 = vmul.f32 1.442695, %v1483_v43  ;;  %v1462_v1 = vpop.xlane.xlu1 %1461 }
 0x563   :  { %v1459_v62 = vpop.xlane.xlu0 %1458  ;;  %v1482_v7 = vsub.f32 %v1429_v46, %v1462_v1 }
 0x564   :  { %7858 = vpow2.f32 %v1493_v21  ;;  %v1481_v13 = vsub.f32 %v1426_v14, %v1459_v62 }
 0x565   :  { %v1491_v45 = vmul.f32 1.442695, %v1482_v7 }
 0x566   :  { %v1489_v52 = vmul.f32 1.442695, %v1481_v13 }
 0x567   :  { %v1477_v59 = vpop.xlane.xlu1 %1476  ;;  %v1468_v54 = vpop.xlane.xlu0 %1467 }
 0x568   :  { %7860 = vpow2.f32 %v1489_v52  ;;  %v1484_v57 = vsub.f32 %v7113_v12, %v1468_v54  ;;  %v1487_v62 = vsub.f32 %v7116_v48, %v1477_v59 }
 0x56a   :  { %v1495_v8 = vmul.f32 1.442695, %v1484_v57  ;;  %v1501_v57 = vmul.f32 1.442695, %v1487_v62 }
 0x56b   :  { %v1471_v27 = vpop.xlane.xlu1 %1470 }
 0x56c   :  { %7862 = vpow2.f32 %v1495_v8  ;;  %v1485_v1 = vsub.f32 %v1442_v9, %v1471_v27 }
 0x56d   :  { %7864 = vpow2.f32 %v1491_v45  ;;  %v1474_v45 = vpop.xlane.xlu0 %1473 }
 0x56e   :  { %v9149_v38 = vpop.eup %7858  ;;  %v1486_v43 = vsub.f32 %v1445_v6, %v1474_v45  ;;  %v1497_v13 = vmul.f32 1.442695, %v1485_v1 }
 0x56f   :  { %v1550_v24 = vpop.permute.xlu1 %1549  ;;  %v1511_v19 = vsel %vm586_vm2, %v9149_v38, 0.0 }
 0x570   :  { %7118 = vmatprep.subr.bf16.mxu0 %v1550_v24  ;;  %1512 = vadd.xlane.f32.xlu1 %v1511_v19  ;;  %v1499_v21 = vmul.f32 1.442695, %v1486_v43 }
 0x571   :  { %7119 = vmatpush3.bf16.msra.mxu0 %v1550_v24  ;;  %v1480_v52 = vpop.xlane.xlu0 %1479 }
 0x572   :  { %v7861_v14 = vpop.eup %7860  ;;  %7866 = vpow2.f32 %v1499_v21  ;;  %v1488_v8 = vsub.f32 %v7117_v36, %v1480_v52 }
 0x573   :  { %v1505_v46 = vsel %vm586_vm2, %v7861_v14, 0.0  ;;  %7868 = vpow2.f32 %v1497_v13 }
 0x574   :  { %1506 = vadd.xlane.f32.xlu1 %v1505_v46  ;;  %7870 = vpow2.f32 %v1501_v57  ;;  %v1503_v24 = vmul.f32 1.442695, %v1488_v8 }
 0x576   :  { %v7863_v15 = vpop.eup %7862  ;;  %7872 = vpow2.f32 %v1503_v24 }
 0x577   :  { %v1514_v54 = vsel %vm586_vm2, %v7863_v15, 0.0  ;;  %v7865_v7 = vpop.eup %7864 }
 0x578   :  { %1515 = vadd.xlane.f32.xlu0 %v1514_v54  ;;  %v1508_v12 = vsel %vm586_vm2, %v7865_v7, 0.0 }
 0x57c   :  { %1509 = vadd.xlane.f32.xlu0 %v1508_v12 }
 0x585   :  { %1553 = vrot.lane.b32.xlu1 %v8683_v35, %s8292_s6  ;;  %v9162_v35 = vpop.eup %7866 }
 0x589   :  { %1555 = vrot.lane.b32.xlu1 %v8680_v34, %s8292_s6  ;;  %v1520_v34 = vsel %vm586_vm2, %v9162_v35, 0.0 }
 0x592   :  { %1551 = vrot.lane.b32.xlu0 %v8663_v16, %s8292_s6  ;;  %v7869_v16 = vpop.eup %7868 }
 0x593   :  { %v1517_v6 = vsel %vm586_vm2, %v7869_v16, 0.0  ;;  %v9167_v27 = vpop.eup %7870 }
 0x594   :  { %v1523_v59 = vsel %vm586_vm2, %v9167_v27, 0.0  ;;  %v7873_v48 = vpop.eup %7872 }
 0x595   :  { %v1526_v9 = vsel %vm586_vm2, %v7873_v48, 0.0 }
 0x5ad   :  { %1521 = vadd.xlane.f32.xlu1 %v1520_v34 }
 0x5b1   :  { %1518 = vadd.xlane.f32.xlu0 %v1517_v6 }
 0x5b5   :  { %1524 = vadd.xlane.f32.xlu0 %v1523_v59  ;;  %v1721_v59 = vsel %vm496_vm1, %v8656_v30, 0 }
 0x5b9   :  { %1527 = vadd.xlane.f32.xlu0 %v1526_v9 }
 0x5fd   :  { %v1513_v36 = vpop.xlane.xlu1 %1512 }
 0x601   :  { %v1507_v19 = vpop.xlane.xlu1 %1506 }
 0x605   :  { %v1516_v46 = vpop.xlane.xlu0 %1515  ;;  %v1554_v12 = vpop.permute.xlu1 %1553 }
 0x606   :  { %7874 = vrcp.f32 %v1516_v46 }
 0x607   :  { %7876 = vrcp.f32 %v1507_v19 }
 0x608   :  { %7878 = vrcp.f32 %v1513_v36 }
 0x609   :  { %v1510_v54 = vpop.xlane.xlu0 %1509  ;;  %v1556_v62 = vpop.permute.xlu1 %1555 }
 0x60a   :  { %7880 = vrcp.f32 %v1510_v54 }
 0x60d   :  { %v1552_v45 = vpop.permute.xlu0 %1551 }
 0x60e   :  { %7120 = vmatprep.subr.bf16.mxu0 %v1552_v45 }
 0x60f   :  { %7121 = vmatpush3.bf16.msra.mxu0 %v1552_v45 }
 0x610   :  { %7122 = vmatprep.subr.bf16.mxu0 %v1554_v12  ;;  %v7875_v43 = vpop.eup %7874 }
 0x611   :  { %v7877_v21 = vpop.eup %7876  ;;  %v1540_v52 = vmul.f32 %v7875_v43, %v7863_v15 }
 0x612   :  { %v7879_v1 = vpop.eup %7878  ;;  %v1537_v57 = vmul.f32 %v7877_v21, %v7861_v14  ;;  %v11308_v14 = vld [vmem:[#allocation15_spill] sm:$0xff] }
 0x613   :  { %7123 = vmatpush3.bf16.msra.mxu0 %v1554_v12  ;;  %v1539_v24 = vmul.f32 %v7879_v1, %v9149_v38  ;;  %v1724_v38 = vsel %vm496_vm1, %v8650_v58, 0  ;;  %v1727_v15 = vsel %vm496_vm1, %v11308_v14, 0 }
 0x614   :  { %v7881_v13 = vpop.eup %7880  ;;  %7124 = vmatprep.subr.bf16.mxu0 %v1556_v62 }
 0x615   :  { %v1538_v8 = vmul.f32 %v7881_v13, %v7865_v7  ;;  %v1546_v6 = vpack.c.bf16 %v1540_v52, %v1539_v24  ;;  %v11309_v7 = vld [vmem:[#allocation14_spill] sm:$0xff]  ;;  %v11310_v24 = vld [vmem:[#allocation13_spill] sm:$0xff] }
 0x616   :  { %v1730_v9 = vsel %vm496_vm1, %v11309_v7, 0 }
 0x617   :  { %7125 = vmatpush3.bf16.msra.mxu0 %v1556_v62  ;;  %v1545_v34 = vpack.c.bf16 %v1538_v8, %v1537_v57 }
 0x618   :  { %7678 = vmatprep.subr.msk.bf16.mxu0 %vm496_vm1, %v8656_v30 }
 0x619   :  { %7126 = vmatprep.mubr.msk.bf16.mxu0 %vm586_vm2, %v1545_v34  ;;  %v11311_v34 = vld [vmem:[#allocation12_spill] sm:$0xff] }
 0x61a   :  { %7127 = vmatmul.mubr.msk.bf16.vlgmr.msra.gmra.mrb[44].mxu0 %vm586_vm2, %v1546_v6 }
 0x620   :  { %7135 = vmatpush3.bf16.xpose.msra.mxu0 %v1721_v59 }
 0x621   :  { %7679 = vmatprep.subr.msk.bf16.mxu0 %vm496_vm1, %v8650_v58 }
 0x628   :  { %7137 = vmatpush3.bf16.xpose.msra.mxu0 %v1724_v38 }
 0x629   :  { %7680 = vmatprep.subr.msk.bf16.mxu0 %vm496_vm1, %v11308_v14 }
 0x630   :  { %7139 = vmatpush3.bf16.xpose.msra.mxu0 %v1727_v15 }
 0x631   :  { %7681 = vmatprep.subr.msk.bf16.mxu0 %vm496_vm1, %v11309_v7 }
 0x638   :  { %7141 = vmatpush3.bf16.xpose.msra.mxu0 %v1730_v9 }
 0x63a   :  { %v1522_v36 = vpop.xlane.xlu1 %1521 }
 0x63b   :  { %7882 = vrcp.f32 %v1522_v36 }
 0x63e   :  { %v1519_v19 = vpop.xlane.xlu0 %1518 }
 0x63f   :  { %7884 = vrcp.f32 %v1519_v19 }
 0x642   :  { %v1525_v46 = vpop.xlane.xlu0 %1524 }
 0x643   :  { %7886 = vrcp.f32 %v1525_v46 }
 0x645   :  { %v7883_v12 = vpop.eup %7882 }
 0x646   :  { %v1528_v54 = vpop.xlane.xlu0 %1527  ;;  %v1542_v21 = vmul.f32 %v7883_v12, %v9162_v35  ;;  %v11313_v35 = vld [vmem:[#allocation10_spill] sm:$0xff] }
 0x647   :  { %7888 = vrcp.f32 %v1528_v54 }
 0x649   :  { %v7885_v45 = vpop.eup %7884 }
 0x64a   :  { %v1541_v43 = vmul.f32 %v7885_v45, %v7869_v16  ;;  %v11312_v16 = vld [vmem:[#allocation11_spill] sm:$0xff] }
 0x64c   :  { %v1547_v1 = vpack.c.bf16 %v1542_v21, %v1541_v43 }
 0x64d   :  { %v7887_v62 = vpop.eup %7886 }
 0x64e   :  { %7130 = vmatprep.mubr.msk.bf16.mxu0 %vm586_vm2, %v1547_v1  ;;  %v1543_v52 = vmul.f32 %v7887_v62, %v9167_v27 }
 0x651   :  { %v7889_v13 = vpop.eup %7888 }
 0x652   :  { %v1544_v57 = vmul.f32 %v7889_v13, %v7873_v48 }
 0x654   :  { %v1548_v8 = vpack.c.bf16 %v1544_v57, %v1543_v52 }
 0x656   :  { %7131 = vmatmul.mubr.msk.bf16.gmra.mrb[48].mxu0 %vm586_vm2, %v1548_v8 }
 0x657   :  { %7142 = vmatprep.mubr.msk.bf16.mxu0 %vm496_vm1, %v11310_v24 }
 0x65e   :  { %7143 = vmatmul.mubr.msk.bf16.vlgmr.msra.gmra.mrb[52].mxu0 %vm496_vm1, %v11311_v34 }
 0x65f   :  { %7146 = vmatprep.mubr.msk.bf16.mxu0 %vm496_vm1, %v11312_v16 }
 0x666   :  { %7147 = vmatmul.mubr.msk.bf16.gmra.mrb[56].mxu0 %vm496_vm1, %v11313_v35 }
 0x6ed   :  { %v9203_v6 = vpop.f32.mrb[44].mxu0 }
 0x6ee   :  { %v9205_v59 = vpop.f32.mrb[45].mxu0 }
 0x6ef   :  { %v9207_v27 = vpop.f32.mrb[46].mxu0 }
 0x6f0   :  { %v9211_v38 = vpop.f32.mrb[47].mxu0 }
 0x729   :  { %v9215_v9 = vpop.f32.mrb[48].mxu0 }
 0x72a   :  { %v9217_v36 = vpop.f32.mrb[49].mxu0 }
 0x72b   :  { %v9219_v19 = vpop.f32.mrb[50].mxu0 }
 0x72c   :  { %v9223_v54 = vpop.f32.mrb[51].mxu0 }
 0x731   :  { %v7144_v45 = vpop.f32.mrb[52].mxu0 }
 0x732   :  { %v1766_v43 = vpop.f32.mrb[53].mxu0  ;;  %v1803_v52 = vsel %vm586_vm2, %v7144_v45, -inf }
 0x733   :  { %v7145_v21 = vpop.f32.mrb[54].mxu0  ;;  %v1797_v1 = vsel %vm586_vm2, %v1766_v43, -inf }
 0x734   :  { %1798 = vmax.xlane.f32.xlu1 %v1797_v1  ;;  %v1769_v62 = vpop.f32.mrb[55].mxu0  ;;  %v1806_v8 = vsel %vm586_vm2, %v7145_v21, -inf }
 0x735   :  { %v1800_v13 = vsel %vm586_vm2, %v1769_v62, -inf }
 0x736   :  { %1801 = vmax.xlane.f32.xlu0 %v1800_v13 }
 0x738   :  { %1804 = vmax.xlane.f32.xlu1 %v1803_v52 }
 0x739   :  { %v7148_v57 = vpop.f32.mrb[56].mxu0 }
 0x73a   :  { %1807 = vmax.xlane.f32.xlu0 %v1806_v8  ;;  %v1782_v4 = vpop.f32.mrb[57].mxu0  ;;  %v1815_v1 = vsel %vm586_vm2, %v7148_v57, -inf }
 0x73b   :  { %v7149_v46 = vpop.f32.mrb[58].mxu0  ;;  %v1809_v12 = vsel %vm586_vm2, %v1782_v4, -inf }
 0x73c   :  { %1810 = vmax.xlane.f32.xlu1 %v1809_v12  ;;  %v1785_v15 = vpop.f32.mrb[59].mxu0  ;;  %v1818_v13 = vsel %vm586_vm2, %v7149_v46, -inf }
 0x73d   :  { %v1812_v28 = vsel %vm586_vm2, %v1785_v15, -inf }
 0x73e   :  { %1813 = vmax.xlane.f32.xlu0 %v1812_v28 }
 0x740   :  { %1816 = vmax.xlane.f32.xlu1 %v1815_v1 }
 0x742   :  { %1819 = vmax.xlane.f32.xlu0 %v1818_v13 }
 0x7c1   :  { %v1799_v52 = vpop.xlane.xlu1 %1798 }
 0x7c2   :  { %v1821_v55 = vsub.f32 %v1766_v43, %v1799_v52 }
 0x7c3   :  { %v1802_v61 = vpop.xlane.xlu0 %1801 }
 0x7c4   :  { %v1822_v8 = vsub.f32 %v1769_v62, %v1802_v61  ;;  %v1829_v47 = vmul.f32 1.442695, %v1821_v55 }
 0x7c5   :  { %v1805_v29 = vpop.xlane.xlu1 %1804 }
 0x7c6   :  { %v1823_v48 = vsub.f32 %v7144_v45, %v1805_v29  ;;  %v1831_v5 = vmul.f32 1.442695, %v1822_v8 }
 0x7c7   :  { %v1808_v31 = vpop.xlane.xlu0 %1807 }
 0x7c8   :  { %v1833_v42 = vmul.f32 1.442695, %v1823_v48  ;;  %v1824_v12 = vsub.f32 %v7145_v21, %v1808_v31 }
 0x7ca   :  { %7890 = vpow2.f32 %v1833_v42  ;;  %v1835_v40 = vmul.f32 1.442695, %v1824_v12 }
 0x7cb   :  { %7892 = vpow2.f32 %v1829_v47  ;;  %v1814_v28 = vpop.xlane.xlu0 %1813 }
 0x7cc   :  { %7894 = vpow2.f32 %v1835_v40  ;;  %v1826_v1 = vsub.f32 %v1785_v15, %v1814_v28  ;;  %v1811_v15 = vpop.xlane.xlu1 %1810 }
 0x7cd   :  { %7896 = vpow2.f32 %v1831_v5  ;;  %v1825_v21 = vsub.f32 %v1782_v4, %v1811_v15 }
 0x7ce   :  { %v1839_v33 = vmul.f32 1.442695, %v1826_v1 }
 0x7cf   :  { %v1820_v25 = vpop.xlane.xlu0 %1819  ;;  %v1837_v8 = vmul.f32 1.442695, %v1825_v21 }
 0x7d0   :  { %v1828_v13 = vsub.f32 %v7149_v46, %v1820_v25  ;;  %v1817_v46 = vpop.xlane.xlu1 %1816 }
 0x7d1   :  { %v1827_v45 = vsub.f32 %v7148_v57, %v1817_v46 }
 0x7d2   :  { %v1843_v43 = vmul.f32 1.442695, %v1828_v13 }
 0x7d3   :  { %v1841_v62 = vmul.f32 1.442695, %v1827_v45 }
 0x7d4   :  { %v7891_v52 = vpop.eup %7890  ;;  %7898 = vpow2.f32 %v1843_v43 }
 0x7d5   :  { %v7893_v61 = vpop.eup %7892  ;;  %v1851_v29 = vsel %vm586_vm2, %v7891_v52, 0.0  ;;  %7900 = vpow2.f32 %v1839_v33 }
 0x7d6   :  { %v7895_v55 = vpop.eup %7894  ;;  %1852 = vadd.xlane.f32.xlu1 %v1851_v29  ;;  %v1845_v40 = vsel %vm586_vm2, %v7893_v61, 0.0  ;;  %7902 = vpow2.f32 %v1841_v62 }
 0x7d7   :  { %v1854_v42 = vsel %vm586_vm2, %v7895_v55, 0.0  ;;  %v7897_v31 = vpop.eup %7896  ;;  %7904 = vpow2.f32 %v1837_v8 }
 0x7d8   :  { %1855 = vadd.xlane.f32.xlu0 %v1854_v42  ;;  %v1848_v5 = vsel %vm586_vm2, %v7897_v31, 0.0 }
 0x7da   :  { %1846 = vadd.xlane.f32.xlu1 %v1845_v40 }
 0x7dc   :  { %1849 = vadd.xlane.f32.xlu0 %v1848_v5 }
 0x7de   :  { %v9239_v25 = vpop.eup %7898 }
 0x7df   :  { %v1866_v47 = vsel %vm586_vm2, %v9239_v25, 0.0  ;;  %v9243_v48 = vpop.eup %7900 }
 0x7e0   :  { %1867 = vadd.xlane.f32.xlu0 %v1866_v47  ;;  %v1860_v33 = vsel %vm586_vm2, %v9243_v48, 0.0  ;;  %v7903_v12 = vpop.eup %7902 }
 0x7e1   :  { %v1863_v28 = vsel %vm586_vm2, %v7903_v12, 0.0  ;;  %v7905_v1 = vpop.eup %7904 }
 0x7e2   :  { %v1857_v57 = vsel %vm586_vm2, %v7905_v1, 0.0 }
 0x7e4   :  { %1861 = vadd.xlane.f32.xlu0 %v1860_v33 }
 0x7eb   :  { %1986 = vrot.lane.b32.xlu1 %v8656_v30, %s8290_s4 }
 0x7fa   :  { %1988 = vrot.lane.b32.xlu0 %v8650_v58, %s8290_s4 }
 0x7fe   :  { %1974 = vrot.lane.b32.xlu0 %v11310_v24, %s8290_s4 }
 0x802   :  { %1978 = vrot.lane.b32.xlu0 %v11312_v16, %s8290_s4 }
 0x80f   :  { %1864 = vadd.xlane.f32.xlu1 %v1863_v28 }
 0x813   :  { %1858 = vadd.xlane.f32.xlu1 %v1857_v57 }
 0x824   :  { %1990 = vrot.lane.b32.xlu1 %v11308_v14, %s8290_s4 }
 0x828   :  { %1992 = vrot.lane.b32.xlu1 %v11309_v7, %s8290_s4 }
 0x82c   :  { %1976 = vrot.lane.b32.xlu1 %v11311_v34, %s8290_s4 }
 0x830   :  { %1980 = vrot.lane.b32.xlu1 %v11313_v35, %s8290_s4 }
 0x863   :  { %v1853_v4 = vpop.xlane.xlu1 %1852 }
 0x865   :  { %v1856_v13 = vpop.xlane.xlu0 %1855 }
 0x866   :  { %7906 = vrcp.f32 %v1856_v13 }
 0x867   :  { %v1847_v43 = vpop.xlane.xlu1 %1846 }
 0x868   :  { %7908 = vrcp.f32 %v1847_v43 }
 0x869   :  { %7910 = vrcp.f32 %v1853_v4  ;;  %v1850_v29 = vpop.xlane.xlu0 %1849 }
 0x86a   :  { %7912 = vrcp.f32 %v1850_v29 }
 0x86b   :  { %v1987_v42 = vpop.permute.xlu1 %1986 }
 0x86c   :  { %7682 = vmatprep.subr.msk.bf16.mxu1 %vm496_vm1, %v1987_v42  ;;  %v2007_v4 = vsel %vm496_vm1, %v1987_v42, 0 }
 0x86d   :  { %v1868_v40 = vpop.xlane.xlu0 %1867 }
 0x870   :  { %v7907_v5 = vpop.eup %7906 }
 0x871   :  { %v1880_v46 = vmul.f32 %v7907_v5, %v7895_v55  ;;  %v1862_v45 = vpop.xlane.xlu0 %1861 }
 0x872   :  { %v7909_v47 = vpop.eup %7908 }
 0x873   :  { %v7911_v33 = vpop.eup %7910  ;;  %v1877_v21 = vmul.f32 %v7909_v47, %v7893_v61 }
 0x874   :  { %v7913_v15 = vpop.eup %7912  ;;  %v1879_v8 = vmul.f32 %v7911_v33, %v7891_v52 }
 0x875   :  { %v1878_v62 = vmul.f32 %v7913_v15, %v7897_v31  ;;  %v1989_v13 = vpop.permute.xlu0 %1988 }
 0x876   :  { %v1886_v57 = vpack.c.bf16 %v1880_v46, %v1879_v8  ;;  %v2010_v43 = vsel %vm496_vm1, %v1989_v13, 0 }
 0x877   :  { %v1885_v28 = vpack.c.bf16 %v1878_v62, %v1877_v21 }
 0x879   :  { %7158 = vmatprep.mubr.msk.bf16.mxu1 %vm586_vm2, %v1885_v28  ;;  %v1975_v28 = vpop.permute.xlu0 %1974 }
 0x87a   :  { %7159 = vmatmul.mubr.msk.bf16.vlgmr.msra.gmra.mrb[60].mxu1 %vm586_vm2, %v1886_v57 }
 0x87b   :  { %7167 = vmatpush3.bf16.xpose.msra.mxu1 %v2007_v4 }
 0x87c   :  { %7683 = vmatprep.subr.msk.bf16.mxu1 %vm496_vm1, %v1989_v13 }
 0x87d   :  { %v1979_v4 = vpop.permute.xlu0 %1978 }
 0x883   :  { %7169 = vmatpush3.bf16.xpose.msra.mxu1 %v2010_v43 }
 0x89c   :  { %v1865_v55 = vpop.xlane.xlu1 %1864 }
 0x89d   :  { %7914 = vrcp.f32 %v1865_v55 }
 0x89e   :  { %7916 = vrcp.f32 %v1862_v45 }
 0x89f   :  { %7918 = vrcp.f32 %v1868_v40 }
 0x8a0   :  { %v1859_v52 = vpop.xlane.xlu1 %1858 }
 0x8a1   :  { %7920 = vrcp.f32 %v1859_v52 }
 0x8a4   :  { %v1991_v61 = vpop.permute.xlu1 %1990 }
 0x8a5   :  { %7684 = vmatprep.subr.msk.bf16.mxu1 %vm496_vm1, %v1991_v61  ;;  %v2013_v31 = vsel %vm496_vm1, %v1991_v61, 0 }
 0x8a6   :  { %7171 = vmatpush3.bf16.xpose.msra.mxu1 %v2013_v31 }
 0x8a7   :  { %v7915_v29 = vpop.eup %7914 }
 0x8a8   :  { %v1993_v42 = vpop.permute.xlu1 %1992  ;;  %v7917_v5 = vpop.eup %7916  ;;  %v1883_v15 = vmul.f32 %v7915_v29, %v7903_v12 }
 0x8a9   :  { %7685 = vmatprep.subr.msk.bf16.mxu1 %vm496_vm1, %v1993_v42  ;;  %v7919_v47 = vpop.eup %7918  ;;  %v1882_v45 = vmul.f32 %v7917_v5, %v9243_v48  ;;  %v2016_v40 = vsel %vm496_vm1, %v1993_v42, 0 }
 0x8aa   :  { %v1884_v21 = vmul.f32 %v7919_v47, %v9239_v25 }
 0x8ab   :  { %v7921_v33 = vpop.eup %7920 }
 0x8ac   :  { %v1881_v46 = vmul.f32 %v7921_v33, %v7905_v1  ;;  %v1888_v8 = vpack.c.bf16 %v1884_v21, %v1883_v15  ;;  %v1977_v57 = vpop.permute.xlu1 %1976 }
 0x8ae   :  { %7173 = vmatpush3.bf16.xpose.msra.mxu1 %v2016_v40  ;;  %v1887_v62 = vpack.c.bf16 %v1882_v45, %v1881_v46 }
 0x8b0   :  { %7162 = vmatprep.mubr.msk.bf16.mxu1 %vm586_vm2, %v1887_v62  ;;  %v1981_v48 = vpop.permute.xlu1 %1980 }
 0x8b1   :  { %7163 = vmatmul.mubr.msk.bf16.gmra.mrb[64].mxu1 %vm586_vm2, %v1888_v8 }
 0x8b2   :  { %7174 = vmatprep.mubr.msk.bf16.mxu1 %vm496_vm1, %v1975_v28 }
 0x8b9   :  { %7175 = vmatmul.mubr.msk.bf16.vlgmr.msra.gmra.mrb[68].mxu1 %vm496_vm1, %v1977_v57 }
 0x8ba   :  { %7178 = vmatprep.mubr.msk.bf16.mxu1 %vm496_vm1, %v1979_v4 }
 0x8c1   :  { %7179 = vmatmul.mubr.msk.bf16.gmra.mrb[72].mxu1 %vm496_vm1, %v1981_v48 }
 0x94d   :  { %v9283_v25 = vpop.f32.mrb[60].mxu1 }
 0x94e   :  { %11314 = vst [vmem:[#allocation15_spill] sm:$0xff] %v9283_v25  ;;  %v9285_v12 = vpop.f32.mrb[61].mxu1 }
 0x94f   :  { %11315 = vst [vmem:[#allocation14_spill] sm:$0xff] %v9285_v12  ;;  %v9287_v1 = vpop.f32.mrb[62].mxu1 }
 0x950   :  { %11316 = vst [vmem:[#allocation13_spill] sm:$0xff] %v9287_v1  ;;  %v9291_v43 = vpop.f32.mrb[63].mxu1 }
 0x951   :  { %11317 = vst [vmem:[#allocation12_spill] sm:$0xff] %v9291_v43 }
 0x984   :  { %v9295_v52 = vpop.f32.mrb[64].mxu1 }
 0x985   :  { %11318 = vst [vmem:[#allocation11_spill] sm:$0xff] %v9295_v52  ;;  %v9297_v61 = vpop.f32.mrb[65].mxu1 }
 0x986   :  { %11319 = vst [vmem:[#allocation10_spill] sm:$0xff] %v9297_v61  ;;  %v9299_v31 = vpop.f32.mrb[66].mxu1 }
 0x987   :  { %11320 = vst [vmem:[#allocation24_spill] sm:$0xff] %v9299_v31  ;;  %v9303_v42 = vpop.f32.mrb[67].mxu1 }
 0x988   :  { %11321 = vst [vmem:[#allocation25_spill] sm:$0xff] %v9303_v42 }
 0x98c   :  { %v7176_v47 = vpop.f32.mrb[68].mxu1 }
 0x98d   :  { %v2052_v33 = vpop.f32.mrb[69].mxu1  ;;  %v2089_v15 = vsel %vm586_vm2, %v7176_v47, -inf }
 0x98e   :  { %2090 = vmax.xlane.f32.xlu0 %v2089_v15  ;;  %v7177_v46 = vpop.f32.mrb[70].mxu1  ;;  %v2083_v21 = vsel %vm586_vm2, %v2052_v33, -inf }
 0x98f   :  { %v2055_v45 = vpop.f32.mrb[71].mxu1  ;;  %v2092_v28 = vsel %vm586_vm2, %v7177_v46, -inf }
 0x990   :  { %v2086_v40 = vsel %vm586_vm2, %v2055_v45, -inf }
 0x991   :  { %2087 = vmax.xlane.f32.xlu1 %v2086_v40 }
 0x992   :  { %2084 = vmax.xlane.f32.xlu0 %v2083_v21 }
 0x994   :  { %v7180_v62 = vpop.f32.mrb[72].mxu1 }
 0x995   :  { %v2068_v8 = vpop.f32.mrb[73].mxu1  ;;  %v2101_v57 = vsel %vm586_vm2, %v7180_v62, -inf }
 0x996   :  { %2093 = vmax.xlane.f32.xlu0 %v2092_v28  ;;  %2102 = vmax.xlane.f32.xlu1 %v2101_v57  ;;  %v7181_v4 = vpop.f32.mrb[74].mxu1  ;;  %v2095_v29 = vsel %vm586_vm2, %v2068_v8, -inf }
 0x997   :  { %v9312_v48 = vpop.f32.mrb[75].mxu1  ;;  %v2104_v40 = vsel %vm586_vm2, %v7181_v4, -inf }
 0x998   :  { %v2098_v15 = vsel %vm586_vm2, %v9312_v48, -inf }
 0x99a   :  { %2096 = vmax.xlane.f32.xlu1 %v2095_v29  ;;  %2099 = vmax.xlane.f32.xlu0 %v2098_v15 }
 0x99e   :  { %2105 = vmax.xlane.f32.xlu0 %v2104_v40 }
 0x9ab   :  { %2179 = vrot.lane.b32.xlu1 %v8714_v2, %s8290_s4 }
 0x9af   :  { %2183 = vrot.lane.b32.xlu1 %v8723_v32, %s8290_s4 }
 0x9b3   :  { %2185 = vrot.lane.b32.xlu1 %v8720_v20, %s8290_s4 }
 0x9b4   :  { %2181 = vrot.lane.b32.xlu0 %v8712_v0, %s8290_s4 }
 0x9b7   :  { %2280 = vrot.lane.b32.xlu1 %v8656_v30, %s8291_s25 }
 0xa1b   :  { %v2091_v29 = vpop.xlane.xlu0 %2090 }
 0xa1c   :  { %v2109_v21 = vsub.f32 %v7176_v47, %v2091_v29 }
 0xa1e   :  { %v2119_v28 = vmul.f32 1.442695, %v2109_v21  ;;  %v2088_v57 = vpop.xlane.xlu1 %2087 }
 0xa1f   :  { %v2085_v15 = vpop.xlane.xlu0 %2084  ;;  %v2108_v13 = vsub.f32 %v2055_v45, %v2088_v57 }
 0xa20   :  { %7922 = vpow2.f32 %v2119_v28  ;;  %v2107_v40 = vsub.f32 %v2052_v33, %v2085_v15 }
 0xa21   :  { %v2117_v42 = vmul.f32 1.442695, %v2108_v13 }
 0xa22   :  { %v2115_v5 = vmul.f32 1.442695, %v2107_v40 }
 0xa23   :  { %v2103_v55 = vpop.xlane.xlu1 %2102  ;;  %v2094_v52 = vpop.xlane.xlu0 %2093 }
 0xa24   :  { %7924 = vpow2.f32 %v2115_v5  ;;  %v2110_v31 = vsub.f32 %v7177_v46, %v2094_v52  ;;  %v2113_v25 = vsub.f32 %v7180_v62, %v2103_v55 }
 0xa26   :  { %v2121_v61 = vmul.f32 1.442695, %v2110_v31  ;;  %v2127_v47 = vmul.f32 1.442695, %v2113_v25 }
 0xa27   :  { %v2097_v1 = vpop.xlane.xlu1 %2096  ;;  %v2100_v12 = vpop.xlane.xlu0 %2099 }
 0xa28   :  { %7926 = vpow2.f32 %v2121_v61  ;;  %v2111_v29 = vsub.f32 %v2068_v8, %v2097_v1 }
 0xa29   :  { %7928 = vpow2.f32 %v2117_v42 }
 0xa2a   :  { %v9328_v43 = vpop.eup %7922  ;;  %7930 = vpow2.f32 %v2127_v47  ;;  %v2123_v13 = vmul.f32 1.442695, %v2111_v29 }
 0xa2b   :  { %v2180_v21 = vpop.permute.xlu1 %2179  ;;  %v2106_v28 = vpop.xlane.xlu0 %2105  ;;  %v2137_v33 = vsel %vm586_vm2, %v9328_v43, 0.0 }
 0xa2c   :  { %7182 = vmatprep.subr.bf16.mxu0 %v2180_v21  ;;  %2138 = vadd.xlane.f32.xlu1 %v2137_v33  ;;  %v2114_v55 = vsub.f32 %v7181_v4, %v2106_v28  ;;  %7932 = vpow2.f32 %v2123_v13 }
 0xa2d   :  { %7183 = vmatpush3.bf16.msra.mxu0 %v2180_v21  ;;  %v2112_v21 = vsub.f32 %v9312_v48, %v2100_v12 }
 0xa2e   :  { %v9332_v52 = vpop.eup %7924  ;;  %v2129_v1 = vmul.f32 1.442695, %v2114_v55 }
 0xa2f   :  { %v2184_v31 = vpop.permute.xlu1 %2183  ;;  %v2182_v61 = vpop.permute.xlu0 %2181  ;;  %v2131_v42 = vsel %vm586_vm2, %v9332_v52, 0.0  ;;  %v2125_v28 = vmul.f32 1.442695, %v2112_v21 }
 0xa30   :  { %2132 = vadd.xlane.f32.xlu1 %v2131_v42  ;;  %7184 = vmatprep.subr.bf16.mxu0 %v2182_v61  ;;  %7934 = vpow2.f32 %v2129_v1 }
 0xa31   :  { %7185 = vmatpush3.bf16.msra.mxu0 %v2182_v61  ;;  %7936 = vpow2.f32 %v2125_v28 }
 0xa32   :  { %7186 = vmatprep.subr.bf16.mxu0 %v2184_v31  ;;  %v7927_v25 = vpop.eup %7926 }
 0xa33   :  { %v2186_v5 = vpop.permute.xlu1 %2185  ;;  %v2140_v46 = vsel %vm586_vm2, %v7927_v25, 0.0  ;;  %v7929_v45 = vpop.eup %7928 }
 0xa34   :  { %2141 = vadd.xlane.f32.xlu0 %v2140_v46  ;;  %v2134_v62 = vsel %vm586_vm2, %v7929_v45, 0.0  ;;  %v9338_v8 = vpop.eup %7930 }
 0xa35   :  { %7187 = vmatpush3.bf16.msra.mxu0 %v2184_v31  ;;  %v2149_v57 = vsel %vm586_vm2, %v9338_v8, 0.0 }
 0xa36   :  { %7188 = vmatprep.subr.bf16.mxu0 %v2186_v5  ;;  %v9343_v15 = vpop.eup %7932 }
 0xa37   :  { %v2281_v4 = vpop.permute.xlu1 %2280  ;;  %v2143_v40 = vsel %vm586_vm2, %v9343_v15, 0.0 }
 0xa38   :  { %2135 = vadd.xlane.f32.xlu0 %v2134_v62 }
 0xa39   :  { %7189 = vmatpush3.bf16.msra.mxu0 %v2186_v5 }
 0xa3a   :  { %7686 = vmatprep.subr.msk.bf16.mxu0 %vm496_vm1, %v2281_v4  ;;  %v9347_v47 = vpop.eup %7934 }
 0xa3b   :  { %v2152_v29 = vsel %vm586_vm2, %v9347_v47, 0.0  ;;  %v7937_v33 = vpop.eup %7936 }
 0xa3c   :  { %2150 = vadd.xlane.f32.xlu0 %v2149_v57  ;;  %v2146_v13 = vsel %vm586_vm2, %v7937_v33, 0.0 }
 0xa40   :  { %2144 = vadd.xlane.f32.xlu0 %v2143_v40 }
 0xa41   :  { %2284 = vrot.lane.b32.xlu1 %v11308_v14, %s8291_s25 }
 0xa44   :  { %2153 = vadd.xlane.f32.xlu0 %v2152_v29 }
 0xa5a   :  { %2282 = vrot.lane.b32.xlu0 %v8650_v58, %s8291_s25 }
 0xa5e   :  { %2272 = vrot.lane.b32.xlu0 %v11310_v24, %s8291_s25 }
 0xa62   :  { %2276 = vrot.lane.b32.xlu0 %v11312_v16, %s8291_s25 }
 0xa65   :  { %2147 = vadd.xlane.f32.xlu1 %v2146_v13 }
 0xa76   :  { %2286 = vrot.lane.b32.xlu1 %v11309_v7, %s8291_s25 }
 0xa7a   :  { %2274 = vrot.lane.b32.xlu1 %v11311_v34, %s8291_s25 }
 0xa7e   :  { %2278 = vrot.lane.b32.xlu1 %v11313_v35, %s8291_s25 }
 0xab9   :  { %v2139_v12 = vpop.xlane.xlu1 %2138 }
 0xabd   :  { %v2133_v48 = vpop.xlane.xlu1 %2132 }
 0xac1   :  { %v2142_v55 = vpop.xlane.xlu0 %2141 }
 0xac2   :  { %7938 = vrcp.f32 %v2142_v55  ;;  %v2285_v55 = vpop.permute.xlu1 %2284 }
 0xac3   :  { %7940 = vrcp.f32 %v2133_v48  ;;  %v2301_v48 = vsel %vm496_vm1, %v2281_v4, 0 }
 0xac4   :  { %7942 = vrcp.f32 %v2139_v12 }
 0xac5   :  { %v2136_v31 = vpop.xlane.xlu0 %2135 }
 0xac6   :  { %7944 = vrcp.f32 %v2136_v31 }
 0xac9   :  { %v2151_v61 = vpop.xlane.xlu0 %2150 }
 0xacc   :  { %v7939_v42 = vpop.eup %7938 }
 0xacd   :  { %v2145_v1 = vpop.xlane.xlu0 %2144  ;;  %v7941_v5 = vpop.eup %7940  ;;  %v2166_v57 = vmul.f32 %v7939_v42, %v7927_v25 }
 0xace   :  { %v7943_v46 = vpop.eup %7942  ;;  %v2163_v29 = vmul.f32 %v7941_v5, %v9332_v52 }
 0xacf   :  { %v2165_v28 = vmul.f32 %v7943_v46, %v9328_v43  ;;  %v2307_v43 = vsel %vm496_vm1, %v2285_v55, 0 }
 0xad0   :  { %v7945_v62 = vpop.eup %7944 }
 0xad1   :  { %v2154_v40 = vpop.xlane.xlu0 %2153  ;;  %v2164_v21 = vmul.f32 %v7945_v62, %v7929_v45  ;;  %v2172_v63 = vpack.c.bf16 %v2166_v57, %v2165_v28 }
 0xad2   :  { %7946 = vrcp.f32 %v2154_v40 }
 0xad3   :  { %v2171_v13 = vpack.c.bf16 %v2164_v21, %v2163_v29  ;;  %7948 = vrcp.f32 %v2145_v1 }
 0xad4   :  { %7950 = vrcp.f32 %v2151_v61 }
 0xad5   :  { %7190 = vmatprep.mubr.msk.bf16.mxu0 %vm586_vm2, %v2171_v13  ;;  %v2283_v12 = vpop.permute.xlu0 %2282 }
 0xad6   :  { %7191 = vmatmul.mubr.msk.bf16.vlgmr.msra.gmra.mrb[60].mxu0 %vm586_vm2, %v2172_v63  ;;  %v2304_v25 = vsel %vm496_vm1, %v2283_v12, 0 }
 0xad7   :  { %7199 = vmatpush3.bf16.xpose.msra.mxu0 %v2301_v48 }
 0xad8   :  { %7687 = vmatprep.subr.msk.bf16.mxu0 %vm496_vm1, %v2283_v12 }
 0xad9   :  { %v2273_v29 = vpop.permute.xlu0 %2272 }
 0xadc   :  { %v7947_v4 = vpop.eup %7946 }
 0xadd   :  { %v7949_v31 = vpop.eup %7948  ;;  %v2170_v46 = vmul.f32 %v7947_v4, %v9347_v47  ;;  %v2277_v28 = vpop.permute.xlu0 %2276 }
 0xade   :  { %v7951_v42 = vpop.eup %7950  ;;  %v2167_v62 = vmul.f32 %v7949_v31, %v9343_v15 }
 0xadf   :  { %7201 = vmatpush3.bf16.xpose.msra.mxu0 %v2304_v25  ;;  %v2169_v1 = vmul.f32 %v7951_v42, %v9338_v8 }
 0xae0   :  { %7688 = vmatprep.subr.msk.bf16.mxu0 %vm496_vm1, %v2285_v55 }
 0xae1   :  { %v2174_v40 = vpack.c.bf16 %v2170_v46, %v2169_v1 }
 0xae7   :  { %7203 = vmatpush3.bf16.xpose.msra.mxu0 %v2307_v43 }
 0xaf2   :  { %v2148_v52 = vpop.xlane.xlu1 %2147 }
 0xaf3   :  { %7952 = vrcp.f32 %v2148_v52 }
 0xaf6   :  { %v2287_v63 = vpop.permute.xlu1 %2286 }
 0xaf7   :  { %7689 = vmatprep.subr.msk.bf16.mxu0 %vm496_vm1, %v2287_v63  ;;  %v2310_v45 = vsel %vm496_vm1, %v2287_v63, 0 }
 0xaf8   :  { %7205 = vmatpush3.bf16.xpose.msra.mxu0 %v2310_v45 }
 0xafa   :  { %v2275_v21 = vpop.permute.xlu1 %2274 }
 0xafd   :  { %v7953_v5 = vpop.eup %7952 }
 0xafe   :  { %v2168_v57 = vmul.f32 %v7953_v5, %v7937_v33  ;;  %v2279_v47 = vpop.permute.xlu1 %2278 }
 0xb00   :  { %v2173_v61 = vpack.c.bf16 %v2168_v57, %v2167_v62 }
 0xb02   :  { %7194 = vmatprep.mubr.msk.bf16.mxu0 %vm586_vm2, %v2173_v61 }
 0xb03   :  { %7195 = vmatmul.mubr.msk.bf16.gmra.mrb[64].mxu0 %vm586_vm2, %v2174_v40 }
 0xb04   :  { %7206 = vmatprep.mubr.msk.bf16.mxu0 %vm496_vm1, %v2273_v29 }
 0xb0b   :  { %7207 = vmatmul.mubr.msk.bf16.vlgmr.msra.gmra.mrb[68].mxu0 %vm496_vm1, %v2275_v21 }
 0xb0c   :  { %7210 = vmatprep.mubr.msk.bf16.mxu0 %vm496_vm1, %v2277_v28 }
 0xb13   :  { %7211 = vmatmul.mubr.msk.bf16.gmra.mrb[72].mxu0 %vm496_vm1, %v2279_v47 }
 0xba9   :  { %v9387_v15 = vpop.f32.mrb[60].mxu0 }
 0xbaa   :  { %v9389_v8 = vpop.f32.mrb[61].mxu0 }
 0xbab   :  { %11322 = vst [vmem:[#allocation26_spill] sm:$0xff] %v9389_v8  ;;  %v9391_v33 = vpop.f32.mrb[62].mxu0 }
 0xbac   :  { %v9395_v12 = vpop.f32.mrb[63].mxu0 }
 0xbad   :  { %11323 = vst [vmem:[#allocation27_spill] sm:$0xff] %v9395_v12 }
 0xbd6   :  { %v9399_v25 = vpop.f32.mrb[64].mxu0 }
 0xbd7   :  { %v9401_v55 = vpop.f32.mrb[65].mxu0 }
 0xbd8   :  { %11324 = vst [vmem:[#allocation28_spill] sm:$0xff] %v9401_v55  ;;  %v9403_v43 = vpop.f32.mrb[66].mxu0 }
 0xbd9   :  { %v9407_v63 = vpop.f32.mrb[67].mxu0 }
 0xbda   :  { %11325 = vst [vmem:[#allocation29_spill] sm:$0xff] %v9407_v63 }
 0xbde   :  { %v7208_v4 = vpop.f32.mrb[68].mxu0 }
 0xbdf   :  { %v2346_v31 = vpop.f32.mrb[69].mxu0  ;;  %v2383_v42 = vsel %vm586_vm2, %v7208_v4, -inf }
 0xbe0   :  { %2384 = vmax.xlane.f32.xlu0 %v2383_v42  ;;  %v7209_v5 = vpop.f32.mrb[70].mxu0  ;;  %v2377_v57 = vsel %vm586_vm2, %v2346_v31, -inf }
 0xbe1   :  { %v2349_v46 = vpop.f32.mrb[71].mxu0  ;;  %v2386_v40 = vsel %vm586_vm2, %v7209_v5, -inf }
 0xbe2   :  { %v2380_v62 = vsel %vm586_vm2, %v2349_v46, -inf }
 0xbe3   :  { %2381 = vmax.xlane.f32.xlu1 %v2380_v62 }
 0xbe4   :  { %2378 = vmax.xlane.f32.xlu0 %v2377_v57 }
 0xbe6   :  { %v7212_v1 = vpop.f32.mrb[72].mxu0 }
 0xbe7   :  { %v2362_v61 = vpop.f32.mrb[73].mxu0  ;;  %v2395_v29 = vsel %vm586_vm2, %v7212_v1, -inf }
 0xbe8   :  { %2387 = vmax.xlane.f32.xlu0 %v2386_v40  ;;  %2396 = vmax.xlane.f32.xlu1 %v2395_v29  ;;  %v7213_v21 = vpop.f32.mrb[74].mxu0  ;;  %v2389_v42 = vsel %vm586_vm2, %v2362_v61, -inf }
 0xbe9   :  { %v9416_v28 = vpop.f32.mrb[75].mxu0  ;;  %v2398_v62 = vsel %vm586_vm2, %v7213_v21, -inf }
 0xbea   :  { %v2392_v47 = vsel %vm586_vm2, %v9416_v28, -inf }
 0xbec   :  { %2390 = vmax.xlane.f32.xlu1 %v2389_v42  ;;  %2393 = vmax.xlane.f32.xlu0 %v2392_v47 }
 0xbf0   :  { %2399 = vmax.xlane.f32.xlu0 %v2398_v62 }
 0xbfd   :  { %2469 = vrot.lane.b32.xlu1 %v8714_v2, %s8291_s25 }
 0xc01   :  { %2473 = vrot.lane.b32.xlu1 %v8723_v32, %s8291_s25 }
 0xc05   :  { %2475 = vrot.lane.b32.xlu1 %v8720_v20, %s8291_s25 }
 0xc06   :  { %2471 = vrot.lane.b32.xlu0 %v8712_v0, %s8291_s25 }
 0xc09   :  { %2570 = vrot.lane.b32.xlu1 %v8656_v30, %s8292_s6 }
 0xc6d   :  { %v2385_v57 = vpop.xlane.xlu0 %2384 }
 0xc6e   :  { %v2403_v40 = vsub.f32 %v7208_v4, %v2385_v57 }
 0xc70   :  { %v2413_v29 = vmul.f32 1.442695, %v2403_v40  ;;  %v2382_v47 = vpop.xlane.xlu1 %2381 }
 0xc71   :  { %v2379_v42 = vpop.xlane.xlu0 %2378  ;;  %v2402_v48 = vsub.f32 %v2349_v46, %v2382_v47 }
 0xc72   :  { %7954 = vpow2.f32 %v2413_v29  ;;  %v2401_v62 = vsub.f32 %v2346_v31, %v2379_v42 }
 0xc73   :  { %v2411_v55 = vmul.f32 1.442695, %v2402_v48 }
 0xc74   :  { %v2409_v45 = vmul.f32 1.442695, %v2401_v62 }
 0xc75   :  { %v2397_v52 = vpop.xlane.xlu1 %2396  ;;  %v2388_v13 = vpop.xlane.xlu0 %2387 }
 0xc76   :  { %7956 = vpow2.f32 %v2409_v45  ;;  %v2404_v41 = vsub.f32 %v7209_v5, %v2388_v13  ;;  %v2407_v63 = vsub.f32 %v7212_v1, %v2397_v52 }
 0xc78   :  { %v2415_v39 = vmul.f32 1.442695, %v2404_v41  ;;  %v2421_v4 = vmul.f32 1.442695, %v2407_v63 }
 0xc79   :  { %v2391_v8 = vpop.xlane.xlu1 %2390  ;;  %v2394_v12 = vpop.xlane.xlu0 %2393 }
 0xc7a   :  { %7958 = vpow2.f32 %v2415_v39  ;;  %v2405_v57 = vsub.f32 %v2362_v61, %v2391_v8 }
 0xc7b   :  { %7960 = vpow2.f32 %v2411_v55 }
 0xc7c   :  { %v9432_v30 = vpop.eup %7954  ;;  %7962 = vpow2.f32 %v2421_v4  ;;  %v2417_v41 = vmul.f32 1.442695, %v2405_v57 }
 0xc7d   :  { %v2470_v40 = vpop.permute.xlu1 %2469  ;;  %v2400_v29 = vpop.xlane.xlu0 %2399  ;;  %v2431_v31 = vsel %vm586_vm2, %v9432_v30, 0.0 }
 0xc7e   :  { %7214 = vmatprep.subr.bf16.mxu1 %v2470_v40  ;;  %2432 = vadd.xlane.f32.xlu1 %v2431_v31  ;;  %v2408_v48 = vsub.f32 %v7213_v21, %v2400_v29  ;;  %7964 = vpow2.f32 %v2417_v41 }
 0xc7f   :  { %7215 = vmatpush3.bf16.msra.mxu1 %v2470_v40  ;;  %v2406_v40 = vsub.f32 %v9416_v28, %v2394_v12 }
 0xc80   :  { %v9436_v13 = vpop.eup %7956  ;;  %v2423_v63 = vmul.f32 1.442695, %v2408_v48 }
 0xc81   :  { %v2474_v52 = vpop.permute.xlu1 %2473  ;;  %v2472_v39 = vpop.permute.xlu0 %2471  ;;  %v2425_v55 = vsel %vm586_vm2, %v9436_v13, 0.0  ;;  %v2419_v29 = vmul.f32 1.442695, %v2406_v40 }
 0xc82   :  { %2426 = vadd.xlane.f32.xlu1 %v2425_v55  ;;  %7216 = vmatprep.subr.bf16.mxu1 %v2472_v39  ;;  %7966 = vpow2.f32 %v2423_v63 }
 0xc83   :  { %7217 = vmatpush3.bf16.msra.mxu1 %v2472_v39  ;;  %7968 = vpow2.f32 %v2419_v29 }
 0xc84   :  { %7218 = vmatprep.subr.bf16.mxu1 %v2474_v52  ;;  %v7959_v8 = vpop.eup %7958 }
 0xc85   :  { %v2476_v45 = vpop.permute.xlu1 %2475  ;;  %v2434_v5 = vsel %vm586_vm2, %v7959_v8, 0.0  ;;  %v7961_v46 = vpop.eup %7960 }
 0xc86   :  { %2435 = vadd.xlane.f32.xlu0 %v2434_v5  ;;  %v2428_v1 = vsel %vm586_vm2, %v7961_v46, 0.0  ;;  %v9442_v61 = vpop.eup %7962 }
 0xc87   :  { %7219 = vmatpush3.bf16.msra.mxu1 %v2474_v52  ;;  %v2443_v47 = vsel %vm586_vm2, %v9442_v61, 0.0 }
 0xc88   :  { %7220 = vmatprep.subr.bf16.mxu1 %v2476_v45  ;;  %v9447_v42 = vpop.eup %7964 }
 0xc89   :  { %v2571_v21 = vpop.permute.xlu1 %2570  ;;  %v2437_v62 = vsel %vm586_vm2, %v9447_v42, 0.0 }
 0xc8a   :  { %2429 = vadd.xlane.f32.xlu0 %v2428_v1 }
 0xc8b   :  { %7221 = vmatpush3.bf16.msra.mxu1 %v2476_v45 }
 0xc8c   :  { %7690 = vmatprep.subr.msk.bf16.mxu1 %vm496_vm1, %v2571_v21  ;;  %v9451_v4 = vpop.eup %7966 }
 0xc8d   :  { %v2446_v57 = vsel %vm586_vm2, %v9451_v4, 0.0  ;;  %v7969_v31 = vpop.eup %7968 }
 0xc8e   :  { %2444 = vadd.xlane.f32.xlu0 %v2443_v47 }
 0xc92   :  { %2438 = vadd.xlane.f32.xlu0 %v2437_v62  ;;  %v2591_v62 = vsel %vm496_vm1, %v2571_v21, 0 }
 0xc93   :  { %2574 = vrot.lane.b32.xlu1 %v11308_v14, %s8292_s6  ;;  %v2440_v14 = vsel %vm586_vm2, %v7969_v31, 0.0 }
 0xc96   :  { %2447 = vadd.xlane.f32.xlu0 %v2446_v57 }
 0xcac   :  { %2572 = vrot.lane.b32.xlu0 %v8650_v58, %s8292_s6 }
 0xcb0   :  { %2562 = vrot.lane.b32.xlu0 %v11310_v24, %s8292_s6 }
 0xcb4   :  { %2566 = vrot.lane.b32.xlu0 %v11312_v16, %s8292_s6 }
 0xcb7   :  { %2441 = vadd.xlane.f32.xlu1 %v2440_v14 }
 0xcc8   :  { %2576 = vrot.lane.b32.xlu1 %v11309_v7, %s8292_s6 }
 0xccc   :  { %2564 = vrot.lane.b32.xlu1 %v11311_v34, %s8292_s6 }
 0xcd0   :  { %2568 = vrot.lane.b32.xlu1 %v11313_v35, %s8292_s6 }
 0xd0b   :  { %v2433_v58 = vpop.xlane.xlu1 %2432 }
 0xd0f   :  { %v2427_v12 = vpop.xlane.xlu1 %2426 }
 0xd13   :  { %v2436_v28 = vpop.xlane.xlu0 %2435  ;;  %v2575_v57 = vpop.permute.xlu1 %2574 }
 0xd14   :  { %7970 = vrcp.f32 %v2436_v28 }
 0xd15   :  { %7972 = vrcp.f32 %v2427_v12 }
 0xd16   :  { %7974 = vrcp.f32 %v2433_v58 }
 0xd17   :  { %v2430_v24 = vpop.xlane.xlu0 %2429 }
 0xd18   :  { %7976 = vrcp.f32 %v2430_v24 }
 0xd1b   :  { %v2445_v16 = vpop.xlane.xlu0 %2444 }
 0xd1e   :  { %v7971_v41 = vpop.eup %7970 }
 0xd1f   :  { %v2439_v48 = vpop.xlane.xlu0 %2438  ;;  %v7973_v52 = vpop.eup %7972  ;;  %v2460_v55 = vmul.f32 %v7971_v41, %v7959_v8 }
 0xd20   :  { %v7975_v39 = vpop.eup %7974  ;;  %v2457_v34 = vmul.f32 %v7973_v52, %v9436_v13 }
 0xd21   :  { %v2459_v35 = vmul.f32 %v7975_v39, %v9432_v30  ;;  %v2597_v30 = vsel %vm496_vm1, %v2575_v57, 0 }
 0xd22   :  { %v7977_v7 = vpop.eup %7976 }
 0xd23   :  { %v2448_v63 = vpop.xlane.xlu0 %2447  ;;  %v2458_v45 = vmul.f32 %v7977_v7, %v7961_v46  ;;  %v2466_v1 = vpack.c.bf16 %v2460_v55, %v2459_v35 }
 0xd24   :  { %7978 = vrcp.f32 %v2448_v63 }
 0xd25   :  { %v2465_v5 = vpack.c.bf16 %v2458_v45, %v2457_v34  ;;  %7980 = vrcp.f32 %v2439_v48 }
 0xd26   :  { %7982 = vrcp.f32 %v2445_v16 }
 0xd27   :  { %7222 = vmatprep.mubr.msk.bf16.mxu1 %vm586_vm2, %v2465_v5  ;;  %v2573_v47 = vpop.permute.xlu0 %2572 }
 0xd28   :  { %7223 = vmatmul.mubr.msk.bf16.vlgmr.msra.gmra.mrb[76].mxu1 %vm586_vm2, %v2466_v1  ;;  %v2594_v8 = vsel %vm496_vm1, %v2573_v47, 0 }
 0xd29   :  { %7231 = vmatpush3.bf16.xpose.msra.mxu1 %v2591_v62 }
 0xd2a   :  { %7691 = vmatprep.subr.msk.bf16.mxu1 %vm496_vm1, %v2573_v47 }
 0xd2b   :  { %v2563_v52 = vpop.permute.xlu0 %2562 }
 0xd2e   :  { %v7979_v40 = vpop.eup %7978 }
 0xd2f   :  { %v7981_v29 = vpop.eup %7980  ;;  %v2464_v12 = vmul.f32 %v7979_v40, %v9451_v4  ;;  %v2567_v7 = vpop.permute.xlu0 %2566 }
 0xd30   :  { %v7983_v14 = vpop.eup %7982  ;;  %v2461_v28 = vmul.f32 %v7981_v29, %v9447_v42 }
 0xd31   :  { %7233 = vmatpush3.bf16.xpose.msra.mxu1 %v2594_v8  ;;  %v2463_v41 = vmul.f32 %v7983_v14, %v9442_v61 }
 0xd32   :  { %7692 = vmatprep.subr.msk.bf16.mxu1 %vm496_vm1, %v2575_v57 }
 0xd33   :  { %v2468_v48 = vpack.c.bf16 %v2464_v12, %v2463_v41 }
 0xd39   :  { %7235 = vmatpush3.bf16.xpose.msra.mxu1 %v2597_v30 }
 0xd44   :  { %v2442_v13 = vpop.xlane.xlu1 %2441 }
 0xd45   :  { %7984 = vrcp.f32 %v2442_v13 }
 0xd48   :  { %v2577_v46 = vpop.permute.xlu1 %2576 }
 0xd49   :  { %7693 = vmatprep.subr.msk.bf16.mxu1 %vm496_vm1, %v2577_v46  ;;  %v2600_v21 = vsel %vm496_vm1, %v2577_v46, 0 }
 0xd4a   :  { %7237 = vmatpush3.bf16.xpose.msra.mxu1 %v2600_v21 }
 0xd4c   :  { %v2565_v39 = vpop.permute.xlu1 %2564 }
 0xd4f   :  { %v7985_v58 = vpop.eup %7984 }
 0xd50   :  { %v2462_v24 = vmul.f32 %v7985_v58, %v7969_v31  ;;  %v2569_v4 = vpop.permute.xlu1 %2568 }
 0xd52   :  { %v2467_v16 = vpack.c.bf16 %v2462_v24, %v2461_v28 }
 0xd54   :  { %7226 = vmatprep.mubr.msk.bf16.mxu1 %vm586_vm2, %v2467_v16 }
 0xd55   :  { %7227 = vmatmul.mubr.msk.bf16.gmra.mrb[80].mxu1 %vm586_vm2, %v2468_v48 }
 0xd56   :  { %7238 = vmatprep.mubr.msk.bf16.mxu1 %vm496_vm1, %v2563_v52 }
 0xd5d   :  { %7239 = vmatmul.mubr.msk.bf16.vlgmr.msra.gmra.mrb[84].mxu1 %vm496_vm1, %v2565_v39 }
 0xd5e   :  { %7242 = vmatprep.mubr.msk.bf16.mxu1 %vm496_vm1, %v2567_v7 }
 0xd65   :  { %7243 = vmatmul.mubr.msk.bf16.gmra.mrb[88].mxu1 %vm496_vm1, %v2569_v4 }
 0xdfb   :  { %v9491_v42 = vpop.f32.mrb[76].mxu1 }
 0xdfc   :  { %v9493_v61 = vpop.f32.mrb[77].mxu1 }
 0xdfd   :  { %v9495_v31 = vpop.f32.mrb[78].mxu1 }
 0xdfe   :  { %v2559_v55 = vpack.c.bf16 %v9495_v31, %v9491_v42  ;;  %v9499_v63 = vpop.f32.mrb[79].mxu1 }
 0xdff   :  { %v2558_v34 = vpack.c.bf16 %v9499_v63, %v9493_v61 }
 0xe28   :  { %v9503_v45 = vpop.f32.mrb[80].mxu1 }
 0xe29   :  { %v9505_v35 = vpop.f32.mrb[81].mxu1 }
 0xe2a   :  { %v9507_v5 = vpop.f32.mrb[82].mxu1 }
 0xe2b   :  { %v9511_v47 = vpop.f32.mrb[83].mxu1 }
 0xe30   :  { %v7240_v8 = vpop.f32.mrb[84].mxu1 }
 0xe31   :  { %v2636_v57 = vpop.f32.mrb[85].mxu1  ;;  %v2673_v40 = vsel %vm586_vm2, %v7240_v8, -inf }
 0xe32   :  { %v7241_v30 = vpop.f32.mrb[86].mxu1  ;;  %v2667_v13 = vsel %vm586_vm2, %v2636_v57, -inf }
 0xe33   :  { %2668 = vmax.xlane.f32.xlu0 %v2667_v13  ;;  %v2639_v46 = vpop.f32.mrb[87].mxu1  ;;  %v2676_v12 = vsel %vm586_vm2, %v7241_v30, -inf }
 0xe34   :  { %v2670_v21 = vsel %vm586_vm2, %v2639_v46, -inf }
 0xe35   :  { %2671 = vmax.xlane.f32.xlu1 %v2670_v21 }
 0xe37   :  { %2674 = vmax.xlane.f32.xlu0 %v2673_v40 }
 0xe38   :  { %v7244_v29 = vpop.f32.mrb[88].mxu1 }
 0xe39   :  { %v2652_v14 = vpop.f32.mrb[89].mxu1  ;;  %v2685_v41 = vsel %vm586_vm2, %v7244_v29, -inf }
 0xe3a   :  { %v7245_v58 = vpop.f32.mrb[90].mxu1  ;;  %v2679_v28 = vsel %vm586_vm2, %v2652_v14, -inf }
 0xe3b   :  { %2677 = vmax.xlane.f32.xlu0 %v2676_v12  ;;  %2680 = vmax.xlane.f32.xlu1 %v2679_v28  ;;  %v2655_v24 = vpop.f32.mrb[91].mxu1  ;;  %v2688_v48 = vsel %vm586_vm2, %v7245_v58, -inf }
 0xe3c   :  { %v2682_v16 = vsel %vm586_vm2, %v2655_v24, -inf }
 0xe3f   :  { %2686 = vmax.xlane.f32.xlu1 %v2685_v41  ;;  %2683 = vmax.xlane.f32.xlu0 %v2682_v16 }
 0xe43   :  { %2689 = vmax.xlane.f32.xlu0 %v2688_v48 }
 0xe50   :  { %2759 = vrot.lane.b32.xlu1 %v8714_v2, %s8292_s6 }
 0xe54   :  { %2763 = vrot.lane.b32.xlu1 %v8723_v32, %s8292_s6 }
 0xe58   :  { %2765 = vrot.lane.b32.xlu1 %v8720_v20, %s8292_s6 }
 0xe59   :  { %2761 = vrot.lane.b32.xlu0 %v8712_v0, %s8292_s6 }
 0xec0   :  { %v2669_v52 = vpop.xlane.xlu0 %2668 }
 0xec1   :  { %v2691_v39 = vsub.f32 %v2636_v57, %v2669_v52 }
 0xec2   :  { %v2672_v7 = vpop.xlane.xlu1 %2671 }
 0xec3   :  { %v2699_v21 = vmul.f32 1.442695, %v2691_v39  ;;  %v2692_v12 = vsub.f32 %v2639_v46, %v2672_v7 }
 0xec4   :  { %v2675_v4 = vpop.xlane.xlu0 %2674 }
 0xec5   :  { %v2693_v13 = vsub.f32 %v7240_v8, %v2675_v4  ;;  %v2701_v48 = vmul.f32 1.442695, %v2692_v12 }
 0xec7   :  { %v2703_v40 = vmul.f32 1.442695, %v2693_v13 }
 0xec8   :  { %v2681_v28 = vpop.xlane.xlu1 %2680  ;;  %v2678_v41 = vpop.xlane.xlu0 %2677 }
 0xec9   :  { %7986 = vpow2.f32 %v2703_v40  ;;  %v2694_v2 = vsub.f32 %v7241_v30, %v2678_v41  ;;  %v2695_v32 = vsub.f32 %v2652_v14, %v2681_v28 }
 0xeca   :  { %7988 = vpow2.f32 %v2699_v21 }
 0xecb   :  { %v2705_v16 = vmul.f32 1.442695, %v2694_v2  ;;  %v2707_v0 = vmul.f32 1.442695, %v2695_v32 }
 0xecc   :  { %v2687_v20 = vpop.xlane.xlu1 %2686  ;;  %v2684_v62 = vpop.xlane.xlu0 %2683 }
 0xecd   :  { %v2697_v1 = vsub.f32 %v7244_v29, %v2687_v20  ;;  %7990 = vpow2.f32 %v2705_v16  ;;  %v2696_v52 = vsub.f32 %v2655_v24, %v2684_v62 }
 0xece   :  { %7992 = vpow2.f32 %v2701_v48 }
 0xecf   :  { %v2711_v57 = vmul.f32 1.442695, %v2697_v1  ;;  %v2709_v14 = vmul.f32 1.442695, %v2696_v52  ;;  %v11327_v52 = vpack.c.bf16 %v9119_v44, %v9115_v3  ;;  %v11331_v3 = vpack.c.bf16 %v9123_v18, %v9117_v26  ;;  %v11340_v18 = vld [vmem:[#allocation27_spill] sm:$0xff] }
 0xed0   :  { %v2760_v8 = vpop.permute.xlu1 %2759  ;;  %v2690_v39 = vpop.xlane.xlu0 %2689  ;;  %v11336_v26 = vpack.c.bf16 %v9391_v33, %v9387_v15  ;;  %v11337_v44 = vpack.c.bf16 %v9135_v37, %v9129_v60  ;;  %v11344_v37 = vld [vmem:[#allocation28_spill] sm:$0xff] }
 0xed1   :  { %7994 = vpow2.f32 %v2711_v57  ;;  %v2698_v46 = vsub.f32 %v7245_v58, %v2690_v39  ;;  %7246 = vmatprep.subr.bf16.mxu0 %v2760_v8  ;;  %v11326_v57 = vpack.c.bf16 %v9095_v23, %v9091_v11  ;;  %v11329_v39 = vpack.c.bf16 %v9099_v53, %v9093_v10  ;;  %v7740_v11 = vld [vmem:[%s11198_s7] sm:$0xff]  }
 0xed2   :  { %7247 = vmatpush3.bf16.msra.mxu0 %v2760_v8  ;;  %7996 = vpow2.f32 %v2707_v0  ;;  %v11328_v8 = vpack.c.bf16 %v9207_v27, %v9203_v6  ;;  %v11330_v23 = vpack.c.bf16 %v9107_v56, %v9103_v17  ;;  %v11332_v10 = vpack.c.bf16 %v9131_v22, %v9127_v50  ;;  %v11341_v50 = vld [vmem:[#allocation26_spill] sm:$0xff]  ;;  %v11343_v22 = vld [vmem:[#allocation29_spill] sm:$0xff] }
 0xed3   :  { %v9531_v7 = vpop.eup %7986  ;;  %v2713_v30 = vmul.f32 1.442695, %v2698_v46  ;;  %v11333_v53 = vpack.c.bf16 %v9211_v38, %v9205_v59  ;;  %v11334_v17 = vpack.c.bf16 %v9219_v19, %v9215_v9  ;;  %v11335_v56 = vpack.c.bf16 %v9111_v51, %v9105_v49 }
 0xed4   :  { %v2764_v4 = vpop.permute.xlu1 %2763  ;;  %v2762_v13 = vpop.permute.xlu0 %2761  ;;  %v2721_v29 = vsel %vm586_vm2, %v9531_v7, 0.0  ;;  %v11338_v49 = vpack.c.bf16 %v9223_v54, %v9217_v36  ;;  %v11339_v51 = vpack.c.bf16 %v9403_v43, %v9399_v25  ;;  %v11342_v60 = vpack.c.bf16 %v11340_v18, %v11341_v50 }
 0xed5   :  { %v9535_v21 = vpop.eup %7988  ;;  %7998 = vpow2.f32 %v2713_v30  ;;  %2722 = vadd.xlane.f32.xlu1 %v2721_v29  ;;  %7248 = vmatprep.subr.bf16.mxu0 %v2762_v13  ;;  %v11345_v6 = vpack.c.bf16 %v11343_v22, %v11344_v37 }
 0xed6   :  { %7249 = vmatpush3.bf16.msra.mxu0 %v2762_v13  ;;  %8000 = vpow2.f32 %v2709_v14  ;;  %v2715_v62 = vsel %vm586_vm2, %v9535_v21, 0.0  ;;  %v7741_v13 = vld [vmem:[%s11198_s7 + $0x8] sm:$0xff]  }
 0xed7   :  { %7250 = vmatprep.subr.bf16.mxu0 %v2764_v4  ;;  %v9537_v1 = vpop.eup %7990 }
 0xed8   :  { %v2724_v58 = vsel %vm586_vm2, %v9537_v1, 0.0  ;;  %v9543_v24 = vpop.eup %7992  ;;  %v2766_v40 = vpop.permute.xlu1 %2765 }
 0xed9   :  { %2716 = vadd.xlane.f32.xlu1 %v2715_v62  ;;  %2725 = vadd.xlane.f32.xlu0 %v2724_v58  ;;  %v2718_v2 = vsel %vm586_vm2, %v9543_v24, 0.0 }
 0xeda   :  { %7251 = vmatpush3.bf16.msra.mxu0 %v2764_v4 }
 0xedb   :  { %v9545_v12 = vpop.eup %7994  ;;  %7252 = vmatprep.subr.bf16.mxu0 %v2766_v40 }
 0xedc   :  { %v2733_v28 = vsel %vm586_vm2, %v9545_v12, 0.0  ;;  %v9549_v41 = vpop.eup %7996 }
 0xedd   :  { %2734 = vadd.xlane.f32.xlu1 %v2733_v28  ;;  %2719 = vadd.xlane.f32.xlu0 %v2718_v2  ;;  %v2727_v16 = vsel %vm586_vm2, %v9549_v41, 0.0 }
 0xede   :  { %7253 = vmatpush3.bf16.msra.mxu0 %v2766_v40 }
 0xedf   :  { %v9553_v32 = vpop.eup %7998  ;;  %7262 = vmatprep.subr.bf16.mxu0 %v7740_v11 }
 0xee0   :  { %v2736_v48 = vsel %vm586_vm2, %v9553_v32, 0.0  ;;  %v9559_v20 = vpop.eup %8000 }
 0xee1   :  { %2728 = vadd.xlane.f32.xlu1 %v2727_v16  ;;  %2737 = vadd.xlane.f32.xlu0 %v2736_v48  ;;  %v2730_v0 = vsel %vm586_vm2, %v9559_v20, 0.0 }
 0xee5   :  { %2731 = vadd.xlane.f32.xlu0 %v2730_v0  ;;  %v11346_v0 = vld [vmem:[#allocation19_spill] sm:$0xff] }
 0xef2   :  { %1648 = vrot.lane.b32.xlu1 %v11326_v57, %s8293_s27  ;;  %v11347_v57 = vld [vmem:[#allocation17_spill] sm:$0xff] }
 0xef6   :  { %1660 = vrot.lane.b32.xlu1 %v11327_v52, %s8294_s28  ;;  %v11348_v52 = vpack.c.bf16 %v11346_v0, %v11347_v57 }
 0xefa   :  { %1672 = vrot.lane.b32.xlu1 %v11328_v8, %s8295_s29 }
 0xefb   :  { %1646 = vrot.lane.b32.xlu0 %v11329_v39, %s8293_s27 }
 0xefe   :  { %1652 = vrot.lane.b32.xlu1 %v11330_v23, %s8293_s27  ;;  %v11349_v23 = vld [vmem:[#allocation18_spill] sm:$0xff] }
 0xeff   :  { %1658 = vrot.lane.b32.xlu0 %v11331_v3, %s8294_s28  ;;  %v11350_v3 = vld [vmem:[#allocation16_spill] sm:$0xff] }
 0xf02   :  { %1664 = vrot.lane.b32.xlu1 %v11332_v10, %s8294_s28  ;;  %v11351_v10 = vpack.c.bf16 %v11349_v23, %v11350_v3 }
 0xf03   :  { %1670 = vrot.lane.b32.xlu0 %v11333_v53, %s8295_s29 }
 0xf06   :  { %1676 = vrot.lane.b32.xlu1 %v11334_v17, %s8295_s29 }
 0xf07   :  { %1650 = vrot.lane.b32.xlu0 %v11335_v56, %s8293_s27 }
 0xf0a   :  { %2858 = vrot.lane.b32.xlu1 %v11336_v26, %s8293_s27  ;;  %v11352_v26 = vld [vmem:[#allocation23_spill] sm:$0xff] }
 0xf0b   :  { %1662 = vrot.lane.b32.xlu0 %v11337_v44, %s8294_s28  ;;  %v11353_v44 = vld [vmem:[#allocation21_spill] sm:$0xff] }
 0xf0e   :  { %2870 = vrot.lane.b32.xlu1 %v2559_v55, %s8294_s28 }
 0xf0f   :  { %1674 = vrot.lane.b32.xlu0 %v11338_v49, %s8295_s29  ;;  %v11354_v49 = vpack.c.bf16 %v11352_v26, %v11353_v44  ;;  %v11360_v26 = vld [vmem:[#allocation12_spill] sm:$0xff]  ;;  %v11361_v44 = vld [vmem:[#allocation14_spill] sm:$0xff] }
 0xf12   :  { %2862 = vrot.lane.b32.xlu1 %v11339_v51, %s8293_s27 }
 0xf13   :  { %2856 = vrot.lane.b32.xlu0 %v11342_v60, %s8293_s27 }
 0xf17   :  { %2868 = vrot.lane.b32.xlu0 %v2558_v34, %s8294_s28 }
 0xf1b   :  { %2860 = vrot.lane.b32.xlu0 %v11345_v6, %s8293_s27  ;;  %v11355_v6 = vld [vmem:[#allocation22_spill] sm:$0xff] }
 0xf62   :  { %v2723_v59 = vpop.xlane.xlu1 %2722 }
 0xf66   :  { %v2717_v27 = vpop.xlane.xlu1 %2716  ;;  %v2726_v38 = vpop.xlane.xlu0 %2725 }
 0xf67   :  { %8002 = vrcp.f32 %v2726_v38 }
 0xf68   :  { %8004 = vrcp.f32 %v2717_v27 }
 0xf69   :  { %8006 = vrcp.f32 %v2723_v59  ;;  %v11356_v59 = vld [vmem:[#allocation20_spill] sm:$0xff] }
 0xf6a   :  { %v2735_v9 = vpop.xlane.xlu1 %2734  ;;  %v2720_v36 = vpop.xlane.xlu0 %2719  ;;  %v11357_v27 = vpack.c.bf16 %v11355_v6, %v11356_v59 }
 0xf6b   :  { %8008 = vrcp.f32 %v2720_v36 }
 0xf6e   :  { %v2729_v19 = vpop.xlane.xlu1 %2728  ;;  %v2738_v54 = vpop.xlane.xlu0 %2737 }
 0xf6f   :  { %8010 = vrcp.f32 %v2738_v54  ;;  %v7743_v54 = vld [vmem:[%s11199_s11 + $0x8] sm:$0xff]  }
 0xf70   :  { %8012 = vrcp.f32 %v2729_v19  ;;  %v7742_v19 = vld [vmem:[%s11199_s11] sm:$0xff]  }
 0xf71   :  { %v8003_v33 = vpop.eup %8002  ;;  %8014 = vrcp.f32 %v2735_v9 }
 0xf72   :  { %v1649_v15 = vpop.permute.xlu1 %1648  ;;  %v2732_v25 = vpop.xlane.xlu0 %2731  ;;  %v2750_v31 = vmul.f32 %v8003_v33, %v9537_v1  ;;  %v7745_v33 = vld [vmem:[%s11199_s11 + $0x10] sm:$0xff]  }
 0xf73   :  { %v8005_v43 = vpop.eup %8004  ;;  %8016 = vrcp.f32 %v2732_v25  ;;  %v1683_v53 = vsel %vm496_vm1, %v11351_v10, %v1649_v15  ;;  %v7744_v15 = vld [vmem:[%s11200_s9] sm:$0xff]  }
 0xf74   :  { %v8007_v42 = vpop.eup %8006  ;;  %v2747_v63 = vmul.f32 %v8005_v43, %v9535_v21  ;;  %7282 = vmatprep.subr.bf16.mxu1 %v7744_v15  ;;  %v7746_v43 = vld [vmem:[%s11200_s9 + $0x8] sm:$0xff]  }
 0xf75   :  { %v8009_v61 = vpop.eup %8008  ;;  %v2749_v46 = vmul.f32 %v8007_v42, %v9531_v7  ;;  %7283 = vmatpush3.bf16.msra.mxu1 %v7744_v15  ;;  %v11367_v15 = vld [vmem:[#allocation10_spill] sm:$0xff] }
 0xf76   :  { %v1647_v55 = vpop.permute.xlu0 %1646  ;;  %v2748_v34 = vmul.f32 %v8009_v61, %v9543_v24  ;;  %v1661_v30 = vpop.permute.xlu1 %1660  ;;  %7284 = vmatprep.subr.bf16.mxu1 %v7746_v43 }
 0xf77   :  { %v2756_v4 = vpack.c.bf16 %v2750_v31, %v2749_v46  ;;  %v1680_v8 = vsel %vm496_vm1, %v11348_v52, %v1647_v55  ;;  %v1694_v17 = vsel %vm1690_vm3, %v1683_v53, %v1661_v30  ;;  %v7749_v30 = vld [vmem:[%s11200_s9 + $0x18] sm:$0xff]  }
 0xf78   :  { %v2755_v14 = vpack.c.bf16 %v2748_v34, %v2747_v63  ;;  %v7747_v63 = vld [vmem:[%s11200_s9 + $0x10] sm:$0xff]   ;;  %v7748_v34 = vld [vmem:[%s11199_s11 + $0x18] sm:$0xff]  }
 0xf79   :  { %v8011_v29 = vpop.eup %8010  ;;  %7285 = vmatpush3.bf16.msra.mxu1 %v7746_v43 }
 0xf7a   :  { %7254 = vmatprep.mubr.msk.bf16.mxu0 %vm586_vm2, %v2755_v14  ;;  %v1659_v62 = vpop.permute.xlu0 %1658  ;;  %v8013_v58 = vpop.eup %8012  ;;  %v2754_v7 = vmul.f32 %v8011_v29, %v9553_v32  ;;  %7286 = vmatprep.subr.bf16.mxu1 %v7747_v63 }
 0xf7b   :  { %7255 = vmatmul.mubr.msk.bf16.vlgmr.msra.gmra.mrb[76].mxu0 %vm586_vm2, %v2756_v4  ;;  %v8015_v1 = vpop.eup %8014  ;;  %v1673_v24 = vpop.permute.xlu1 %1672  ;;  %v2751_v28 = vmul.f32 %v8013_v58, %v9549_v41  ;;  %v1692_v32 = vsel %vm1690_vm3, %v1680_v8, %v1659_v62  ;;  %v11358_v4 = vpack.c.bf16 %v9507_v5, %v9503_v45  ;;  %v11359_v62 = vpack.c.bf16 %v9511_v47, %v9505_v35  ;;  %v9720_v45 = vld [vmem:[%s11201_s8] ss:$0 sm:$0xff] }
 0xf7c   :  { %7263 = vmatpush3.bf16.msra.mxu0 %v7740_v11  ;;  %v2753_v16 = vmul.f32 %v8015_v1, %v9545_v12  ;;  %v1703_v18 = vsel %vm1699_vm4, %v1694_v17, %v1673_v24 }
 0xf7d   :  { %v8017_v21 = vpop.eup %8016  ;;  %7264 = vmatprep.subr.bf16.mxu0 %v7741_v13  ;;  %7287 = vmatpush3.bf16.msra.mxu1 %v7747_v63 }
 0xf7e   :  { %v1671_v40 = vpop.permute.xlu0 %1670  ;;  %v2752_v2 = vmul.f32 %v8017_v21, %v9559_v20  ;;  %v2758_v39 = vpack.c.bf16 %v2754_v7, %v2753_v16  ;;  %7288 = vmatprep.subr.bf16.mxu1 %v7749_v30 }
 0xf7f   :  { %v1653_v41 = vpop.permute.xlu1 %1652  ;;  %v1701_v20 = vsel %vm1699_vm4, %v1692_v32, %v1671_v40 }
 0xf80   :  { %v2757_v48 = vpack.c.bf16 %v2752_v2, %v2751_v28  ;;  %7265 = vmatpush3.bf16.msra.mxu0 %v7741_v13  ;;  %v1689_v38 = vsel %vm496_vm1, %v11357_v27, %v1653_v41 }
 0xf81   :  { %7306 = vmatprep.subr.bf16.mxu0 %v7742_v19  ;;  %7289 = vmatpush3.bf16.msra.mxu1 %v7749_v30 }
 0xf82   :  { %7258 = vmatprep.mubr.msk.bf16.mxu0 %vm586_vm2, %v2757_v48  ;;  %v1651_v11 = vpop.permute.xlu0 %1650 }
 0xf83   :  { %7259 = vmatmul.mubr.msk.bf16.gmra.mrb[80].mxu0 %vm586_vm2, %v2758_v39  ;;  %v1665_v56 = vpop.permute.xlu1 %1664  ;;  %v1686_v51 = vsel %vm496_vm1, %v11354_v49, %v1651_v11  ;;  %v11362_v49 = vpack.c.bf16 %v11360_v26, %v11361_v44 }
 0xf84   :  { %7266 = vmatprep.mubr.msk.bf16.mxu0 %vm110_vm0, %v1701_v20  ;;  %v1698_v9 = vsel %vm1690_vm3, %v1689_v38, %v1665_v56 }
 0xf86   :  { %v1663_v12 = vpop.permute.xlu0 %1662 }
 0xf87   :  { %v1696_v50 = vsel %vm1690_vm3, %v1686_v51, %v1663_v12  ;;  %v1677_v37 = vpop.permute.xlu1 %1676 }
 0xf88   :  { %v1707_v36 = vsel %vm1699_vm4, %v1698_v9, %v1677_v37 }
 0xf8a   :  { %v1675_v60 = vpop.permute.xlu0 %1674 }
 0xf8b   :  { %v1705_v22 = vsel %vm1699_vm4, %v1696_v50, %v1675_v60  ;;  %7267 = vmatmul.mubr.msk.bf16.vlgmr.msra.gmra.mrb[84].mxu0 %vm110_vm0, %v1703_v18  ;;  %v2859_v23 = vpop.permute.xlu1 %2858  ;;  %v11363_v50 = vld [vmem:[#allocation13_spill] sm:$0xff]  ;;  %v11364_v60 = vld [vmem:[#allocation15_spill] sm:$0xff] }
 0xf8c   :  { %7270 = vmatprep.mubr.msk.bf16.mxu0 %vm110_vm0, %v1705_v22  ;;  %7307 = vmatpush3.bf16.msra.mxu0 %v7742_v19  ;;  %v11365_v22 = vpack.c.bf16 %v11363_v50, %v11364_v60  ;;  %v9826_v60 = vld [vmem:[%s11204_s12] ss:$0 sm:$0xff] }
 0xf8d   :  { %7308 = vmatprep.subr.bf16.mxu0 %v7743_v54 }
 0xf8e   :  { %v2857_v3 = vpop.permute.xlu0 %2856  ;;  %v2893_v37 = vsel %vm496_vm1, %v11365_v22, %v2859_v23 }
 0xf8f   :  { %v2871_v10 = vpop.permute.xlu1 %2870  ;;  %v2890_v51 = vsel %vm496_vm1, %v11362_v49, %v2857_v3 }
 0xf90   :  { %7309 = vmatpush3.bf16.msra.mxu0 %v7743_v54  ;;  %v2903_v27 = vsel %vm1690_vm3, %v2893_v37, %v2871_v10  ;;  %v11366_v54 = vld [vmem:[#allocation25_spill] sm:$0xff] }
 0xf91   :  { %7310 = vmatprep.subr.bf16.mxu0 %v7745_v33 }
 0xf92   :  { %v2869_v53 = vpop.permute.xlu0 %2868 }
 0xf93   :  { %7271 = vmatmul.mubr.msk.bf16.gmra.mrb[88].mxu0 %vm110_vm0, %v1707_v36  ;;  %v2863_v17 = vpop.permute.xlu1 %2862  ;;  %v2901_v6 = vsel %vm1690_vm3, %v2890_v51, %v2869_v53 }
 0xf94   :  { %7311 = vmatpush3.bf16.msra.mxu0 %v7745_v33  ;;  %v11368_v33 = vpack.c.bf16 %v11366_v54, %v11367_v15 }
 0xf95   :  { %7312 = vmatprep.subr.bf16.mxu0 %v7748_v34 }
 0xf96   :  { %v2861_v56 = vpop.permute.xlu0 %2860 }
 0xf98   :  { %7313 = vmatpush3.bf16.msra.mxu0 %v7748_v34 }
0x104e   :  { %v7256_v25 = vpop.f32.mrb[76].mxu0 }
0x104f   :  { %v2817_v42 = vpop.f32.mrb[77].mxu0 }
0x1050   :  { %v7257_v61 = vpop.f32.mrb[78].mxu0 }
0x1051   :  { %v2849_v31 = vpack.c.bf16 %v7257_v61, %v7256_v25  ;;  %v2820_v55 = vpop.f32.mrb[79].mxu0  ;;  %v2896_v25 = vsel %vm496_vm1, %v11368_v33, %v2861_v56  ;;  %v11370_v61 = vld [vmem:[#allocation11_spill] sm:$0xff] }
0x1052   :  { %v2848_v46 = vpack.c.bf16 %v2820_v55, %v2817_v42  ;;  %v11369_v42 = vld [vmem:[#allocation24_spill] sm:$0xff] }
0x1053   :  { %2882 = vrot.lane.b32.xlu1 %v2849_v31, %s8295_s29  ;;  %v11371_v31 = vpack.c.bf16 %v11369_v42, %v11370_v61 }
0x1054   :  { %2880 = vrot.lane.b32.xlu0 %v2848_v46, %s8295_s29 }
0x1055   :  { %v2899_v55 = vsel %vm496_vm1, %v11371_v31, %v2863_v17 }
0x1056   :  { %v7260_v14 = vpop.f32.mrb[80].mxu0 }
0x1057   :  { %2874 = vrot.lane.b32.xlu1 %v11358_v4, %s8294_s28  ;;  %v2833_v13 = vpop.f32.mrb[81].mxu0 }
0x1058   :  { %v7261_v29 = vpop.f32.mrb[82].mxu0  ;;  %2872 = vrot.lane.b32.xlu0 %v11359_v62, %s8294_s28 }
0x1059   :  { %v2851_v58 = vpack.c.bf16 %v7261_v29, %v7260_v14  ;;  %v2836_v1 = vpop.f32.mrb[83].mxu0  ;;  %v11372_v29 = vld [vmem:[#allocation4_spill] sm:$0xff] }
0x105a   :  { %v2850_v21 = vpack.c.bf16 %v2836_v1, %v2833_v13 }
0x105b   :  { %2886 = vrot.lane.b32.xlu1 %v2851_v58, %s8295_s29  ;;  %v11374_v58 = vld [vmem:[#allocation5_spill] sm:$0xff] }
0x105c   :  { %2884 = vrot.lane.b32.xlu0 %v2850_v21, %s8295_s29 }
0x105e   :  { %v7268_v24 = vpop.f32.mrb[84].mxu0 }
0x105f   :  { %v2989_v5 = vpop.f32.mrb[85].mxu0  ;;  %v2998_v40 = vadd.f32 %v7268_v24, %v9720_v45 }
0x1060   :  { %v7269_v7 = vpop.f32.mrb[86].mxu0  ;;  %v2990_v28 = vadd.f32 %v9720_v45, %v2989_v5  ;;  %v11376_v5 = vld [vmem:[#allocation6_spill] sm:$0xff] }
0x1061   :  { %v3001_v35 = vadd.f32 %v7269_v7, %v9720_v45  ;;  %v2992_v47 = vpop.f32.mrb[87].mxu0 }
0x1062   :  { %v2993_v2 = vadd.f32 %v9720_v45, %v2992_v47  ;;  %v7750_v47 = vld [vmem:[%s11202_s13] sm:$0xff]  }
0x1063   :  { %v3053_v16 = vpack.c.bf16 %v3001_v35, %v2998_v40  ;;  %v11378_v40 = vld [vmem:[#allocation8_spill] sm:$0xff]  ;;  %7330 = vmatprep.subr.bf16.mxu1 %v7750_v47 }
0x1064   :  { %v3052_v48 = vpack.c.bf16 %v2993_v2, %v2990_v28  ;;  %v7751_v2 = vld [vmem:[%s11202_s13 + $0x8] sm:$0xff]  }
0x1065   :  { %3070 = vrot.lane.b32.xlu1 %v3053_v16, %s8296_s2 }
0x1066   :  { %3068 = vrot.lane.b32.xlu0 %v3052_v48, %s8296_s2  ;;  %v7272_v0 = vpop.f32.mrb[88].mxu0 }
0x1067   :  { %v3005_v57 = vpop.f32.mrb[89].mxu0  ;;  %v3014_v8 = vadd.f32 %v7272_v0, %v9720_v45 }
0x1068   :  { %v7273_v52 = vpop.f32.mrb[90].mxu0  ;;  %v3006_v11 = vadd.f32 %v9720_v45, %v3005_v57 }
0x1069   :  { %v3017_v39 = vadd.f32 %v7273_v52, %v9720_v45  ;;  %v3008_v32 = vpop.f32.mrb[91].mxu0 }
0x106a   :  { %v3009_v41 = vadd.f32 %v9720_v45, %v3008_v32  ;;  %v7752_v32 = vld [vmem:[%s11202_s13 + $0x10] sm:$0xff]  }
0x106b   :  { %v3055_v20 = vpack.c.bf16 %v3017_v39, %v3014_v8 }
0x106c   :  { %v3054_v12 = vpack.c.bf16 %v3009_v41, %v3006_v11 }
0x106d   :  { %3074 = vrot.lane.b32.xlu1 %v3055_v20, %s8296_s2  ;;  %v7753_v20 = vld [vmem:[%s11202_s13 + $0x18] sm:$0xff]  }
0x106e   :  { %3072 = vrot.lane.b32.xlu0 %v3054_v12, %s8296_s2 }
0x10c5   :  { %v2883_v18 = vpop.permute.xlu1 %2882 }
0x10c6   :  { %v2881_v59 = vpop.permute.xlu0 %2880  ;;  %v2911_v9 = vsel %vm1699_vm4, %v2903_v27, %v2883_v18  ;;  %v9821_v18 = vld [vmem:[%s11203_s10] ss:$0 sm:$0xff] }
0x10c7   :  { %v2909_v38 = vsel %vm1699_vm4, %v2901_v6, %v2881_v59 }
0x10c8   :  { %7274 = vmatprep.mubr.msk.bf16.mxu0 %vm110_vm0, %v2909_v38 }
0x10c9   :  { %v2875_v36 = vpop.permute.xlu1 %2874  ;;  %7275 = vmatmul.mubr.msk.bf16.gmra.mrb[92].mxu0 %vm110_vm0, %v2911_v9 }
0x10ca   :  { %v2873_v19 = vpop.permute.xlu0 %2872  ;;  %v2907_v46 = vsel %vm1690_vm3, %v2899_v55, %v2875_v36 }
0x10cb   :  { %v2905_v63 = vsel %vm1690_vm3, %v2896_v25, %v2873_v19 }
0x10cd   :  { %v2887_v43 = vpop.permute.xlu1 %2886 }
0x10ce   :  { %v2885_v34 = vpop.permute.xlu0 %2884  ;;  %v2915_v14 = vsel %vm1699_vm4, %v2907_v46, %v2887_v43 }
0x10cf   :  { %v2913_v30 = vsel %vm1699_vm4, %v2905_v63, %v2885_v34 }
0x10d0   :  { %7278 = vmatprep.mubr.msk.bf16.mxu0 %vm110_vm0, %v2913_v30 }
0x10d1   :  { %7279 = vmatmul.mubr.msk.bf16.gmra.mrb[96].mxu0 %vm110_vm0, %v2915_v14 }
0x10d7   :  { %v3071_v4 = vpop.permute.xlu1 %3070 }
0x10d8   :  { %v3069_v13 = vpop.permute.xlu0 %3068  ;;  %v9768_v1 = vsel %vm110_vm0, %v11374_v58, %v3071_v4 }
0x10d9   :  { %v9764_v62 = vsel %vm110_vm0, %v11372_v29, %v3069_v13  ;;  %11375 = vst [vmem:[#allocation26_spill] sm:$0xff] %v9768_v1 }
0x10da   :  { %11373 = vst [vmem:[#allocation27_spill] sm:$0xff] %v9764_v62  ;;  %7290 = vmatprep.mubr.msk.bf16.mxu1 %vm586_vm2, %v9764_v62  ;;  %7314 = vmatprep.mubr.msk.bf16.mxu0 %vm586_vm2, %v9764_v62 }
0x10db   :  { %7291 = vmatmul.mubr.msk.bf16.vlgmr.msra.gmra.mrb[92].mxu1 %vm586_vm2, %v9768_v1  ;;  %7315 = vmatmul.mubr.msk.bf16.vlgmr.msra.gmra.mrb[100].mxu0 %vm586_vm2, %v9768_v1 }
0x10dc   :  { %7331 = vmatpush3.bf16.msra.mxu1 %v7750_v47 }
0x10dd   :  { %7332 = vmatprep.subr.bf16.mxu1 %v7751_v2 }
0x10df   :  { %v3075_v21 = vpop.permute.xlu1 %3074 }
0x10e0   :  { %v3073_v24 = vpop.permute.xlu0 %3072  ;;  %v9784_v35 = vsel %vm110_vm0, %v11378_v40, %v3075_v21  ;;  %7333 = vmatpush3.bf16.msra.mxu1 %v7751_v2 }
0x10e1   :  { %v9780_v7 = vsel %vm110_vm0, %v11376_v5, %v3073_v24  ;;  %11379 = vst [vmem:[#allocation28_spill] sm:$0xff] %v9784_v35  ;;  %7334 = vmatprep.subr.bf16.mxu1 %v7752_v32 }
0x10e2   :  { %11377 = vst [vmem:[#allocation29_spill] sm:$0xff] %v9780_v7  ;;  %7294 = vmatprep.mubr.msk.bf16.mxu1 %vm586_vm2, %v9780_v7  ;;  %7318 = vmatprep.mubr.msk.bf16.mxu0 %vm586_vm2, %v9780_v7 }
0x10e3   :  { %7295 = vmatmul.mubr.msk.bf16.gmra.mrb[96].mxu1 %vm586_vm2, %v9784_v35  ;;  %7319 = vmatmul.mubr.msk.bf16.gmra.mrb[104].mxu0 %vm586_vm2, %v9784_v35 }
0x10e4   :  { %7335 = vmatpush3.bf16.msra.mxu1 %v7752_v32 }
0x10e5   :  { %7336 = vmatprep.subr.bf16.mxu1 %v7753_v20 }
0x10e8   :  { %7337 = vmatpush3.bf16.msra.mxu1 %v7753_v20 }
0x119c   :  { %v7276_v28 = vpop.f32.mrb[92].mxu0 }
0x119d   :  { %v3021_v16 = vpop.f32.mrb[93].mxu0  ;;  %v3030_v0 = vadd.f32 %v7276_v28, %v9720_v45 }
0x119e   :  { %v7277_v48 = vpop.f32.mrb[94].mxu0  ;;  %v3022_v8 = vadd.f32 %v9720_v45, %v3021_v16 }
0x119f   :  { %v3033_v57 = vadd.f32 %v7277_v48, %v9720_v45  ;;  %v3024_v52 = vpop.f32.mrb[95].mxu0 }
0x11a0   :  { %v3025_v39 = vadd.f32 %v9720_v45, %v3024_v52 }
0x11a1   :  { %v3057_v11 = vpack.c.bf16 %v3033_v57, %v3030_v0 }
0x11a2   :  { %v3056_v41 = vpack.c.bf16 %v3025_v39, %v3022_v8 }
0x11a3   :  { %3078 = vrot.lane.b32.xlu1 %v3057_v11, %s8296_s2 }
0x11a4   :  { %3076 = vrot.lane.b32.xlu0 %v3056_v41, %s8296_s2  ;;  %v7280_v12 = vpop.f32.mrb[96].mxu0  ;;  %v11380_v41 = vld [vmem:[#allocation7_spill] sm:$0xff] }
0x11a5   :  { %v3037_v23 = vpop.f32.mrb[97].mxu0  ;;  %v3046_v10 = vadd.f32 %v7280_v12, %v9720_v45  ;;  %v11382_v12 = vld [vmem:[#allocation9_spill] sm:$0xff] }
0x11a6   :  { %v7281_v3 = vpop.f32.mrb[98].mxu0  ;;  %v3038_v56 = vadd.f32 %v9720_v45, %v3037_v23 }
0x11a7   :  { %v3049_v53 = vadd.f32 %v7281_v3, %v9720_v45  ;;  %v3040_v17 = vpop.f32.mrb[99].mxu0 }
0x11a8   :  { %v3041_v26 = vadd.f32 %v9720_v45, %v3040_v17 }
0x11a9   :  { %v3059_v44 = vpack.c.bf16 %v3049_v53, %v3046_v10  ;;  %v11384_v53 = vld [vmem:[#allocation2_spill] sm:$0xff] }
0x11aa   :  { %v3058_v49 = vpack.c.bf16 %v3041_v26, %v3038_v56  ;;  %v11386_v56 = vld [vmem:[#allocation3_spill] sm:$0xff] }
0x11ab   :  { %3082 = vrot.lane.b32.xlu1 %v3059_v44, %s8296_s2 }
0x11ac   :  { %3080 = vrot.lane.b32.xlu0 %v3058_v49, %s8296_s2 }
0x11ae   :  { %v7292_v51 = vpop.f32.mrb[92].mxu1  ;;  %v7316_v50 = vpop.f32.mrb[100].mxu0 }
0x11af   :  { %v3189_v22 = vpop.f32.mrb[93].mxu1  ;;  %v3325_v45 = vpop.f32.mrb[101].mxu0  ;;  %v3198_v59 = vadd.f32 %v7292_v51, %v9821_v18  ;;  %v3334_v27 = vadd.f32 %v7316_v50, %v9826_v60 }
0x11b0   :  { %v7293_v37 = vpop.f32.mrb[94].mxu1  ;;  %v7317_v6 = vpop.f32.mrb[102].mxu0  ;;  %v3190_v54 = vadd.f32 %v9821_v18, %v3189_v22  ;;  %v3326_v15 = vadd.f32 %v9826_v60, %v3325_v45 }
0x11b1   :  { %v3201_v38 = vadd.f32 %v7293_v37, %v9821_v18  ;;  %v3337_v9 = vadd.f32 %v7317_v6, %v9826_v60  ;;  %v3192_v36 = vpop.f32.mrb[95].mxu1  ;;  %v3328_v19 = vpop.f32.mrb[103].mxu0 }
0x11b2   :  { %v3193_v33 = vadd.f32 %v9821_v18, %v3192_v36  ;;  %v3329_v25 = vadd.f32 %v9826_v60, %v3328_v19 }
0x11b3   :  { %v9836_v43 = vpack.c.bf16 %v3201_v38, %v3198_v59  ;;  %v9838_v42 = vpack.c.bf16 %v3337_v9, %v3334_v27 }
0x11b4   :  { %v9840_v61 = vpack.c.bf16 %v3193_v33, %v3190_v54  ;;  %v9842_v31 = vpack.c.bf16 %v3329_v25, %v3326_v15 }
0x11b5   :  { %3828 = vrot.lane.b32.xlu1 %v9838_v42, %s8290_s4  ;;  %v3564_v52 = vsel %vm496_vm1, %v9838_v42, 0 }
0x11b6   :  { %3826 = vrot.lane.b32.xlu0 %v9842_v31, %s8290_s4  ;;  %v7296_v55 = vpop.f32.mrb[96].mxu1  ;;  %v7320_v63 = vpop.f32.mrb[104].mxu0  ;;  %7694 = vmatprep.subr.msk.bf16.mxu0 %vm496_vm1, %v9842_v31  ;;  %v3561_v34 = vsel %vm496_vm1, %v9842_v31, 0 }
0x11b7   :  { %v3205_v46 = vpop.f32.mrb[97].mxu1  ;;  %v3341_v30 = vpop.f32.mrb[105].mxu0  ;;  %7355 = vmatpush3.bf16.xpose.msra.mxu0 %v3561_v34  ;;  %v3214_v13 = vadd.f32 %v7296_v55, %v9821_v18  ;;  %v3350_v29 = vadd.f32 %v7320_v63, %v9826_v60 }
0x11b8   :  { %v7297_v14 = vpop.f32.mrb[98].mxu1  ;;  %v7321_v4 = vpop.f32.mrb[106].mxu0  ;;  %7695 = vmatprep.subr.msk.bf16.mxu0 %vm496_vm1, %v9838_v42  ;;  %v3206_v40 = vadd.f32 %v9821_v18, %v3205_v46  ;;  %v3342_v47 = vadd.f32 %v9826_v60, %v3341_v30 }
0x11b9   :  { %v3217_v58 = vadd.f32 %v7297_v14, %v9821_v18  ;;  %v3353_v21 = vadd.f32 %v7321_v4, %v9826_v60  ;;  %v3208_v24 = vpop.f32.mrb[99].mxu1  ;;  %v3344_v5 = vpop.f32.mrb[107].mxu0 }
0x11ba   :  { %v3209_v28 = vadd.f32 %v9821_v18, %v3208_v24  ;;  %v3345_v2 = vadd.f32 %v9826_v60, %v3344_v5 }
0x11bb   :  { %v9862_v16 = vpack.c.bf16 %v3217_v58, %v3214_v13  ;;  %v9864_v48 = vpack.c.bf16 %v3353_v21, %v3350_v29 }
0x11bc   :  { %v9866_v0 = vpack.c.bf16 %v3209_v28, %v3206_v40  ;;  %v9868_v57 = vpack.c.bf16 %v3345_v2, %v3342_v47 }
0x11bd   :  { %3832 = vrot.lane.b32.xlu1 %v9864_v48, %s8290_s4  ;;  %v3570_v39 = vsel %vm496_vm1, %v9864_v48, 0 }
0x11be   :  { %3830 = vrot.lane.b32.xlu0 %v9868_v57, %s8290_s4  ;;  %v3567_v8 = vsel %vm496_vm1, %v9868_v57, 0 }
0x11bf   :  { %7357 = vmatpush3.bf16.xpose.msra.mxu0 %v3564_v52 }
0x11c0   :  { %7696 = vmatprep.subr.msk.bf16.mxu0 %vm496_vm1, %v9868_v57 }
0x11c1   :  { %3816 = vrot.lane.b32.xlu1 %v9836_v43, %s8290_s4 }
0x11c2   :  { %3814 = vrot.lane.b32.xlu0 %v9840_v61, %s8290_s4 }
0x11c5   :  { %3820 = vrot.lane.b32.xlu1 %v9862_v16, %s8290_s4 }
0x11c6   :  { %3818 = vrot.lane.b32.xlu0 %v9866_v0, %s8290_s4 }
0x11c7   :  { %7359 = vmatpush3.bf16.xpose.msra.mxu0 %v3567_v8 }
0x11c8   :  { %7697 = vmatprep.subr.msk.bf16.mxu0 %vm496_vm1, %v9864_v48 }
0x11cf   :  { %7361 = vmatpush3.bf16.xpose.msra.mxu0 %v3570_v39 }
0x1215   :  { %v3079_v32 = vpop.permute.xlu1 %3078 }
0x1216   :  { %v3077_v11 = vpop.permute.xlu0 %3076  ;;  %v9898_v23 = vsel %vm110_vm0, %v11382_v12, %v3079_v32 }
0x1217   :  { %v9894_v20 = vsel %vm110_vm0, %v11380_v41, %v3077_v11  ;;  %11383 = vst [vmem:[#allocation17_spill] sm:$0xff] %v9898_v23 }
0x1218   :  { %11381 = vst [vmem:[#allocation19_spill] sm:$0xff] %v9894_v20  ;;  %7298 = vmatprep.mubr.msk.bf16.mxu1 %vm586_vm2, %v9894_v20  ;;  %7322 = vmatprep.mubr.msk.bf16.mxu0 %vm586_vm2, %v9894_v20 }
0x1219   :  { %7299 = vmatmul.mubr.msk.bf16.gmra.mrb[100].mxu1 %vm586_vm2, %v9898_v23  ;;  %7323 = vmatmul.mubr.msk.bf16.gmra.mrb[108].mxu0 %vm586_vm2, %v9898_v23 }
0x121d   :  { %v3083_v3 = vpop.permute.xlu1 %3082 }
0x121e   :  { %v3081_v10 = vpop.permute.xlu0 %3080  ;;  %v9914_v26 = vsel %vm110_vm0, %v11386_v56, %v3083_v3 }
0x121f   :  { %v9910_v17 = vsel %vm110_vm0, %v11384_v53, %v3081_v10  ;;  %11387 = vst [vmem:[#allocation16_spill] sm:$0xff] %v9914_v26 }
0x1220   :  { %11385 = vst [vmem:[#allocation18_spill] sm:$0xff] %v9910_v17  ;;  %7302 = vmatprep.mubr.msk.bf16.mxu1 %vm586_vm2, %v9910_v17  ;;  %7326 = vmatprep.mubr.msk.bf16.mxu0 %vm586_vm2, %v9910_v17 }
0x1221   :  { %7303 = vmatmul.mubr.msk.bf16.gmra.mrb[104].mxu1 %vm586_vm2, %v9914_v26  ;;  %7327 = vmatmul.mubr.msk.bf16.gmra.mrb[112].mxu0 %vm586_vm2, %v9914_v26 }
0x1222   :  { %7338 = vmatprep.mubr.msk.bf16.mxu1 %vm586_vm2, %v9764_v62  ;;  %7362 = vmatprep.mubr.msk.bf16.mxu0 %vm496_vm1, %v9840_v61 }
0x1227   :  { %v3829_v51 = vpop.permute.xlu1 %3828 }
0x1228   :  { %v3827_v44 = vpop.permute.xlu0 %3826  ;;  %v3850_v22 = vsel %vm496_vm1, %v3829_v51, 0 }
0x1229   :  { %7339 = vmatmul.mubr.msk.bf16.vlgmr.msra.gmra.mrb[108].mxu1 %vm586_vm2, %v9768_v1  ;;  %7363 = vmatmul.mubr.msk.bf16.vlgmr.msra.gmra.mrb[116].mxu0 %vm496_vm1, %v9836_v43  ;;  %v3847_v49 = vsel %vm496_vm1, %v3827_v44, 0 }
0x122a   :  { %7698 = vmatprep.subr.msk.bf16.mxu0 %vm496_vm1, %v3827_v44  ;;  %7342 = vmatprep.mubr.msk.bf16.mxu1 %vm586_vm2, %v9780_v7 }
0x122b   :  { %7366 = vmatprep.mubr.msk.bf16.mxu0 %vm496_vm1, %v9866_v0  ;;  %7387 = vmatpush3.bf16.xpose.msra.mxu0 %v3847_v49 }
0x122c   :  { %7699 = vmatprep.subr.msk.bf16.mxu0 %vm496_vm1, %v3829_v51 }
0x122f   :  { %v3833_v6 = vpop.permute.xlu1 %3832 }
0x1230   :  { %v3831_v50 = vpop.permute.xlu0 %3830  ;;  %v3856_v59 = vsel %vm496_vm1, %v3833_v6, 0 }
0x1231   :  { %7343 = vmatmul.mubr.msk.bf16.gmra.mrb[112].mxu1 %vm586_vm2, %v9784_v35  ;;  %7367 = vmatmul.mubr.msk.bf16.gmra.mrb[120].mxu0 %vm496_vm1, %v9862_v16  ;;  %v3853_v37 = vsel %vm496_vm1, %v3831_v50, 0 }
0x1232   :  { %7346 = vmatprep.mubr.msk.bf16.mxu1 %vm586_vm2, %v9894_v20 }
0x1233   :  { %7389 = vmatpush3.bf16.xpose.msra.mxu0 %v3850_v22  ;;  %v3817_v27 = vpop.permute.xlu1 %3816 }
0x1234   :  { %7700 = vmatprep.subr.msk.bf16.mxu0 %vm496_vm1, %v3831_v50  ;;  %v3815_v45 = vpop.permute.xlu0 %3814 }
0x1235   :  { %7394 = vmatprep.mubr.msk.bf16.mxu0 %vm496_vm1, %v3815_v45 }
0x1237   :  { %v3821_v9 = vpop.permute.xlu1 %3820 }
0x1238   :  { %v3819_v38 = vpop.permute.xlu0 %3818 }
0x1239   :  { %7347 = vmatmul.mubr.msk.bf16.gmra.mrb[116].mxu1 %vm586_vm2, %v9898_v23 }
0x123a   :  { %7350 = vmatprep.mubr.msk.bf16.mxu1 %vm586_vm2, %v9910_v17 }
0x123b   :  { %7391 = vmatpush3.bf16.xpose.msra.mxu0 %v3853_v37 }
0x123c   :  { %7701 = vmatprep.subr.msk.bf16.mxu0 %vm496_vm1, %v3833_v6  ;;  %v9995_v6 = vld [vmem:[%s11205_s14] ss:$0 sm:$0xff] }
0x1241   :  { %7351 = vmatmul.mubr.msk.bf16.gmra.mrb[120].mxu1 %vm586_vm2, %v9914_v26 }
0x1243   :  { %7393 = vmatpush3.bf16.xpose.msra.mxu0 %v3856_v59 }
0x124a   :  { %7395 = vmatmul.mubr.msk.bf16.vlgmr.msra.gmra.mrb[124].mxu0 %vm496_vm1, %v3817_v27 }
0x124b   :  { %7398 = vmatprep.mubr.msk.bf16.mxu0 %vm496_vm1, %v3819_v38 }
0x1252   :  { %7399 = vmatmul.mubr.msk.bf16.gmra.mrb[128].mxu0 %vm496_vm1, %v3821_v9 }
0x12ec   :  { %v7300_v36 = vpop.f32.mrb[100].mxu1  ;;  %v7324_v19 = vpop.f32.mrb[108].mxu0 }
0x12ed   :  { %v3221_v54 = vpop.f32.mrb[101].mxu1  ;;  %v3357_v15 = vpop.f32.mrb[109].mxu0  ;;  %v3230_v55 = vadd.f32 %v7300_v36, %v9821_v18  ;;  %v3366_v63 = vadd.f32 %v7324_v19, %v9826_v60 }
0x12ee   :  { %v7301_v33 = vpop.f32.mrb[102].mxu1  ;;  %v7325_v25 = vpop.f32.mrb[110].mxu0  ;;  %v3222_v4 = vadd.f32 %v9821_v18, %v3221_v54  ;;  %v3358_v13 = vadd.f32 %v9826_v60, %v3357_v15 }
0x12ef   :  { %v3233_v34 = vadd.f32 %v7301_v33, %v9821_v18  ;;  %v3369_v46 = vadd.f32 %v7325_v25, %v9826_v60  ;;  %v3224_v30 = vpop.f32.mrb[103].mxu1  ;;  %v3360_v14 = vpop.f32.mrb[111].mxu0 }
0x12f0   :  { %v3225_v29 = vadd.f32 %v9821_v18, %v3224_v30  ;;  %v3361_v58 = vadd.f32 %v9826_v60, %v3360_v14 }
0x12f1   :  { %v9968_v21 = vpack.c.bf16 %v3233_v34, %v3230_v55  ;;  %v9970_v24 = vpack.c.bf16 %v3369_v46, %v3366_v63 }
0x12f2   :  { %v9972_v5 = vpack.c.bf16 %v3225_v29, %v3222_v4  ;;  %v9974_v40 = vpack.c.bf16 %v3361_v58, %v3358_v13 }
0x12f4   :  { %v7304_v47 = vpop.f32.mrb[104].mxu1  ;;  %v7328_v28 = vpop.f32.mrb[112].mxu0 }
0x12f5   :  { %v3237_v2 = vpop.f32.mrb[105].mxu1  ;;  %v3373_v52 = vpop.f32.mrb[113].mxu0  ;;  %v3246_v32 = vadd.f32 %v7304_v47, %v9821_v18  ;;  %v3382_v11 = vadd.f32 %v7328_v28, %v9826_v60 }
0x12f6   :  { %v7305_v8 = vpop.f32.mrb[106].mxu1  ;;  %v7329_v39 = vpop.f32.mrb[114].mxu0  ;;  %v3238_v53 = vadd.f32 %v9821_v18, %v3237_v2  ;;  %v3374_v56 = vadd.f32 %v9826_v60, %v3373_v52 }
0x12f7   :  { %v3249_v41 = vadd.f32 %v7305_v8, %v9821_v18  ;;  %v3385_v12 = vadd.f32 %v7329_v39, %v9826_v60  ;;  %v3240_v3 = vpop.f32.mrb[107].mxu1  ;;  %v3376_v10 = vpop.f32.mrb[115].mxu0 }
0x12f8   :  { %v3241_v44 = vadd.f32 %v9821_v18, %v3240_v3  ;;  %v3377_v49 = vadd.f32 %v9826_v60, %v3376_v10 }
0x12f9   :  { %v9984_v51 = vpack.c.bf16 %v3249_v41, %v3246_v32  ;;  %v9986_v50 = vpack.c.bf16 %v3385_v12, %v3382_v11 }
0x12fa   :  { %v9988_v22 = vpack.c.bf16 %v3241_v44, %v3238_v53  ;;  %v9990_v45 = vpack.c.bf16 %v3377_v49, %v3374_v56 }
0x12fc   :  { %v7340_v37 = vpop.f32.mrb[108].mxu1  ;;  %v9997_v59 = vpop.f32.mrb[116].mxu0 }
0x12fd   :  { %v3461_v27 = vpop.f32.mrb[109].mxu1  ;;  %v9999_v18 = vpop.f32.mrb[117].mxu0  ;;  %v3643_v60 = vsel %vm586_vm2, %v9997_v59, -inf  ;;  %v3470_v36 = vadd.f32 %v7340_v37, %v9995_v6 }
0x12fe   :  { %3644 = vmax.xlane.f32.xlu0 %v3643_v60  ;;  %v7341_v38 = vpop.f32.mrb[110].mxu1  ;;  %v10003_v9 = vpop.f32.mrb[118].mxu0  ;;  %v3462_v33 = vadd.f32 %v9995_v6, %v3461_v27  ;;  %v3637_v34 = vsel %vm586_vm2, %v9999_v18, -inf }
0x12ff   :  { %v3473_v19 = vadd.f32 %v7341_v38, %v9995_v6  ;;  %v3464_v54 = vpop.f32.mrb[111].mxu1  ;;  %v10007_v15 = vpop.f32.mrb[119].mxu0  ;;  %v3646_v29 = vsel %vm586_vm2, %v10003_v9, -inf }
0x1300   :  { %v3465_v25 = vadd.f32 %v9995_v6, %v3464_v54  ;;  %v3640_v55 = vsel %vm586_vm2, %v10007_v15, -inf }
0x1301   :  { %v10013_v63 = vpack.c.bf16 %v3473_v19, %v3470_v36  ;;  %3641 = vmax.xlane.f32.xlu1 %v3640_v55 }
0x1302   :  { %v10017_v46 = vpack.c.bf16 %v3465_v25, %v3462_v33  ;;  %3638 = vmax.xlane.f32.xlu0 %v3637_v34 }
0x1304   :  { %v7344_v30 = vpop.f32.mrb[112].mxu1  ;;  %v10019_v14 = vpop.f32.mrb[120].mxu0  ;;  %7370 = vmatprep.subr.bf16.mxu1 %v10017_v46 }
0x1305   :  { %v3477_v4 = vpop.f32.mrb[113].mxu1  ;;  %v10022_v13 = vpop.f32.mrb[121].mxu0  ;;  %7371 = vmatpush3.bf16.msra.mxu1 %v10017_v46  ;;  %v3655_v58 = vsel %vm586_vm2, %v10019_v14, -inf  ;;  %v3486_v2 = vadd.f32 %v7344_v30, %v9995_v6 }
0x1306   :  { %3647 = vmax.xlane.f32.xlu0 %v3646_v29  ;;  %3656 = vmax.xlane.f32.xlu1 %v3655_v58  ;;  %v7345_v47 = vpop.f32.mrb[114].mxu1  ;;  %v10029_v28 = vpop.f32.mrb[122].mxu0  ;;  %v3478_v32 = vadd.f32 %v9995_v6, %v3477_v4  ;;  %v3649_v3 = vsel %vm586_vm2, %v10022_v13, -inf }
0x1307   :  { %v3489_v52 = vadd.f32 %v7345_v47, %v9995_v6  ;;  %7372 = vmatprep.subr.bf16.mxu1 %v10013_v63  ;;  %v3480_v8 = vpop.f32.mrb[115].mxu1  ;;  %v10034_v39 = vpop.f32.mrb[123].mxu0  ;;  %v3658_v49 = vsel %vm586_vm2, %v10029_v28, -inf }
0x1308   :  { %v3481_v11 = vadd.f32 %v9995_v6, %v3480_v8  ;;  %v3652_v41 = vsel %vm586_vm2, %v10034_v39, -inf }
0x1309   :  { %v10040_v12 = vpack.c.bf16 %v3489_v52, %v3486_v2  ;;  %7373 = vmatpush3.bf16.msra.mxu1 %v10013_v63 }
0x130a   :  { %v10045_v10 = vpack.c.bf16 %v3481_v11, %v3478_v32  ;;  %3650 = vmax.xlane.f32.xlu1 %v3649_v3  ;;  %3653 = vmax.xlane.f32.xlu0 %v3652_v41 }
0x130c   :  { %v7348_v53 = vpop.f32.mrb[116].mxu1  ;;  %7374 = vmatprep.subr.bf16.mxu1 %v10045_v10 }
0x130d   :  { %v3502_v56 = vadd.f32 %v7348_v53, %v9995_v6  ;;  %v3493_v44 = vpop.f32.mrb[117].mxu1  ;;  %7375 = vmatpush3.bf16.msra.mxu1 %v10045_v10 }
0x130e   :  { %v3494_v37 = vadd.f32 %v9995_v6, %v3493_v44  ;;  %3659 = vmax.xlane.f32.xlu0 %v3658_v49  ;;  %v7349_v27 = vpop.f32.mrb[118].mxu1  ;;  %7376 = vmatprep.subr.bf16.mxu1 %v10040_v12 }
0x130f   :  { %v3505_v60 = vadd.f32 %v7349_v27, %v9995_v6  ;;  %v3496_v38 = vpop.f32.mrb[119].mxu1 }
0x1310   :  { %v3497_v36 = vadd.f32 %v9995_v6, %v3496_v38 }
0x1311   :  { %v10056_v19 = vpack.c.bf16 %v3505_v60, %v3502_v56  ;;  %7377 = vmatpush3.bf16.msra.mxu1 %v10040_v12 }
0x1312   :  { %v10059_v54 = vpack.c.bf16 %v3497_v36, %v3494_v37 }
0x1314   :  { %v7352_v33 = vpop.f32.mrb[120].mxu1 }
0x1315   :  { %v3518_v25 = vadd.f32 %v7352_v33, %v9995_v6  ;;  %v3509_v55 = vpop.f32.mrb[121].mxu1 }
0x1316   :  { %v3510_v34 = vadd.f32 %v9995_v6, %v3509_v55  ;;  %v7353_v30 = vpop.f32.mrb[122].mxu1 }
0x1317   :  { %v3521_v4 = vadd.f32 %v7353_v30, %v9995_v6  ;;  %v3512_v29 = vpop.f32.mrb[123].mxu1 }
0x1318   :  { %v3513_v58 = vadd.f32 %v9995_v6, %v3512_v29 }
0x1319   :  { %v10065_v47 = vpack.c.bf16 %v3521_v4, %v3518_v25 }
0x131a   :  { %v10067_v2 = vpack.c.bf16 %v3513_v58, %v3510_v34 }
0x131d   :  { %v10069_v52 = vpop.f32.mrb[124].mxu0 }
0x131e   :  { %v10071_v8 = vpop.f32.mrb[125].mxu0  ;;  %v3929_v32 = vsel %vm586_vm2, %v10069_v52, -inf }
0x131f   :  { %3930 = vmax.xlane.f32.xlu1 %v3929_v32  ;;  %v10075_v11 = vpop.f32.mrb[126].mxu0  ;;  %v3923_v6 = vsel %vm586_vm2, %v10071_v8, -inf }
0x1320   :  { %v10077_v41 = vpop.f32.mrb[127].mxu0  ;;  %v3932_v56 = vsel %vm586_vm2, %v10075_v11, -inf }
0x1321   :  { %v3926_v3 = vsel %vm586_vm2, %v10077_v41, -inf }
0x1322   :  { %3927 = vmax.xlane.f32.xlu0 %v3926_v3 }
0x1323   :  { %3924 = vmax.xlane.f32.xlu1 %v3923_v6 }
0x1325   :  { %v10083_v53 = vpop.f32.mrb[128].mxu0 }
0x1326   :  { %3933 = vmax.xlane.f32.xlu0 %v3932_v56  ;;  %v10087_v44 = vpop.f32.mrb[129].mxu0  ;;  %v3941_v38 = vsel %vm586_vm2, %v10083_v53, -inf }
0x1327   :  { %v10089_v49 = vpop.f32.mrb[130].mxu0  ;;  %v3935_v36 = vsel %vm586_vm2, %v10087_v44, -inf }
0x1328   :  { %v10091_v37 = vpop.f32.mrb[131].mxu0  ;;  %v3944_v27 = vsel %vm586_vm2, %v10089_v49, -inf }
0x1329   :  { %v3938_v60 = vsel %vm586_vm2, %v10091_v37, -inf }
0x132a   :  { %3945 = vmax.xlane.f32.xlu0 %v3944_v27 }
0x132e   :  { %3939 = vmax.xlane.f32.xlu0 %v3938_v60 }
0x1334   :  { %4019 = vrot.lane.b32.xlu1 %v10017_v46, %s8290_s4 }
0x1344   :  { %4021 = vrot.lane.b32.xlu0 %v10013_v63, %s8290_s4 }
0x1358   :  { %3942 = vmax.xlane.f32.xlu1 %v3941_v38 }
0x135c   :  { %3936 = vmax.xlane.f32.xlu1 %v3935_v36 }
0x136d   :  { %4023 = vrot.lane.b32.xlu1 %v10045_v10, %s8290_s4 }
0x1371   :  { %4025 = vrot.lane.b32.xlu1 %v10040_v12, %s8290_s4 }
0x1375   :  { %4120 = vrot.lane.b32.xlu1 %v9842_v31, %s8291_s25 }
0x138b   :  { %v3645_v33 = vpop.xlane.xlu0 %3644 }
0x138c   :  { %v3663_v25 = vsub.f32 %v9997_v59, %v3645_v33 }
0x138e   :  { %v3673_v55 = vmul.f32 1.442695, %v3663_v25  ;;  %v3642_v34 = vpop.xlane.xlu1 %3641 }
0x138f   :  { %v3639_v30 = vpop.xlane.xlu0 %3638  ;;  %v3662_v58 = vsub.f32 %v10007_v15, %v3642_v34 }
0x1390   :  { %8018 = vpow2.f32 %v3673_v55  ;;  %v3661_v4 = vsub.f32 %v9999_v18, %v3639_v30 }
0x1391   :  { %v3671_v38 = vmul.f32 1.442695, %v3662_v58 }
0x1392   :  { %v3669_v29 = vmul.f32 1.442695, %v3661_v4 }
0x1393   :  { %v3657_v32 = vpop.xlane.xlu1 %3656  ;;  %v3648_v3 = vpop.xlane.xlu0 %3647 }
0x1394   :  { %8020 = vpow2.f32 %v3669_v29  ;;  %v3667_v6 = vsub.f32 %v10019_v14, %v3657_v32  ;;  %v3664_v56 = vsub.f32 %v10003_v9, %v3648_v3 }
0x1396   :  { %v3681_v27 = vmul.f32 1.442695, %v3667_v6  ;;  %v3675_v60 = vmul.f32 1.442695, %v3664_v56 }
0x1397   :  { %v3651_v59 = vpop.xlane.xlu1 %3650  ;;  %v3654_v36 = vpop.xlane.xlu0 %3653 }
0x1398   :  { %8022 = vpow2.f32 %v3681_v27  ;;  %v3665_v33 = vsub.f32 %v10022_v13, %v3651_v59  ;;  %v3666_v15 = vsub.f32 %v10034_v39, %v3654_v36 }
0x1399   :  { %8024 = vpow2.f32 %v3675_v60 }
0x139a   :  { %v10117_v18 = vpop.eup %8018  ;;  %v3677_v25 = vmul.f32 1.442695, %v3665_v33  ;;  %8026 = vpow2.f32 %v3671_v38  ;;  %v3679_v4 = vmul.f32 1.442695, %v3666_v15 }
0x139b   :  { %v3660_v55 = vpop.xlane.xlu0 %3659  ;;  %v3691_v14 = vsel %vm586_vm2, %v10117_v18, 0.0 }
0x139c   :  { %8028 = vpow2.f32 %v3677_v25  ;;  %v3668_v9 = vsub.f32 %v10029_v28, %v3660_v55  ;;  %3692 = vadd.xlane.f32.xlu1 %v3691_v14 }
0x139e   :  { %v10123_v34 = vpop.eup %8020  ;;  %v3683_v30 = vmul.f32 1.442695, %v3668_v9 }
0x139f   :  { %v3685_v13 = vsel %vm586_vm2, %v10123_v34, 0.0 }
0x13a0   :  { %8030 = vpow2.f32 %v3683_v30  ;;  %3686 = vadd.xlane.f32.xlu1 %v3685_v13 }
0x13a1   :  { %8032 = vpow2.f32 %v3679_v4 }
0x13a2   :  { %v10127_v29 = vpop.eup %8022 }
0x13a3   :  { %v10129_v39 = vpop.eup %8024  ;;  %v3703_v58 = vsel %vm586_vm2, %v10127_v29, 0.0 }
0x13a4   :  { %3704 = vadd.xlane.f32.xlu1 %v3703_v58  ;;  %v3694_v28 = vsel %vm586_vm2, %v10129_v39, 0.0  ;;  %v10135_v32 = vpop.eup %8026 }
0x13a5   :  { %3695 = vadd.xlane.f32.xlu0 %v3694_v28  ;;  %v3688_v56 = vsel %vm586_vm2, %v10135_v32, 0.0 }
0x13a6   :  { %v10137_v3 = vpop.eup %8028 }
0x13a7   :  { %v3697_v6 = vsel %vm586_vm2, %v10137_v3, 0.0 }
0x13a8   :  { %3698 = vadd.xlane.f32.xlu1 %v3697_v6 }
0x13a9   :  { %3689 = vadd.xlane.f32.xlu0 %v3688_v56 }
0x13aa   :  { %v10143_v27 = vpop.eup %8030 }
0x13ab   :  { %v3706_v60 = vsel %vm586_vm2, %v10143_v27, 0.0  ;;  %v10147_v59 = vpop.eup %8032 }
0x13ac   :  { %v3931_v38 = vpop.xlane.xlu1 %3930  ;;  %v3700_v55 = vsel %vm586_vm2, %v10147_v59, 0.0 }
0x13ad   :  { %v3949_v36 = vsub.f32 %v10069_v52, %v3931_v38  ;;  %3707 = vadd.xlane.f32.xlu0 %v3706_v60 }
0x13af   :  { %v3959_v33 = vmul.f32 1.442695, %v3949_v36  ;;  %v3928_v25 = vpop.xlane.xlu0 %3927 }
0x13b0   :  { %v3925_v15 = vpop.xlane.xlu1 %3924  ;;  %v3948_v9 = vsub.f32 %v10077_v41, %v3928_v25 }
0x13b1   :  { %8034 = vpow2.f32 %v3959_v33  ;;  %v3947_v14 = vsub.f32 %v10071_v8, %v3925_v15  ;;  %3701 = vadd.xlane.f32.xlu0 %v3700_v55 }
0x13b2   :  { %v3957_v52 = vmul.f32 1.442695, %v3948_v9 }
0x13b3   :  { %v3955_v30 = vmul.f32 1.442695, %v3947_v14  ;;  %v3934_v4 = vpop.xlane.xlu0 %3933 }
0x13b4   :  { %v3950_v13 = vsub.f32 %v10075_v11, %v3934_v4  ;;  %v10155_v58 = vpop.permute.xlu1 %4019 }
0x13b5   :  { %8036 = vpow2.f32 %v3955_v30  ;;  %7402 = vmatprep.subr.bf16.mxu1 %v10155_v58 }
0x13b6   :  { %v3961_v28 = vmul.f32 1.442695, %v3950_v13 }
0x13b7   :  { %v3946_v33 = vpop.xlane.xlu0 %3945 }
0x13b8   :  { %8038 = vpow2.f32 %v3961_v28  ;;  %v3954_v30 = vsub.f32 %v10089_v49, %v3946_v33 }
0x13b9   :  { %8040 = vpow2.f32 %v3957_v52 }
0x13ba   :  { %v3969_v28 = vmul.f32 1.442695, %v3954_v30 }
0x13bb   :  { %v10158_v6 = vpop.eup %8034  ;;  %v3940_v25 = vpop.xlane.xlu0 %3939 }
0x13bc   :  { %v3977_v8 = vsel %vm586_vm2, %v10158_v6, 0.0  ;;  %v3952_v15 = vsub.f32 %v10091_v37, %v3940_v25 }
0x13bd   :  { %3978 = vadd.xlane.f32.xlu1 %v3977_v8 }
0x13be   :  { %v3965_v55 = vmul.f32 1.442695, %v3952_v15 }
0x13bf   :  { %v10162_v41 = vpop.eup %8036 }
0x13c0   :  { %v3971_v11 = vsel %vm586_vm2, %v10162_v41, 0.0  ;;  %8042 = vpow2.f32 %v3965_v55 }
0x13c1   :  { %3972 = vadd.xlane.f32.xlu1 %v3971_v11 }
0x13c2   :  { %v10166_v56 = vpop.eup %8038 }
0x13c3   :  { %v3980_v60 = vsel %vm586_vm2, %v10166_v56, 0.0  ;;  %v10170_v38 = vpop.eup %8040 }
0x13c4   :  { %3981 = vadd.xlane.f32.xlu0 %v3980_v60  ;;  %v3974_v36 = vsel %vm586_vm2, %v10170_v38, 0.0 }
0x13c8   :  { %3975 = vadd.xlane.f32.xlu0 %v3974_v36 }
0x13ca   :  { %v10180_v11 = vpop.eup %8042 }
0x13d2   :  { %4124 = vrot.lane.b32.xlu1 %v9868_v57, %s8291_s25 }
0x13e5   :  { %v3943_v14 = vpop.xlane.xlu1 %3942 }
0x13e6   :  { %v3953_v9 = vsub.f32 %v10083_v53, %v3943_v14  ;;  %v3986_v53 = vsel %vm586_vm2, %v10180_v11, 0.0 }
0x13e8   :  { %v3967_v4 = vmul.f32 1.442695, %v3953_v9  ;;  %v4022_v9 = vpop.permute.xlu0 %4021 }
0x13e9   :  { %v3937_v13 = vpop.xlane.xlu1 %3936 }
0x13ea   :  { %8044 = vpow2.f32 %v3967_v4  ;;  %v3951_v52 = vsub.f32 %v10087_v44, %v3937_v13 }
0x13ec   :  { %v3963_v8 = vmul.f32 1.442695, %v3951_v52 }
0x13ed   :  { %v4024_v25 = vpop.permute.xlu1 %4023 }
0x13ee   :  { %8046 = vpow2.f32 %v3963_v8 }
0x13ef   :  { %8048 = vpow2.f32 %v3969_v28 }
0x13f1   :  { %v4026_v15 = vpop.permute.xlu1 %4025 }
0x13f4   :  { %v10182_v60 = vpop.eup %8044 }
0x13f5   :  { %v3989_v37 = vsel %vm586_vm2, %v10182_v60, 0.0  ;;  %v10208_v55 = vpop.permute.xlu1 %4120 }
0x13f6   :  { %3990 = vadd.xlane.f32.xlu0 %v3989_v37  ;;  %3987 = vadd.xlane.f32.xlu1 %v3986_v53 }
0x13f8   :  { %v10188_v49 = vpop.eup %8046 }
0x13f9   :  { %v3983_v44 = vsel %vm586_vm2, %v10188_v49, 0.0  ;;  %v10192_v36 = vpop.eup %8048 }
0x13fa   :  { %3984 = vadd.xlane.f32.xlu0 %v3983_v44  ;;  %v3992_v33 = vsel %vm586_vm2, %v10192_v36, 0.0 }
0x13fe   :  { %3993 = vadd.xlane.f32.xlu0 %v3992_v33 }
0x1407   :  { %4126 = vrot.lane.b32.xlu1 %v9864_v48, %s8291_s25 }
0x140b   :  { %4114 = vrot.lane.b32.xlu1 %v9836_v43, %s8291_s25 }
0x140f   :  { %4118 = vrot.lane.b32.xlu1 %v9862_v16, %s8291_s25 }
0x1414   :  { %4122 = vrot.lane.b32.xlu0 %v9838_v42, %s8291_s25 }
0x1418   :  { %4112 = vrot.lane.b32.xlu0 %v9840_v61, %s8291_s25 }
0x141c   :  { %4116 = vrot.lane.b32.xlu0 %v9866_v0, %s8291_s25 }
0x1429   :  { %v3693_v14 = vpop.xlane.xlu1 %3692 }
0x142d   :  { %v3687_v30 = vpop.xlane.xlu1 %3686 }
0x1431   :  { %v3705_v13 = vpop.xlane.xlu1 %3704 }
0x1432   :  { %v3696_v4 = vpop.xlane.xlu0 %3695 }
0x1433   :  { %8050 = vrcp.f32 %v3696_v4 }
0x1434   :  { %8052 = vrcp.f32 %v3687_v30 }
0x1435   :  { %8054 = vrcp.f32 %v3693_v14  ;;  %v3699_v28 = vpop.xlane.xlu1 %3698 }
0x1436   :  { %v3690_v52 = vpop.xlane.xlu0 %3689 }
0x1437   :  { %8056 = vrcp.f32 %v3690_v52 }
0x143a   :  { %v3708_v8 = vpop.xlane.xlu0 %3707 }
0x143b   :  { %8058 = vrcp.f32 %v3708_v8 }
0x143c   :  { %8060 = vrcp.f32 %v3699_v28 }
0x143d   :  { %v8051_v37 = vpop.eup %8050  ;;  %8062 = vrcp.f32 %v3705_v13 }
0x143e   :  { %v3702_v53 = vpop.xlane.xlu0 %3701  ;;  %v8053_v44 = vpop.eup %8052  ;;  %v3720_v17 = vmul.f32 %v8051_v37, %v10129_v39 }
0x143f   :  { %8064 = vrcp.f32 %v3702_v53  ;;  %v8055_v33 = vpop.eup %8054  ;;  %v3717_v23 = vmul.f32 %v8053_v44, %v10123_v34 }
0x1440   :  { %v3719_v14 = vmul.f32 %v8055_v33, %v10117_v18 }
0x1441   :  { %v8057_v26 = vpop.eup %8056 }
0x1442   :  { %v3718_v30 = vmul.f32 %v8057_v26, %v10135_v32  ;;  %v3726_v52 = vpack.c.bf16 %v3720_v17, %v3719_v14 }
0x1444   :  { %v3725_v4 = vpack.c.bf16 %v3718_v30, %v3717_v23  ;;  %v4141_v30 = vsel %vm496_vm1, %v10208_v55, 0 }
0x1445   :  { %v8059_v20 = vpop.eup %8058 }
0x1446   :  { %7378 = vmatprep.mubr.msk.bf16.mxu1 %vm586_vm2, %v3725_v4  ;;  %v8061_v28 = vpop.eup %8060  ;;  %v3724_v39 = vmul.f32 %v8059_v20, %v10143_v27 }
0x1447   :  { %7379 = vmatmul.mubr.msk.bf16.vlgmr.msra.gmra.mrb[124].mxu1 %vm586_vm2, %v3726_v52  ;;  %v8063_v13 = vpop.eup %8062  ;;  %v3721_v34 = vmul.f32 %v8061_v28, %v10137_v3 }
0x1448   :  { %7403 = vmatpush3.bf16.msra.mxu1 %v10155_v58  ;;  %v3723_v23 = vmul.f32 %v8063_v13, %v10127_v29 }
0x1449   :  { %v8065_v8 = vpop.eup %8064  ;;  %7404 = vmatprep.subr.bf16.mxu1 %v4022_v9 }
0x144a   :  { %v3722_v26 = vmul.f32 %v8065_v8, %v10147_v59  ;;  %v3979_v18 = vpop.xlane.xlu1 %3978  ;;  %v3728_v32 = vpack.c.bf16 %v3724_v39, %v3723_v23 }
0x144c   :  { %7405 = vmatpush3.bf16.msra.mxu1 %v4022_v9  ;;  %v3727_v17 = vpack.c.bf16 %v3722_v26, %v3721_v34 }
0x144d   :  { %7406 = vmatprep.subr.bf16.mxu1 %v4024_v25 }
0x144e   :  { %7382 = vmatprep.mubr.msk.bf16.mxu1 %vm586_vm2, %v3727_v17  ;;  %v3973_v58 = vpop.xlane.xlu1 %3972 }
0x144f   :  { %7383 = vmatmul.mubr.msk.bf16.gmra.mrb[128].mxu1 %vm586_vm2, %v3728_v32 }
0x1450   :  { %7407 = vmatpush3.bf16.msra.mxu1 %v4024_v25 }
0x1451   :  { %7408 = vmatprep.subr.bf16.mxu1 %v4026_v15  ;;  %v3982_v37 = vpop.xlane.xlu0 %3981 }
0x1452   :  { %8066 = vrcp.f32 %v3982_v37  ;;  %v4125_v14 = vpop.permute.xlu1 %4124 }
0x1453   :  { %8068 = vrcp.f32 %v3973_v58  ;;  %v4147_v17 = vsel %vm496_vm1, %v4125_v14, 0 }
0x1454   :  { %7409 = vmatpush3.bf16.msra.mxu1 %v4026_v15  ;;  %8070 = vrcp.f32 %v3979_v18 }
0x1455   :  { %7702 = vmatprep.subr.msk.bf16.mxu1 %vm496_vm1, %v10208_v55  ;;  %v3976_v20 = vpop.xlane.xlu0 %3975 }
0x1456   :  { %8072 = vrcp.f32 %v3976_v20 }
0x145c   :  { %v8067_v29 = vpop.eup %8066 }
0x145d   :  { %v8069_v3 = vpop.eup %8068  ;;  %v4006_v9 = vmul.f32 %v8067_v29, %v10166_v56 }
0x145e   :  { %v8071_v27 = vpop.eup %8070  ;;  %v4003_v25 = vmul.f32 %v8069_v3, %v10162_v41 }
0x145f   :  { %v4005_v44 = vmul.f32 %v8071_v27, %v10158_v6 }
0x1460   :  { %v8073_v59 = vpop.eup %8072 }
0x1461   :  { %v4004_v53 = vmul.f32 %v8073_v59, %v10170_v38  ;;  %v4012_v15 = vpack.c.bf16 %v4006_v9, %v4005_v44 }
0x1463   :  { %v4011_v33 = vpack.c.bf16 %v4004_v53, %v4003_v25 }
0x1465   :  { %7410 = vmatprep.mubr.msk.bf16.mxu1 %vm586_vm2, %v4011_v33 }
0x1466   :  { %7411 = vmatmul.mubr.msk.bf16.vlgmr.msra.gmra.mrb[132].mxu1 %vm586_vm2, %v4012_v15 }
0x1467   :  { %7419 = vmatpush3.bf16.xpose.msra.mxu1 %v4141_v30 }
0x1483   :  { %v3988_v4 = vpop.xlane.xlu1 %3987  ;;  %v3991_v52 = vpop.xlane.xlu0 %3990 }
0x1484   :  { %8074 = vrcp.f32 %v3988_v4 }
0x1487   :  { %v3985_v56 = vpop.xlane.xlu0 %3984  ;;  %v4127_v32 = vpop.permute.xlu1 %4126 }
0x1488   :  { %8076 = vrcp.f32 %v3985_v56 }
0x1489   :  { %8078 = vrcp.f32 %v3991_v52 }
0x148b   :  { %v3994_v41 = vpop.xlane.xlu0 %3993 }
0x148c   :  { %8080 = vrcp.f32 %v3994_v41 }
0x148e   :  { %v8075_v38 = vpop.eup %8074 }
0x148f   :  { %v4123_v6 = vpop.permute.xlu0 %4122  ;;  %v4008_v8 = vmul.f32 %v8075_v38, %v10180_v11  ;;  %v4150_v11 = vsel %vm496_vm1, %v4127_v32, 0 }
0x1490   :  { %7703 = vmatprep.subr.msk.bf16.mxu1 %vm496_vm1, %v4123_v6  ;;  %v4144_v28 = vsel %vm496_vm1, %v4123_v6, 0 }
0x1491   :  { %7421 = vmatpush3.bf16.xpose.msra.mxu1 %v4144_v28 }
0x1492   :  { %v8077_v13 = vpop.eup %8076  ;;  %7704 = vmatprep.subr.msk.bf16.mxu1 %vm496_vm1, %v4125_v14 }
0x1493   :  { %v4007_v55 = vmul.f32 %v8077_v13, %v10188_v49  ;;  %v8079_v39 = vpop.eup %8078  ;;  %v4113_v37 = vpop.permute.xlu0 %4112 }
0x1494   :  { %v4009_v18 = vmul.f32 %v8079_v39, %v10182_v60  ;;  %v4115_v49 = vpop.permute.xlu1 %4114 }
0x1495   :  { %v4013_v34 = vpack.c.bf16 %v4008_v8, %v4007_v55 }
0x1496   :  { %v8081_v26 = vpop.eup %8080 }
0x1497   :  { %7414 = vmatprep.mubr.msk.bf16.mxu1 %vm586_vm2, %v4013_v34  ;;  %v4010_v23 = vmul.f32 %v8081_v26, %v10192_v36  ;;  %v4117_v20 = vpop.permute.xlu0 %4116 }
0x1498   :  { %v4119_v60 = vpop.permute.xlu1 %4118 }
0x1499   :  { %7423 = vmatpush3.bf16.xpose.msra.mxu1 %v4147_v17  ;;  %v4014_v58 = vpack.c.bf16 %v4010_v23, %v4009_v18 }
0x149a   :  { %7705 = vmatprep.subr.msk.bf16.mxu1 %vm496_vm1, %v4127_v32 }
0x149b   :  { %7415 = vmatmul.mubr.msk.bf16.gmra.mrb[136].mxu1 %vm586_vm2, %v4014_v58 }
0x149c   :  { %7426 = vmatprep.mubr.msk.bf16.mxu1 %vm496_vm1, %v4113_v37 }
0x14a1   :  { %7425 = vmatpush3.bf16.xpose.msra.mxu1 %v4150_v11 }
0x14a8   :  { %7427 = vmatmul.mubr.msk.bf16.vlgmr.msra.gmra.mrb[140].mxu1 %vm496_vm1, %v4115_v49 }
0x14a9   :  { %7430 = vmatprep.mubr.msk.bf16.mxu1 %vm496_vm1, %v4117_v20 }
0x14b0   :  { %7431 = vmatmul.mubr.msk.bf16.gmra.mrb[144].mxu1 %vm496_vm1, %v4119_v60 }
0x151a   :  { %v10249_v36 = vpop.f32.mrb[124].mxu1 }
0x151b   :  { %11388 = vst [vmem:[#allocation23_spill] sm:$0xff] %v10249_v36  ;;  %v10251_v29 = vpop.f32.mrb[125].mxu1 }
0x151c   :  { %11389 = vst [vmem:[#allocation21_spill] sm:$0xff] %v10251_v29  ;;  %v10253_v3 = vpop.f32.mrb[126].mxu1 }
0x151d   :  { %11390 = vst [vmem:[#allocation22_spill] sm:$0xff] %v10253_v3  ;;  %v10257_v59 = vpop.f32.mrb[127].mxu1 }
0x151e   :  { %11391 = vst [vmem:[#allocation20_spill] sm:$0xff] %v10257_v59 }
0x1522   :  { %v10261_v25 = vpop.f32.mrb[128].mxu1 }
0x1523   :  { %11392 = vst [vmem:[#allocation12_spill] sm:$0xff] %v10261_v25  ;;  %v10263_v53 = vpop.f32.mrb[129].mxu1 }
0x1524   :  { %11393 = vst [vmem:[#allocation14_spill] sm:$0xff] %v10263_v53  ;;  %v10265_v44 = vpop.f32.mrb[130].mxu1 }
0x1525   :  { %11394 = vst [vmem:[#allocation13_spill] sm:$0xff] %v10265_v44  ;;  %v10269_v15 = vpop.f32.mrb[131].mxu1 }
0x1526   :  { %11395 = vst [vmem:[#allocation15_spill] sm:$0xff] %v10269_v15 }
0x1539   :  { %v10273_v14 = vpop.f32.mrb[132].mxu1 }
0x153a   :  { %v10275_v4 = vpop.f32.mrb[133].mxu1 }
0x153b   :  { %v10277_v52 = vpop.f32.mrb[134].mxu1 }
0x153c   :  { %v10281_v41 = vpop.f32.mrb[135].mxu1 }
0x156e   :  { %v10285_v38 = vpop.f32.mrb[136].mxu1 }
0x156f   :  { %v10287_v28 = vpop.f32.mrb[137].mxu1 }
0x1570   :  { %v10289_v13 = vpop.f32.mrb[138].mxu1 }
0x1571   :  { %v10293_v8 = vpop.f32.mrb[139].mxu1 }
0x157b   :  { %v7428_v34 = vpop.f32.mrb[140].mxu1 }
0x157c   :  { %v4186_v26 = vpop.f32.mrb[141].mxu1  ;;  %v4223_v18 = vsel %vm586_vm2, %v7428_v34, -inf }
0x157d   :  { %4224 = vmax.xlane.f32.xlu0 %v4223_v18  ;;  %v7429_v23 = vpop.f32.mrb[142].mxu1  ;;  %v4217_v58 = vsel %vm586_vm2, %v4186_v26, -inf }
0x157e   :  { %v4189_v17 = vpop.f32.mrb[143].mxu1  ;;  %v4226_v49 = vsel %vm586_vm2, %v7429_v23, -inf }
0x157f   :  { %v4220_v32 = vsel %vm586_vm2, %v4189_v17, -inf }
0x1580   :  { %4221 = vmax.xlane.f32.xlu1 %v4220_v32 }
0x1581   :  { %4218 = vmax.xlane.f32.xlu0 %v4217_v58 }
0x1583   :  { %v7432_v37 = vpop.f32.mrb[144].mxu1 }
0x1584   :  { %v4202_v11 = vpop.f32.mrb[145].mxu1  ;;  %v4235_v20 = vsel %vm586_vm2, %v7432_v37, -inf }
0x1585   :  { %4227 = vmax.xlane.f32.xlu0 %v4226_v49  ;;  %4236 = vmax.xlane.f32.xlu1 %v4235_v20  ;;  %v7433_v60 = vpop.f32.mrb[146].mxu1  ;;  %v4229_v30 = vsel %vm586_vm2, %v4202_v11, -inf }
0x1586   :  { %v10302_v33 = vpop.f32.mrb[147].mxu1  ;;  %v4238_v32 = vsel %vm586_vm2, %v7433_v60, -inf }
0x1587   :  { %v4232_v18 = vsel %vm586_vm2, %v10302_v33, -inf }
0x1589   :  { %4230 = vmax.xlane.f32.xlu1 %v4229_v30  ;;  %4233 = vmax.xlane.f32.xlu0 %v4232_v18 }
0x158d   :  { %4239 = vmax.xlane.f32.xlu0 %v4238_v32 }
0x159a   :  { %4309 = vrot.lane.b32.xlu1 %v10017_v46, %s8291_s25 }
0x159e   :  { %4313 = vrot.lane.b32.xlu1 %v10045_v10, %s8291_s25 }
0x15a2   :  { %4315 = vrot.lane.b32.xlu1 %v10040_v12, %s8291_s25 }
0x15a3   :  { %4311 = vrot.lane.b32.xlu0 %v10013_v63, %s8291_s25 }
0x15a6   :  { %4410 = vrot.lane.b32.xlu1 %v9842_v31, %s8292_s6 }
0x160a   :  { %v4225_v30 = vpop.xlane.xlu0 %4224 }
0x160b   :  { %v4243_v58 = vsub.f32 %v7428_v34, %v4225_v30 }
0x160d   :  { %v4253_v49 = vmul.f32 1.442695, %v4243_v58  ;;  %v4222_v20 = vpop.xlane.xlu1 %4221 }
0x160e   :  { %v4219_v18 = vpop.xlane.xlu0 %4218  ;;  %v4242_v9 = vsub.f32 %v4189_v17, %v4222_v20 }
0x160f   :  { %8082 = vpow2.f32 %v4253_v49  ;;  %v4241_v32 = vsub.f32 %v4186_v26, %v4219_v18 }
0x1610   :  { %v4251_v35 = vmul.f32 1.442695, %v4242_v9 }
0x1611   :  { %v4249_v27 = vmul.f32 1.442695, %v4241_v32 }
0x1612   :  { %v4237_v39 = vpop.xlane.xlu1 %4236  ;;  %v4228_v55 = vpop.xlane.xlu0 %4227 }
0x1613   :  { %8084 = vpow2.f32 %v4249_v27  ;;  %v4244_v6 = vsub.f32 %v7429_v23, %v4228_v55  ;;  %v4247_v7 = vsub.f32 %v7432_v37, %v4237_v39 }
0x1615   :  { %v4255_v56 = vmul.f32 1.442695, %v4244_v6  ;;  %v4261_v34 = vmul.f32 1.442695, %v4247_v7 }
0x1616   :  { %v4231_v1 = vpop.xlane.xlu1 %4230  ;;  %v4234_v62 = vpop.xlane.xlu0 %4233 }
0x1617   :  { %8086 = vpow2.f32 %v4255_v56  ;;  %v4245_v30 = vsub.f32 %v4202_v11, %v4231_v1 }
0x1618   :  { %8088 = vpow2.f32 %v4251_v35 }
0x1619   :  { %v10318_v31 = vpop.eup %8082  ;;  %8090 = vpow2.f32 %v4261_v34  ;;  %v4257_v9 = vmul.f32 1.442695, %v4245_v30 }
0x161a   :  { %v4310_v58 = vpop.permute.xlu1 %4309  ;;  %v4240_v49 = vpop.xlane.xlu0 %4239  ;;  %v4271_v26 = vsel %vm586_vm2, %v10318_v31, 0.0 }
0x161b   :  { %7434 = vmatprep.subr.bf16.mxu0 %v4310_v58  ;;  %4272 = vadd.xlane.f32.xlu1 %v4271_v26  ;;  %v4248_v6 = vsub.f32 %v7433_v60, %v4240_v49  ;;  %8092 = vpow2.f32 %v4257_v9 }
0x161c   :  { %7435 = vmatpush3.bf16.msra.mxu0 %v4310_v58  ;;  %v4246_v58 = vsub.f32 %v10302_v33, %v4234_v62 }
0x161d   :  { %v10322_v27 = vpop.eup %8084  ;;  %v4263_v7 = vmul.f32 1.442695, %v4248_v6 }
0x161e   :  { %v4314_v55 = vpop.permute.xlu1 %4313  ;;  %v4312_v56 = vpop.permute.xlu0 %4311  ;;  %v4265_v35 = vsel %vm586_vm2, %v10322_v27, 0.0  ;;  %v4259_v49 = vmul.f32 1.442695, %v4246_v58 }
0x161f   :  { %4266 = vadd.xlane.f32.xlu1 %v4265_v35  ;;  %7436 = vmatprep.subr.bf16.mxu0 %v4312_v56  ;;  %8094 = vpow2.f32 %v4263_v7 }
0x1620   :  { %7437 = vmatpush3.bf16.msra.mxu0 %v4312_v56  ;;  %8096 = vpow2.f32 %v4259_v49 }
0x1621   :  { %7438 = vmatprep.subr.bf16.mxu0 %v4314_v55  ;;  %v8087_v1 = vpop.eup %8086 }
0x1622   :  { %v4316_v39 = vpop.permute.xlu1 %4315  ;;  %v4274_v23 = vsel %vm586_vm2, %v8087_v1, 0.0  ;;  %v8089_v17 = vpop.eup %8088 }
0x1623   :  { %4275 = vadd.xlane.f32.xlu0 %v4274_v23  ;;  %v4268_v37 = vsel %vm586_vm2, %v8089_v17, 0.0  ;;  %v10328_v11 = vpop.eup %8090 }
0x1624   :  { %7439 = vmatpush3.bf16.msra.mxu0 %v4314_v55  ;;  %v4283_v20 = vsel %vm586_vm2, %v10328_v11, 0.0 }
0x1625   :  { %7440 = vmatprep.subr.bf16.mxu0 %v4316_v39  ;;  %v10333_v18 = vpop.eup %8092 }
0x1626   :  { %v4411_v60 = vpop.permute.xlu1 %4410  ;;  %v4277_v32 = vsel %vm586_vm2, %v10333_v18, 0.0 }
0x1627   :  { %4269 = vadd.xlane.f32.xlu0 %v4268_v37 }
0x1628   :  { %7441 = vmatpush3.bf16.msra.mxu0 %v4316_v39 }
0x1629   :  { %7706 = vmatprep.subr.msk.bf16.mxu0 %vm496_vm1, %v4411_v60  ;;  %v10337_v34 = vpop.eup %8094 }
0x162a   :  { %v4286_v30 = vsel %vm586_vm2, %v10337_v34, 0.0  ;;  %v8097_v26 = vpop.eup %8096 }
0x162b   :  { %4284 = vadd.xlane.f32.xlu0 %v4283_v20 }
0x162f   :  { %4278 = vadd.xlane.f32.xlu0 %v4277_v32  ;;  %v4431_v32 = vsel %vm496_vm1, %v4411_v60, 0 }
0x1630   :  { %4414 = vrot.lane.b32.xlu1 %v9868_v57, %s8292_s6  ;;  %v4280_v57 = vsel %vm586_vm2, %v8097_v26, 0.0 }
0x1633   :  { %4287 = vadd.xlane.f32.xlu0 %v4286_v30 }
0x1649   :  { %4412 = vrot.lane.b32.xlu0 %v9838_v42, %s8292_s6 }
0x164d   :  { %4402 = vrot.lane.b32.xlu0 %v9840_v61, %s8292_s6 }
0x1651   :  { %4406 = vrot.lane.b32.xlu0 %v9866_v0, %s8292_s6 }
0x1654   :  { %4281 = vadd.xlane.f32.xlu1 %v4280_v57 }
0x1665   :  { %4416 = vrot.lane.b32.xlu1 %v9864_v48, %s8292_s6 }
0x1669   :  { %4404 = vrot.lane.b32.xlu1 %v9836_v43, %s8292_s6 }
0x166d   :  { %4408 = vrot.lane.b32.xlu1 %v9862_v16, %s8292_s6 }
0x16a8   :  { %v4273_v62 = vpop.xlane.xlu1 %4272 }
0x16ac   :  { %v4267_v42 = vpop.xlane.xlu1 %4266 }
0x16b0   :  { %v4276_v33 = vpop.xlane.xlu0 %4275  ;;  %v4415_v30 = vpop.permute.xlu1 %4414 }
0x16b1   :  { %8098 = vrcp.f32 %v4276_v33 }
0x16b2   :  { %8100 = vrcp.f32 %v4267_v42 }
0x16b3   :  { %8102 = vrcp.f32 %v4273_v62 }
0x16b4   :  { %v4270_v61 = vpop.xlane.xlu0 %4269 }
0x16b5   :  { %8104 = vrcp.f32 %v4270_v61 }
0x16b8   :  { %v4285_v0 = vpop.xlane.xlu0 %4284 }
0x16bb   :  { %v8099_v9 = vpop.eup %8098 }
0x16bc   :  { %v4279_v6 = vpop.xlane.xlu0 %4278  ;;  %v8101_v55 = vpop.eup %8100  ;;  %v4300_v35 = vmul.f32 %v8099_v9, %v8087_v1 }
0x16bd   :  { %v8103_v56 = vpop.eup %8102  ;;  %v4297_v43 = vmul.f32 %v8101_v55, %v10322_v27 }
0x16be   :  { %v4299_v16 = vmul.f32 %v8103_v56, %v10318_v31  ;;  %v4437_v31 = vsel %vm496_vm1, %v4415_v30, 0 }
0x16bf   :  { %v8105_v48 = vpop.eup %8104 }
0x16c0   :  { %v4288_v7 = vpop.xlane.xlu0 %4287  ;;  %v4298_v39 = vmul.f32 %v8105_v48, %v8089_v17  ;;  %v4306_v37 = vpack.c.bf16 %v4300_v35, %v4299_v16 }
0x16c1   :  { %8106 = vrcp.f32 %v4288_v7 }
0x16c2   :  { %v4305_v23 = vpack.c.bf16 %v4298_v39, %v4297_v43  ;;  %8108 = vrcp.f32 %v4279_v6 }
0x16c3   :  { %8110 = vrcp.f32 %v4285_v0 }
0x16c4   :  { %7442 = vmatprep.mubr.msk.bf16.mxu0 %vm586_vm2, %v4305_v23  ;;  %v4413_v20 = vpop.permute.xlu0 %4412 }
0x16c5   :  { %7443 = vmatmul.mubr.msk.bf16.vlgmr.msra.gmra.mrb[132].mxu0 %vm586_vm2, %v4306_v37  ;;  %v4434_v1 = vsel %vm496_vm1, %v4413_v20, 0 }
0x16c6   :  { %7451 = vmatpush3.bf16.xpose.msra.mxu0 %v4431_v32 }
0x16c7   :  { %7707 = vmatprep.subr.msk.bf16.mxu0 %vm496_vm1, %v4413_v20 }
0x16c8   :  { %v4403_v55 = vpop.permute.xlu0 %4402 }
0x16cb   :  { %v8107_v58 = vpop.eup %8106 }
0x16cc   :  { %v8109_v49 = vpop.eup %8108  ;;  %v4304_v42 = vmul.f32 %v8107_v58, %v10337_v34  ;;  %v4407_v48 = vpop.permute.xlu0 %4406 }
0x16cd   :  { %v8111_v57 = vpop.eup %8110  ;;  %v4301_v33 = vmul.f32 %v8109_v49, %v10333_v18 }
0x16ce   :  { %7453 = vmatpush3.bf16.xpose.msra.mxu0 %v4434_v1  ;;  %v4303_v0 = vmul.f32 %v8111_v57, %v10328_v11 }
0x16cf   :  { %7708 = vmatprep.subr.msk.bf16.mxu0 %vm496_vm1, %v4415_v30 }
0x16d0   :  { %v4308_v6 = vpack.c.bf16 %v4304_v42, %v4303_v0 }
0x16d6   :  { %7455 = vmatpush3.bf16.xpose.msra.mxu0 %v4437_v31 }
0x16e1   :  { %v4282_v27 = vpop.xlane.xlu1 %4281 }
0x16e2   :  { %8112 = vrcp.f32 %v4282_v27 }
0x16e5   :  { %v4417_v17 = vpop.permute.xlu1 %4416 }
0x16e6   :  { %7709 = vmatprep.subr.msk.bf16.mxu0 %vm496_vm1, %v4417_v17  ;;  %v4440_v60 = vsel %vm496_vm1, %v4417_v17, 0 }
0x16e7   :  { %7457 = vmatpush3.bf16.xpose.msra.mxu0 %v4440_v60 }
0x16e8   :  { %7498 = vmatprep.subr.bf16.mxu0 %v10059_v54 }
0x16e9   :  { %v4405_v56 = vpop.permute.xlu1 %4404 }
0x16ec   :  { %v8113_v62 = vpop.eup %8112 }
0x16ed   :  { %v4302_v61 = vmul.f32 %v8113_v62, %v8097_v26  ;;  %v4409_v11 = vpop.permute.xlu1 %4408 }
0x16ef   :  { %v4307_v9 = vpack.c.bf16 %v4302_v61, %v4301_v33 }
0x16f1   :  { %7446 = vmatprep.mubr.msk.bf16.mxu0 %vm586_vm2, %v4307_v9 }
0x16f2   :  { %7447 = vmatmul.mubr.msk.bf16.gmra.mrb[136].mxu0 %vm586_vm2, %v4308_v6 }
0x16f3   :  { %7458 = vmatprep.mubr.msk.bf16.mxu0 %vm496_vm1, %v4403_v55 }
0x16fa   :  { %7459 = vmatmul.mubr.msk.bf16.vlgmr.msra.gmra.mrb[140].mxu0 %vm496_vm1, %v4405_v56 }
0x16fb   :  { %7499 = vmatpush3.bf16.msra.mxu0 %v10059_v54  ;;  %7462 = vmatprep.mubr.msk.bf16.mxu0 %vm496_vm1, %v4407_v48 }
0x16fc   :  { %7500 = vmatprep.subr.bf16.mxu0 %v10056_v19 }
0x16ff   :  { %7501 = vmatpush3.bf16.msra.mxu0 %v10056_v19 }
0x1700   :  { %7502 = vmatprep.subr.bf16.mxu0 %v10067_v2 }
0x1702   :  { %7463 = vmatmul.mubr.msk.bf16.gmra.mrb[144].mxu0 %vm496_vm1, %v4409_v11 }
0x1703   :  { %7503 = vmatpush3.bf16.msra.mxu0 %v10067_v2 }
0x1704   :  { %7504 = vmatprep.subr.bf16.mxu0 %v10065_v47 }
0x1707   :  { %7505 = vmatpush3.bf16.msra.mxu0 %v10065_v47 }
0x1798   :  { %v10385_v18 = vpop.f32.mrb[132].mxu0 }
0x1799   :  { %v10387_v34 = vpop.f32.mrb[133].mxu0 }
0x179a   :  { %v10389_v26 = vpop.f32.mrb[134].mxu0 }
0x179b   :  { %v10393_v7 = vpop.f32.mrb[135].mxu0 }
0x17c5   :  { %v10397_v39 = vpop.f32.mrb[136].mxu0 }
0x17c6   :  { %v10399_v16 = vpop.f32.mrb[137].mxu0 }
0x17c7   :  { %v10401_v23 = vpop.f32.mrb[138].mxu0 }
0x17c8   :  { %v10405_v20 = vpop.f32.mrb[139].mxu0 }
0x17cd   :  { %v7460_v1 = vpop.f32.mrb[140].mxu0 }
0x17ce   :  { %v4476_v30 = vpop.f32.mrb[141].mxu0  ;;  %v4513_v31 = vsel %vm586_vm2, %v7460_v1, -inf }
0x17cf   :  { %4514 = vmax.xlane.f32.xlu0 %v4513_v31  ;;  %v7461_v27 = vpop.f32.mrb[142].mxu0  ;;  %v4507_v58 = vsel %vm586_vm2, %v4476_v30, -inf }
0x17d0   :  { %v4479_v17 = vpop.f32.mrb[143].mxu0  ;;  %v4516_v62 = vsel %vm586_vm2, %v7461_v27, -inf }
0x17d1   :  { %v4510_v60 = vsel %vm586_vm2, %v4479_v17, -inf }
0x17d2   :  { %4511 = vmax.xlane.f32.xlu1 %v4510_v60 }
0x17d3   :  { %4508 = vmax.xlane.f32.xlu0 %v4507_v58 }
0x17d5   :  { %v7464_v49 = vpop.f32.mrb[144].mxu0 }
0x17d6   :  { %v4492_v57 = vpop.f32.mrb[145].mxu0  ;;  %v4525_v42 = vsel %vm586_vm2, %v7464_v49, -inf }
0x17d7   :  { %4517 = vmax.xlane.f32.xlu0 %v4516_v62  ;;  %4526 = vmax.xlane.f32.xlu1 %v4525_v42  ;;  %v7465_v33 = vpop.f32.mrb[146].mxu0  ;;  %v4519_v9 = vsel %vm586_vm2, %v4492_v57, -inf }
0x17d8   :  { %v4495_v61 = vpop.f32.mrb[147].mxu0  ;;  %v4528_v6 = vsel %vm586_vm2, %v7465_v33, -inf }
0x17d9   :  { %v4522_v0 = vsel %vm586_vm2, %v4495_v61, -inf }
0x17db   :  { %4520 = vmax.xlane.f32.xlu1 %v4519_v9  ;;  %4523 = vmax.xlane.f32.xlu0 %v4522_v0 }
0x17df   :  { %4529 = vmax.xlane.f32.xlu0 %v4528_v6 }
0x17ec   :  { %4599 = vrot.lane.b32.xlu1 %v10017_v46, %s8292_s6 }
0x185c   :  { %v4515_v55 = vpop.xlane.xlu0 %4514 }
0x185d   :  { %v4533_v56 = vsub.f32 %v7460_v1, %v4515_v55 }
0x185f   :  { %v4543_v48 = vmul.f32 1.442695, %v4533_v56  ;;  %v4512_v11 = vpop.xlane.xlu1 %4511 }
0x1860   :  { %v4509_v31 = vpop.xlane.xlu0 %4508  ;;  %v4532_v62 = vsub.f32 %v4479_v17, %v4512_v11 }
0x1861   :  { %8114 = vpow2.f32 %v4543_v48  ;;  %v4531_v60 = vsub.f32 %v4476_v30, %v4509_v31 }
0x1862   :  { %v4541_v37 = vmul.f32 1.442695, %v4532_v62 }
0x1863   :  { %v4539_v58 = vmul.f32 1.442695, %v4531_v60 }
0x1864   :  { %v4527_v42 = vpop.xlane.xlu1 %4526  ;;  %v4518_v32 = vpop.xlane.xlu0 %4517 }
0x1865   :  { %8116 = vpow2.f32 %v4539_v58  ;;  %v4534_v9 = vsub.f32 %v7461_v27, %v4518_v32  ;;  %v4537_v60 = vsub.f32 %v7464_v49, %v4527_v42 }
0x1867   :  { %v4545_v0 = vmul.f32 1.442695, %v4534_v9  ;;  %v4551_v9 = vmul.f32 1.442695, %v4537_v60 }
0x1868   :  { %v4521_v43 = vpop.xlane.xlu1 %4520 }
0x1869   :  { %8118 = vpow2.f32 %v4545_v0  ;;  %v4535_v31 = vsub.f32 %v4492_v57, %v4521_v43 }
0x186a   :  { %8120 = vpow2.f32 %v4541_v37  ;;  %v4524_v37 = vpop.xlane.xlu0 %4523 }
0x186b   :  { %v10419_v6 = vpop.eup %8114  ;;  %v4536_v48 = vsub.f32 %v4495_v61, %v4524_v37  ;;  %v4547_v58 = vmul.f32 1.442695, %v4535_v31 }
0x186c   :  { %v4600_v46 = vpop.permute.xlu1 %4599  ;;  %v4561_v1 = vsel %vm586_vm2, %v10419_v6, 0.0 }
0x186d   :  { %7466 = vmatprep.subr.bf16.mxu1 %v4600_v46  ;;  %4562 = vadd.xlane.f32.xlu1 %v4561_v1  ;;  %v4549_v11 = vmul.f32 1.442695, %v4536_v48 }
0x186e   :  { %7467 = vmatpush3.bf16.msra.mxu1 %v4600_v46  ;;  %v4530_v62 = vpop.xlane.xlu0 %4529 }
0x186f   :  { %v8117_v30 = vpop.eup %8116  ;;  %8122 = vpow2.f32 %v4549_v11  ;;  %v4538_v0 = vsub.f32 %v7465_v33, %v4530_v62 }
0x1870   :  { %v4555_v17 = vsel %vm586_vm2, %v8117_v30, 0.0  ;;  %8124 = vpow2.f32 %v4547_v58 }
0x1871   :  { %4556 = vadd.xlane.f32.xlu1 %v4555_v17  ;;  %8126 = vpow2.f32 %v4551_v9  ;;  %v4553_v46 = vmul.f32 1.442695, %v4538_v0 }
0x1873   :  { %v8119_v55 = vpop.eup %8118  ;;  %8128 = vpow2.f32 %v4553_v46 }
0x1874   :  { %v4564_v32 = vsel %vm586_vm2, %v8119_v55, 0.0  ;;  %v8121_v27 = vpop.eup %8120 }
0x1875   :  { %4565 = vadd.xlane.f32.xlu0 %v4564_v32  ;;  %v4558_v56 = vsel %vm586_vm2, %v8121_v27, 0.0 }
0x1879   :  { %4559 = vadd.xlane.f32.xlu0 %v4558_v56 }
0x1882   :  { %4603 = vrot.lane.b32.xlu1 %v10045_v10, %s8292_s6  ;;  %v10432_v10 = vpop.eup %8122 }
0x1886   :  { %4605 = vrot.lane.b32.xlu1 %v10040_v12, %s8292_s6  ;;  %v4570_v12 = vsel %vm586_vm2, %v10432_v10, 0.0 }
0x188f   :  { %4601 = vrot.lane.b32.xlu0 %v10013_v63, %s8292_s6  ;;  %v8125_v63 = vpop.eup %8124 }
0x1890   :  { %v4567_v61 = vsel %vm586_vm2, %v8125_v63, 0.0  ;;  %v10437_v43 = vpop.eup %8126 }
0x1891   :  { %v4573_v49 = vsel %vm586_vm2, %v10437_v43, 0.0  ;;  %v8129_v57 = vpop.eup %8128 }
0x1892   :  { %v4576_v33 = vsel %vm586_vm2, %v8129_v57, 0.0 }
0x18aa   :  { %4571 = vadd.xlane.f32.xlu1 %v4570_v12 }
0x18ae   :  { %4568 = vadd.xlane.f32.xlu0 %v4567_v61 }
0x18b2   :  { %4574 = vadd.xlane.f32.xlu0 %v4573_v49  ;;  %v4769_v49 = vsel %vm496_vm1, %v9974_v40, 0 }
0x18b6   :  { %4577 = vadd.xlane.f32.xlu0 %v4576_v33 }
0x18fa   :  { %v4563_v42 = vpop.xlane.xlu1 %4562 }
0x18fe   :  { %v4557_v1 = vpop.xlane.xlu1 %4556 }
0x1902   :  { %v4566_v17 = vpop.xlane.xlu0 %4565  ;;  %v4604_v56 = vpop.permute.xlu1 %4603 }
0x1903   :  { %8130 = vrcp.f32 %v4566_v17 }
0x1904   :  { %8132 = vrcp.f32 %v4557_v1 }
0x1905   :  { %8134 = vrcp.f32 %v4563_v42 }
0x1906   :  { %v4560_v32 = vpop.xlane.xlu0 %4559  ;;  %v4606_v60 = vpop.permute.xlu1 %4605 }
0x1907   :  { %8136 = vrcp.f32 %v4560_v32 }
0x190a   :  { %v4602_v37 = vpop.permute.xlu0 %4601 }
0x190b   :  { %7468 = vmatprep.subr.bf16.mxu1 %v4602_v37 }
0x190c   :  { %7469 = vmatpush3.bf16.msra.mxu1 %v4602_v37 }
0x190d   :  { %7470 = vmatprep.subr.bf16.mxu1 %v4604_v56  ;;  %v8131_v48 = vpop.eup %8130 }
0x190e   :  { %v8133_v11 = vpop.eup %8132  ;;  %v4590_v62 = vmul.f32 %v8131_v48, %v8119_v55  ;;  %v4778_v55 = vsel %vm496_vm1, %v9986_v50, 0 }
0x190f   :  { %v8135_v31 = vpop.eup %8134  ;;  %v4587_v9 = vmul.f32 %v8133_v11, %v8117_v30  ;;  %v4775_v30 = vsel %vm496_vm1, %v9990_v45, 0 }
0x1910   :  { %7471 = vmatpush3.bf16.msra.mxu1 %v4604_v56  ;;  %v4589_v46 = vmul.f32 %v8135_v31, %v10419_v6  ;;  %v4772_v6 = vsel %vm496_vm1, %v9970_v24, 0 }
0x1911   :  { %v8137_v58 = vpop.eup %8136  ;;  %7472 = vmatprep.subr.bf16.mxu1 %v4606_v60 }
0x1912   :  { %v4588_v0 = vmul.f32 %v8137_v58, %v8121_v27  ;;  %v4596_v61 = vpack.c.bf16 %v4590_v62, %v4589_v46 }
0x1914   :  { %7473 = vmatpush3.bf16.msra.mxu1 %v4606_v60  ;;  %v4595_v12 = vpack.c.bf16 %v4588_v0, %v4587_v9 }
0x1915   :  { %7710 = vmatprep.subr.msk.bf16.mxu1 %vm496_vm1, %v9974_v40 }
0x1916   :  { %7474 = vmatprep.mubr.msk.bf16.mxu1 %vm586_vm2, %v4595_v12 }
0x1917   :  { %7475 = vmatmul.mubr.msk.bf16.vlgmr.msra.gmra.mrb[148].mxu1 %vm586_vm2, %v4596_v61 }
0x191d   :  { %7483 = vmatpush3.bf16.xpose.msra.mxu1 %v4769_v49 }
0x191e   :  { %7711 = vmatprep.subr.msk.bf16.mxu1 %vm496_vm1, %v9970_v24 }
0x1925   :  { %7485 = vmatpush3.bf16.xpose.msra.mxu1 %v4772_v6 }
0x1926   :  { %7712 = vmatprep.subr.msk.bf16.mxu1 %vm496_vm1, %v9990_v45 }
0x192d   :  { %7487 = vmatpush3.bf16.xpose.msra.mxu1 %v4775_v30 }
0x192e   :  { %7713 = vmatprep.subr.msk.bf16.mxu1 %vm496_vm1, %v9986_v50 }
0x1935   :  { %7489 = vmatpush3.bf16.xpose.msra.mxu1 %v4778_v55 }
0x1937   :  { %v4572_v27 = vpop.xlane.xlu1 %4571 }
0x1938   :  { %8138 = vrcp.f32 %v4572_v27 }
0x193b   :  { %v4569_v33 = vpop.xlane.xlu0 %4568 }
0x193c   :  { %8140 = vrcp.f32 %v4569_v33 }
0x193f   :  { %v4575_v42 = vpop.xlane.xlu0 %4574 }
0x1940   :  { %8142 = vrcp.f32 %v4575_v42 }
0x1942   :  { %v8139_v17 = vpop.eup %8138 }
0x1943   :  { %v4578_v1 = vpop.xlane.xlu0 %4577  ;;  %v4592_v37 = vmul.f32 %v8139_v17, %v10432_v10 }
0x1944   :  { %8144 = vrcp.f32 %v4578_v1 }
0x1946   :  { %v8141_v32 = vpop.eup %8140 }
0x1947   :  { %v4591_v56 = vmul.f32 %v8141_v32, %v8125_v63 }
0x1949   :  { %v4597_v48 = vpack.c.bf16 %v4592_v37, %v4591_v56 }
0x194a   :  { %v8143_v11 = vpop.eup %8142 }
0x194b   :  { %7478 = vmatprep.mubr.msk.bf16.mxu1 %vm586_vm2, %v4597_v48  ;;  %v4593_v60 = vmul.f32 %v8143_v11, %v10437_v43 }
0x194e   :  { %v8145_v31 = vpop.eup %8144 }
0x194f   :  { %v4594_v58 = vmul.f32 %v8145_v31, %v8129_v57 }
0x1951   :  { %v4598_v62 = vpack.c.bf16 %v4594_v58, %v4593_v60 }
0x1953   :  { %7479 = vmatmul.mubr.msk.bf16.gmra.mrb[152].mxu1 %vm586_vm2, %v4598_v62 }
0x1954   :  { %7490 = vmatprep.mubr.msk.bf16.mxu1 %vm496_vm1, %v9972_v5 }
0x195b   :  { %7491 = vmatmul.mubr.msk.bf16.vlgmr.msra.gmra.mrb[156].mxu1 %vm496_vm1, %v9968_v21 }
0x195c   :  { %7494 = vmatprep.mubr.msk.bf16.mxu1 %vm496_vm1, %v9988_v22 }
0x1963   :  { %7495 = vmatmul.mubr.msk.bf16.gmra.mrb[160].mxu1 %vm496_vm1, %v9984_v51 }
0x19ea   :  { %v10473_v10 = vpop.f32.mrb[148].mxu1 }
0x19eb   :  { %v10475_v63 = vpop.f32.mrb[149].mxu1 }
0x19ec   :  { %v10477_v43 = vpop.f32.mrb[150].mxu1 }
0x19ed   :  { %v10481_v9 = vpop.f32.mrb[151].mxu1 }
0x1a26   :  { %v10485_v46 = vpop.f32.mrb[152].mxu1 }
0x1a27   :  { %v10487_v12 = vpop.f32.mrb[153].mxu1 }
0x1a28   :  { %v10489_v61 = vpop.f32.mrb[154].mxu1 }
0x1a29   :  { %v10493_v6 = vpop.f32.mrb[155].mxu1 }
0x1a2e   :  { %v7492_v55 = vpop.f32.mrb[156].mxu1 }
0x1a2f   :  { %v4814_v27 = vpop.f32.mrb[157].mxu1  ;;  %v4851_v32 = vsel %vm586_vm2, %v7492_v55, -inf }
0x1a30   :  { %v7493_v33 = vpop.f32.mrb[158].mxu1  ;;  %v4845_v42 = vsel %vm586_vm2, %v4814_v27, -inf }
0x1a31   :  { %4846 = vmax.xlane.f32.xlu1 %v4845_v42  ;;  %v4817_v1 = vpop.f32.mrb[159].mxu1  ;;  %v4854_v37 = vsel %vm586_vm2, %v7493_v33, -inf }
0x1a32   :  { %v4848_v17 = vsel %vm586_vm2, %v4817_v1, -inf }
0x1a33   :  { %4849 = vmax.xlane.f32.xlu0 %v4848_v17 }
0x1a35   :  { %4852 = vmax.xlane.f32.xlu1 %v4851_v32 }
0x1a36   :  { %v7496_v56 = vpop.f32.mrb[160].mxu1 }
0x1a37   :  { %4855 = vmax.xlane.f32.xlu0 %v4854_v37  ;;  %v4830_v48 = vpop.f32.mrb[161].mxu1  ;;  %v4863_v62 = vsel %vm586_vm2, %v7496_v56, -inf }
0x1a38   :  { %v7497_v11 = vpop.f32.mrb[162].mxu1  ;;  %v4857_v31 = vsel %vm586_vm2, %v4830_v48, -inf }
0x1a39   :  { %4858 = vmax.xlane.f32.xlu1 %v4857_v31  ;;  %v4833_v60 = vpop.f32.mrb[163].mxu1  ;;  %v4866_v42 = vsel %vm586_vm2, %v7497_v11, -inf }
0x1a3a   :  { %v4860_v58 = vsel %vm586_vm2, %v4833_v60, -inf }
0x1a3b   :  { %4861 = vmax.xlane.f32.xlu0 %v4860_v58 }
0x1a3d   :  { %4864 = vmax.xlane.f32.xlu1 %v4863_v62 }
0x1a3f   :  { %4867 = vmax.xlane.f32.xlu0 %v4866_v42 }
0x1abe   :  { %v4847_v17 = vpop.xlane.xlu1 %4846 }
0x1abf   :  { %v4869_v32 = vsub.f32 %v4814_v27, %v4847_v17 }
0x1ac0   :  { %v4850_v30 = vpop.xlane.xlu0 %4849 }
0x1ac1   :  { %v4870_v37 = vsub.f32 %v4817_v1, %v4850_v30  ;;  %v4877_v57 = vmul.f32 1.442695, %v4869_v32 }
0x1ac2   :  { %v4853_v49 = vpop.xlane.xlu1 %4852 }
0x1ac3   :  { %v4871_v0 = vsub.f32 %v7492_v55, %v4853_v49  ;;  %v4879_v44 = vmul.f32 1.442695, %v4870_v37 }
0x1ac4   :  { %v4856_v35 = vpop.xlane.xlu0 %4855 }
0x1ac5   :  { %v4881_v25 = vmul.f32 1.442695, %v4871_v0  ;;  %v4872_v31 = vsub.f32 %v7493_v33, %v4856_v35 }
0x1ac6   :  { %v4859_v33 = vpop.xlane.xlu1 %4858 }
0x1ac7   :  { %8146 = vpow2.f32 %v4881_v25  ;;  %v4883_v53 = vmul.f32 1.442695, %v4872_v31 }
0x1ac8   :  { %8148 = vpow2.f32 %v4877_v57  ;;  %v4862_v58 = vpop.xlane.xlu0 %4861 }
0x1ac9   :  { %8150 = vpow2.f32 %v4883_v53  ;;  %v4874_v62 = vsub.f32 %v4833_v60, %v4862_v58  ;;  %v4873_v60 = vsub.f32 %v4830_v48, %v4859_v33 }
0x1aca   :  { %8152 = vpow2.f32 %v4879_v44  ;;  %v4865_v1 = vpop.xlane.xlu1 %4864 }
0x1acb   :  { %v4887_v36 = vmul.f32 1.442695, %v4874_v62  ;;  %v4885_v37 = vmul.f32 1.442695, %v4873_v60 }
0x1acc   :  { %v4868_v15 = vpop.xlane.xlu0 %4867 }
0x1acd   :  { %v4876_v42 = vsub.f32 %v7497_v11, %v4868_v15  ;;  %v4875_v11 = vsub.f32 %v7496_v56, %v4865_v1 }
0x1acf   :  { %v4891_v27 = vmul.f32 1.442695, %v4876_v42  ;;  %v4889_v32 = vmul.f32 1.442695, %v4875_v11 }
0x1ad1   :  { %v8147_v17 = vpop.eup %8146  ;;  %8154 = vpow2.f32 %v4891_v27 }
0x1ad2   :  { %v8149_v30 = vpop.eup %8148  ;;  %v4899_v49 = vsel %vm586_vm2, %v8147_v17, 0.0  ;;  %8156 = vpow2.f32 %v4887_v36 }
0x1ad3   :  { %v8151_v55 = vpop.eup %8150  ;;  %4900 = vadd.xlane.f32.xlu1 %v4899_v49  ;;  %v4893_v53 = vsel %vm586_vm2, %v8149_v30, 0.0  ;;  %8158 = vpow2.f32 %v4889_v32 }
0x1ad4   :  { %v4902_v25 = vsel %vm586_vm2, %v8151_v55, 0.0  ;;  %v8153_v35 = vpop.eup %8152  ;;  %8160 = vpow2.f32 %v4885_v37 }
0x1ad5   :  { %4903 = vadd.xlane.f32.xlu0 %v4902_v25  ;;  %v4896_v44 = vsel %vm586_vm2, %v8153_v35, 0.0 }
0x1ad7   :  { %4894 = vadd.xlane.f32.xlu1 %v4893_v53 }
0x1ad9   :  { %4897 = vadd.xlane.f32.xlu0 %v4896_v44 }
0x1adb   :  { %v10509_v15 = vpop.eup %8154 }
0x1adc   :  { %v4914_v57 = vsel %vm586_vm2, %v10509_v15, 0.0  ;;  %v10513_v0 = vpop.eup %8156 }
0x1add   :  { %4915 = vadd.xlane.f32.xlu0 %v4914_v57  ;;  %v4908_v36 = vsel %vm586_vm2, %v10513_v0, 0.0  ;;  %v8159_v31 = vpop.eup %8158 }
0x1ade   :  { %v4911_v58 = vsel %vm586_vm2, %v8159_v31, 0.0  ;;  %v8161_v62 = vpop.eup %8160 }
0x1adf   :  { %v4905_v56 = vsel %vm586_vm2, %v8161_v62, 0.0 }
0x1ae1   :  { %4909 = vadd.xlane.f32.xlu0 %v4908_v36 }
0x1ae8   :  { %5034 = vrot.lane.b32.xlu1 %v9974_v40, %s8290_s4 }
0x1af7   :  { %5036 = vrot.lane.b32.xlu0 %v9970_v24, %s8290_s4 }
0x1afb   :  { %5022 = vrot.lane.b32.xlu0 %v9972_v5, %s8290_s4 }
0x1aff   :  { %5026 = vrot.lane.b32.xlu0 %v9988_v22, %s8290_s4 }
0x1b0c   :  { %4912 = vadd.xlane.f32.xlu1 %v4911_v58 }
0x1b10   :  { %4906 = vadd.xlane.f32.xlu1 %v4905_v56 }
0x1b21   :  { %5038 = vrot.lane.b32.xlu1 %v9990_v45, %s8290_s4 }
0x1b25   :  { %5040 = vrot.lane.b32.xlu1 %v9986_v50, %s8290_s4 }
0x1b29   :  { %5024 = vrot.lane.b32.xlu1 %v9968_v21, %s8290_s4 }
0x1b2d   :  { %5028 = vrot.lane.b32.xlu1 %v9984_v51, %s8290_s4 }
0x1b60   :  { %v4901_v48 = vpop.xlane.xlu1 %4900 }
0x1b62   :  { %v4904_v42 = vpop.xlane.xlu0 %4903 }
0x1b63   :  { %8162 = vrcp.f32 %v4904_v42 }
0x1b64   :  { %v4895_v27 = vpop.xlane.xlu1 %4894 }
0x1b65   :  { %8164 = vrcp.f32 %v4895_v27 }
0x1b66   :  { %8166 = vrcp.f32 %v4901_v48  ;;  %v4898_v49 = vpop.xlane.xlu0 %4897 }
0x1b67   :  { %8168 = vrcp.f32 %v4898_v49 }
0x1b68   :  { %v5035_v25 = vpop.permute.xlu1 %5034 }
0x1b69   :  { %7714 = vmatprep.subr.msk.bf16.mxu0 %vm496_vm1, %v5035_v25  ;;  %v5055_v48 = vsel %vm496_vm1, %v5035_v25, 0 }
0x1b6a   :  { %v4916_v53 = vpop.xlane.xlu0 %4915 }
0x1b6d   :  { %v8163_v44 = vpop.eup %8162 }
0x1b6e   :  { %v4928_v1 = vmul.f32 %v8163_v44, %v8151_v55  ;;  %v4910_v11 = vpop.xlane.xlu0 %4909 }
0x1b6f   :  { %v8165_v57 = vpop.eup %8164 }
0x1b70   :  { %v8167_v36 = vpop.eup %8166  ;;  %v4925_v60 = vmul.f32 %v8165_v57, %v8149_v30 }
0x1b71   :  { %v8169_v33 = vpop.eup %8168  ;;  %v4927_v37 = vmul.f32 %v8167_v36, %v8147_v17 }
0x1b72   :  { %v4926_v32 = vmul.f32 %v8169_v33, %v8153_v35  ;;  %v5037_v42 = vpop.permute.xlu0 %5036 }
0x1b73   :  { %v4934_v56 = vpack.c.bf16 %v4928_v1, %v4927_v37  ;;  %v5058_v27 = vsel %vm496_vm1, %v5037_v42, 0 }
0x1b74   :  { %v4933_v58 = vpack.c.bf16 %v4926_v32, %v4925_v60 }
0x1b76   :  { %7506 = vmatprep.mubr.msk.bf16.mxu0 %vm586_vm2, %v4933_v58  ;;  %v5023_v58 = vpop.permute.xlu0 %5022 }
0x1b77   :  { %7507 = vmatmul.mubr.msk.bf16.vlgmr.msra.gmra.mrb[148].mxu0 %vm586_vm2, %v4934_v56 }
0x1b78   :  { %7515 = vmatpush3.bf16.xpose.msra.mxu0 %v5055_v48 }
0x1b79   :  { %7715 = vmatprep.subr.msk.bf16.mxu0 %vm496_vm1, %v5037_v42 }
0x1b7a   :  { %v5027_v48 = vpop.permute.xlu0 %5026 }
0x1b80   :  { %7517 = vmatpush3.bf16.xpose.msra.mxu0 %v5058_v27 }
0x1b99   :  { %v4913_v55 = vpop.xlane.xlu1 %4912 }
0x1b9a   :  { %8170 = vrcp.f32 %v4913_v55 }
0x1b9b   :  { %8172 = vrcp.f32 %v4910_v11 }
0x1b9c   :  { %8174 = vrcp.f32 %v4916_v53 }
0x1b9d   :  { %v4907_v17 = vpop.xlane.xlu1 %4906 }
0x1b9e   :  { %8176 = vrcp.f32 %v4907_v17 }
0x1ba1   :  { %v5039_v30 = vpop.permute.xlu1 %5038 }
0x1ba2   :  { %7716 = vmatprep.subr.msk.bf16.mxu0 %vm496_vm1, %v5039_v30  ;;  %v5061_v35 = vsel %vm496_vm1, %v5039_v30, 0 }
0x1ba3   :  { %7519 = vmatpush3.bf16.xpose.msra.mxu0 %v5061_v35 }
0x1ba4   :  { %v8171_v49 = vpop.eup %8170 }
0x1ba5   :  { %v5041_v25 = vpop.permute.xlu1 %5040  ;;  %v8173_v44 = vpop.eup %8172  ;;  %v4931_v33 = vmul.f32 %v8171_v49, %v8159_v31 }
0x1ba6   :  { %7717 = vmatprep.subr.msk.bf16.mxu0 %vm496_vm1, %v5041_v25  ;;  %v8175_v57 = vpop.eup %8174  ;;  %v4930_v11 = vmul.f32 %v8173_v44, %v10513_v0  ;;  %v5064_v53 = vsel %vm496_vm1, %v5041_v25, 0 }
0x1ba7   :  { %v4932_v60 = vmul.f32 %v8175_v57, %v10509_v15 }
0x1ba8   :  { %v8177_v36 = vpop.eup %8176 }
0x1ba9   :  { %v4929_v1 = vmul.f32 %v8177_v36, %v8161_v62  ;;  %v4936_v37 = vpack.c.bf16 %v4932_v60, %v4931_v33  ;;  %v5025_v56 = vpop.permute.xlu1 %5024 }
0x1bab   :  { %7521 = vmatpush3.bf16.xpose.msra.mxu0 %v5064_v53  ;;  %v4935_v32 = vpack.c.bf16 %v4930_v11, %v4929_v1 }
0x1bad   :  { %7510 = vmatprep.mubr.msk.bf16.mxu0 %vm586_vm2, %v4935_v32  ;;  %v5029_v0 = vpop.permute.xlu1 %5028 }
0x1bae   :  { %7511 = vmatmul.mubr.msk.bf16.gmra.mrb[152].mxu0 %vm586_vm2, %v4936_v37 }
0x1baf   :  { %7522 = vmatprep.mubr.msk.bf16.mxu0 %vm496_vm1, %v5023_v58 }
0x1bb6   :  { %7523 = vmatmul.mubr.msk.bf16.vlgmr.msra.gmra.mrb[156].mxu0 %vm496_vm1, %v5025_v56 }
0x1bb7   :  { %7526 = vmatprep.mubr.msk.bf16.mxu0 %vm496_vm1, %v5027_v48 }
0x1bbe   :  { %7527 = vmatmul.mubr.msk.bf16.gmra.mrb[160].mxu0 %vm496_vm1, %v5029_v0 }
0x1c4a   :  { %v10553_v15 = vpop.f32.mrb[148].mxu0 }
0x1c4b   :  { %11396 = vst [vmem:[#allocation25_spill] sm:$0xff] %v10553_v15  ;;  %v10555_v31 = vpop.f32.mrb[149].mxu0 }
0x1c4c   :  { %11397 = vst [vmem:[#allocation10_spill] sm:$0xff] %v10555_v31  ;;  %v10557_v62 = vpop.f32.mrb[150].mxu0 }
0x1c4d   :  { %11398 = vst [vmem:[#allocation24_spill] sm:$0xff] %v10557_v62  ;;  %v10561_v27 = vpop.f32.mrb[151].mxu0 }
0x1c4e   :  { %11399 = vst [vmem:[#allocation11_spill] sm:$0xff] %v10561_v27 }
0x1c81   :  { %v10565_v17 = vpop.f32.mrb[152].mxu0 }
0x1c82   :  { %11400 = vst [vmem:[#allocation4_spill] sm:$0xff] %v10565_v17  ;;  %v10567_v30 = vpop.f32.mrb[153].mxu0 }
0x1c83   :  { %11401 = vst [vmem:[#allocation5_spill] sm:$0xff] %v10567_v30  ;;  %v10569_v35 = vpop.f32.mrb[154].mxu0 }
0x1c84   :  { %11402 = vst [vmem:[#allocation6_spill] sm:$0xff] %v10569_v35  ;;  %v10573_v25 = vpop.f32.mrb[155].mxu0 }
0x1c85   :  { %11403 = vst [vmem:[#allocation8_spill] sm:$0xff] %v10573_v25 }
0x1c89   :  { %v7524_v57 = vpop.f32.mrb[156].mxu0 }
0x1c8a   :  { %v5100_v36 = vpop.f32.mrb[157].mxu0  ;;  %v5137_v33 = vsel %vm586_vm2, %v7524_v57, -inf }
0x1c8b   :  { %5138 = vmax.xlane.f32.xlu0 %v5137_v33  ;;  %v7525_v1 = vpop.f32.mrb[158].mxu0  ;;  %v5131_v60 = vsel %vm586_vm2, %v5100_v36, -inf }
0x1c8c   :  { %v5103_v11 = vpop.f32.mrb[159].mxu0  ;;  %v5140_v58 = vsel %vm586_vm2, %v7525_v1, -inf }
0x1c8d   :  { %v5134_v53 = vsel %vm586_vm2, %v5103_v11, -inf }
0x1c8e   :  { %5135 = vmax.xlane.f32.xlu1 %v5134_v53 }
0x1c8f   :  { %5132 = vmax.xlane.f32.xlu0 %v5131_v60 }
0x1c91   :  { %v7528_v32 = vpop.f32.mrb[160].mxu0 }
0x1c92   :  { %v5116_v37 = vpop.f32.mrb[161].mxu0  ;;  %v5149_v56 = vsel %vm586_vm2, %v7528_v32, -inf }
0x1c93   :  { %5141 = vmax.xlane.f32.xlu0 %v5140_v58  ;;  %5150 = vmax.xlane.f32.xlu1 %v5149_v56  ;;  %v7529_v48 = vpop.f32.mrb[162].mxu0  ;;  %v5143_v49 = vsel %vm586_vm2, %v5116_v37, -inf }
0x1c94   :  { %v10582_v0 = vpop.f32.mrb[163].mxu0  ;;  %v5152_v53 = vsel %vm586_vm2, %v7529_v48, -inf }
0x1c95   :  { %v5146_v33 = vsel %vm586_vm2, %v10582_v0, -inf }
0x1c97   :  { %5144 = vmax.xlane.f32.xlu1 %v5143_v49  ;;  %5147 = vmax.xlane.f32.xlu0 %v5146_v33 }
0x1c9b   :  { %5153 = vmax.xlane.f32.xlu0 %v5152_v53 }
0x1ca8   :  { %5227 = vrot.lane.b32.xlu1 %v10059_v54, %s8290_s4 }
0x1cac   :  { %5231 = vrot.lane.b32.xlu1 %v10067_v2, %s8290_s4 }
0x1cb0   :  { %5233 = vrot.lane.b32.xlu1 %v10065_v47, %s8290_s4 }
0x1cb1   :  { %5229 = vrot.lane.b32.xlu0 %v10056_v19, %s8290_s4 }
0x1cb4   :  { %5328 = vrot.lane.b32.xlu1 %v9974_v40, %s8291_s25 }
0x1d18   :  { %v5139_v49 = vpop.xlane.xlu0 %5138 }
0x1d19   :  { %v5157_v60 = vsub.f32 %v7524_v57, %v5139_v49 }
0x1d1b   :  { %v5167_v58 = vmul.f32 1.442695, %v5157_v60  ;;  %v5136_v56 = vpop.xlane.xlu1 %5135 }
0x1d1c   :  { %v5133_v33 = vpop.xlane.xlu0 %5132  ;;  %v5156_v42 = vsub.f32 %v5103_v11, %v5136_v56 }
0x1d1d   :  { %8178 = vpow2.f32 %v5167_v58  ;;  %v5155_v53 = vsub.f32 %v5100_v36, %v5133_v33 }
0x1d1e   :  { %v5165_v25 = vmul.f32 1.442695, %v5156_v42 }
0x1d1f   :  { %v5163_v44 = vmul.f32 1.442695, %v5155_v53 }
0x1d20   :  { %v5151_v55 = vpop.xlane.xlu1 %5150  ;;  %v5142_v17 = vpop.xlane.xlu0 %5141 }
0x1d21   :  { %8180 = vpow2.f32 %v5163_v44  ;;  %v5158_v35 = vsub.f32 %v7525_v1, %v5142_v17  ;;  %v5161_v15 = vsub.f32 %v7528_v32, %v5151_v55 }
0x1d23   :  { %v5169_v30 = vmul.f32 1.442695, %v5158_v35  ;;  %v5175_v57 = vmul.f32 1.442695, %v5161_v15 }
0x1d24   :  { %v5145_v62 = vpop.xlane.xlu1 %5144  ;;  %v5148_v31 = vpop.xlane.xlu0 %5147 }
0x1d25   :  { %8182 = vpow2.f32 %v5169_v30  ;;  %v5159_v49 = vsub.f32 %v5116_v37, %v5145_v62 }
0x1d26   :  { %8184 = vpow2.f32 %v5165_v25 }
0x1d27   :  { %v10598_v27 = vpop.eup %8178  ;;  %8186 = vpow2.f32 %v5175_v57  ;;  %v5171_v42 = vmul.f32 1.442695, %v5159_v49 }
0x1d28   :  { %v5228_v60 = vpop.permute.xlu1 %5227  ;;  %v5154_v58 = vpop.xlane.xlu0 %5153  ;;  %v5185_v36 = vsel %vm586_vm2, %v10598_v27, 0.0 }
0x1d29   :  { %7530 = vmatprep.subr.bf16.mxu1 %v5228_v60  ;;  %5186 = vadd.xlane.f32.xlu1 %v5185_v36  ;;  %v5162_v55 = vsub.f32 %v7529_v48, %v5154_v58  ;;  %8188 = vpow2.f32 %v5171_v42 }
0x1d2a   :  { %7531 = vmatpush3.bf16.msra.mxu1 %v5228_v60  ;;  %v5160_v60 = vsub.f32 %v10582_v0, %v5148_v31 }
0x1d2b   :  { %v10602_v17 = vpop.eup %8180  ;;  %v5177_v62 = vmul.f32 1.442695, %v5162_v55 }
0x1d2c   :  { %v5232_v35 = vpop.permute.xlu1 %5231  ;;  %v5230_v30 = vpop.permute.xlu0 %5229  ;;  %v5179_v25 = vsel %vm586_vm2, %v10602_v17, 0.0  ;;  %v5173_v58 = vmul.f32 1.442695, %v5160_v60 }
0x1d2d   :  { %5180 = vadd.xlane.f32.xlu1 %v5179_v25  ;;  %7532 = vmatprep.subr.bf16.mxu1 %v5230_v30  ;;  %8190 = vpow2.f32 %v5177_v62 }
0x1d2e   :  { %7533 = vmatpush3.bf16.msra.mxu1 %v5230_v30  ;;  %8192 = vpow2.f32 %v5173_v58 }
0x1d2f   :  { %7534 = vmatprep.subr.bf16.mxu1 %v5232_v35  ;;  %v8183_v15 = vpop.eup %8182 }
0x1d30   :  { %v5234_v44 = vpop.permute.xlu1 %5233  ;;  %v5188_v1 = vsel %vm586_vm2, %v8183_v15, 0.0  ;;  %v8185_v11 = vpop.eup %8184 }
0x1d31   :  { %5189 = vadd.xlane.f32.xlu0 %v5188_v1  ;;  %v5182_v32 = vsel %vm586_vm2, %v8185_v11, 0.0  ;;  %v10608_v37 = vpop.eup %8186 }
0x1d32   :  { %7535 = vmatpush3.bf16.msra.mxu1 %v5232_v35  ;;  %v5197_v56 = vsel %vm586_vm2, %v10608_v37, 0.0 }
0x1d33   :  { %7536 = vmatprep.subr.bf16.mxu1 %v5234_v44  ;;  %v10613_v33 = vpop.eup %8188 }
0x1d34   :  { %v5329_v48 = vpop.permute.xlu1 %5328  ;;  %v5191_v53 = vsel %vm586_vm2, %v10613_v33, 0.0 }
0x1d35   :  { %5183 = vadd.xlane.f32.xlu0 %v5182_v32 }
0x1d36   :  { %7537 = vmatpush3.bf16.msra.mxu1 %v5234_v44 }
0x1d37   :  { %7718 = vmatprep.subr.msk.bf16.mxu1 %vm496_vm1, %v5329_v48  ;;  %v10617_v57 = vpop.eup %8190 }
0x1d38   :  { %v5200_v49 = vsel %vm586_vm2, %v10617_v57, 0.0  ;;  %v8193_v36 = vpop.eup %8192 }
0x1d39   :  { %5198 = vadd.xlane.f32.xlu0 %v5197_v56  ;;  %v5194_v42 = vsel %vm586_vm2, %v8193_v36, 0.0 }
0x1d3d   :  { %5192 = vadd.xlane.f32.xlu0 %v5191_v53 }
0x1d3e   :  { %5332 = vrot.lane.b32.xlu1 %v9990_v45, %s8291_s25 }
0x1d41   :  { %5201 = vadd.xlane.f32.xlu0 %v5200_v49 }
0x1d57   :  { %5330 = vrot.lane.b32.xlu0 %v9970_v24, %s8291_s25 }
0x1d5b   :  { %5320 = vrot.lane.b32.xlu0 %v9972_v5, %s8291_s25 }
0x1d5f   :  { %5324 = vrot.lane.b32.xlu0 %v9988_v22, %s8291_s25 }
0x1d62   :  { %5195 = vadd.xlane.f32.xlu1 %v5194_v42 }
0x1d73   :  { %5334 = vrot.lane.b32.xlu1 %v9986_v50, %s8291_s25 }
0x1d77   :  { %5322 = vrot.lane.b32.xlu1 %v9968_v21, %s8291_s25 }
0x1d7b   :  { %5326 = vrot.lane.b32.xlu1 %v9984_v51, %s8291_s25 }
0x1db6   :  { %v5187_v31 = vpop.xlane.xlu1 %5186 }
0x1dba   :  { %v5181_v0 = vpop.xlane.xlu1 %5180 }
0x1dbe   :  { %v5190_v55 = vpop.xlane.xlu0 %5189 }
0x1dbf   :  { %8194 = vrcp.f32 %v5190_v55  ;;  %v5333_v55 = vpop.permute.xlu1 %5332 }
0x1dc0   :  { %8196 = vrcp.f32 %v5181_v0  ;;  %v5349_v0 = vsel %vm496_vm1, %v5329_v48, 0 }
0x1dc1   :  { %8198 = vrcp.f32 %v5187_v31 }
0x1dc2   :  { %v5184_v35 = vpop.xlane.xlu0 %5183 }
0x1dc3   :  { %8200 = vrcp.f32 %v5184_v35 }
0x1dc6   :  { %v5199_v30 = vpop.xlane.xlu0 %5198 }
0x1dc9   :  { %v8195_v25 = vpop.eup %8194 }
0x1dca   :  { %v5193_v62 = vpop.xlane.xlu0 %5192  ;;  %v8197_v44 = vpop.eup %8196  ;;  %v5214_v56 = vmul.f32 %v8195_v25, %v8183_v15 }
0x1dcb   :  { %v8199_v1 = vpop.eup %8198  ;;  %v5211_v49 = vmul.f32 %v8197_v44, %v10602_v17 }
0x1dcc   :  { %v5213_v58 = vmul.f32 %v8199_v1, %v10598_v27  ;;  %v5355_v27 = vsel %vm496_vm1, %v5333_v55, 0 }
0x1dcd   :  { %v8201_v32 = vpop.eup %8200 }
0x1dce   :  { %v5202_v53 = vpop.xlane.xlu0 %5201  ;;  %v5212_v60 = vmul.f32 %v8201_v32, %v8185_v11  ;;  %v5220_v3 = vpack.c.bf16 %v5214_v56, %v5213_v58 }
0x1dcf   :  { %8202 = vrcp.f32 %v5202_v53 }
0x1dd0   :  { %v5219_v42 = vpack.c.bf16 %v5212_v60, %v5211_v49  ;;  %8204 = vrcp.f32 %v5193_v62 }
0x1dd1   :  { %8206 = vrcp.f32 %v5199_v30 }
0x1dd2   :  { %7538 = vmatprep.mubr.msk.bf16.mxu1 %vm586_vm2, %v5219_v42  ;;  %v5331_v31 = vpop.permute.xlu0 %5330 }
0x1dd3   :  { %7539 = vmatmul.mubr.msk.bf16.vlgmr.msra.gmra.mrb[164].mxu1 %vm586_vm2, %v5220_v3  ;;  %v5352_v15 = vsel %vm496_vm1, %v5331_v31, 0 }
0x1dd4   :  { %7547 = vmatpush3.bf16.xpose.msra.mxu1 %v5349_v0 }
0x1dd5   :  { %7719 = vmatprep.subr.msk.bf16.mxu1 %vm496_vm1, %v5331_v31 }
0x1dd6   :  { %v5321_v49 = vpop.permute.xlu0 %5320 }
0x1dd9   :  { %v8203_v48 = vpop.eup %8202 }
0x1dda   :  { %v8205_v35 = vpop.eup %8204  ;;  %v5218_v1 = vmul.f32 %v8203_v48, %v10617_v57  ;;  %v5325_v58 = vpop.permute.xlu0 %5324 }
0x1ddb   :  { %v8207_v25 = vpop.eup %8206  ;;  %v5215_v32 = vmul.f32 %v8205_v35, %v10613_v33 }
0x1ddc   :  { %7549 = vmatpush3.bf16.xpose.msra.mxu1 %v5352_v15  ;;  %v5217_v62 = vmul.f32 %v8207_v25, %v10608_v37 }
0x1ddd   :  { %7720 = vmatprep.subr.msk.bf16.mxu1 %vm496_vm1, %v5333_v55 }
0x1dde   :  { %v5222_v53 = vpack.c.bf16 %v5218_v1, %v5217_v62 }
0x1de4   :  { %7551 = vmatpush3.bf16.xpose.msra.mxu1 %v5355_v27 }
0x1def   :  { %v5196_v17 = vpop.xlane.xlu1 %5195 }
0x1df0   :  { %8208 = vrcp.f32 %v5196_v17 }
0x1df3   :  { %v5335_v11 = vpop.permute.xlu1 %5334 }
0x1df4   :  { %v5358_v3 = vsel %vm496_vm1, %v5335_v11, 0  ;;  %7721 = vmatprep.subr.msk.bf16.mxu1 %vm496_vm1, %v5335_v11 }
0x1df5   :  { %7553 = vmatpush3.bf16.xpose.msra.mxu1 %v5358_v3 }
0x1df7   :  { %v5323_v60 = vpop.permute.xlu1 %5322 }
0x1dfa   :  { %v8209_v44 = vpop.eup %8208 }
0x1dfb   :  { %v5216_v56 = vmul.f32 %v8209_v44, %v8193_v36  ;;  %v5327_v57 = vpop.permute.xlu1 %5326 }
0x1dfd   :  { %v5221_v30 = vpack.c.bf16 %v5216_v56, %v5215_v32 }
0x1dff   :  { %7542 = vmatprep.mubr.msk.bf16.mxu1 %vm586_vm2, %v5221_v30 }
0x1e00   :  { %7543 = vmatmul.mubr.msk.bf16.gmra.mrb[168].mxu1 %vm586_vm2, %v5222_v53 }
0x1e01   :  { %7554 = vmatprep.mubr.msk.bf16.mxu1 %vm496_vm1, %v5321_v49 }
0x1e08   :  { %7555 = vmatmul.mubr.msk.bf16.vlgmr.msra.gmra.mrb[172].mxu1 %vm496_vm1, %v5323_v60 }
0x1e09   :  { %7558 = vmatprep.mubr.msk.bf16.mxu1 %vm496_vm1, %v5325_v58 }
0x1e10   :  { %7559 = vmatmul.mubr.msk.bf16.gmra.mrb[176].mxu1 %vm496_vm1, %v5327_v57 }
0x1ea6   :  { %v10657_v33 = vpop.f32.mrb[164].mxu1 }
0x1ea7   :  { %v10659_v37 = vpop.f32.mrb[165].mxu1 }
0x1ea8   :  { %v10661_v36 = vpop.f32.mrb[166].mxu1 }
0x1ea9   :  { %v10665_v31 = vpop.f32.mrb[167].mxu1 }
0x1ed3   :  { %v10669_v15 = vpop.f32.mrb[168].mxu1 }
0x1ed4   :  { %11404 = vst [vmem:[#allocation7_spill] sm:$0xff] %v10669_v15  ;;  %v10671_v55 = vpop.f32.mrb[169].mxu1 }
0x1ed5   :  { %11405 = vst [vmem:[#allocation9_spill] sm:$0xff] %v10671_v55  ;;  %v10673_v27 = vpop.f32.mrb[170].mxu1 }
0x1ed6   :  { %11406 = vst [vmem:[#allocation2_spill] sm:$0xff] %v10673_v27  ;;  %v10677_v11 = vpop.f32.mrb[171].mxu1 }
0x1ed7   :  { %11407 = vst [vmem:[#allocation3_spill] sm:$0xff] %v10677_v11 }
0x1edb   :  { %v7556_v48 = vpop.f32.mrb[172].mxu1 }
0x1edc   :  { %v5394_v35 = vpop.f32.mrb[173].mxu1  ;;  %v5431_v25 = vsel %vm586_vm2, %v7556_v48, -inf }
0x1edd   :  { %5432 = vmax.xlane.f32.xlu0 %v5431_v25  ;;  %v7557_v44 = vpop.f32.mrb[174].mxu1  ;;  %v5425_v56 = vsel %vm586_vm2, %v5394_v35, -inf }
0x1ede   :  { %v5397_v1 = vpop.f32.mrb[175].mxu1  ;;  %v5434_v53 = vsel %vm586_vm2, %v7557_v44, -inf }
0x1edf   :  { %v5428_v32 = vsel %vm586_vm2, %v5397_v1, -inf }
0x1ee0   :  { %5429 = vmax.xlane.f32.xlu1 %v5428_v32 }
0x1ee1   :  { %5426 = vmax.xlane.f32.xlu0 %v5425_v56 }
0x1ee3   :  { %v7560_v62 = vpop.f32.mrb[176].mxu1 }
0x1ee4   :  { %v5410_v30 = vpop.f32.mrb[177].mxu1  ;;  %v5443_v49 = vsel %vm586_vm2, %v7560_v62, -inf }
0x1ee5   :  { %5435 = vmax.xlane.f32.xlu0 %v5434_v53  ;;  %5444 = vmax.xlane.f32.xlu1 %v5443_v49  ;;  %v7561_v60 = vpop.f32.mrb[178].mxu1  ;;  %v5437_v25 = vsel %vm586_vm2, %v5410_v30, -inf }
0x1ee6   :  { %v10686_v58 = vpop.f32.mrb[179].mxu1  ;;  %v5446_v32 = vsel %vm586_vm2, %v7561_v60, -inf }
0x1ee7   :  { %v5440_v57 = vsel %vm586_vm2, %v10686_v58, -inf }
0x1ee9   :  { %5438 = vmax.xlane.f32.xlu1 %v5437_v25  ;;  %5441 = vmax.xlane.f32.xlu0 %v5440_v57 }
0x1eed   :  { %5447 = vmax.xlane.f32.xlu0 %v5446_v32 }
0x1efa   :  { %5517 = vrot.lane.b32.xlu1 %v10059_v54, %s8291_s25 }
0x1efe   :  { %5521 = vrot.lane.b32.xlu1 %v10067_v2, %s8291_s25 }
0x1f02   :  { %5523 = vrot.lane.b32.xlu1 %v10065_v47, %s8291_s25 }
0x1f03   :  { %5519 = vrot.lane.b32.xlu0 %v10056_v19, %s8291_s25 }
0x1f06   :  { %5618 = vrot.lane.b32.xlu1 %v9974_v40, %s8292_s6 }
0x1f6a   :  { %v5433_v56 = vpop.xlane.xlu0 %5432 }
0x1f6b   :  { %v5451_v53 = vsub.f32 %v7556_v48, %v5433_v56 }
0x1f6d   :  { %v5461_v49 = vmul.f32 1.442695, %v5451_v53  ;;  %v5430_v57 = vpop.xlane.xlu1 %5429 }
0x1f6e   :  { %v5427_v25 = vpop.xlane.xlu0 %5426  ;;  %v5450_v17 = vsub.f32 %v5397_v1, %v5430_v57 }
0x1f6f   :  { %8210 = vpow2.f32 %v5461_v49  ;;  %v5449_v32 = vsub.f32 %v5394_v35, %v5427_v25 }
0x1f70   :  { %v5459_v55 = vmul.f32 1.442695, %v5450_v17 }
0x1f71   :  { %v5457_v3 = vmul.f32 1.442695, %v5449_v32 }
0x1f72   :  { %v5445_v0 = vpop.xlane.xlu1 %5444  ;;  %v5436_v42 = vpop.xlane.xlu0 %5435 }
0x1f73   :  { %8212 = vpow2.f32 %v5457_v3  ;;  %v5452_v29 = vsub.f32 %v7557_v44, %v5436_v42  ;;  %v5455_v11 = vsub.f32 %v7560_v62, %v5445_v0 }
0x1f75   :  { %v5463_v59 = vmul.f32 1.442695, %v5452_v29  ;;  %v5469_v48 = vmul.f32 1.442695, %v5455_v11 }
0x1f76   :  { %v5439_v15 = vpop.xlane.xlu1 %5438  ;;  %v5442_v27 = vpop.xlane.xlu0 %5441 }
0x1f77   :  { %8214 = vpow2.f32 %v5463_v59  ;;  %v5453_v56 = vsub.f32 %v5410_v30, %v5439_v15 }
0x1f78   :  { %8216 = vpow2.f32 %v5459_v55 }
0x1f79   :  { %v10702_v40 = vpop.eup %8210  ;;  %8218 = vpow2.f32 %v5469_v48  ;;  %v5465_v29 = vmul.f32 1.442695, %v5453_v56 }
0x1f7a   :  { %v5518_v53 = vpop.permute.xlu1 %5517  ;;  %v5448_v49 = vpop.xlane.xlu0 %5447  ;;  %v5479_v35 = vsel %vm586_vm2, %v10702_v40, 0.0 }
0x1f7b   :  { %7562 = vmatprep.subr.bf16.mxu0 %v5518_v53  ;;  %5480 = vadd.xlane.f32.xlu1 %v5479_v35  ;;  %v5456_v0 = vsub.f32 %v7561_v60, %v5448_v49  ;;  %8220 = vpow2.f32 %v5465_v29 }
0x1f7c   :  { %7563 = vmatpush3.bf16.msra.mxu0 %v5518_v53  ;;  %v5454_v53 = vsub.f32 %v10686_v58, %v5442_v27 }
0x1f7d   :  { %v10706_v42 = vpop.eup %8212  ;;  %v5471_v11 = vmul.f32 1.442695, %v5456_v0 }
0x1f7e   :  { %v5522_v17 = vpop.permute.xlu1 %5521  ;;  %v5520_v59 = vpop.permute.xlu0 %5519  ;;  %v5473_v55 = vsel %vm586_vm2, %v10706_v42, 0.0  ;;  %v5467_v49 = vmul.f32 1.442695, %v5454_v53 }
0x1f7f   :  { %5474 = vadd.xlane.f32.xlu1 %v5473_v55  ;;  %7564 = vmatprep.subr.bf16.mxu0 %v5520_v59  ;;  %8222 = vpow2.f32 %v5471_v11 }
0x1f80   :  { %7565 = vmatpush3.bf16.msra.mxu0 %v5520_v59  ;;  %8224 = vpow2.f32 %v5467_v49 }
0x1f81   :  { %7566 = vmatprep.subr.bf16.mxu0 %v5522_v17  ;;  %v8215_v15 = vpop.eup %8214 }
0x1f82   :  { %v5524_v3 = vpop.permute.xlu1 %5523  ;;  %v5482_v44 = vsel %vm586_vm2, %v8215_v15, 0.0  ;;  %v8217_v1 = vpop.eup %8216 }
0x1f83   :  { %5483 = vadd.xlane.f32.xlu0 %v5482_v44  ;;  %v5476_v62 = vsel %vm586_vm2, %v8217_v1, 0.0  ;;  %v10712_v30 = vpop.eup %8218 }
0x1f84   :  { %7567 = vmatpush3.bf16.msra.mxu0 %v5522_v17  ;;  %v5491_v57 = vsel %vm586_vm2, %v10712_v30, 0.0 }
0x1f85   :  { %7568 = vmatprep.subr.bf16.mxu0 %v5524_v3  ;;  %v10717_v25 = vpop.eup %8220 }
0x1f86   :  { %v5619_v60 = vpop.permute.xlu1 %5618  ;;  %v5485_v32 = vsel %vm586_vm2, %v10717_v25, 0.0 }
0x1f87   :  { %5477 = vadd.xlane.f32.xlu0 %v5476_v62 }
0x1f88   :  { %7569 = vmatpush3.bf16.msra.mxu0 %v5524_v3 }
0x1f89   :  { %7722 = vmatprep.subr.msk.bf16.mxu0 %vm496_vm1, %v5619_v60  ;;  %v10721_v48 = vpop.eup %8222 }
0x1f8a   :  { %v5494_v56 = vsel %vm586_vm2, %v10721_v48, 0.0  ;;  %v8225_v35 = vpop.eup %8224 }
0x1f8b   :  { %5492 = vadd.xlane.f32.xlu0 %v5491_v57 }
0x1f8f   :  { %5486 = vadd.xlane.f32.xlu0 %v5485_v32  ;;  %v5639_v32 = vsel %vm496_vm1, %v5619_v60, 0 }
0x1f90   :  { %5622 = vrot.lane.b32.xlu1 %v9990_v45, %s8292_s6  ;;  %v5488_v45 = vsel %vm586_vm2, %v8225_v35, 0.0 }
0x1f93   :  { %5495 = vadd.xlane.f32.xlu0 %v5494_v56 }
0x1fa9   :  { %5620 = vrot.lane.b32.xlu0 %v9970_v24, %s8292_s6 }
0x1fad   :  { %5610 = vrot.lane.b32.xlu0 %v9972_v5, %s8292_s6 }
0x1fb1   :  { %5614 = vrot.lane.b32.xlu0 %v9988_v22, %s8292_s6 }
0x1fb4   :  { %5489 = vadd.xlane.f32.xlu1 %v5488_v45 }
0x1fc5   :  { %5624 = vrot.lane.b32.xlu1 %v9986_v50, %s8292_s6 }
0x1fc9   :  { %5612 = vrot.lane.b32.xlu1 %v9968_v21, %s8292_s6 }
0x1fcd   :  { %5616 = vrot.lane.b32.xlu1 %v9984_v51, %s8292_s6 }
0x2008   :  { %v5481_v24 = vpop.xlane.xlu1 %5480 }
0x200c   :  { %v5475_v27 = vpop.xlane.xlu1 %5474 }
0x2010   :  { %v5484_v58 = vpop.xlane.xlu0 %5483  ;;  %v5623_v56 = vpop.permute.xlu1 %5622 }
0x2011   :  { %8226 = vrcp.f32 %v5484_v58 }
0x2012   :  { %8228 = vrcp.f32 %v5475_v27 }
0x2013   :  { %8230 = vrcp.f32 %v5481_v24 }
0x2014   :  { %v5478_v5 = vpop.xlane.xlu0 %5477 }
0x2015   :  { %8232 = vrcp.f32 %v5478_v5 }
0x2018   :  { %v5493_v22 = vpop.xlane.xlu0 %5492 }
0x201b   :  { %v8227_v29 = vpop.eup %8226 }
0x201c   :  { %v5487_v0 = vpop.xlane.xlu0 %5486  ;;  %v8229_v17 = vpop.eup %8228  ;;  %v5508_v55 = vmul.f32 %v8227_v29, %v8215_v15 }
0x201d   :  { %v8231_v59 = vpop.eup %8230  ;;  %v5505_v21 = vmul.f32 %v8229_v17, %v10706_v42 }
0x201e   :  { %v5507_v51 = vmul.f32 %v8231_v59, %v10702_v40  ;;  %v5645_v40 = vsel %vm496_vm1, %v5623_v56, 0 }
0x201f   :  { %v8233_v50 = vpop.eup %8232 }
0x2020   :  { %v5496_v11 = vpop.xlane.xlu0 %5495  ;;  %v5506_v3 = vmul.f32 %v8233_v50, %v8217_v1  ;;  %v5514_v62 = vpack.c.bf16 %v5508_v55, %v5507_v51 }
0x2021   :  { %8234 = vrcp.f32 %v5496_v11 }
0x2022   :  { %v5513_v44 = vpack.c.bf16 %v5506_v3, %v5505_v21  ;;  %8236 = vrcp.f32 %v5487_v0 }
0x2023   :  { %8238 = vrcp.f32 %v5493_v22 }
0x2024   :  { %7570 = vmatprep.mubr.msk.bf16.mxu0 %vm586_vm2, %v5513_v44  ;;  %v5621_v57 = vpop.permute.xlu0 %5620 }
0x2025   :  { %7571 = vmatmul.mubr.msk.bf16.vlgmr.msra.gmra.mrb[164].mxu0 %vm586_vm2, %v5514_v62  ;;  %v5642_v15 = vsel %vm496_vm1, %v5621_v57, 0 }
0x2026   :  { %7579 = vmatpush3.bf16.xpose.msra.mxu0 %v5639_v32 }
0x2027   :  { %7723 = vmatprep.subr.msk.bf16.mxu0 %vm496_vm1, %v5621_v57 }
0x2028   :  { %v5611_v17 = vpop.permute.xlu0 %5610 }
0x202b   :  { %v8235_v53 = vpop.eup %8234 }
0x202c   :  { %v8237_v49 = vpop.eup %8236  ;;  %v5512_v27 = vmul.f32 %v8235_v53, %v10721_v48  ;;  %v5615_v50 = vpop.permute.xlu0 %5614 }
0x202d   :  { %v8239_v45 = vpop.eup %8238  ;;  %v5509_v58 = vmul.f32 %v8237_v49, %v10717_v25 }
0x202e   :  { %7581 = vmatpush3.bf16.xpose.msra.mxu0 %v5642_v15  ;;  %v5511_v29 = vmul.f32 %v8239_v45, %v10712_v30 }
0x202f   :  { %7724 = vmatprep.subr.msk.bf16.mxu0 %vm496_vm1, %v5623_v56 }
0x2030   :  { %v5516_v0 = vpack.c.bf16 %v5512_v27, %v5511_v29 }
0x2036   :  { %7583 = vmatpush3.bf16.xpose.msra.mxu0 %v5645_v40 }
0x2041   :  { %v5490_v42 = vpop.xlane.xlu1 %5489 }
0x2042   :  { %8240 = vrcp.f32 %v5490_v42 }
0x2045   :  { %v5625_v1 = vpop.permute.xlu1 %5624 }
0x2046   :  { %v5648_v60 = vsel %vm496_vm1, %v5625_v1, 0  ;;  %7725 = vmatprep.subr.msk.bf16.mxu0 %vm496_vm1, %v5625_v1 }
0x2047   :  { %7585 = vmatpush3.bf16.xpose.msra.mxu0 %v5648_v60 }
0x2049   :  { %v5613_v59 = vpop.permute.xlu1 %5612 }
0x204c   :  { %v8241_v24 = vpop.eup %8240 }
0x204d   :  { %v5510_v5 = vmul.f32 %v8241_v24, %v8225_v35  ;;  %v5617_v48 = vpop.permute.xlu1 %5616 }
0x204f   :  { %v5515_v22 = vpack.c.bf16 %v5510_v5, %v5509_v58 }
0x2051   :  { %7574 = vmatprep.mubr.msk.bf16.mxu0 %vm586_vm2, %v5515_v22 }
0x2052   :  { %7575 = vmatmul.mubr.msk.bf16.gmra.mrb[168].mxu0 %vm586_vm2, %v5516_v0 }
0x2053   :  { %7586 = vmatprep.mubr.msk.bf16.mxu0 %vm496_vm1, %v5611_v17 }
0x205a   :  { %7587 = vmatmul.mubr.msk.bf16.vlgmr.msra.gmra.mrb[172].mxu0 %vm496_vm1, %v5613_v59 }
0x205b   :  { %7590 = vmatprep.mubr.msk.bf16.mxu0 %vm496_vm1, %v5615_v50 }
0x2062   :  { %7591 = vmatmul.mubr.msk.bf16.gmra.mrb[176].mxu0 %vm496_vm1, %v5617_v48 }
0x20f8   :  { %v10761_v25 = vpop.f32.mrb[164].mxu0 }
0x20f9   :  { %v10763_v30 = vpop.f32.mrb[165].mxu0 }
0x20fa   :  { %v10765_v35 = vpop.f32.mrb[166].mxu0 }
0x20fb   :  { %v10769_v11 = vpop.f32.mrb[167].mxu0 }
0x2125   :  { %v10773_v3 = vpop.f32.mrb[168].mxu0 }
0x2126   :  { %v10775_v51 = vpop.f32.mrb[169].mxu0 }
0x2127   :  { %11408 = vst [vmem:[#allocation30_spill] sm:$0xff] %v10775_v51  ;;  %v10777_v44 = vpop.f32.mrb[170].mxu0 }
0x2128   :  { %v10781_v57 = vpop.f32.mrb[171].mxu0 }
0x212d   :  { %v7588_v15 = vpop.f32.mrb[172].mxu0 }
0x212e   :  { %v5684_v56 = vpop.f32.mrb[173].mxu0  ;;  %v5721_v53 = vsel %vm586_vm2, %v7588_v15, -inf }
0x212f   :  { %v7589_v40 = vpop.f32.mrb[174].mxu0  ;;  %v5715_v42 = vsel %vm586_vm2, %v5684_v56, -inf }
0x2130   :  { %5716 = vmax.xlane.f32.xlu0 %v5715_v42  ;;  %v5687_v1 = vpop.f32.mrb[175].mxu0  ;;  %v5724_v27 = vsel %vm586_vm2, %v7589_v40, -inf }
0x2131   :  { %v5718_v60 = vsel %vm586_vm2, %v5687_v1, -inf }
0x2132   :  { %5719 = vmax.xlane.f32.xlu1 %v5718_v60 }
0x2134   :  { %5722 = vmax.xlane.f32.xlu0 %v5721_v53 }
0x2135   :  { %v7592_v49 = vpop.f32.mrb[176].mxu0 }
0x2136   :  { %v5700_v45 = vpop.f32.mrb[177].mxu0  ;;  %v5733_v29 = vsel %vm586_vm2, %v7592_v49, -inf }
0x2137   :  { %v7593_v24 = vpop.f32.mrb[178].mxu0  ;;  %v5727_v58 = vsel %vm586_vm2, %v5700_v45, -inf }
0x2138   :  { %5725 = vmax.xlane.f32.xlu0 %v5724_v27  ;;  %5728 = vmax.xlane.f32.xlu1 %v5727_v58  ;;  %v5703_v5 = vpop.f32.mrb[179].mxu0  ;;  %v5736_v0 = vsel %vm586_vm2, %v7593_v24, -inf }
0x2139   :  { %v5730_v22 = vsel %vm586_vm2, %v5703_v5, -inf }
0x213c   :  { %5734 = vmax.xlane.f32.xlu1 %v5733_v29  ;;  %5731 = vmax.xlane.f32.xlu0 %v5730_v22 }
0x2140   :  { %5737 = vmax.xlane.f32.xlu0 %v5736_v0 }
0x214d   :  { %5807 = vrot.lane.b32.xlu1 %v10059_v54, %s8292_s6 }
0x21bd   :  { %v5717_v17 = vpop.xlane.xlu0 %5716 }
0x21be   :  { %v5739_v59 = vsub.f32 %v5684_v56, %v5717_v17 }
0x21bf   :  { %v5720_v50 = vpop.xlane.xlu1 %5719 }
0x21c0   :  { %v5747_v60 = vmul.f32 1.442695, %v5739_v59  ;;  %v5740_v27 = vsub.f32 %v5687_v1, %v5720_v50 }
0x21c1   :  { %v5723_v48 = vpop.xlane.xlu0 %5722 }
0x21c2   :  { %v5741_v42 = vsub.f32 %v7588_v15, %v5723_v48  ;;  %v5749_v21 = vmul.f32 1.442695, %v5740_v27 }
0x21c4   :  { %v5751_v53 = vmul.f32 1.442695, %v5741_v42 }
0x21c5   :  { %v5729_v58 = vpop.xlane.xlu1 %5728  ;;  %v5726_v32 = vpop.xlane.xlu0 %5725 }
0x21c6   :  { %8242 = vpow2.f32 %v5751_v53  ;;  %v5742_v62 = vsub.f32 %v7589_v40, %v5726_v32  ;;  %v5743_v29 = vsub.f32 %v5700_v45, %v5729_v58 }
0x21c7   :  { %8244 = vpow2.f32 %v5747_v60 }
0x21c8   :  { %v5753_v22 = vmul.f32 1.442695, %v5742_v62  ;;  %v5755_v54 = vmul.f32 1.442695, %v5743_v29 }
0x21c9   :  { %v5735_v0 = vpop.xlane.xlu1 %5734  ;;  %v5732_v55 = vpop.xlane.xlu0 %5731 }
0x21ca   :  { %v5745_v51 = vsub.f32 %v7592_v49, %v5735_v0  ;;  %8246 = vpow2.f32 %v5753_v22  ;;  %v5744_v17 = vsub.f32 %v5703_v5, %v5732_v55  ;;  %v11409_v22 = vpack.c.bf16 %v10277_v52, %v10273_v14 }
0x21cb   :  { %8248 = vpow2.f32 %v5749_v21  ;;  %v11410_v0 = vpack.c.bf16 %v10389_v26, %v10385_v18  ;;  %v11413_v14 = vpack.c.bf16 %v10393_v7, %v10387_v34  ;;  %v11416_v52 = vpack.c.bf16 %v10401_v23, %v10397_v39  ;;  %v11424_v26 = vld [vmem:[#allocation2_spill] sm:$0xff]  ;;  %v11425_v7 = vld [vmem:[#allocation7_spill] sm:$0xff] }
0x21cc   :  { %v5759_v56 = vmul.f32 1.442695, %v5745_v51  ;;  %v5757_v62 = vmul.f32 1.442695, %v5744_v17  ;;  %v11420_v18 = vpack.c.bf16 %v10661_v36, %v10657_v33  ;;  %v11423_v34 = vpack.c.bf16 %v10665_v31, %v10659_v37  ;;  %v11428_v23 = vld [vmem:[#allocation3_spill] sm:$0xff] }
0x21cd   :  { %v5808_v15 = vpop.permute.xlu1 %5807  ;;  %v5738_v59 = vpop.xlane.xlu0 %5737  ;;  %v11426_v39 = vpack.c.bf16 %v11424_v26, %v11425_v7  ;;  %v11437_v26 = vld [vmem:[#allocation15_spill] sm:$0xff]  ;;  %v11438_v7 = vld [vmem:[#allocation14_spill] sm:$0xff] }
0x21ce   :  { %8250 = vpow2.f32 %v5759_v56  ;;  %v5746_v1 = vsub.f32 %v7593_v24, %v5738_v59  ;;  %7594 = vmatprep.subr.bf16.mxu1 %v5808_v15 }
0x21cf   :  { %7595 = vmatpush3.bf16.msra.mxu1 %v5808_v15  ;;  %8252 = vpow2.f32 %v5755_v54 }
0x21d0   :  { %v10795_v50 = vpop.eup %8242  ;;  %v5761_v32 = vmul.f32 1.442695, %v5746_v1 }
0x21d1   :  { %v5769_v40 = vsel %vm586_vm2, %v10795_v50, 0.0  ;;  %v10799_v49 = vpop.eup %8244 }
0x21d2   :  { %8254 = vpow2.f32 %v5761_v32  ;;  %5770 = vadd.xlane.f32.xlu1 %v5769_v40  ;;  %v5763_v55 = vsel %vm586_vm2, %v10799_v49, 0.0  ;;  %v7754_v40 = vld [vmem:[%s11206_s15] sm:$0xff]  }
0x21d3   :  { %8256 = vpow2.f32 %v5757_v62 }
0x21d4   :  { %v10801_v21 = vpop.eup %8246 }
0x21d5   :  { %v5772_v51 = vsel %vm586_vm2, %v10801_v21, 0.0  ;;  %v8249_v45 = vpop.eup %8248 }
0x21d6   :  { %5764 = vadd.xlane.f32.xlu1 %v5763_v55  ;;  %5773 = vadd.xlane.f32.xlu0 %v5772_v51  ;;  %v5766_v42 = vsel %vm586_vm2, %v8249_v45, 0.0 }
0x21d8   :  { %v10807_v24 = vpop.eup %8250 }
0x21d9   :  { %v5781_v5 = vsel %vm586_vm2, %v10807_v24, 0.0  ;;  %v10811_v48 = vpop.eup %8252 }
0x21da   :  { %5782 = vadd.xlane.f32.xlu1 %v5781_v5  ;;  %5767 = vadd.xlane.f32.xlu0 %v5766_v42  ;;  %v5775_v53 = vsel %vm586_vm2, %v10811_v48, 0.0 }
0x21dc   :  { %v10814_v60 = vpop.eup %8254 }
0x21dd   :  { %v5784_v27 = vsel %vm586_vm2, %v10814_v60, 0.0  ;;  %v10820_v58 = vpop.eup %8256 }
0x21de   :  { %5776 = vadd.xlane.f32.xlu1 %v5775_v53  ;;  %5785 = vadd.xlane.f32.xlu0 %v5784_v27  ;;  %v5778_v29 = vsel %vm586_vm2, %v10820_v58, 0.0 }
0x21e2   :  { %5779 = vadd.xlane.f32.xlu0 %v5778_v29 }
0x21ef   :  { %5811 = vrot.lane.b32.xlu1 %v10067_v2, %s8292_s6  ;;  %v11411_v2 = vpack.c.bf16 %v10281_v41, %v10275_v4  ;;  %v11415_v4 = vpack.c.bf16 %v10481_v9, %v10475_v63  ;;  %v11417_v41 = vpack.c.bf16 %v10293_v8, %v10287_v28  ;;  %v11421_v28 = vpack.c.bf16 %v10493_v6, %v10487_v12 }
0x21f0   :  { %v11422_v8 = vpack.c.bf16 %v10765_v35, %v10761_v25 }
0x21f3   :  { %5813 = vrot.lane.b32.xlu1 %v10065_v47, %s8292_s6  ;;  %v11412_v47 = vpack.c.bf16 %v10477_v43, %v10473_v10 }
0x21f7   :  { %4698 = vrot.lane.b32.xlu1 %v11409_v22, %s8293_s27 }
0x21f8   :  { %5809 = vrot.lane.b32.xlu0 %v10056_v19, %s8292_s6  ;;  %v11414_v19 = vpack.c.bf16 %v10289_v13, %v10285_v38  ;;  %v11418_v38 = vpack.c.bf16 %v10489_v61, %v10485_v46  ;;  %v11419_v13 = vpack.c.bf16 %v10405_v20, %v10399_v16  ;;  %v11427_v16 = vpack.c.bf16 %v10769_v11, %v10763_v30  ;;  %v11429_v20 = vld [vmem:[#allocation9_spill] sm:$0xff] }
0x21f9   :  { %v11430_v10 = vpack.c.bf16 %v11428_v23, %v11429_v20 }
0x21fb   :  { %4710 = vrot.lane.b32.xlu1 %v11410_v0, %s8294_s28 }
0x21fc   :  { %4696 = vrot.lane.b32.xlu0 %v11411_v2, %s8293_s27  ;;  %v11431_v2 = vld [vmem:[#allocation20_spill] sm:$0xff] }
0x21ff   :  { %4722 = vrot.lane.b32.xlu1 %v11412_v47, %s8295_s29  ;;  %v11432_v47 = vld [vmem:[#allocation21_spill] sm:$0xff] }
0x2200   :  { %4708 = vrot.lane.b32.xlu0 %v11413_v14, %s8294_s28  ;;  %v11433_v14 = vpack.c.bf16 %v11431_v2, %v11432_v47 }
0x2203   :  { %4702 = vrot.lane.b32.xlu1 %v11414_v19, %s8293_s27 }
0x2204   :  { %4720 = vrot.lane.b32.xlu0 %v11415_v4, %s8295_s29 }
0x2207   :  { %4714 = vrot.lane.b32.xlu1 %v11416_v52, %s8294_s28 }
0x2208   :  { %4700 = vrot.lane.b32.xlu0 %v11417_v41, %s8293_s27 }
0x220b   :  { %4726 = vrot.lane.b32.xlu1 %v11418_v38, %s8295_s29 }
0x220c   :  { %4712 = vrot.lane.b32.xlu0 %v11419_v13, %s8294_s28 }
0x220f   :  { %5906 = vrot.lane.b32.xlu1 %v11420_v18, %s8293_s27  ;;  %v11435_v18 = vld [vmem:[#allocation23_spill] sm:$0xff] }
0x2210   :  { %4724 = vrot.lane.b32.xlu0 %v11421_v28, %s8295_s29 }
0x2213   :  { %5918 = vrot.lane.b32.xlu1 %v11422_v8, %s8294_s28 }
0x2214   :  { %5904 = vrot.lane.b32.xlu0 %v11423_v34, %s8293_s27 }
0x2217   :  { %5910 = vrot.lane.b32.xlu1 %v11426_v39, %s8293_s27  ;;  %v11439_v39 = vpack.c.bf16 %v11437_v26, %v11438_v7  ;;  %v11447_v26 = vld [vmem:[#allocation10_spill] sm:$0xff] }
0x2218   :  { %5916 = vrot.lane.b32.xlu0 %v11427_v16, %s8294_s28 }
0x221c   :  { %5908 = vrot.lane.b32.xlu0 %v11430_v10, %s8293_s27 }
0x225f   :  { %v5771_v63 = vpop.xlane.xlu1 %5770 }
0x2263   :  { %v5765_v43 = vpop.xlane.xlu1 %5764  ;;  %v5774_v9 = vpop.xlane.xlu0 %5773 }
0x2264   :  { %8258 = vrcp.f32 %v5765_v43 }
0x2267   :  { %v5783_v46 = vpop.xlane.xlu1 %5782  ;;  %v5768_v12 = vpop.xlane.xlu0 %5767 }
0x2268   :  { %8260 = vrcp.f32 %v5768_v12 }
0x2269   :  { %8262 = vrcp.f32 %v5774_v9  ;;  %v11440_v9 = vld [vmem:[#allocation13_spill] sm:$0xff] }
0x226a   :  { %8264 = vrcp.f32 %v5771_v63 }
0x226b   :  { %v5777_v61 = vpop.xlane.xlu1 %5776  ;;  %v5786_v6 = vpop.xlane.xlu0 %5785 }
0x226c   :  { %8266 = vrcp.f32 %v5777_v61 }
0x226e   :  { %v8259_v36 = vpop.eup %8258 }
0x226f   :  { %v5812_v33 = vpop.permute.xlu1 %5811  ;;  %v5780_v37 = vpop.xlane.xlu0 %5779  ;;  %v5795_v35 = vmul.f32 %v8259_v36, %v10799_v49  ;;  %v7757_v36 = vld [vmem:[%s11207_s17 + $0x8] sm:$0xff]  }
0x2270   :  { %8268 = vrcp.f32 %v5780_v37  ;;  %v7756_v37 = vld [vmem:[%s11207_s17] sm:$0xff]  }
0x2271   :  { %8270 = vrcp.f32 %v5786_v6  ;;  %7630 = vmatprep.subr.bf16.mxu0 %v7756_v37 }
0x2272   :  { %v8261_v31 = vpop.eup %8260  ;;  %8272 = vrcp.f32 %v5783_v46  ;;  %v11441_v46 = vld [vmem:[#allocation12_spill] sm:$0xff]  ;;  %7631 = vmatpush3.bf16.msra.mxu0 %v7756_v37 }
0x2273   :  { %v5814_v25 = vpop.permute.xlu1 %5813  ;;  %v5810_v30 = vpop.permute.xlu0 %5809  ;;  %v5796_v11 = vmul.f32 %v8261_v31, %v8249_v45  ;;  %v11442_v12 = vpack.c.bf16 %v11440_v9, %v11441_v46  ;;  %7632 = vmatprep.subr.bf16.mxu0 %v7757_v36  ;;  %v7758_v31 = vld [vmem:[%s11207_s17 + $0x10] sm:$0xff]  }
0x2274   :  { %7596 = vmatprep.subr.bf16.mxu1 %v5810_v30  ;;  %v8263_v17 = vpop.eup %8262  ;;  %v11452_v37 = vld [vmem:[#allocation8_spill] sm:$0xff] }
0x2275   :  { %7597 = vmatpush3.bf16.msra.mxu1 %v5810_v30  ;;  %v5803_v54 = vpack.c.bf16 %v5796_v11, %v5795_v35  ;;  %v8265_v59 = vpop.eup %8264  ;;  %v5798_v62 = vmul.f32 %v8263_v17, %v10801_v21  ;;  %v7755_v21 = vld [vmem:[%s11206_s15 + $0x8] sm:$0xff]   ;;  %v7759_v30 = vld [vmem:[%s11207_s17 + $0x18] sm:$0xff]   ;;  %v7760_v17 = vld [vmem:[%s11207_s17 + $0x20] sm:$0xff]  }
0x2276   :  { %7598 = vmatprep.subr.bf16.mxu1 %v5812_v33  ;;  %v8267_v1 = vpop.eup %8266  ;;  %v5797_v51 = vmul.f32 %v8265_v59, %v10795_v50  ;;  %7633 = vmatpush3.bf16.msra.mxu0 %v7757_v36  ;;  %v7761_v59 = vld [vmem:[%s11207_s17 + $0x28] sm:$0xff]   ;;  %v11453_v36 = vld [vmem:[#allocation5_spill] sm:$0xff] }
0x2277   :  { %v4699_v56 = vpop.permute.xlu1 %4698  ;;  %7602 = vmatprep.mubr.msk.bf16.mxu1 %vm586_vm2, %v5803_v54  ;;  %v4697_v15 = vpop.permute.xlu0 %4696  ;;  %v5799_v5 = vmul.f32 %v8267_v1, %v10811_v48  ;;  %7634 = vmatprep.subr.bf16.mxu0 %v7758_v31 }
0x2278   :  { %v5804_v42 = vpack.c.bf16 %v5798_v62, %v5797_v51  ;;  %v4730_v19 = vsel %vm496_vm1, %v11433_v14, %v4697_v15 }
0x2279   :  { %7599 = vmatpush3.bf16.msra.mxu1 %v5812_v33 }
0x227a   :  { %v8269_v32 = vpop.eup %8268  ;;  %7600 = vmatprep.subr.bf16.mxu1 %v5814_v25  ;;  %7635 = vmatpush3.bf16.msra.mxu0 %v7758_v31  ;;  %v11454_v31 = vpack.c.bf16 %v11452_v37, %v11453_v36 }
0x227b   :  { %v4709_v49 = vpop.permute.xlu0 %4708  ;;  %v5800_v55 = vmul.f32 %v8269_v32, %v10820_v58  ;;  %v4711_v45 = vpop.permute.xlu1 %4710  ;;  %7636 = vmatprep.subr.bf16.mxu0 %v7759_v30  ;;  %v11443_v32 = vpack.c.bf16 %v10777_v44, %v10773_v3  ;;  %v10980_v3 = vld [vmem:[%s11208_s16] ss:$0 sm:$0xff] }
0x227c   :  { %v8271_v53 = vpop.eup %8270  ;;  %v4741_v52 = vsel %vm1690_vm3, %v4730_v19, %v4709_v49  ;;  %v11444_v49 = vld [vmem:[#allocation30_spill] sm:$0xff] }
0x227d   :  { %7601 = vmatpush3.bf16.msra.mxu1 %v5814_v25  ;;  %v5805_v29 = vpack.c.bf16 %v5800_v55, %v5799_v5  ;;  %v8273_v22 = vpop.eup %8272  ;;  %v5802_v58 = vmul.f32 %v8271_v53, %v10814_v60  ;;  %v11434_v60 = vld [vmem:[#allocation22_spill] sm:$0xff]  ;;  %v11445_v55 = vpack.c.bf16 %v10781_v57, %v11444_v49  ;;  %v11458_v49 = vld [vmem:[#allocation27_spill] sm:$0xff] }
0x227e   :  { %7610 = vmatprep.subr.bf16.mxu1 %v7754_v40  ;;  %v5801_v0 = vmul.f32 %v8273_v22, %v10807_v24  ;;  %v11436_v24 = vpack.c.bf16 %v11434_v60, %v11435_v18  ;;  %7637 = vmatpush3.bf16.msra.mxu0 %v7759_v30 }
0x227f   :  { %v4721_v27 = vpop.permute.xlu0 %4720  ;;  %v4723_v50 = vpop.permute.xlu1 %4722  ;;  %7638 = vmatprep.subr.bf16.mxu0 %v7760_v17 }
0x2280   :  { %7603 = vmatmul.mubr.msk.bf16.vlgmr.msra.gmra.mrb[180].mxu1 %vm586_vm2, %v5804_v42  ;;  %v5806_v4 = vpack.c.bf16 %v5802_v58, %v5801_v0  ;;  %v4749_v38 = vsel %vm1699_vm4, %v4741_v52, %v4721_v27  ;;  %v4733_v28 = vsel %vm496_vm1, %v11436_v24, %v4699_v56 }
0x2281   :  { %7606 = vmatprep.mubr.msk.bf16.mxu1 %vm586_vm2, %v5805_v29  ;;  %7611 = vmatpush3.bf16.msra.mxu1 %v7754_v40  ;;  %v4743_v34 = vsel %vm1690_vm3, %v4733_v28, %v4711_v45 }
0x2282   :  { %7612 = vmatprep.subr.bf16.mxu1 %v7755_v21  ;;  %v4751_v20 = vsel %vm1699_vm4, %v4743_v34, %v4723_v50  ;;  %7639 = vmatpush3.bf16.msra.mxu0 %v7760_v17  ;;  %v11446_v34 = vld [vmem:[#allocation11_spill] sm:$0xff] }
0x2283   :  { %v4701_v48 = vpop.permute.xlu0 %4700  ;;  %v4703_v13 = vpop.permute.xlu1 %4702  ;;  %7640 = vmatprep.subr.bf16.mxu0 %v7761_v59  ;;  %v11448_v7 = vpack.c.bf16 %v11446_v34, %v11447_v26 }
0x2284   :  { %v4736_v16 = vsel %vm496_vm1, %v11439_v39, %v4701_v48  ;;  %v4739_v61 = vsel %vm496_vm1, %v11442_v12, %v4703_v13 }
0x2285   :  { %7613 = vmatpush3.bf16.msra.mxu1 %v7755_v21 }
0x2286   :  { %7641 = vmatpush3.bf16.msra.mxu0 %v7761_v59 }
0x2287   :  { %v4713_v41 = vpop.permute.xlu0 %4712  ;;  %v4715_v23 = vpop.permute.xlu1 %4714 }
0x2288   :  { %7607 = vmatmul.mubr.msk.bf16.gmra.mrb[184].mxu1 %vm586_vm2, %v5806_v4  ;;  %v4745_v10 = vsel %vm1690_vm3, %v4736_v16, %v4713_v41  ;;  %v4747_v6 = vsel %vm1690_vm3, %v4739_v61, %v4715_v23  ;;  %v11449_v23 = vld [vmem:[#allocation24_spill] sm:$0xff] }
0x2289   :  { %7614 = vmatprep.mubr.msk.bf16.mxu1 %vm110_vm0, %v4749_v38 }
0x228b   :  { %v4725_v8 = vpop.permute.xlu0 %4724  ;;  %v4727_v43 = vpop.permute.xlu1 %4726 }
0x228c   :  { %v4753_v63 = vsel %vm1699_vm4, %v4745_v10, %v4725_v8  ;;  %v4755_v33 = vsel %vm1699_vm4, %v4747_v6, %v4727_v43 }
0x228f   :  { %v5907_v13 = vpop.permute.xlu1 %5906  ;;  %v5905_v60 = vpop.permute.xlu0 %5904 }
0x2290   :  { %7615 = vmatmul.mubr.msk.bf16.vlgmr.msra.gmra.mrb[188].mxu1 %vm110_vm0, %v4751_v20  ;;  %v5938_v39 = vsel %vm496_vm1, %v11448_v7, %v5905_v60  ;;  %v11450_v20 = vld [vmem:[#allocation25_spill] sm:$0xff] }
0x2291   :  { %7618 = vmatprep.mubr.msk.bf16.mxu1 %vm110_vm0, %v4753_v63  ;;  %v11451_v10 = vpack.c.bf16 %v11449_v23, %v11450_v20 }
0x2293   :  { %v5919_v18 = vpop.permute.xlu1 %5918  ;;  %v5917_v24 = vpop.permute.xlu0 %5916  ;;  %v5941_v63 = vsel %vm496_vm1, %v11451_v10, %v5907_v13 }
0x2294   :  { %v5949_v43 = vsel %vm1690_vm3, %v5938_v39, %v5917_v24  ;;  %v5951_v46 = vsel %vm1690_vm3, %v5941_v63, %v5919_v18  ;;  %v8275_v63 = vld [vmem:[%s11283_s23] sm:$0xff] }
0x2297   :  { %v5911_v28 = vpop.permute.xlu1 %5910  ;;  %v5909_v8 = vpop.permute.xlu0 %5908 }
0x2298   :  { %7619 = vmatmul.mubr.msk.bf16.gmra.mrb[192].mxu1 %vm110_vm0, %v4755_v33 }
0x2353   :  { %v7604_v25 = vpop.f32.mrb[180].mxu1 }
0x2354   :  { %v5865_v35 = vpop.f32.mrb[181].mxu1 }
0x2355   :  { %v7605_v11 = vpop.f32.mrb[182].mxu1 }
0x2356   :  { %v5897_v54 = vpack.c.bf16 %v7605_v11, %v7604_v25  ;;  %v5868_v56 = vpop.f32.mrb[183].mxu1  ;;  %v5944_v25 = vsel %vm496_vm1, %v11454_v31, %v5909_v8  ;;  %v11456_v11 = vld [vmem:[#allocation4_spill] sm:$0xff]  ;;  %v11049_v8 = vld [vmem:[%s11209_s18] ss:$0 sm:$0xff] }
0x2357   :  { %v5896_v15 = vpack.c.bf16 %v5868_v56, %v5865_v35  ;;  %v11455_v35 = vld [vmem:[#allocation6_spill] sm:$0xff] }
0x2358   :  { %5930 = vrot.lane.b32.xlu1 %v5897_v54, %s8295_s29  ;;  %v11457_v54 = vpack.c.bf16 %v11455_v35, %v11456_v11 }
0x2359   :  { %5928 = vrot.lane.b32.xlu0 %v5896_v15, %s8295_s29 }
0x235a   :  { %v5947_v56 = vsel %vm496_vm1, %v11457_v54, %v5911_v28 }
0x235b   :  { %v7608_v1 = vpop.f32.mrb[184].mxu1 }
0x235c   :  { %5922 = vrot.lane.b32.xlu1 %v11443_v32, %s8294_s28  ;;  %v5881_v62 = vpop.f32.mrb[185].mxu1 }
0x235d   :  { %v7609_v40 = vpop.f32.mrb[186].mxu1  ;;  %5920 = vrot.lane.b32.xlu0 %v11445_v55, %s8294_s28  ;;  %s8297_s28 = smov 64  }
0x235e   :  { %v5899_v51 = vpack.c.bf16 %v7609_v40, %v7608_v1  ;;  %v5884_v45 = vpop.f32.mrb[187].mxu1 }
0x235f   :  { %v5898_v5 = vpack.c.bf16 %v5884_v45, %v5881_v62 }
0x2360   :  { %5934 = vrot.lane.b32.xlu1 %v5899_v51, %s8295_s29  ;;  %v11459_v51 = vld [vmem:[#allocation26_spill] sm:$0xff] }
0x2361   :  { %5932 = vrot.lane.b32.xlu0 %v5898_v5, %s8295_s29 }
0x2363   :  { %v7616_v42 = vpop.f32.mrb[188].mxu1 }
0x2364   :  { %v6037_v44 = vpop.f32.mrb[189].mxu1  ;;  %v6046_v53 = vadd.f32 %v7616_v42, %v10980_v3 }
0x2365   :  { %v7617_v21 = vpop.f32.mrb[190].mxu1  ;;  %v6038_v29 = vadd.f32 %v10980_v3, %v6037_v44  ;;  %v11460_v44 = vld [vmem:[#allocation29_spill] sm:$0xff] }
0x2366   :  { %v6049_v57 = vadd.f32 %v7617_v21, %v10980_v3  ;;  %v6040_v27 = vpop.f32.mrb[191].mxu1 }
0x2367   :  { %v6041_v22 = vadd.f32 %v10980_v3, %v6040_v27 }
0x2368   :  { %v6101_v50 = vpack.c.bf16 %v6049_v57, %v6046_v53  ;;  %v11461_v53 = vld [vmem:[#allocation28_spill] sm:$0xff] }
0x2369   :  { %v6100_v58 = vpack.c.bf16 %v6041_v22, %v6038_v29 }
0x236a   :  { %6118 = vrot.lane.b32.xlu1 %v6101_v50, %s8297_s28 }
0x236b   :  { %6116 = vrot.lane.b32.xlu0 %v6100_v58, %s8297_s28  ;;  %v7620_v48 = vpop.f32.mrb[192].mxu1 }
0x236c   :  { %v6053_v0 = vpop.f32.mrb[193].mxu1  ;;  %v6062_v47 = vadd.f32 %v7620_v48, %v10980_v3 }
0x236d   :  { %v7621_v2 = vpop.f32.mrb[194].mxu1  ;;  %v6054_v4 = vadd.f32 %v10980_v3, %v6053_v0 }
0x236e   :  { %v6065_v14 = vadd.f32 %v7621_v2, %v10980_v3  ;;  %v6056_v19 = vpop.f32.mrb[195].mxu1 }
0x236f   :  { %v6057_v52 = vadd.f32 %v10980_v3, %v6056_v19 }
0x2370   :  { %v6103_v41 = vpack.c.bf16 %v6065_v14, %v6062_v47 }
0x2371   :  { %v6102_v38 = vpack.c.bf16 %v6057_v52, %v6054_v4 }
0x2372   :  { %6122 = vrot.lane.b32.xlu1 %v6103_v41, %s8297_s28 }
0x2373   :  { %6120 = vrot.lane.b32.xlu0 %v6102_v38, %s8297_s28 }
0x23ca   :  { %v5931_v16 = vpop.permute.xlu1 %5930 }
0x23cb   :  { %v5929_v9 = vpop.permute.xlu0 %5928  ;;  %v5959_v61 = vsel %vm1699_vm4, %v5951_v46, %v5931_v16  ;;  %v8276_v46 = vld [vmem:[%s11283_s23 + $0x18] sm:$0xff] }
0x23cc   :  { %v5957_v12 = vsel %vm1699_vm4, %v5949_v43, %v5929_v9 }
0x23cd   :  { %7622 = vmatprep.mubr.msk.bf16.mxu1 %vm110_vm0, %v5957_v12 }
0x23ce   :  { %v5923_v6 = vpop.permute.xlu1 %5922  ;;  %7623 = vmatmul.mubr.msk.bf16.gmra.mrb[196].mxu1 %vm110_vm0, %v5959_v61  ;;  %v8277_v61 = vld [vmem:[%s11283_s23 + $0x8] sm:$0xff] }
0x23cf   :  { %v5921_v33 = vpop.permute.xlu0 %5920  ;;  %v5955_v59 = vsel %vm1690_vm3, %v5947_v56, %v5923_v6  ;;  %v8279_v56 = vld [vmem:[%s11283_s23 + $0x20] sm:$0xff] }
0x23d0   :  { %v5953_v17 = vsel %vm1690_vm3, %v5944_v25, %v5921_v33 }
0x23d2   :  { %v5935_v30 = vpop.permute.xlu1 %5934 }
0x23d3   :  { %v5933_v15 = vpop.permute.xlu0 %5932  ;;  %v5963_v32 = vsel %vm1699_vm4, %v5955_v59, %v5935_v30  ;;  %v8278_v30 = vld [vmem:[%s11283_s23 + $0x30] sm:$0xff]  ;;  %v8280_v59 = vld [vmem:[%s11283_s23 + $0x38] sm:$0xff] }
0x23d4   :  { %v5961_v1 = vsel %vm1699_vm4, %v5953_v17, %v5933_v15 }
0x23d5   :  { %7626 = vmatprep.mubr.msk.bf16.mxu1 %vm110_vm0, %v5961_v1 }
0x23d6   :  { %7627 = vmatmul.mubr.msk.bf16.gmra.mrb[200].mxu1 %vm110_vm0, %v5963_v32  ;;  %v8281_v32 = vld [vmem:[%s11283_s23 + $0x28] sm:$0xff] }
0x23dc   :  { %v6119_v62 = vpop.permute.xlu1 %6118 }
0x23dd   :  { %v6117_v40 = vpop.permute.xlu0 %6116  ;;  %v6135_v45 = vsel %vm586_vm2, %v11459_v51, %v6119_v62 }
0x23de   :  { %v6133_v55 = vsel %vm586_vm2, %v11458_v49, %v6117_v40 }
0x23df   :  { %7642 = vmatprep.mubr.msk.bf16.mxu0 %vm6203_vm5, %v6133_v55  ;;  %v11462_v55 = vld [vmem:[#allocation19_spill] sm:$0xff] }
0x23e0   :  { %7643 = vmatmul.mubr.msk.bf16.vlgmr.msra.gmra.mrb[180].mxu0 %vm6203_vm5, %v6135_v45  ;;  %v11463_v45 = vld [vmem:[#allocation17_spill] sm:$0xff] }
0x23e4   :  { %v6123_v5 = vpop.permute.xlu1 %6122 }
0x23e5   :  { %v6121_v42 = vpop.permute.xlu0 %6120  ;;  %v6139_v57 = vsel %vm586_vm2, %v11461_v53, %v6123_v5 }
0x23e6   :  { %v6137_v21 = vsel %vm586_vm2, %v11460_v44, %v6121_v42 }
0x23e7   :  { %7646 = vmatprep.mubr.msk.bf16.mxu0 %vm6203_vm5, %v6137_v21  ;;  %v11464_v21 = vld [vmem:[#allocation18_spill] sm:$0xff] }
0x23e8   :  { %7647 = vmatmul.mubr.msk.bf16.gmra.mrb[184].mxu0 %vm6203_vm5, %v6139_v57  ;;  %v11465_v57 = vld [vmem:[#allocation16_spill] sm:$0xff] }
0x24a1   :  { %v7624_v27 = vpop.f32.mrb[196].mxu1 }
0x24a2   :  { %v6069_v29 = vpop.f32.mrb[197].mxu1  ;;  %v6078_v50 = vadd.f32 %v7624_v27, %v10980_v3 }
0x24a3   :  { %v7625_v22 = vpop.f32.mrb[198].mxu1  ;;  %v6070_v0 = vadd.f32 %v10980_v3, %v6069_v29 }
0x24a4   :  { %v6081_v58 = vadd.f32 %v7625_v22, %v10980_v3  ;;  %v6072_v48 = vpop.f32.mrb[199].mxu1 }
0x24a5   :  { %v6073_v2 = vadd.f32 %v10980_v3, %v6072_v48 }
0x24a6   :  { %v6105_v47 = vpack.c.bf16 %v6081_v58, %v6078_v50 }
0x24a7   :  { %v6104_v14 = vpack.c.bf16 %v6073_v2, %v6070_v0  ;;  %v8282_v0 = vld [vmem:[%s11283_s23 + $0x50] sm:$0xff] }
0x24a8   :  { %6126 = vrot.lane.b32.xlu1 %v6105_v47, %s8297_s28 }
0x24a9   :  { %6124 = vrot.lane.b32.xlu0 %v6104_v14, %s8297_s28  ;;  %v7628_v19 = vpop.f32.mrb[200].mxu1 }
0x24aa   :  { %v6085_v4 = vpop.f32.mrb[201].mxu1  ;;  %v6094_v41 = vadd.f32 %v7628_v19, %v10980_v3  ;;  %v8283_v19 = vld [vmem:[%s11283_s23 + $0x40] sm:$0xff] }
0x24ab   :  { %v7629_v52 = vpop.f32.mrb[202].mxu1  ;;  %v6086_v60 = vadd.f32 %v10980_v3, %v6085_v4 }
0x24ac   :  { %v6097_v38 = vadd.f32 %v7629_v52, %v10980_v3  ;;  %v6088_v13 = vpop.f32.mrb[203].mxu1 }
0x24ad   :  { %v6089_v18 = vadd.f32 %v10980_v3, %v6088_v13  ;;  %v8274_v3 = vld [vmem:[%s11283_s23 + $0x10] sm:$0xff]  ;;  %v8285_v13 = vld [vmem:[%s11283_s23 + $0x48] sm:$0xff] }
0x24ae   :  { %v6107_v24 = vpack.c.bf16 %v6097_v38, %v6094_v41  ;;  %v8284_v41 = vld [vmem:[%s11283_s23 + $0x58] sm:$0xff] }
0x24af   :  { %v6106_v28 = vpack.c.bf16 %v6089_v18, %v6086_v60 }
0x24b0   :  { %6130 = vrot.lane.b32.xlu1 %v6107_v24, %s8297_s28 }
0x24b1   :  { %6128 = vrot.lane.b32.xlu0 %v6106_v28, %s8297_s28 }
0x24b3   :  { %v7644_v34 = vpop.f32.mrb[180].mxu0 }
0x24b4   :  { %v6263_v26 = vadd.f32 %v7644_v34, %v11049_v8  ;;  %v6254_v7 = vpop.f32.mrb[181].mxu0 }
0x24b5   :  { %v6255_v39 = vadd.f32 %v11049_v8, %v6254_v7  ;;  %v7645_v16 = vpop.f32.mrb[182].mxu0  ;;  %v8286_v7 = vld [vmem:[%s11283_s23 + $0x70] sm:$0xff] }
0x24b6   :  { %v6319_v23 = vadd.f32 %v8274_v3, %v6263_v26  ;;  %v6266_v20 = vadd.f32 %v7645_v16, %v11049_v8  ;;  %v6257_v10 = vpop.f32.mrb[183].mxu0 }
0x24b7   :  { %v6317_v43 = vadd.f32 %v8275_v63, %v6255_v39  ;;  %v6258_v9 = vadd.f32 %v11049_v8, %v6257_v10  ;;  %v8288_v63 = vld [vmem:[%s11283_s23 + $0x78] sm:$0xff] }
0x24b8   :  { %6335 = vst.msk [vmem:[%s11210_s19 + $0x10] sm:$0xff] %vm110_vm0, %v6319_v23  ;;  %v6320_v12 = vadd.f32 %v8276_v46, %v6266_v20  ;;  %v8287_v23 = vld [vmem:[%s11283_s23 + $0x60] sm:$0xff] }
0x24b9   :  { %6333 = vst.msk [vmem:[%s11210_s19] sm:$0xff] %vm110_vm0, %v6317_v43  ;;  %v6318_v6 = vadd.f32 %v8277_v61, %v6258_v9  ;;  %v8289_v9 = vld [vmem:[%s11283_s23 + $0x68] sm:$0xff] }
0x24ba   :  { %6336 = vst.msk [vmem:[%s11210_s19 + $0x18] sm:$0xff] %vm110_vm0, %v6320_v12 }
0x24bb   :  { %6334 = vst.msk [vmem:[%s11210_s19 + $0x8] sm:$0xff] %vm110_vm0, %v6318_v6  ;;  %v7648_v33 = vpop.f32.mrb[184].mxu0 }
0x24bc   :  { %v6279_v37 = vadd.f32 %v7648_v33, %v11049_v8  ;;  %v6270_v36 = vpop.f32.mrb[185].mxu0 }
0x24bd   :  { %v6271_v31 = vadd.f32 %v11049_v8, %v6270_v36  ;;  %v7649_v25 = vpop.f32.mrb[186].mxu0 }
0x24be   :  { %v6323_v35 = vadd.f32 %v8278_v30, %v6279_v37  ;;  %v6282_v11 = vadd.f32 %v7649_v25, %v11049_v8  ;;  %v6273_v54 = vpop.f32.mrb[187].mxu0 }
0x24bf   :  { %v6321_v17 = vadd.f32 %v8279_v56, %v6271_v31  ;;  %v6274_v15 = vadd.f32 %v11049_v8, %v6273_v54 }
0x24c0   :  { %6339 = vst.msk [vmem:[%s11210_s19 + $0x30] sm:$0xff] %vm110_vm0, %v6323_v35  ;;  %v6324_v1 = vadd.f32 %v8280_v59, %v6282_v11 }
0x24c1   :  { %6337 = vst.msk [vmem:[%s11210_s19 + $0x20] sm:$0xff] %vm110_vm0, %v6321_v17  ;;  %v6322_v62 = vadd.f32 %v8281_v32, %v6274_v15 }
0x24c2   :  { %6340 = vst.msk [vmem:[%s11210_s19 + $0x38] sm:$0xff] %vm110_vm0, %v6324_v1 }
0x24c3   :  { %6338 = vst.msk [vmem:[%s11210_s19 + $0x28] sm:$0xff] %vm110_vm0, %v6322_v62 }
0x251a   :  { %v6127_v40 = vpop.permute.xlu1 %6126 }
0x251b   :  { %v6125_v49 = vpop.permute.xlu0 %6124  ;;  %v6143_v5 = vsel %vm586_vm2, %v11463_v45, %v6127_v40 }
0x251c   :  { %v6141_v51 = vsel %vm586_vm2, %v11462_v55, %v6125_v49 }
0x251d   :  { %7650 = vmatprep.mubr.msk.bf16.mxu0 %vm6203_vm5, %v6141_v51 }
0x251e   :  { %7651 = vmatmul.mubr.msk.bf16.gmra.mrb[188].mxu0 %vm6203_vm5, %v6143_v5 }
0x2522   :  { %v6131_v42 = vpop.permute.xlu1 %6130 }
0x2523   :  { %v6129_v44 = vpop.permute.xlu0 %6128  ;;  %v6147_v27 = vsel %vm586_vm2, %v11465_v57, %v6131_v42 }
0x2524   :  { %v6145_v53 = vsel %vm586_vm2, %v11464_v21, %v6129_v44 }
0x2525   :  { %7654 = vmatprep.mubr.msk.bf16.mxu0 %vm6203_vm5, %v6145_v53 }
0x2526   :  { %7655 = vmatmul.mubr.msk.bf16.gmra.mrb[192].mxu0 %vm6203_vm5, %v6147_v27 }
0x25f1   :  { %v7652_v29 = vpop.f32.mrb[188].mxu0 }
0x25f2   :  { %v6295_v22 = vadd.f32 %v7652_v29, %v11049_v8  ;;  %v6286_v50 = vpop.f32.mrb[189].mxu0 }
0x25f3   :  { %v6287_v58 = vadd.f32 %v11049_v8, %v6286_v50  ;;  %v7653_v48 = vpop.f32.mrb[190].mxu0 }
0x25f4   :  { %v6327_v2 = vadd.f32 %v8282_v0, %v6295_v22  ;;  %v6298_v47 = vadd.f32 %v7653_v48, %v11049_v8  ;;  %v6289_v14 = vpop.f32.mrb[191].mxu0 }
0x25f5   :  { %v6325_v4 = vadd.f32 %v8283_v19, %v6287_v58  ;;  %v6290_v52 = vadd.f32 %v11049_v8, %v6289_v14 }
0x25f6   :  { %6343 = vst.msk [vmem:[%s11210_s19 + $0x50] sm:$0xff] %vm110_vm0, %v6327_v2  ;;  %v6328_v38 = vadd.f32 %v8284_v41, %v6298_v47 }
0x25f7   :  { %6341 = vst.msk [vmem:[%s11210_s19 + $0x40] sm:$0xff] %vm110_vm0, %v6325_v4  ;;  %v6326_v60 = vadd.f32 %v8285_v13, %v6290_v52 }
0x25f8   :  { %6344 = vst.msk [vmem:[%s11210_s19 + $0x58] sm:$0xff] %vm110_vm0, %v6328_v38 }
0x25f9   :  { %6342 = vst.msk [vmem:[%s11210_s19 + $0x48] sm:$0xff] %vm110_vm0, %v6326_v60  ;;  %v7656_v18 = vpop.f32.mrb[192].mxu0 }
0x25fa   :  { %v6311_v24 = vadd.f32 %v7656_v18, %v11049_v8  ;;  %v6302_v28 = vpop.f32.mrb[193].mxu0 }
0x25fb   :  { %v6303_v34 = vadd.f32 %v11049_v8, %v6302_v28  ;;  %v7657_v26 = vpop.f32.mrb[194].mxu0 }
0x25fc   :  { %v6331_v39 = vadd.f32 %v8286_v7, %v6311_v24  ;;  %v6314_v16 = vadd.f32 %v7657_v26, %v11049_v8  ;;  %v6305_v3 = vpop.f32.mrb[195].mxu0 }
0x25fd   :  { %v6329_v20 = vadd.f32 %v8287_v23, %v6303_v34  ;;  %v6306_v10 = vadd.f32 %v11049_v8, %v6305_v3 }
0x25fe   :  { %6347 = vst.msk [vmem:[%s11210_s19 + $0x70] sm:$0xff] %vm110_vm0, %v6331_v39  ;;  %v6332_v43 = vadd.f32 %v8288_v63, %v6314_v16 }
0x25ff   :  { %6345 = vst.msk [vmem:[%s11210_s19 + $0x60] sm:$0xff] %vm110_vm0, %v6329_v20  ;;  %v6330_v8 = vadd.f32 %v8289_v9, %v6306_v10 }
0x2600   :  { %6348 = vst.msk [vmem:[%s11210_s19 + $0x78] sm:$0xff] %vm110_vm0, %v6332_v43 }
0x2601   :  { %6346 = vst.msk [vmem:[%s11210_s19 + $0x68] sm:$0xff] %vm110_vm0, %v6330_v8 }

</bundles_post_ra>
